<compile_context>
chip_gen: v7x
topology: tpu7x:2x2x1
jax: 0.10.0
libtpu: 0.0.40
codegen_flags: <defaults>
</compile_context>

<pallas_src>
import functools

import numpy as np

import jax
import jax.numpy as jnp
from jax.experimental import pallas as pl
from jax.experimental.pallas import tpu as pltpu


# Depthwise-separable block table: (dw input channels, pw output channels, stride).
_CHANS = (32, 64, 128, 128, 256, 256, 256)
_COUTS = (64, 128, 128, 256, 256, 256, 256)
_STRIDES = (1, 2, 1, 2, 1, 1, 1)
_BN_ROWS = 32          # rows in the packed BN scale/bias table
_FC_BIAS_ROW = 30      # row of the packed table that holds the FC bias


# ----------------------------------------------------------------------------
# Static configuration helpers
# ----------------------------------------------------------------------------
def _build_cfg(h0, w0):
    """Per-block static config plus deduplicated scratch-buffer shapes."""
    cfg = []
    pad_keys, pad_idx = [], {}
    ybuf_keys, ybuf_idx = [], {}
    h, w = h0, w0
    pw_off = 0
    sel_count = 0
    for blk, (cin, cout, stride) in enumerate(zip(_CHANS, _COUTS, _STRIDES)):
        pk = (h, w, cin)
        if pk not in pad_idx:
            pad_idx[pk] = len(pad_keys)
            pad_keys.append(pk)
        ho, wo = h // stride, w // stride
        yk = (ho * wo, cin)
        if yk not in ybuf_idx:
            ybuf_idx[yk] = len(ybuf_keys)
            ybuf_keys.append(yk)
        sel_idx = sel_count if stride == 2 else -1
        if stride == 2:
            sel_count += 1
        cfg.append(dict(h=h, w=w, stride=stride, cin=cin, cout=cout,
                        pad=pad_idx[pk], ybuf=ybuf_idx[yk],
                        pw_off=pw_off, bn_row=2 + 4 * blk, sel=sel_idx))
        pw_off += cin
        h, w = ho, wo
    return tuple(cfg), tuple(pad_keys), tuple(ybuf_keys), h * w


def _images_per_step(n):
    """Largest divisor of n that is <= 8: images stacked along the MXU M axis."""
    b = 1
    for d in range(1, min(n, 8) + 1):
        if n % d == 0:
            b = d
    return b


def _whole_spec(shape):
    """Whole-array VMEM block (same block for every grid step)."""
    zeros = (0,) * len(shape)
    return pl.BlockSpec(shape, lambda i, _z=zeros: _z)


def _subsample_matrix(h, w):
    """Per-image 0/1 row-selection matrix mapping a stride-1 dw output to stride-2."""
    ho, wo = h // 2, w // 2
    s = np.zeros((ho * wo, h * w), np.float32)
    for i in range(ho):
        for j in range(wo):
            s[i * wo + j, (2 * i) * w + 2 * j] = 1.0
    return jnp.asarray(s, jnp.bfloat16)


# ----------------------------------------------------------------------------
# The fused kernel: B images per grid step, activations never leave VMEM.
# ----------------------------------------------------------------------------
def _col_index(hw, w):
    """Column index j of each flat output row r = i*w + j (built in-kernel, no constants)."""
    r = jax.lax.broadcasted_iota(jnp.int32, (hw, 1), 0)
    if (w & (w - 1)) == 0:                    # w is a power of two here
        return jnp.bitwise_and(r, w - 1)
    return r % w


def _fused_kernel(cfg, b_imgs, final_hw, n_pad,
                  cols_ref, c0w_ref, bn_ref, dww_ref, pw_ref,
                  sel0_ref, sel1_ref, fcw_ref, o_ref, *scratch):
    f32, bf16 = jnp.float32, jnp.bfloat16
    pad_refs = scratch[:n_pad]
    ybuf_refs = scratch[n_pad:-1]
    pooled_ref = scratch[-1]
    sel_refs = (sel0_ref, sel1_ref)

    # Zero the padded-image scratches once per grid step.  Only the halo rows need
    # to stay zero (interiors are fully rewritten before each use), but a single
    # full clear per step is cheap and megacore-safe.
    for p in pad_refs:
        p[...] = jnp.zeros_like(p)

    # conv_bn(3, 32, stride=2): im2col'd patches (B*hw0, 27) @ (27, 32) + BN + ReLU6.
    x = jnp.dot(cols_ref[...], c0w_ref[...], preferred_element_type=f32)
    x = jnp.clip(x * bn_ref[0:1, :32] + bn_ref[1:2, :32], 0.0, 6.0)

    for blk, bc in enumerate(cfg):
        h, w, stride = bc["h"], bc["w"], bc["stride"]
        cin, cout = bc["cin"], bc["cout"]
        hw = h * w
        hw_out = hw // (stride * stride)
        pad = pad_refs[bc["pad"]]
        ybuf = ybuf_refs[bc["ybuf"]]
        r0 = bc["bn_row"]

        dw_w = dww_ref[blk]                          # (9, 256) f32
        dw_scale = bn_ref[r0:r0 + 1, :cin]
        dw_bias = bn_ref[r0 + 1:r0 + 2, :cin]

        # Fold the left/right column-wrap masks into the tap weights once per block
        # (shared across the B images).
        col = _col_index(hw, w)                      # (hw, 1) int32
        not_first = col != 0
        not_last = col != (w - 1)
        taps = []
        for k in range(9):
            wk = dw_w[k:k + 1, :cin]                 # (1, cin)
            kj = k % 3
            if kj == 0:
                wk = jnp.where(not_first, wk, 0.0)   # (hw, cin)
            elif kj == 2:
                wk = jnp.where(not_last, wk, 0.0)
            taps.append(((k // 3) * w + kj, wk))

        # Depthwise 3x3 + BN + ReLU6 per image; results land in a batch-wide bf16
        # buffer so the pointwise conv below is a single big MXU matmul.
        for b in range(b_imgs):
            pad[b, 1 + w:1 + w + hw, :] = x[b * hw:(b + 1) * hw, :]
            acc = jnp.zeros((hw, cin), f32)
            for start, wk in taps:
                acc = acc + pad[b, start:start + hw, :] * wk
            y = jnp.clip(acc * dw_scale + dw_bias, 0.0, 6.0).astype(bf16)
            if stride == 2:
                sel = sel_refs[bc["sel"]][...]       # (hw_out, hw) 0/1 bf16
                y = jnp.dot(sel, y, preferred_element_type=f32).astype(bf16)
            ybuf[b * hw_out:(b + 1) * hw_out, :] = y

        # Pointwise 1x1 conv (bf16 MXU, f32 accumulate) + BN + ReLU6, batch-wide.
        pw_w = pw_ref[bc["pw_off"]:bc["pw_off"] + cin, :cout]
        z = jnp.dot(ybuf[...], pw_w, preferred_element_type=f32)
        x = jnp.clip(z * bn_ref[r0 + 2:r0 + 3, :cout] +
                     bn_ref[r0 + 3:r0 + 4, :cout], 0.0, 6.0)

    # AdaptiveAvgPool2d((1,1)) per image, then Linear(256, 11) padded to 128 lanes.
    for b in range(b_imgs):
        pooled_ref[b:b + 1, :] = jnp.mean(
            x[b * final_hw:(b + 1) * final_hw, :], axis=0, keepdims=True)
    logits = jnp.dot(pooled_ref[...].astype(bf16), fcw_ref[...],
                     preferred_element_type=f32)
    logits = logits + bn_ref[_FC_BIAS_ROW:_FC_BIAS_ROW + 1, :128]
    o_ref[0] = logits                                # (B, 128) lane-dense


# ----------------------------------------------------------------------------
# JAX glue: im2col for conv0 (tiny one-off layout plumbing) and parameter init.
# ----------------------------------------------------------------------------
def im2col(x, ksize, stride, pad):
    n, h, w, c = x.shape
    xp = jnp.pad(x, ((0, 0), (pad, pad), (pad, pad), (0, 0)))
    ho = (h + 2 * pad - ksize) // stride + 1
    wo = (w + 2 * pad - ksize) // stride + 1
    cols = []
    for ki in range(ksize):
        for kj in range(ksize):
            cols.append(xp[:, ki:ki + stride * (ho - 1) + 1:stride,
                           kj:kj + stride * (wo - 1) + 1:stride, :])
    patches = jnp.stack(cols, axis=-1)               # (N, Ho, Wo, C, K*K)
    return patches.reshape(n * ho * wo, c * ksize * ksize), ho, wo


def fold_bn(gamma, beta, mean, var, eps=1e-5):
    scale = gamma * jax.lax.rsqrt(var + eps)
    return scale, beta - mean * scale


def _init_bn(key, c):
    k1, k2, k3, k4 = jax.random.split(key, 4)
    gamma = jax.random.uniform(k1, (c,), jnp.float32, 0.8, 1.2)
    beta = 0.1 * jax.random.normal(k2, (c,), jnp.float32)
    mean = 0.1 * jax.random.normal(k3, (c,), jnp.float32)
    var = jax.random.uniform(k4, (c,), jnp.float32, 0.5, 1.5)
    return fold_bn(gamma, beta, mean, var)


def _pad_lanes(v, lanes=256):
    return jnp.zeros((lanes,), jnp.float32).at[:v.shape[0]].set(v)


def init_params(key):
    keys = jax.random.split(key, 64)
    ki = iter(range(64))
    bn_rows = []

    # conv_bn(3, 32, 2): torch-layout weight (out, in, kh, kw) -> (in*9, out), bf16.
    w0 = 0.1 * jax.random.normal(keys[next(ki)], (32, 3, 3, 3), jnp.float32)
    conv0_w = jnp.transpose(w0, (1, 2, 3, 0)).reshape(27, 32).astype(jnp.bfloat16)
    s, b = _init_bn(keys[next(ki)], 32)
    bn_rows += [_pad_lanes(s), _pad_lanes(b)]

    dw_pack, pw_pack = [], []
    for cin, cout in zip(_CHANS, _COUTS):
        dw = 0.3 * jax.random.normal(keys[next(ki)], (9, cin), jnp.float32)
        dw_pack.append(jnp.zeros((9, 256), jnp.float32).at[:, :cin].set(dw))
        s, b = _init_bn(keys[next(ki)], cin)
        bn_rows += [_pad_lanes(s), _pad_lanes(b)]
        pw = 0.1 * jax.random.normal(keys[next(ki)], (cin, cout), jnp.float32)
        pw_pack.append(jnp.zeros((cin, 256), jnp.float32).at[:, :cout].set(pw))
        s, b = _init_bn(keys[next(ki)], cout)
        bn_rows += [_pad_lanes(s), _pad_lanes(b)]

    fc_w = 0.1 * jax.random.normal(keys[next(ki)], (256, 11), jnp.float32)
    fc_b = 0.1 * jax.random.normal(keys[next(ki)], (11,), jnp.float32)
    bn_rows.append(_pad_lanes(fc_b))                 # row 30: fc bias in lanes 0..10
    while len(bn_rows) < _BN_ROWS:
        bn_rows.append(jnp.zeros((256,), jnp.float32))

    return dict(
        conv0_w=conv0_w,                                                  # (27, 32) bf16
        bn_pack=jnp.stack(bn_rows),                                       # (32, 256) f32
        dw_pack=jnp.stack(dw_pack),                                       # (7, 9, 256) f32
        pw_pack=jnp.concatenate(pw_pack, axis=0).astype(jnp.bfloat16),    # (1120, 256) bf16
        fc_w=jnp.zeros((256, 128), jnp.float32).at[:, :11].set(fc_w).astype(jnp.bfloat16),
    )


# ----------------------------------------------------------------------------
# Forward pass: one fused pallas_call, B images per grid step.
# ----------------------------------------------------------------------------
@jax.jit
def student_net_forward(params, x_nchw):
    x = jnp.transpose(x_nchw, (0, 2, 3, 1)).astype(jnp.float32)   # NHWC once
    n = x.shape[0]

    cols, ho, wo = im2col(x, 3, 2, 1)                 # (n*ho*wo, 27) bf16, tiny one-off
    cols = cols.astype(jnp.bfloat16)
    hw0 = ho * wo

    b = _images_per_step(n)
    steps = n // b
    cfg, pad_keys, ybuf_keys, final_hw = _build_cfg(ho, wo)

    sels = [_subsample_matrix(c["h"], c["w"]) for c in cfg if c["stride"] == 2]
    assert len(sels) == 2

    kernel = functools.partial(_fused_kernel, cfg, b, final_hw, len(pad_keys))

    in_specs = [
        pl.BlockSpec((b * hw0, cols.shape[1]), lambda i: (i, 0)),
        _whole_spec(params["conv0_w"].shape),
        _whole_spec(params["bn_pack"].shape),
        _whole_spec(params["dw_pack"].shape),
        _whole_spec(params["pw_pack"].shape),
        _whole_spec(sels[0].shape),
        _whole_spec(sels[1].shape),
        _whole_spec(params["fc_w"].shape),
    ]

    scratch_shapes = (
        [pltpu.VMEM((b, (h + 2) * w + 2, c), jnp.float32) for (h, w, c) in pad_keys]
        + [pltpu.VMEM((b * rows, c), jnp.bfloat16) for (rows, c) in ybuf_keys]
        + [pltpu.VMEM((b, 256), jnp.float32)]          # pooled features
    )

    out = pl.pallas_call(
        kernel,
        grid=(steps,),
        in_specs=in_specs,
        out_specs=pl.BlockSpec((1, b, 128), lambda i: (i, 0, 0)),
        out_shape=jax.ShapeDtypeStruct((steps, b, 128), jnp.float32),
        scratch_shapes=scratch_shapes,
        compiler_params=pltpu.CompilerParams(
            dimension_semantics=("parallel",),
            vmem_limit_bytes=32 * 1024 * 1024),
    )(cols, params["conv0_w"], params["bn_pack"], params["dw_pack"],
      params["pw_pack"], sels[0], sels[1], params["fc_w"])

    return out.reshape(n, 128)[:, :11]                # lane-dense in-kernel; slice here


if __name__ == "__main__":
    key = jax.random.PRNGKey(0)
    kp, kx = jax.random.split(key)
    params = init_params(kp)

    # PyTorch-convention NCHW input: batch=2, 3 channels, 16x16 spatial.
    x = jax.random.normal(kx, (2, 3, 16, 16), dtype=jnp.float32)

    out = jax.block_until_ready(student_net_forward(params, x))
    assert out.shape == (2, 11), out.shape
    assert bool(jnp.all(jnp.isfinite(out)))
    print("KERNEL_OK")
</pallas_src>

<mosaic_0001>
module attributes {stable_mosaic.version = 11 : i64} {
  func.func @_fused_kernel(%arg0: i32, %arg1: memref<128x27xbf16, #tpu.memory_space<vmem>>, %arg2: memref<27x32xbf16, #tpu.memory_space<vmem>>, %arg3: memref<32x256xf32, #tpu.memory_space<vmem>>, %arg4: memref<7x9x256xf32, #tpu.memory_space<vmem>>, %arg5: memref<1120x256xbf16, #tpu.memory_space<vmem>>, %arg6: memref<16x64xbf16, #tpu.memory_space<vmem>>, %arg7: memref<4x16xbf16, #tpu.memory_space<vmem>>, %arg8: memref<256x128xbf16, #tpu.memory_space<vmem>>, %arg9: memref<1x2x128xf32, #tpu.memory_space<vmem>>, %arg10: memref<2x82x32xf32, #tpu.memory_space<vmem>>, %arg11: memref<2x82x64xf32, #tpu.memory_space<vmem>>, %arg12: memref<2x26x128xf32, #tpu.memory_space<vmem>>, %arg13: memref<2x10x256xf32, #tpu.memory_space<vmem>>, %arg14: memref<128x32xbf16, #tpu.memory_space<vmem>>, %arg15: memref<32x64xbf16, #tpu.memory_space<vmem>>, %arg16: memref<32x128xbf16, #tpu.memory_space<vmem>>, %arg17: memref<8x128xbf16, #tpu.memory_space<vmem>>, %arg18: memref<8x256xbf16, #tpu.memory_space<vmem>>, %arg19: memref<2x256xf32, #tpu.memory_space<vmem>>) attributes {dimension_semantics = [#tpu.dimension_semantics<parallel>], iteration_bounds = array<i64: 1>, scalar_prefetch = 0 : i64, scratch_operands = 10 : i64, tpu.core_type = #tpu.core_type<tc>, window_params = [{transform_indices = @transform_0, window_bounds = array<i64: 128, 27>}, {pipeline_mode = #tpu.pipeline_mode<synchronous>, transform_indices = @transform_1, window_bounds = array<i64: 27, 32>}, {pipeline_mode = #tpu.pipeline_mode<synchronous>, transform_indices = @transform_2, window_bounds = array<i64: 32, 256>}, {pipeline_mode = #tpu.pipeline_mode<synchronous>, transform_indices = @transform_3, window_bounds = array<i64: 7, 9, 256>}, {pipeline_mode = #tpu.pipeline_mode<synchronous>, transform_indices = @transform_4, window_bounds = array<i64: 1120, 256>}, {pipeline_mode = #tpu.pipeline_mode<synchronous>, transform_indices = @transform_5, window_bounds = array<i64: 16, 64>}, {pipeline_mode = #tpu.pipeline_mode<synchronous>, transform_indices = @transform_6, window_bounds = array<i64: 4, 16>}, {pipeline_mode = #tpu.pipeline_mode<synchronous>, transform_indices = @transform_7, window_bounds = array<i64: 256, 128>}, {transform_indices = @transform_8, window_bounds = array<i64: 1, 2, 128>}]} {
    %cst = arith.constant 0.000000e+00 : f32
    %0 = vector.broadcast %cst : f32 to vector<2x82x32xf32>
    %c0 = arith.constant 0 : index
    %c0_0 = arith.constant 0 : index
    %c0_1 = arith.constant 0 : index
    %1 = vector.load %arg10[%c0, %c0_0, %c0_1] : memref<2x82x32xf32, #tpu.memory_space<vmem>>, vector<2x82x32xf32>
    tpu.vector_store %arg10[%c0, %c0_0, %c0_1], %0 {strides = array<i32>} : memref<2x82x32xf32, #tpu.memory_space<vmem>>, vector<2x82x32xf32>,
    %cst_2 = arith.constant 0.000000e+00 : f32
    %2 = vector.broadcast %cst_2 : f32 to vector<2x82x64xf32>
    %c0_3 = arith.constant 0 : index
    %c0_4 = arith.constant 0 : index
    %c0_5 = arith.constant 0 : index
    %3 = vector.load %arg11[%c0_3, %c0_4, %c0_5] : memref<2x82x64xf32, #tpu.memory_space<vmem>>, vector<2x82x64xf32>
    tpu.vector_store %arg11[%c0_3, %c0_4, %c0_5], %2 {strides = array<i32>} : memref<2x82x64xf32, #tpu.memory_space<vmem>>, vector<2x82x64xf32>,
    %cst_6 = arith.constant 0.000000e+00 : f32
    %4 = vector.broadcast %cst_6 : f32 to vector<2x26x128xf32>
    %c0_7 = arith.constant 0 : index
    %c0_8 = arith.constant 0 : index
    %c0_9 = arith.constant 0 : index
    %5 = vector.load %arg12[%c0_7, %c0_8, %c0_9] : memref<2x26x128xf32, #tpu.memory_space<vmem>>, vector<2x26x128xf32>
    tpu.vector_store %arg12[%c0_7, %c0_8, %c0_9], %4 {strides = array<i32>} : memref<2x26x128xf32, #tpu.memory_space<vmem>>, vector<2x26x128xf32>,
    %cst_10 = arith.constant 0.000000e+00 : f32
    %6 = vector.broadcast %cst_10 : f32 to vector<2x10x256xf32>
    %c0_11 = arith.constant 0 : index
    %c0_12 = arith.constant 0 : index
    %c0_13 = arith.constant 0 : index
    %7 = vector.load %arg13[%c0_11, %c0_12, %c0_13] : memref<2x10x256xf32, #tpu.memory_space<vmem>>, vector<2x10x256xf32>
    tpu.vector_store %arg13[%c0_11, %c0_12, %c0_13], %6 {strides = array<i32>} : memref<2x10x256xf32, #tpu.memory_space<vmem>>, vector<2x10x256xf32>,
    %c0_14 = arith.constant 0 : index
    %c0_15 = arith.constant 0 : index
    %8 = vector.load %arg1[%c0_14, %c0_15] : memref<128x27xbf16, #tpu.memory_space<vmem>>, vector<128x27xbf16>
    %c0_16 = arith.constant 0 : index
    %c0_17 = arith.constant 0 : index
    %9 = vector.load %arg2[%c0_16, %c0_17] : memref<27x32xbf16, #tpu.memory_space<vmem>>, vector<27x32xbf16>
    %cst_18 = arith.constant dense<0.000000e+00> : vector<128x32xf32>
    %10 = tpu.matmul %8, %9, %cst_18 {dimension_numbers = #tpu.dot_dimension_numbers<[1], [0], [0], [1], [0, 0, 1, 1], [], []>} : vector<128x27xbf16>, vector<27x32xbf16>, vector<128x32xf32> -> vector<128x32xf32>
    %c0_19 = arith.constant 0 : index
    %c0_20 = arith.constant 0 : index
    %11 = vector.load %arg3[%c0_19, %c0_20] : memref<32x256xf32, #tpu.memory_space<vmem>>, vector<1x32xf32>
    %12 = vector.broadcast %11 : vector<1x32xf32> to vector<128x32xf32>
    %13 = arith.mulf %10, %12 : vector<128x32xf32>
    %c1 = arith.constant 1 : index
    %c0_21 = arith.constant 0 : index
    %14 = vector.load %arg3[%c1, %c0_21] : memref<32x256xf32, #tpu.memory_space<vmem>>, vector<1x32xf32>
    %15 = vector.broadcast %14 : vector<1x32xf32> to vector<128x32xf32>
    %16 = arith.addf %13, %15 : vector<128x32xf32>
    %cst_22 = arith.constant 0.000000e+00 : f32
    %cst_23 = arith.constant 6.000000e+00 : f32
    %17 = vector.broadcast %cst_22 : f32 to vector<128x32xf32>
    %18 = arith.maximumf %17, %16 : vector<128x32xf32>
    %19 = vector.broadcast %cst_23 : f32 to vector<128x32xf32>
    %20 = arith.minimumf %19, %18 : vector<128x32xf32>
    %c0_24 = arith.constant 0 : index
    %c0_25 = arith.constant 0 : index
    %c0_26 = arith.constant 0 : index
    %21 = vector.load %arg4[%c0_24, %c0_25, %c0_26] : memref<7x9x256xf32, #tpu.memory_space<vmem>>, vector<1x9x256xf32>
    %22 = vector.shape_cast %21 : vector<1x9x256xf32> to vector<9x256xf32>
    %c2 = arith.constant 2 : index
    %c0_27 = arith.constant 0 : index
    %23 = vector.load %arg3[%c2, %c0_27] : memref<32x256xf32, #tpu.memory_space<vmem>>, vector<1x32xf32>
    %c3 = arith.constant 3 : index
    %c0_28 = arith.constant 0 : index
    %24 = vector.load %arg3[%c3, %c0_28] : memref<32x256xf32, #tpu.memory_space<vmem>>, vector<1x32xf32>
    %25 = tpu.iota {dimensions = array<i32: 0>} : vector<64x1xi32>
    %c7_i32 = arith.constant 7 : i32
    %26 = vector.broadcast %c7_i32 : i32 to vector<64x1xi32>
    %27 = arith.andi %25, %26 : vector<64x1xi32>
    %c0_i32 = arith.constant 0 : i32
    %28 = vector.broadcast %c0_i32 : i32 to vector<64x1xi32>
    %29 = arith.cmpi ne, %27, %28 : vector<64x1xi32>
    %c7_i32_29 = arith.constant 7 : i32
    %30 = vector.broadcast %c7_i32_29 : i32 to vector<64x1xi32>
    %31 = arith.cmpi ne, %27, %30 : vector<64x1xi32>
    %32 = vector.extract_strided_slice %22 {offsets = [0, 0], sizes = [1, 32], strides = [1, 1]} : vector<9x256xf32> to vector<1x32xf32>
    %cst_30 = arith.constant 0.000000e+00 : f32
    %33 = vector.shape_cast %29 : vector<64x1xi1> to vector<64x1xi1>
    %34 = vector.broadcast %33 : vector<64x1xi1> to vector<64x32xi1>
    %35 = vector.shape_cast %32 : vector<1x32xf32> to vector<1x32xf32>
    %36 = vector.broadcast %35 : vector<1x32xf32> to vector<64x32xf32>
    %37 = vector.broadcast %cst_30 : f32 to vector<64x32xf32>
    %38 = arith.select %34, %36, %37 : vector<64x32xi1>, vector<64x32xf32>
    %39 = vector.extract_strided_slice %22 {offsets = [1, 0], sizes = [1, 32], strides = [1, 1]} : vector<9x256xf32> to vector<1x32xf32>
    %40 = vector.extract_strided_slice %22 {offsets = [2, 0], sizes = [1, 32], strides = [1, 1]} : vector<9x256xf32> to vector<1x32xf32>
    %cst_31 = arith.constant 0.000000e+00 : f32
    %41 = vector.shape_cast %31 : vector<64x1xi1> to vector<64x1xi1>
    %42 = vector.broadcast %41 : vector<64x1xi1> to vector<64x32xi1>
    %43 = vector.shape_cast %40 : vector<1x32xf32> to vector<1x32xf32>
    %44 = vector.broadcast %43 : vector<1x32xf32> to vector<64x32xf32>
    %45 = vector.broadcast %cst_31 : f32 to vector<64x32xf32>
    %46 = arith.select %42, %44, %45 : vector<64x32xi1>, vector<64x32xf32>
    %47 = vector.extract_strided_slice %22 {offsets = [3, 0], sizes = [1, 32], strides = [1, 1]} : vector<9x256xf32> to vector<1x32xf32>
    %cst_32 = arith.constant 0.000000e+00 : f32
    %48 = vector.shape_cast %29 : vector<64x1xi1> to vector<64x1xi1>
    %49 = vector.broadcast %48 : vector<64x1xi1> to vector<64x32xi1>
    %50 = vector.shape_cast %47 : vector<1x32xf32> to vector<1x32xf32>
    %51 = vector.broadcast %50 : vector<1x32xf32> to vector<64x32xf32>
    %52 = vector.broadcast %cst_32 : f32 to vector<64x32xf32>
    %53 = arith.select %49, %51, %52 : vector<64x32xi1>, vector<64x32xf32>
    %54 = vector.extract_strided_slice %22 {offsets = [4, 0], sizes = [1, 32], strides = [1, 1]} : vector<9x256xf32> to vector<1x32xf32>
    %55 = vector.extract_strided_slice %22 {offsets = [5, 0], sizes = [1, 32], strides = [1, 1]} : vector<9x256xf32> to vector<1x32xf32>
    %cst_33 = arith.constant 0.000000e+00 : f32
    %56 = vector.shape_cast %31 : vector<64x1xi1> to vector<64x1xi1>
    %57 = vector.broadcast %56 : vector<64x1xi1> to vector<64x32xi1>
    %58 = vector.shape_cast %55 : vector<1x32xf32> to vector<1x32xf32>
    %59 = vector.broadcast %58 : vector<1x32xf32> to vector<64x32xf32>
    %60 = vector.broadcast %cst_33 : f32 to vector<64x32xf32>
    %61 = arith.select %57, %59, %60 : vector<64x32xi1>, vector<64x32xf32>
    %62 = vector.extract_strided_slice %22 {offsets = [6, 0], sizes = [1, 32], strides = [1, 1]} : vector<9x256xf32> to vector<1x32xf32>
    %cst_34 = arith.constant 0.000000e+00 : f32
    %63 = vector.shape_cast %29 : vector<64x1xi1> to vector<64x1xi1>
    %64 = vector.broadcast %63 : vector<64x1xi1> to vector<64x32xi1>
    %65 = vector.shape_cast %62 : vector<1x32xf32> to vector<1x32xf32>
    %66 = vector.broadcast %65 : vector<1x32xf32> to vector<64x32xf32>
    %67 = vector.broadcast %cst_34 : f32 to vector<64x32xf32>
    %68 = arith.select %64, %66, %67 : vector<64x32xi1>, vector<64x32xf32>
    %69 = vector.extract_strided_slice %22 {offsets = [7, 0], sizes = [1, 32], strides = [1, 1]} : vector<9x256xf32> to vector<1x32xf32>
    %70 = vector.extract_strided_slice %22 {offsets = [8, 0], sizes = [1, 32], strides = [1, 1]} : vector<9x256xf32> to vector<1x32xf32>
    %cst_35 = arith.constant 0.000000e+00 : f32
    %71 = vector.shape_cast %31 : vector<64x1xi1> to vector<64x1xi1>
    %72 = vector.broadcast %71 : vector<64x1xi1> to vector<64x32xi1>
    %73 = vector.shape_cast %70 : vector<1x32xf32> to vector<1x32xf32>
    %74 = vector.broadcast %73 : vector<1x32xf32> to vector<64x32xf32>
    %75 = vector.broadcast %cst_35 : f32 to vector<64x32xf32>
    %76 = arith.select %72, %74, %75 : vector<64x32xi1>, vector<64x32xf32>
    %77 = vector.extract_strided_slice %20 {offsets = [0, 0], sizes = [64, 32], strides = [1, 1]} : vector<128x32xf32> to vector<64x32xf32>
    %c0_36 = arith.constant 0 : index
    %c9 = arith.constant 9 : index
    %c0_37 = arith.constant 0 : index
    %78 = vector.load %arg10[%c0_36, %c9, %c0_37] : memref<2x82x32xf32, #tpu.memory_space<vmem>>, vector<1x64x32xf32>
    %79 = vector.shape_cast %78 : vector<1x64x32xf32> to vector<64x32xf32>
    %80 = vector.shape_cast %77 : vector<64x32xf32> to vector<1x64x32xf32>
    tpu.vector_store %arg10[%c0_36, %c9, %c0_37], %80 {strides = array<i32>} : memref<2x82x32xf32, #tpu.memory_space<vmem>>, vector<1x64x32xf32>,
    %cst_38 = arith.constant 0.000000e+00 : f32
    %81 = vector.broadcast %cst_38 : f32 to vector<64x32xf32>
    %c0_39 = arith.constant 0 : index
    %c0_40 = arith.constant 0 : index
    %c0_41 = arith.constant 0 : index
    %82 = vector.load %arg10[%c0_39, %c0_40, %c0_41] : memref<2x82x32xf32, #tpu.memory_space<vmem>>, vector<1x64x32xf32>
    %83 = vector.shape_cast %82 : vector<1x64x32xf32> to vector<64x32xf32>
    %84 = arith.mulf %83, %38 : vector<64x32xf32>
    %85 = arith.addf %81, %84 : vector<64x32xf32>
    %c0_42 = arith.constant 0 : index
    %c1_43 = arith.constant 1 : index
    %c0_44 = arith.constant 0 : index
    %86 = vector.load %arg10[%c0_42, %c1_43, %c0_44] : memref<2x82x32xf32, #tpu.memory_space<vmem>>, vector<1x64x32xf32>
    %87 = vector.shape_cast %86 : vector<1x64x32xf32> to vector<64x32xf32>
    %88 = vector.broadcast %39 : vector<1x32xf32> to vector<64x32xf32>
    %89 = arith.mulf %87, %88 : vector<64x32xf32>
    %90 = arith.addf %85, %89 : vector<64x32xf32>
    %c0_45 = arith.constant 0 : index
    %c2_46 = arith.constant 2 : index
    %c0_47 = arith.constant 0 : index
    %91 = vector.load %arg10[%c0_45, %c2_46, %c0_47] : memref<2x82x32xf32, #tpu.memory_space<vmem>>, vector<1x64x32xf32>
    %92 = vector.shape_cast %91 : vector<1x64x32xf32> to vector<64x32xf32>
    %93 = arith.mulf %92, %46 : vector<64x32xf32>
    %94 = arith.addf %90, %93 : vector<64x32xf32>
    %c0_48 = arith.constant 0 : index
    %c8 = arith.constant 8 : index
    %c0_49 = arith.constant 0 : index
    %95 = vector.load %arg10[%c0_48, %c8, %c0_49] : memref<2x82x32xf32, #tpu.memory_space<vmem>>, vector<1x64x32xf32>
    %96 = vector.shape_cast %95 : vector<1x64x32xf32> to vector<64x32xf32>
    %97 = arith.mulf %96, %53 : vector<64x32xf32>
    %98 = arith.addf %94, %97 : vector<64x32xf32>
    %c0_50 = arith.constant 0 : index
    %c9_51 = arith.constant 9 : index
    %c0_52 = arith.constant 0 : index
    %99 = vector.load %arg10[%c0_50, %c9_51, %c0_52] : memref<2x82x32xf32, #tpu.memory_space<vmem>>, vector<1x64x32xf32>
    %100 = vector.shape_cast %99 : vector<1x64x32xf32> to vector<64x32xf32>
    %101 = vector.broadcast %54 : vector<1x32xf32> to vector<64x32xf32>
    %102 = arith.mulf %100, %101 : vector<64x32xf32>
    %103 = arith.addf %98, %102 : vector<64x32xf32>
    %c0_53 = arith.constant 0 : index
    %c10 = arith.constant 10 : index
    %c0_54 = arith.constant 0 : index
    %104 = vector.load %arg10[%c0_53, %c10, %c0_54] : memref<2x82x32xf32, #tpu.memory_space<vmem>>, vector<1x64x32xf32>
    %105 = vector.shape_cast %104 : vector<1x64x32xf32> to vector<64x32xf32>
    %106 = arith.mulf %105, %61 : vector<64x32xf32>
    %107 = arith.addf %103, %106 : vector<64x32xf32>
    %c0_55 = arith.constant 0 : index
    %c16 = arith.constant 16 : index
    %c0_56 = arith.constant 0 : index
    %108 = vector.load %arg10[%c0_55, %c16, %c0_56] : memref<2x82x32xf32, #tpu.memory_space<vmem>>, vector<1x64x32xf32>
    %109 = vector.shape_cast %108 : vector<1x64x32xf32> to vector<64x32xf32>
    %110 = arith.mulf %109, %68 : vector<64x32xf32>
    %111 = arith.addf %107, %110 : vector<64x32xf32>
    %c0_57 = arith.constant 0 : index
    %c17 = arith.constant 17 : index
    %c0_58 = arith.constant 0 : index
    %112 = vector.load %arg10[%c0_57, %c17, %c0_58] : memref<2x82x32xf32, #tpu.memory_space<vmem>>, vector<1x64x32xf32>
    %113 = vector.shape_cast %112 : vector<1x64x32xf32> to vector<64x32xf32>
    %114 = vector.broadcast %69 : vector<1x32xf32> to vector<64x32xf32>
    %115 = arith.mulf %113, %114 : vector<64x32xf32>
    %116 = arith.addf %111, %115 : vector<64x32xf32>
    %c0_59 = arith.constant 0 : index
    %c18 = arith.constant 18 : index
    %c0_60 = arith.constant 0 : index
    %117 = vector.load %arg10[%c0_59, %c18, %c0_60] : memref<2x82x32xf32, #tpu.memory_space<vmem>>, vector<1x64x32xf32>
    %118 = vector.shape_cast %117 : vector<1x64x32xf32> to vector<64x32xf32>
    %119 = arith.mulf %118, %76 : vector<64x32xf32>
    %120 = arith.addf %116, %119 : vector<64x32xf32>
    %121 = vector.broadcast %23 : vector<1x32xf32> to vector<64x32xf32>
    %122 = arith.mulf %120, %121 : vector<64x32xf32>
    %123 = vector.broadcast %24 : vector<1x32xf32> to vector<64x32xf32>
    %124 = arith.addf %122, %123 : vector<64x32xf32>
    %cst_61 = arith.constant 0.000000e+00 : f32
    %cst_62 = arith.constant 6.000000e+00 : f32
    %125 = vector.broadcast %cst_61 : f32 to vector<64x32xf32>
    %126 = arith.maximumf %125, %124 : vector<64x32xf32>
    %127 = vector.broadcast %cst_62 : f32 to vector<64x32xf32>
    %128 = arith.minimumf %127, %126 : vector<64x32xf32>
    %129 = arith.truncf %128 : vector<64x32xf32> to vector<64x32xbf16>
    %c0_63 = arith.constant 0 : index
    %c0_64 = arith.constant 0 : index
    %130 = vector.load %arg14[%c0_63, %c0_64] : memref<128x32xbf16, #tpu.memory_space<vmem>>, vector<64x32xbf16>
    tpu.vector_store %arg14[%c0_63, %c0_64], %129 {strides = array<i32>} : memref<128x32xbf16, #tpu.memory_space<vmem>>, vector<64x32xbf16>,
    %131 = vector.extract_strided_slice %20 {offsets = [64, 0], sizes = [64, 32], strides = [1, 1]} : vector<128x32xf32> to vector<64x32xf32>
    %c1_65 = arith.constant 1 : index
    %c9_66 = arith.constant 9 : index
    %c0_67 = arith.constant 0 : index
    %132 = vector.load %arg10[%c1_65, %c9_66, %c0_67] : memref<2x82x32xf32, #tpu.memory_space<vmem>>, vector<1x64x32xf32>
    %133 = vector.shape_cast %132 : vector<1x64x32xf32> to vector<64x32xf32>
    %134 = vector.shape_cast %131 : vector<64x32xf32> to vector<1x64x32xf32>
    tpu.vector_store %arg10[%c1_65, %c9_66, %c0_67], %134 {strides = array<i32>} : memref<2x82x32xf32, #tpu.memory_space<vmem>>, vector<1x64x32xf32>,
    %cst_68 = arith.constant 0.000000e+00 : f32
    %135 = vector.broadcast %cst_68 : f32 to vector<64x32xf32>
    %c1_69 = arith.constant 1 : index
    %c0_70 = arith.constant 0 : index
    %c0_71 = arith.constant 0 : index
    %136 = vector.load %arg10[%c1_69, %c0_70, %c0_71] : memref<2x82x32xf32, #tpu.memory_space<vmem>>, vector<1x64x32xf32>
    %137 = vector.shape_cast %136 : vector<1x64x32xf32> to vector<64x32xf32>
    %138 = arith.mulf %137, %38 : vector<64x32xf32>
    %139 = arith.addf %135, %138 : vector<64x32xf32>
    %c1_72 = arith.constant 1 : index
    %c1_73 = arith.constant 1 : index
    %c0_74 = arith.constant 0 : index
    %140 = vector.load %arg10[%c1_72, %c1_73, %c0_74] : memref<2x82x32xf32, #tpu.memory_space<vmem>>, vector<1x64x32xf32>
    %141 = vector.shape_cast %140 : vector<1x64x32xf32> to vector<64x32xf32>
    %142 = vector.broadcast %39 : vector<1x32xf32> to vector<64x32xf32>
    %143 = arith.mulf %141, %142 : vector<64x32xf32>
    %144 = arith.addf %139, %143 : vector<64x32xf32>
    %c1_75 = arith.constant 1 : index
    %c2_76 = arith.constant 2 : index
    %c0_77 = arith.constant 0 : index
    %145 = vector.load %arg10[%c1_75, %c2_76, %c0_77] : memref<2x82x32xf32, #tpu.memory_space<vmem>>, vector<1x64x32xf32>
    %146 = vector.shape_cast %145 : vector<1x64x32xf32> to vector<64x32xf32>
    %147 = arith.mulf %146, %46 : vector<64x32xf32>
    %148 = arith.addf %144, %147 : vector<64x32xf32>
    %c1_78 = arith.constant 1 : index
    %c8_79 = arith.constant 8 : index
    %c0_80 = arith.constant 0 : index
    %149 = vector.load %arg10[%c1_78, %c8_79, %c0_80] : memref<2x82x32xf32, #tpu.memory_space<vmem>>, vector<1x64x32xf32>
    %150 = vector.shape_cast %149 : vector<1x64x32xf32> to vector<64x32xf32>
    %151 = arith.mulf %150, %53 : vector<64x32xf32>
    %152 = arith.addf %148, %151 : vector<64x32xf32>
    %c1_81 = arith.constant 1 : index
    %c9_82 = arith.constant 9 : index
    %c0_83 = arith.constant 0 : index
    %153 = vector.load %arg10[%c1_81, %c9_82, %c0_83] : memref<2x82x32xf32, #tpu.memory_space<vmem>>, vector<1x64x32xf32>
    %154 = vector.shape_cast %153 : vector<1x64x32xf32> to vector<64x32xf32>
    %155 = vector.broadcast %54 : vector<1x32xf32> to vector<64x32xf32>
    %156 = arith.mulf %154, %155 : vector<64x32xf32>
    %157 = arith.addf %152, %156 : vector<64x32xf32>
    %c1_84 = arith.constant 1 : index
    %c10_85 = arith.constant 10 : index
    %c0_86 = arith.constant 0 : index
    %158 = vector.load %arg10[%c1_84, %c10_85, %c0_86] : memref<2x82x32xf32, #tpu.memory_space<vmem>>, vector<1x64x32xf32>
    %159 = vector.shape_cast %158 : vector<1x64x32xf32> to vector<64x32xf32>
    %160 = arith.mulf %159, %61 : vector<64x32xf32>
    %161 = arith.addf %157, %160 : vector<64x32xf32>
    %c1_87 = arith.constant 1 : index
    %c16_88 = arith.constant 16 : index
    %c0_89 = arith.constant 0 : index
    %162 = vector.load %arg10[%c1_87, %c16_88, %c0_89] : memref<2x82x32xf32, #tpu.memory_space<vmem>>, vector<1x64x32xf32>
    %163 = vector.shape_cast %162 : vector<1x64x32xf32> to vector<64x32xf32>
    %164 = arith.mulf %163, %68 : vector<64x32xf32>
    %165 = arith.addf %161, %164 : vector<64x32xf32>
    %c1_90 = arith.constant 1 : index
    %c17_91 = arith.constant 17 : index
    %c0_92 = arith.constant 0 : index
    %166 = vector.load %arg10[%c1_90, %c17_91, %c0_92] : memref<2x82x32xf32, #tpu.memory_space<vmem>>, vector<1x64x32xf32>
    %167 = vector.shape_cast %166 : vector<1x64x32xf32> to vector<64x32xf32>
    %168 = vector.broadcast %69 : vector<1x32xf32> to vector<64x32xf32>
    %169 = arith.mulf %167, %168 : vector<64x32xf32>
    %170 = arith.addf %165, %169 : vector<64x32xf32>
    %c1_93 = arith.constant 1 : index
    %c18_94 = arith.constant 18 : index
    %c0_95 = arith.constant 0 : index
    %171 = vector.load %arg10[%c1_93, %c18_94, %c0_95] : memref<2x82x32xf32, #tpu.memory_space<vmem>>, vector<1x64x32xf32>
    %172 = vector.shape_cast %171 : vector<1x64x32xf32> to vector<64x32xf32>
    %173 = arith.mulf %172, %76 : vector<64x32xf32>
    %174 = arith.addf %170, %173 : vector<64x32xf32>
    %175 = vector.broadcast %23 : vector<1x32xf32> to vector<64x32xf32>
    %176 = arith.mulf %174, %175 : vector<64x32xf32>
    %177 = vector.broadcast %24 : vector<1x32xf32> to vector<64x32xf32>
    %178 = arith.addf %176, %177 : vector<64x32xf32>
    %cst_96 = arith.constant 0.000000e+00 : f32
    %cst_97 = arith.constant 6.000000e+00 : f32
    %179 = vector.broadcast %cst_96 : f32 to vector<64x32xf32>
    %180 = arith.maximumf %179, %178 : vector<64x32xf32>
    %181 = vector.broadcast %cst_97 : f32 to vector<64x32xf32>
    %182 = arith.minimumf %181, %180 : vector<64x32xf32>
    %183 = arith.truncf %182 : vector<64x32xf32> to vector<64x32xbf16>
    %c64 = arith.constant 64 : index
    %c0_98 = arith.constant 0 : index
    %184 = vector.load %arg14[%c64, %c0_98] : memref<128x32xbf16, #tpu.memory_space<vmem>>, vector<64x32xbf16>
    tpu.vector_store %arg14[%c64, %c0_98], %183 {strides = array<i32>} : memref<128x32xbf16, #tpu.memory_space<vmem>>, vector<64x32xbf16>,
    %c0_99 = arith.constant 0 : index
    %c0_100 = arith.constant 0 : index
    %185 = vector.load %arg5[%c0_99, %c0_100] : memref<1120x256xbf16, #tpu.memory_space<vmem>>, vector<32x64xbf16>
    %c0_101 = arith.constant 0 : index
    %c0_102 = arith.constant 0 : index
    %186 = vector.load %arg14[%c0_101, %c0_102] : memref<128x32xbf16, #tpu.memory_space<vmem>>, vector<128x32xbf16>
    %cst_103 = arith.constant dense<0.000000e+00> : vector<128x64xf32>
    %187 = tpu.matmul %186, %185, %cst_103 {dimension_numbers = #tpu.dot_dimension_numbers<[1], [0], [0], [1], [0, 0, 1, 1], [], []>} : vector<128x32xbf16>, vector<32x64xbf16>, vector<128x64xf32> -> vector<128x64xf32>
    %c4 = arith.constant 4 : index
    %c0_104 = arith.constant 0 : index
    %188 = vector.load %arg3[%c4, %c0_104] : memref<32x256xf32, #tpu.memory_space<vmem>>, vector<1x64xf32>
    %189 = vector.broadcast %188 : vector<1x64xf32> to vector<128x64xf32>
    %190 = arith.mulf %187, %189 : vector<128x64xf32>
    %c5 = arith.constant 5 : index
    %c0_105 = arith.constant 0 : index
    %191 = vector.load %arg3[%c5, %c0_105] : memref<32x256xf32, #tpu.memory_space<vmem>>, vector<1x64xf32>
    %192 = vector.broadcast %191 : vector<1x64xf32> to vector<128x64xf32>
    %193 = arith.addf %190, %192 : vector<128x64xf32>
    %cst_106 = arith.constant 0.000000e+00 : f32
    %cst_107 = arith.constant 6.000000e+00 : f32
    %194 = vector.broadcast %cst_106 : f32 to vector<128x64xf32>
    %195 = arith.maximumf %194, %193 : vector<128x64xf32>
    %196 = vector.broadcast %cst_107 : f32 to vector<128x64xf32>
    %197 = arith.minimumf %196, %195 : vector<128x64xf32>
    %c1_108 = arith.constant 1 : index
    %c0_109 = arith.constant 0 : index
    %c0_110 = arith.constant 0 : index
    %198 = vector.load %arg4[%c1_108, %c0_109, %c0_110] : memref<7x9x256xf32, #tpu.memory_space<vmem>>, vector<1x9x256xf32>
    %199 = vector.shape_cast %198 : vector<1x9x256xf32> to vector<9x256xf32>
    %c6 = arith.constant 6 : index
    %c0_111 = arith.constant 0 : index
    %200 = vector.load %arg3[%c6, %c0_111] : memref<32x256xf32, #tpu.memory_space<vmem>>, vector<1x64xf32>
    %c7 = arith.constant 7 : index
    %c0_112 = arith.constant 0 : index
    %201 = vector.load %arg3[%c7, %c0_112] : memref<32x256xf32, #tpu.memory_space<vmem>>, vector<1x64xf32>
    %202 = tpu.iota {dimensions = array<i32: 0>} : vector<64x1xi32>
    %c7_i32_113 = arith.constant 7 : i32
    %203 = vector.broadcast %c7_i32_113 : i32 to vector<64x1xi32>
    %204 = arith.andi %202, %203 : vector<64x1xi32>
    %c0_i32_114 = arith.constant 0 : i32
    %205 = vector.broadcast %c0_i32_114 : i32 to vector<64x1xi32>
    %206 = arith.cmpi ne, %204, %205 : vector<64x1xi32>
    %c7_i32_115 = arith.constant 7 : i32
    %207 = vector.broadcast %c7_i32_115 : i32 to vector<64x1xi32>
    %208 = arith.cmpi ne, %204, %207 : vector<64x1xi32>
    %209 = vector.extract_strided_slice %199 {offsets = [0, 0], sizes = [1, 64], strides = [1, 1]} : vector<9x256xf32> to vector<1x64xf32>
    %cst_116 = arith.constant 0.000000e+00 : f32
    %210 = vector.shape_cast %206 : vector<64x1xi1> to vector<64x1xi1>
    %211 = vector.broadcast %210 : vector<64x1xi1> to vector<64x64xi1>
    %212 = vector.shape_cast %209 : vector<1x64xf32> to vector<1x64xf32>
    %213 = vector.broadcast %212 : vector<1x64xf32> to vector<64x64xf32>
    %214 = vector.broadcast %cst_116 : f32 to vector<64x64xf32>
    %215 = arith.select %211, %213, %214 : vector<64x64xi1>, vector<64x64xf32>
    %216 = vector.extract_strided_slice %199 {offsets = [1, 0], sizes = [1, 64], strides = [1, 1]} : vector<9x256xf32> to vector<1x64xf32>
    %217 = vector.extract_strided_slice %199 {offsets = [2, 0], sizes = [1, 64], strides = [1, 1]} : vector<9x256xf32> to vector<1x64xf32>
    %cst_117 = arith.constant 0.000000e+00 : f32
    %218 = vector.shape_cast %208 : vector<64x1xi1> to vector<64x1xi1>
    %219 = vector.broadcast %218 : vector<64x1xi1> to vector<64x64xi1>
    %220 = vector.shape_cast %217 : vector<1x64xf32> to vector<1x64xf32>
    %221 = vector.broadcast %220 : vector<1x64xf32> to vector<64x64xf32>
    %222 = vector.broadcast %cst_117 : f32 to vector<64x64xf32>
    %223 = arith.select %219, %221, %222 : vector<64x64xi1>, vector<64x64xf32>
    %224 = vector.extract_strided_slice %199 {offsets = [3, 0], sizes = [1, 64], strides = [1, 1]} : vector<9x256xf32> to vector<1x64xf32>
    %cst_118 = arith.constant 0.000000e+00 : f32
    %225 = vector.shape_cast %206 : vector<64x1xi1> to vector<64x1xi1>
    %226 = vector.broadcast %225 : vector<64x1xi1> to vector<64x64xi1>
    %227 = vector.shape_cast %224 : vector<1x64xf32> to vector<1x64xf32>
    %228 = vector.broadcast %227 : vector<1x64xf32> to vector<64x64xf32>
    %229 = vector.broadcast %cst_118 : f32 to vector<64x64xf32>
    %230 = arith.select %226, %228, %229 : vector<64x64xi1>, vector<64x64xf32>
    %231 = vector.extract_strided_slice %199 {offsets = [4, 0], sizes = [1, 64], strides = [1, 1]} : vector<9x256xf32> to vector<1x64xf32>
    %232 = vector.extract_strided_slice %199 {offsets = [5, 0], sizes = [1, 64], strides = [1, 1]} : vector<9x256xf32> to vector<1x64xf32>
    %cst_119 = arith.constant 0.000000e+00 : f32
    %233 = vector.shape_cast %208 : vector<64x1xi1> to vector<64x1xi1>
    %234 = vector.broadcast %233 : vector<64x1xi1> to vector<64x64xi1>
    %235 = vector.shape_cast %232 : vector<1x64xf32> to vector<1x64xf32>
    %236 = vector.broadcast %235 : vector<1x64xf32> to vector<64x64xf32>
    %237 = vector.broadcast %cst_119 : f32 to vector<64x64xf32>
    %238 = arith.select %234, %236, %237 : vector<64x64xi1>, vector<64x64xf32>
    %239 = vector.extract_strided_slice %199 {offsets = [6, 0], sizes = [1, 64], strides = [1, 1]} : vector<9x256xf32> to vector<1x64xf32>
    %cst_120 = arith.constant 0.000000e+00 : f32
    %240 = vector.shape_cast %206 : vector<64x1xi1> to vector<64x1xi1>
    %241 = vector.broadcast %240 : vector<64x1xi1> to vector<64x64xi1>
    %242 = vector.shape_cast %239 : vector<1x64xf32> to vector<1x64xf32>
    %243 = vector.broadcast %242 : vector<1x64xf32> to vector<64x64xf32>
    %244 = vector.broadcast %cst_120 : f32 to vector<64x64xf32>
    %245 = arith.select %241, %243, %244 : vector<64x64xi1>, vector<64x64xf32>
    %246 = vector.extract_strided_slice %199 {offsets = [7, 0], sizes = [1, 64], strides = [1, 1]} : vector<9x256xf32> to vector<1x64xf32>
    %247 = vector.extract_strided_slice %199 {offsets = [8, 0], sizes = [1, 64], strides = [1, 1]} : vector<9x256xf32> to vector<1x64xf32>
    %cst_121 = arith.constant 0.000000e+00 : f32
    %248 = vector.shape_cast %208 : vector<64x1xi1> to vector<64x1xi1>
    %249 = vector.broadcast %248 : vector<64x1xi1> to vector<64x64xi1>
    %250 = vector.shape_cast %247 : vector<1x64xf32> to vector<1x64xf32>
    %251 = vector.broadcast %250 : vector<1x64xf32> to vector<64x64xf32>
    %252 = vector.broadcast %cst_121 : f32 to vector<64x64xf32>
    %253 = arith.select %249, %251, %252 : vector<64x64xi1>, vector<64x64xf32>
    %254 = vector.extract_strided_slice %197 {offsets = [0, 0], sizes = [64, 64], strides = [1, 1]} : vector<128x64xf32> to vector<64x64xf32>
    %c0_122 = arith.constant 0 : index
    %c9_123 = arith.constant 9 : index
    %c0_124 = arith.constant 0 : index
    %255 = vector.load %arg11[%c0_122, %c9_123, %c0_124] : memref<2x82x64xf32, #tpu.memory_space<vmem>>, vector<1x64x64xf32>
    %256 = vector.shape_cast %255 : vector<1x64x64xf32> to vector<64x64xf32>
    %257 = vector.shape_cast %254 : vector<64x64xf32> to vector<1x64x64xf32>
    tpu.vector_store %arg11[%c0_122, %c9_123, %c0_124], %257 {strides = array<i32>} : memref<2x82x64xf32, #tpu.memory_space<vmem>>, vector<1x64x64xf32>,
    %cst_125 = arith.constant 0.000000e+00 : f32
    %258 = vector.broadcast %cst_125 : f32 to vector<64x64xf32>
    %c0_126 = arith.constant 0 : index
    %c0_127 = arith.constant 0 : index
    %c0_128 = arith.constant 0 : index
    %259 = vector.load %arg11[%c0_126, %c0_127, %c0_128] : memref<2x82x64xf32, #tpu.memory_space<vmem>>, vector<1x64x64xf32>
    %260 = vector.shape_cast %259 : vector<1x64x64xf32> to vector<64x64xf32>
    %261 = arith.mulf %260, %215 : vector<64x64xf32>
    %262 = arith.addf %258, %261 : vector<64x64xf32>
    %c0_129 = arith.constant 0 : index
    %c1_130 = arith.constant 1 : index
    %c0_131 = arith.constant 0 : index
    %263 = vector.load %arg11[%c0_129, %c1_130, %c0_131] : memref<2x82x64xf32, #tpu.memory_space<vmem>>, vector<1x64x64xf32>
    %264 = vector.shape_cast %263 : vector<1x64x64xf32> to vector<64x64xf32>
    %265 = vector.broadcast %216 : vector<1x64xf32> to vector<64x64xf32>
    %266 = arith.mulf %264, %265 : vector<64x64xf32>
    %267 = arith.addf %262, %266 : vector<64x64xf32>
    %c0_132 = arith.constant 0 : index
    %c2_133 = arith.constant 2 : index
    %c0_134 = arith.constant 0 : index
    %268 = vector.load %arg11[%c0_132, %c2_133, %c0_134] : memref<2x82x64xf32, #tpu.memory_space<vmem>>, vector<1x64x64xf32>
    %269 = vector.shape_cast %268 : vector<1x64x64xf32> to vector<64x64xf32>
    %270 = arith.mulf %269, %223 : vector<64x64xf32>
    %271 = arith.addf %267, %270 : vector<64x64xf32>
    %c0_135 = arith.constant 0 : index
    %c8_136 = arith.constant 8 : index
    %c0_137 = arith.constant 0 : index
    %272 = vector.load %arg11[%c0_135, %c8_136, %c0_137] : memref<2x82x64xf32, #tpu.memory_space<vmem>>, vector<1x64x64xf32>
    %273 = vector.shape_cast %272 : vector<1x64x64xf32> to vector<64x64xf32>
    %274 = arith.mulf %273, %230 : vector<64x64xf32>
    %275 = arith.addf %271, %274 : vector<64x64xf32>
    %c0_138 = arith.constant 0 : index
    %c9_139 = arith.constant 9 : index
    %c0_140 = arith.constant 0 : index
    %276 = vector.load %arg11[%c0_138, %c9_139, %c0_140] : memref<2x82x64xf32, #tpu.memory_space<vmem>>, vector<1x64x64xf32>
    %277 = vector.shape_cast %276 : vector<1x64x64xf32> to vector<64x64xf32>
    %278 = vector.broadcast %231 : vector<1x64xf32> to vector<64x64xf32>
    %279 = arith.mulf %277, %278 : vector<64x64xf32>
    %280 = arith.addf %275, %279 : vector<64x64xf32>
    %c0_141 = arith.constant 0 : index
    %c10_142 = arith.constant 10 : index
    %c0_143 = arith.constant 0 : index
    %281 = vector.load %arg11[%c0_141, %c10_142, %c0_143] : memref<2x82x64xf32, #tpu.memory_space<vmem>>, vector<1x64x64xf32>
    %282 = vector.shape_cast %281 : vector<1x64x64xf32> to vector<64x64xf32>
    %283 = arith.mulf %282, %238 : vector<64x64xf32>
    %284 = arith.addf %280, %283 : vector<64x64xf32>
    %c0_144 = arith.constant 0 : index
    %c16_145 = arith.constant 16 : index
    %c0_146 = arith.constant 0 : index
    %285 = vector.load %arg11[%c0_144, %c16_145, %c0_146] : memref<2x82x64xf32, #tpu.memory_space<vmem>>, vector<1x64x64xf32>
    %286 = vector.shape_cast %285 : vector<1x64x64xf32> to vector<64x64xf32>
    %287 = arith.mulf %286, %245 : vector<64x64xf32>
    %288 = arith.addf %284, %287 : vector<64x64xf32>
    %c0_147 = arith.constant 0 : index
    %c17_148 = arith.constant 17 : index
    %c0_149 = arith.constant 0 : index
    %289 = vector.load %arg11[%c0_147, %c17_148, %c0_149] : memref<2x82x64xf32, #tpu.memory_space<vmem>>, vector<1x64x64xf32>
    %290 = vector.shape_cast %289 : vector<1x64x64xf32> to vector<64x64xf32>
    %291 = vector.broadcast %246 : vector<1x64xf32> to vector<64x64xf32>
    %292 = arith.mulf %290, %291 : vector<64x64xf32>
    %293 = arith.addf %288, %292 : vector<64x64xf32>
    %c0_150 = arith.constant 0 : index
    %c18_151 = arith.constant 18 : index
    %c0_152 = arith.constant 0 : index
    %294 = vector.load %arg11[%c0_150, %c18_151, %c0_152] : memref<2x82x64xf32, #tpu.memory_space<vmem>>, vector<1x64x64xf32>
    %295 = vector.shape_cast %294 : vector<1x64x64xf32> to vector<64x64xf32>
    %296 = arith.mulf %295, %253 : vector<64x64xf32>
    %297 = arith.addf %293, %296 : vector<64x64xf32>
    %298 = vector.broadcast %200 : vector<1x64xf32> to vector<64x64xf32>
    %299 = arith.mulf %297, %298 : vector<64x64xf32>
    %300 = vector.broadcast %201 : vector<1x64xf32> to vector<64x64xf32>
    %301 = arith.addf %299, %300 : vector<64x64xf32>
    %cst_153 = arith.constant 0.000000e+00 : f32
    %cst_154 = arith.constant 6.000000e+00 : f32
    %302 = vector.broadcast %cst_153 : f32 to vector<64x64xf32>
    %303 = arith.maximumf %302, %301 : vector<64x64xf32>
    %304 = vector.broadcast %cst_154 : f32 to vector<64x64xf32>
    %305 = arith.minimumf %304, %303 : vector<64x64xf32>
    %306 = arith.truncf %305 : vector<64x64xf32> to vector<64x64xbf16>
    %c0_155 = arith.constant 0 : index
    %c0_156 = arith.constant 0 : index
    %307 = vector.load %arg6[%c0_155, %c0_156] : memref<16x64xbf16, #tpu.memory_space<vmem>>, vector<16x64xbf16>
    %cst_157 = arith.constant dense<0.000000e+00> : vector<16x64xf32>
    %308 = tpu.matmul %307, %306, %cst_157 {dimension_numbers = #tpu.dot_dimension_numbers<[1], [0], [0], [1], [0, 0, 1, 1], [], []>} : vector<16x64xbf16>, vector<64x64xbf16>, vector<16x64xf32> -> vector<16x64xf32>
    %309 = arith.truncf %308 : vector<16x64xf32> to vector<16x64xbf16>
    %c0_158 = arith.constant 0 : index
    %c0_159 = arith.constant 0 : index
    %310 = vector.load %arg15[%c0_158, %c0_159] : memref<32x64xbf16, #tpu.memory_space<vmem>>, vector<16x64xbf16>
    tpu.vector_store %arg15[%c0_158, %c0_159], %309 {strides = array<i32>} : memref<32x64xbf16, #tpu.memory_space<vmem>>, vector<16x64xbf16>,
    %311 = vector.extract_strided_slice %197 {offsets = [64, 0], sizes = [64, 64], strides = [1, 1]} : vector<128x64xf32> to vector<64x64xf32>
    %c1_160 = arith.constant 1 : index
    %c9_161 = arith.constant 9 : index
    %c0_162 = arith.constant 0 : index
    %312 = vector.load %arg11[%c1_160, %c9_161, %c0_162] : memref<2x82x64xf32, #tpu.memory_space<vmem>>, vector<1x64x64xf32>
    %313 = vector.shape_cast %312 : vector<1x64x64xf32> to vector<64x64xf32>
    %314 = vector.shape_cast %311 : vector<64x64xf32> to vector<1x64x64xf32>
    tpu.vector_store %arg11[%c1_160, %c9_161, %c0_162], %314 {strides = array<i32>} : memref<2x82x64xf32, #tpu.memory_space<vmem>>, vector<1x64x64xf32>,
    %cst_163 = arith.constant 0.000000e+00 : f32
    %315 = vector.broadcast %cst_163 : f32 to vector<64x64xf32>
    %c1_164 = arith.constant 1 : index
    %c0_165 = arith.constant 0 : index
    %c0_166 = arith.constant 0 : index
    %316 = vector.load %arg11[%c1_164, %c0_165, %c0_166] : memref<2x82x64xf32, #tpu.memory_space<vmem>>, vector<1x64x64xf32>
    %317 = vector.shape_cast %316 : vector<1x64x64xf32> to vector<64x64xf32>
    %318 = arith.mulf %317, %215 : vector<64x64xf32>
    %319 = arith.addf %315, %318 : vector<64x64xf32>
    %c1_167 = arith.constant 1 : index
    %c1_168 = arith.constant 1 : index
    %c0_169 = arith.constant 0 : index
    %320 = vector.load %arg11[%c1_167, %c1_168, %c0_169] : memref<2x82x64xf32, #tpu.memory_space<vmem>>, vector<1x64x64xf32>
    %321 = vector.shape_cast %320 : vector<1x64x64xf32> to vector<64x64xf32>
    %322 = vector.broadcast %216 : vector<1x64xf32> to vector<64x64xf32>
    %323 = arith.mulf %321, %322 : vector<64x64xf32>
    %324 = arith.addf %319, %323 : vector<64x64xf32>
    %c1_170 = arith.constant 1 : index
    %c2_171 = arith.constant 2 : index
    %c0_172 = arith.constant 0 : index
    %325 = vector.load %arg11[%c1_170, %c2_171, %c0_172] : memref<2x82x64xf32, #tpu.memory_space<vmem>>, vector<1x64x64xf32>
    %326 = vector.shape_cast %325 : vector<1x64x64xf32> to vector<64x64xf32>
    %327 = arith.mulf %326, %223 : vector<64x64xf32>
    %328 = arith.addf %324, %327 : vector<64x64xf32>
    %c1_173 = arith.constant 1 : index
    %c8_174 = arith.constant 8 : index
    %c0_175 = arith.constant 0 : index
    %329 = vector.load %arg11[%c1_173, %c8_174, %c0_175] : memref<2x82x64xf32, #tpu.memory_space<vmem>>, vector<1x64x64xf32>
    %330 = vector.shape_cast %329 : vector<1x64x64xf32> to vector<64x64xf32>
    %331 = arith.mulf %330, %230 : vector<64x64xf32>
    %332 = arith.addf %328, %331 : vector<64x64xf32>
    %c1_176 = arith.constant 1 : index
    %c9_177 = arith.constant 9 : index
    %c0_178 = arith.constant 0 : index
    %333 = vector.load %arg11[%c1_176, %c9_177, %c0_178] : memref<2x82x64xf32, #tpu.memory_space<vmem>>, vector<1x64x64xf32>
    %334 = vector.shape_cast %333 : vector<1x64x64xf32> to vector<64x64xf32>
    %335 = vector.broadcast %231 : vector<1x64xf32> to vector<64x64xf32>
    %336 = arith.mulf %334, %335 : vector<64x64xf32>
    %337 = arith.addf %332, %336 : vector<64x64xf32>
    %c1_179 = arith.constant 1 : index
    %c10_180 = arith.constant 10 : index
    %c0_181 = arith.constant 0 : index
    %338 = vector.load %arg11[%c1_179, %c10_180, %c0_181] : memref<2x82x64xf32, #tpu.memory_space<vmem>>, vector<1x64x64xf32>
    %339 = vector.shape_cast %338 : vector<1x64x64xf32> to vector<64x64xf32>
    %340 = arith.mulf %339, %238 : vector<64x64xf32>
    %341 = arith.addf %337, %340 : vector<64x64xf32>
    %c1_182 = arith.constant 1 : index
    %c16_183 = arith.constant 16 : index
    %c0_184 = arith.constant 0 : index
    %342 = vector.load %arg11[%c1_182, %c16_183, %c0_184] : memref<2x82x64xf32, #tpu.memory_space<vmem>>, vector<1x64x64xf32>
    %343 = vector.shape_cast %342 : vector<1x64x64xf32> to vector<64x64xf32>
    %344 = arith.mulf %343, %245 : vector<64x64xf32>
    %345 = arith.addf %341, %344 : vector<64x64xf32>
    %c1_185 = arith.constant 1 : index
    %c17_186 = arith.constant 17 : index
    %c0_187 = arith.constant 0 : index
    %346 = vector.load %arg11[%c1_185, %c17_186, %c0_187] : memref<2x82x64xf32, #tpu.memory_space<vmem>>, vector<1x64x64xf32>
    %347 = vector.shape_cast %346 : vector<1x64x64xf32> to vector<64x64xf32>
    %348 = vector.broadcast %246 : vector<1x64xf32> to vector<64x64xf32>
    %349 = arith.mulf %347, %348 : vector<64x64xf32>
    %350 = arith.addf %345, %349 : vector<64x64xf32>
    %c1_188 = arith.constant 1 : index
    %c18_189 = arith.constant 18 : index
    %c0_190 = arith.constant 0 : index
    %351 = vector.load %arg11[%c1_188, %c18_189, %c0_190] : memref<2x82x64xf32, #tpu.memory_space<vmem>>, vector<1x64x64xf32>
    %352 = vector.shape_cast %351 : vector<1x64x64xf32> to vector<64x64xf32>
    %353 = arith.mulf %352, %253 : vector<64x64xf32>
    %354 = arith.addf %350, %353 : vector<64x64xf32>
    %355 = vector.broadcast %200 : vector<1x64xf32> to vector<64x64xf32>
    %356 = arith.mulf %354, %355 : vector<64x64xf32>
    %357 = vector.broadcast %201 : vector<1x64xf32> to vector<64x64xf32>
    %358 = arith.addf %356, %357 : vector<64x64xf32>
    %cst_191 = arith.constant 0.000000e+00 : f32
    %cst_192 = arith.constant 6.000000e+00 : f32
    %359 = vector.broadcast %cst_191 : f32 to vector<64x64xf32>
    %360 = arith.maximumf %359, %358 : vector<64x64xf32>
    %361 = vector.broadcast %cst_192 : f32 to vector<64x64xf32>
    %362 = arith.minimumf %361, %360 : vector<64x64xf32>
    %363 = arith.truncf %362 : vector<64x64xf32> to vector<64x64xbf16>
    %c0_193 = arith.constant 0 : index
    %c0_194 = arith.constant 0 : index
    %364 = vector.load %arg6[%c0_193, %c0_194] : memref<16x64xbf16, #tpu.memory_space<vmem>>, vector<16x64xbf16>
    %cst_195 = arith.constant dense<0.000000e+00> : vector<16x64xf32>
    %365 = tpu.matmul %364, %363, %cst_195 {dimension_numbers = #tpu.dot_dimension_numbers<[1], [0], [0], [1], [0, 0, 1, 1], [], []>} : vector<16x64xbf16>, vector<64x64xbf16>, vector<16x64xf32> -> vector<16x64xf32>
    %366 = arith.truncf %365 : vector<16x64xf32> to vector<16x64xbf16>
    %c16_196 = arith.constant 16 : index
    %c0_197 = arith.constant 0 : index
    %367 = vector.load %arg15[%c16_196, %c0_197] : memref<32x64xbf16, #tpu.memory_space<vmem>>, vector<16x64xbf16>
    tpu.vector_store %arg15[%c16_196, %c0_197], %366 {strides = array<i32>} : memref<32x64xbf16, #tpu.memory_space<vmem>>, vector<16x64xbf16>,
    %c32 = arith.constant 32 : index
    %c0_198 = arith.constant 0 : index
    %368 = vector.load %arg5[%c32, %c0_198] : memref<1120x256xbf16, #tpu.memory_space<vmem>>, vector<64x128xbf16>
    %c0_199 = arith.constant 0 : index
    %c0_200 = arith.constant 0 : index
    %369 = vector.load %arg15[%c0_199, %c0_200] : memref<32x64xbf16, #tpu.memory_space<vmem>>, vector<32x64xbf16>
    %cst_201 = arith.constant dense<0.000000e+00> : vector<32x128xf32>
    %370 = tpu.matmul %369, %368, %cst_201 {dimension_numbers = #tpu.dot_dimension_numbers<[1], [0], [0], [1], [0, 0, 1, 1], [], []>} : vector<32x64xbf16>, vector<64x128xbf16>, vector<32x128xf32> -> vector<32x128xf32>
    %c8_202 = arith.constant 8 : index
    %c0_203 = arith.constant 0 : index
    %371 = vector.load %arg3[%c8_202, %c0_203] : memref<32x256xf32, #tpu.memory_space<vmem>>, vector<1x128xf32>
    %372 = vector.broadcast %371 : vector<1x128xf32> to vector<32x128xf32>
    %373 = arith.mulf %370, %372 : vector<32x128xf32>
    %c9_204 = arith.constant 9 : index
    %c0_205 = arith.constant 0 : index
    %374 = vector.load %arg3[%c9_204, %c0_205] : memref<32x256xf32, #tpu.memory_space<vmem>>, vector<1x128xf32>
    %375 = vector.broadcast %374 : vector<1x128xf32> to vector<32x128xf32>
    %376 = arith.addf %373, %375 : vector<32x128xf32>
    %cst_206 = arith.constant 0.000000e+00 : f32
    %cst_207 = arith.constant 6.000000e+00 : f32
    %377 = vector.broadcast %cst_206 : f32 to vector<32x128xf32>
    %378 = arith.maximumf %377, %376 : vector<32x128xf32>
    %379 = vector.broadcast %cst_207 : f32 to vector<32x128xf32>
    %380 = arith.minimumf %379, %378 : vector<32x128xf32>
    %c2_208 = arith.constant 2 : index
    %c0_209 = arith.constant 0 : index
    %c0_210 = arith.constant 0 : index
    %381 = vector.load %arg4[%c2_208, %c0_209, %c0_210] : memref<7x9x256xf32, #tpu.memory_space<vmem>>, vector<1x9x256xf32>
    %382 = vector.shape_cast %381 : vector<1x9x256xf32> to vector<9x256xf32>
    %c10_211 = arith.constant 10 : index
    %c0_212 = arith.constant 0 : index
    %383 = vector.load %arg3[%c10_211, %c0_212] : memref<32x256xf32, #tpu.memory_space<vmem>>, vector<1x128xf32>
    %c11 = arith.constant 11 : index
    %c0_213 = arith.constant 0 : index
    %384 = vector.load %arg3[%c11, %c0_213] : memref<32x256xf32, #tpu.memory_space<vmem>>, vector<1x128xf32>
    %385 = tpu.iota {dimensions = array<i32: 0>} : vector<16x1xi32>
    %c3_i32 = arith.constant 3 : i32
    %386 = vector.broadcast %c3_i32 : i32 to vector<16x1xi32>
    %387 = arith.andi %385, %386 : vector<16x1xi32>
    %c0_i32_214 = arith.constant 0 : i32
    %388 = vector.broadcast %c0_i32_214 : i32 to vector<16x1xi32>
    %389 = arith.cmpi ne, %387, %388 : vector<16x1xi32>
    %c3_i32_215 = arith.constant 3 : i32
    %390 = vector.broadcast %c3_i32_215 : i32 to vector<16x1xi32>
    %391 = arith.cmpi ne, %387, %390 : vector<16x1xi32>
    %392 = vector.extract_strided_slice %382 {offsets = [0, 0], sizes = [1, 128], strides = [1, 1]} : vector<9x256xf32> to vector<1x128xf32>
    %cst_216 = arith.constant 0.000000e+00 : f32
    %393 = vector.shape_cast %389 : vector<16x1xi1> to vector<16x1xi1>
    %394 = vector.broadcast %393 : vector<16x1xi1> to vector<16x128xi1>
    %395 = vector.shape_cast %392 : vector<1x128xf32> to vector<1x128xf32>
    %396 = vector.broadcast %395 : vector<1x128xf32> to vector<16x128xf32>
    %397 = vector.broadcast %cst_216 : f32 to vector<16x128xf32>
    %398 = arith.select %394, %396, %397 : vector<16x128xi1>, vector<16x128xf32>
    %399 = vector.extract_strided_slice %382 {offsets = [1, 0], sizes = [1, 128], strides = [1, 1]} : vector<9x256xf32> to vector<1x128xf32>
    %400 = vector.extract_strided_slice %382 {offsets = [2, 0], sizes = [1, 128], strides = [1, 1]} : vector<9x256xf32> to vector<1x128xf32>
    %cst_217 = arith.constant 0.000000e+00 : f32
    %401 = vector.shape_cast %391 : vector<16x1xi1> to vector<16x1xi1>
    %402 = vector.broadcast %401 : vector<16x1xi1> to vector<16x128xi1>
    %403 = vector.shape_cast %400 : vector<1x128xf32> to vector<1x128xf32>
    %404 = vector.broadcast %403 : vector<1x128xf32> to vector<16x128xf32>
    %405 = vector.broadcast %cst_217 : f32 to vector<16x128xf32>
    %406 = arith.select %402, %404, %405 : vector<16x128xi1>, vector<16x128xf32>
    %407 = vector.extract_strided_slice %382 {offsets = [3, 0], sizes = [1, 128], strides = [1, 1]} : vector<9x256xf32> to vector<1x128xf32>
    %cst_218 = arith.constant 0.000000e+00 : f32
    %408 = vector.shape_cast %389 : vector<16x1xi1> to vector<16x1xi1>
    %409 = vector.broadcast %408 : vector<16x1xi1> to vector<16x128xi1>
    %410 = vector.shape_cast %407 : vector<1x128xf32> to vector<1x128xf32>
    %411 = vector.broadcast %410 : vector<1x128xf32> to vector<16x128xf32>
    %412 = vector.broadcast %cst_218 : f32 to vector<16x128xf32>
    %413 = arith.select %409, %411, %412 : vector<16x128xi1>, vector<16x128xf32>
    %414 = vector.extract_strided_slice %382 {offsets = [4, 0], sizes = [1, 128], strides = [1, 1]} : vector<9x256xf32> to vector<1x128xf32>
    %415 = vector.extract_strided_slice %382 {offsets = [5, 0], sizes = [1, 128], strides = [1, 1]} : vector<9x256xf32> to vector<1x128xf32>
    %cst_219 = arith.constant 0.000000e+00 : f32
    %416 = vector.shape_cast %391 : vector<16x1xi1> to vector<16x1xi1>
    %417 = vector.broadcast %416 : vector<16x1xi1> to vector<16x128xi1>
    %418 = vector.shape_cast %415 : vector<1x128xf32> to vector<1x128xf32>
    %419 = vector.broadcast %418 : vector<1x128xf32> to vector<16x128xf32>
    %420 = vector.broadcast %cst_219 : f32 to vector<16x128xf32>
    %421 = arith.select %417, %419, %420 : vector<16x128xi1>, vector<16x128xf32>
    %422 = vector.extract_strided_slice %382 {offsets = [6, 0], sizes = [1, 128], strides = [1, 1]} : vector<9x256xf32> to vector<1x128xf32>
    %cst_220 = arith.constant 0.000000e+00 : f32
    %423 = vector.shape_cast %389 : vector<16x1xi1> to vector<16x1xi1>
    %424 = vector.broadcast %423 : vector<16x1xi1> to vector<16x128xi1>
    %425 = vector.shape_cast %422 : vector<1x128xf32> to vector<1x128xf32>
    %426 = vector.broadcast %425 : vector<1x128xf32> to vector<16x128xf32>
    %427 = vector.broadcast %cst_220 : f32 to vector<16x128xf32>
    %428 = arith.select %424, %426, %427 : vector<16x128xi1>, vector<16x128xf32>
    %429 = vector.extract_strided_slice %382 {offsets = [7, 0], sizes = [1, 128], strides = [1, 1]} : vector<9x256xf32> to vector<1x128xf32>
    %430 = vector.extract_strided_slice %382 {offsets = [8, 0], sizes = [1, 128], strides = [1, 1]} : vector<9x256xf32> to vector<1x128xf32>
    %cst_221 = arith.constant 0.000000e+00 : f32
    %431 = vector.shape_cast %391 : vector<16x1xi1> to vector<16x1xi1>
    %432 = vector.broadcast %431 : vector<16x1xi1> to vector<16x128xi1>
    %433 = vector.shape_cast %430 : vector<1x128xf32> to vector<1x128xf32>
    %434 = vector.broadcast %433 : vector<1x128xf32> to vector<16x128xf32>
    %435 = vector.broadcast %cst_221 : f32 to vector<16x128xf32>
    %436 = arith.select %432, %434, %435 : vector<16x128xi1>, vector<16x128xf32>
    %437 = vector.extract_strided_slice %380 {offsets = [0, 0], sizes = [16, 128], strides = [1, 1]} : vector<32x128xf32> to vector<16x128xf32>
    %c0_222 = arith.constant 0 : index
    %c5_223 = arith.constant 5 : index
    %c0_224 = arith.constant 0 : index
    %438 = vector.load %arg12[%c0_222, %c5_223, %c0_224] : memref<2x26x128xf32, #tpu.memory_space<vmem>>, vector<1x16x128xf32>
    %439 = vector.shape_cast %438 : vector<1x16x128xf32> to vector<16x128xf32>
    %440 = vector.shape_cast %437 : vector<16x128xf32> to vector<1x16x128xf32>
    tpu.vector_store %arg12[%c0_222, %c5_223, %c0_224], %440 {strides = array<i32>} : memref<2x26x128xf32, #tpu.memory_space<vmem>>, vector<1x16x128xf32>,
    %cst_225 = arith.constant 0.000000e+00 : f32
    %441 = vector.broadcast %cst_225 : f32 to vector<16x128xf32>
    %c0_226 = arith.constant 0 : index
    %c0_227 = arith.constant 0 : index
    %c0_228 = arith.constant 0 : index
    %442 = vector.load %arg12[%c0_226, %c0_227, %c0_228] : memref<2x26x128xf32, #tpu.memory_space<vmem>>, vector<1x16x128xf32>
    %443 = vector.shape_cast %442 : vector<1x16x128xf32> to vector<16x128xf32>
    %444 = arith.mulf %443, %398 : vector<16x128xf32>
    %445 = arith.addf %441, %444 : vector<16x128xf32>
    %c0_229 = arith.constant 0 : index
    %c1_230 = arith.constant 1 : index
    %c0_231 = arith.constant 0 : index
    %446 = vector.load %arg12[%c0_229, %c1_230, %c0_231] : memref<2x26x128xf32, #tpu.memory_space<vmem>>, vector<1x16x128xf32>
    %447 = vector.shape_cast %446 : vector<1x16x128xf32> to vector<16x128xf32>
    %448 = vector.broadcast %399 : vector<1x128xf32> to vector<16x128xf32>
    %449 = arith.mulf %447, %448 : vector<16x128xf32>
    %450 = arith.addf %445, %449 : vector<16x128xf32>
    %c0_232 = arith.constant 0 : index
    %c2_233 = arith.constant 2 : index
    %c0_234 = arith.constant 0 : index
    %451 = vector.load %arg12[%c0_232, %c2_233, %c0_234] : memref<2x26x128xf32, #tpu.memory_space<vmem>>, vector<1x16x128xf32>
    %452 = vector.shape_cast %451 : vector<1x16x128xf32> to vector<16x128xf32>
    %453 = arith.mulf %452, %406 : vector<16x128xf32>
    %454 = arith.addf %450, %453 : vector<16x128xf32>
    %c0_235 = arith.constant 0 : index
    %c4_236 = arith.constant 4 : index
    %c0_237 = arith.constant 0 : index
    %455 = vector.load %arg12[%c0_235, %c4_236, %c0_237] : memref<2x26x128xf32, #tpu.memory_space<vmem>>, vector<1x16x128xf32>
    %456 = vector.shape_cast %455 : vector<1x16x128xf32> to vector<16x128xf32>
    %457 = arith.mulf %456, %413 : vector<16x128xf32>
    %458 = arith.addf %454, %457 : vector<16x128xf32>
    %c0_238 = arith.constant 0 : index
    %c5_239 = arith.constant 5 : index
    %c0_240 = arith.constant 0 : index
    %459 = vector.load %arg12[%c0_238, %c5_239, %c0_240] : memref<2x26x128xf32, #tpu.memory_space<vmem>>, vector<1x16x128xf32>
    %460 = vector.shape_cast %459 : vector<1x16x128xf32> to vector<16x128xf32>
    %461 = vector.broadcast %414 : vector<1x128xf32> to vector<16x128xf32>
    %462 = arith.mulf %460, %461 : vector<16x128xf32>
    %463 = arith.addf %458, %462 : vector<16x128xf32>
    %c0_241 = arith.constant 0 : index
    %c6_242 = arith.constant 6 : index
    %c0_243 = arith.constant 0 : index
    %464 = vector.load %arg12[%c0_241, %c6_242, %c0_243] : memref<2x26x128xf32, #tpu.memory_space<vmem>>, vector<1x16x128xf32>
    %465 = vector.shape_cast %464 : vector<1x16x128xf32> to vector<16x128xf32>
    %466 = arith.mulf %465, %421 : vector<16x128xf32>
    %467 = arith.addf %463, %466 : vector<16x128xf32>
    %c0_244 = arith.constant 0 : index
    %c8_245 = arith.constant 8 : index
    %c0_246 = arith.constant 0 : index
    %468 = vector.load %arg12[%c0_244, %c8_245, %c0_246] : memref<2x26x128xf32, #tpu.memory_space<vmem>>, vector<1x16x128xf32>
    %469 = vector.shape_cast %468 : vector<1x16x128xf32> to vector<16x128xf32>
    %470 = arith.mulf %469, %428 : vector<16x128xf32>
    %471 = arith.addf %467, %470 : vector<16x128xf32>
    %c0_247 = arith.constant 0 : index
    %c9_248 = arith.constant 9 : index
    %c0_249 = arith.constant 0 : index
    %472 = vector.load %arg12[%c0_247, %c9_248, %c0_249] : memref<2x26x128xf32, #tpu.memory_space<vmem>>, vector<1x16x128xf32>
    %473 = vector.shape_cast %472 : vector<1x16x128xf32> to vector<16x128xf32>
    %474 = vector.broadcast %429 : vector<1x128xf32> to vector<16x128xf32>
    %475 = arith.mulf %473, %474 : vector<16x128xf32>
    %476 = arith.addf %471, %475 : vector<16x128xf32>
    %c0_250 = arith.constant 0 : index
    %c10_251 = arith.constant 10 : index
    %c0_252 = arith.constant 0 : index
    %477 = vector.load %arg12[%c0_250, %c10_251, %c0_252] : memref<2x26x128xf32, #tpu.memory_space<vmem>>, vector<1x16x128xf32>
    %478 = vector.shape_cast %477 : vector<1x16x128xf32> to vector<16x128xf32>
    %479 = arith.mulf %478, %436 : vector<16x128xf32>
    %480 = arith.addf %476, %479 : vector<16x128xf32>
    %481 = vector.broadcast %383 : vector<1x128xf32> to vector<16x128xf32>
    %482 = arith.mulf %480, %481 : vector<16x128xf32>
    %483 = vector.broadcast %384 : vector<1x128xf32> to vector<16x128xf32>
    %484 = arith.addf %482, %483 : vector<16x128xf32>
    %cst_253 = arith.constant 0.000000e+00 : f32
    %cst_254 = arith.constant 6.000000e+00 : f32
    %485 = vector.broadcast %cst_253 : f32 to vector<16x128xf32>
    %486 = arith.maximumf %485, %484 : vector<16x128xf32>
    %487 = vector.broadcast %cst_254 : f32 to vector<16x128xf32>
    %488 = arith.minimumf %487, %486 : vector<16x128xf32>
    %489 = arith.truncf %488 : vector<16x128xf32> to vector<16x128xbf16>
    %c0_255 = arith.constant 0 : index
    %c0_256 = arith.constant 0 : index
    %490 = vector.load %arg16[%c0_255, %c0_256] : memref<32x128xbf16, #tpu.memory_space<vmem>>, vector<16x128xbf16>
    tpu.vector_store %arg16[%c0_255, %c0_256], %489 {strides = array<i32>} : memref<32x128xbf16, #tpu.memory_space<vmem>>, vector<16x128xbf16>,
    %491 = vector.extract_strided_slice %380 {offsets = [16, 0], sizes = [16, 128], strides = [1, 1]} : vector<32x128xf32> to vector<16x128xf32>
    %c1_257 = arith.constant 1 : index
    %c5_258 = arith.constant 5 : index
    %c0_259 = arith.constant 0 : index
    %492 = vector.load %arg12[%c1_257, %c5_258, %c0_259] : memref<2x26x128xf32, #tpu.memory_space<vmem>>, vector<1x16x128xf32>
    %493 = vector.shape_cast %492 : vector<1x16x128xf32> to vector<16x128xf32>
    %494 = vector.shape_cast %491 : vector<16x128xf32> to vector<1x16x128xf32>
    tpu.vector_store %arg12[%c1_257, %c5_258, %c0_259], %494 {strides = array<i32>} : memref<2x26x128xf32, #tpu.memory_space<vmem>>, vector<1x16x128xf32>,
    %cst_260 = arith.constant 0.000000e+00 : f32
    %495 = vector.broadcast %cst_260 : f32 to vector<16x128xf32>
    %c1_261 = arith.constant 1 : index
    %c0_262 = arith.constant 0 : index
    %c0_263 = arith.constant 0 : index
    %496 = vector.load %arg12[%c1_261, %c0_262, %c0_263] : memref<2x26x128xf32, #tpu.memory_space<vmem>>, vector<1x16x128xf32>
    %497 = vector.shape_cast %496 : vector<1x16x128xf32> to vector<16x128xf32>
    %498 = arith.mulf %497, %398 : vector<16x128xf32>
    %499 = arith.addf %495, %498 : vector<16x128xf32>
    %c1_264 = arith.constant 1 : index
    %c1_265 = arith.constant 1 : index
    %c0_266 = arith.constant 0 : index
    %500 = vector.load %arg12[%c1_264, %c1_265, %c0_266] : memref<2x26x128xf32, #tpu.memory_space<vmem>>, vector<1x16x128xf32>
    %501 = vector.shape_cast %500 : vector<1x16x128xf32> to vector<16x128xf32>
    %502 = vector.broadcast %399 : vector<1x128xf32> to vector<16x128xf32>
    %503 = arith.mulf %501, %502 : vector<16x128xf32>
    %504 = arith.addf %499, %503 : vector<16x128xf32>
    %c1_267 = arith.constant 1 : index
    %c2_268 = arith.constant 2 : index
    %c0_269 = arith.constant 0 : index
    %505 = vector.load %arg12[%c1_267, %c2_268, %c0_269] : memref<2x26x128xf32, #tpu.memory_space<vmem>>, vector<1x16x128xf32>
    %506 = vector.shape_cast %505 : vector<1x16x128xf32> to vector<16x128xf32>
    %507 = arith.mulf %506, %406 : vector<16x128xf32>
    %508 = arith.addf %504, %507 : vector<16x128xf32>
    %c1_270 = arith.constant 1 : index
    %c4_271 = arith.constant 4 : index
    %c0_272 = arith.constant 0 : index
    %509 = vector.load %arg12[%c1_270, %c4_271, %c0_272] : memref<2x26x128xf32, #tpu.memory_space<vmem>>, vector<1x16x128xf32>
    %510 = vector.shape_cast %509 : vector<1x16x128xf32> to vector<16x128xf32>
    %511 = arith.mulf %510, %413 : vector<16x128xf32>
    %512 = arith.addf %508, %511 : vector<16x128xf32>
    %c1_273 = arith.constant 1 : index
    %c5_274 = arith.constant 5 : index
    %c0_275 = arith.constant 0 : index
    %513 = vector.load %arg12[%c1_273, %c5_274, %c0_275] : memref<2x26x128xf32, #tpu.memory_space<vmem>>, vector<1x16x128xf32>
    %514 = vector.shape_cast %513 : vector<1x16x128xf32> to vector<16x128xf32>
    %515 = vector.broadcast %414 : vector<1x128xf32> to vector<16x128xf32>
    %516 = arith.mulf %514, %515 : vector<16x128xf32>
    %517 = arith.addf %512, %516 : vector<16x128xf32>
    %c1_276 = arith.constant 1 : index
    %c6_277 = arith.constant 6 : index
    %c0_278 = arith.constant 0 : index
    %518 = vector.load %arg12[%c1_276, %c6_277, %c0_278] : memref<2x26x128xf32, #tpu.memory_space<vmem>>, vector<1x16x128xf32>
    %519 = vector.shape_cast %518 : vector<1x16x128xf32> to vector<16x128xf32>
    %520 = arith.mulf %519, %421 : vector<16x128xf32>
    %521 = arith.addf %517, %520 : vector<16x128xf32>
    %c1_279 = arith.constant 1 : index
    %c8_280 = arith.constant 8 : index
    %c0_281 = arith.constant 0 : index
    %522 = vector.load %arg12[%c1_279, %c8_280, %c0_281] : memref<2x26x128xf32, #tpu.memory_space<vmem>>, vector<1x16x128xf32>
    %523 = vector.shape_cast %522 : vector<1x16x128xf32> to vector<16x128xf32>
    %524 = arith.mulf %523, %428 : vector<16x128xf32>
    %525 = arith.addf %521, %524 : vector<16x128xf32>
    %c1_282 = arith.constant 1 : index
    %c9_283 = arith.constant 9 : index
    %c0_284 = arith.constant 0 : index
    %526 = vector.load %arg12[%c1_282, %c9_283, %c0_284] : memref<2x26x128xf32, #tpu.memory_space<vmem>>, vector<1x16x128xf32>
    %527 = vector.shape_cast %526 : vector<1x16x128xf32> to vector<16x128xf32>
    %528 = vector.broadcast %429 : vector<1x128xf32> to vector<16x128xf32>
    %529 = arith.mulf %527, %528 : vector<16x128xf32>
    %530 = arith.addf %525, %529 : vector<16x128xf32>
    %c1_285 = arith.constant 1 : index
    %c10_286 = arith.constant 10 : index
    %c0_287 = arith.constant 0 : index
    %531 = vector.load %arg12[%c1_285, %c10_286, %c0_287] : memref<2x26x128xf32, #tpu.memory_space<vmem>>, vector<1x16x128xf32>
    %532 = vector.shape_cast %531 : vector<1x16x128xf32> to vector<16x128xf32>
    %533 = arith.mulf %532, %436 : vector<16x128xf32>
    %534 = arith.addf %530, %533 : vector<16x128xf32>
    %535 = vector.broadcast %383 : vector<1x128xf32> to vector<16x128xf32>
    %536 = arith.mulf %534, %535 : vector<16x128xf32>
    %537 = vector.broadcast %384 : vector<1x128xf32> to vector<16x128xf32>
    %538 = arith.addf %536, %537 : vector<16x128xf32>
    %cst_288 = arith.constant 0.000000e+00 : f32
    %cst_289 = arith.constant 6.000000e+00 : f32
    %539 = vector.broadcast %cst_288 : f32 to vector<16x128xf32>
    %540 = arith.maximumf %539, %538 : vector<16x128xf32>
    %541 = vector.broadcast %cst_289 : f32 to vector<16x128xf32>
    %542 = arith.minimumf %541, %540 : vector<16x128xf32>
    %543 = arith.truncf %542 : vector<16x128xf32> to vector<16x128xbf16>
    %c16_290 = arith.constant 16 : index
    %c0_291 = arith.constant 0 : index
    %544 = vector.load %arg16[%c16_290, %c0_291] : memref<32x128xbf16, #tpu.memory_space<vmem>>, vector<16x128xbf16>
    tpu.vector_store %arg16[%c16_290, %c0_291], %543 {strides = array<i32>} : memref<32x128xbf16, #tpu.memory_space<vmem>>, vector<16x128xbf16>,
    %c96 = arith.constant 96 : index
    %c0_292 = arith.constant 0 : index
    %545 = vector.load %arg5[%c96, %c0_292] : memref<1120x256xbf16, #tpu.memory_space<vmem>>, vector<128x128xbf16>
    %c0_293 = arith.constant 0 : index
    %c0_294 = arith.constant 0 : index
    %546 = vector.load %arg16[%c0_293, %c0_294] : memref<32x128xbf16, #tpu.memory_space<vmem>>, vector<32x128xbf16>
    %cst_295 = arith.constant dense<0.000000e+00> : vector<32x128xf32>
    %547 = tpu.matmul %546, %545, %cst_295 {dimension_numbers = #tpu.dot_dimension_numbers<[1], [0], [0], [1], [0, 0, 1, 1], [], []>} : vector<32x128xbf16>, vector<128x128xbf16>, vector<32x128xf32> -> vector<32x128xf32>
    %c12 = arith.constant 12 : index
    %c0_296 = arith.constant 0 : index
    %548 = vector.load %arg3[%c12, %c0_296] : memref<32x256xf32, #tpu.memory_space<vmem>>, vector<1x128xf32>
    %549 = vector.broadcast %548 : vector<1x128xf32> to vector<32x128xf32>
    %550 = arith.mulf %547, %549 : vector<32x128xf32>
    %c13 = arith.constant 13 : index
    %c0_297 = arith.constant 0 : index
    %551 = vector.load %arg3[%c13, %c0_297] : memref<32x256xf32, #tpu.memory_space<vmem>>, vector<1x128xf32>
    %552 = vector.broadcast %551 : vector<1x128xf32> to vector<32x128xf32>
    %553 = arith.addf %550, %552 : vector<32x128xf32>
    %cst_298 = arith.constant 0.000000e+00 : f32
    %cst_299 = arith.constant 6.000000e+00 : f32
    %554 = vector.broadcast %cst_298 : f32 to vector<32x128xf32>
    %555 = arith.maximumf %554, %553 : vector<32x128xf32>
    %556 = vector.broadcast %cst_299 : f32 to vector<32x128xf32>
    %557 = arith.minimumf %556, %555 : vector<32x128xf32>
    %c3_300 = arith.constant 3 : index
    %c0_301 = arith.constant 0 : index
    %c0_302 = arith.constant 0 : index
    %558 = vector.load %arg4[%c3_300, %c0_301, %c0_302] : memref<7x9x256xf32, #tpu.memory_space<vmem>>, vector<1x9x256xf32>
    %559 = vector.shape_cast %558 : vector<1x9x256xf32> to vector<9x256xf32>
    %c14 = arith.constant 14 : index
    %c0_303 = arith.constant 0 : index
    %560 = vector.load %arg3[%c14, %c0_303] : memref<32x256xf32, #tpu.memory_space<vmem>>, vector<1x128xf32>
    %c15 = arith.constant 15 : index
    %c0_304 = arith.constant 0 : index
    %561 = vector.load %arg3[%c15, %c0_304] : memref<32x256xf32, #tpu.memory_space<vmem>>, vector<1x128xf32>
    %562 = tpu.iota {dimensions = array<i32: 0>} : vector<16x1xi32>
    %c3_i32_305 = arith.constant 3 : i32
    %563 = vector.broadcast %c3_i32_305 : i32 to vector<16x1xi32>
    %564 = arith.andi %562, %563 : vector<16x1xi32>
    %c0_i32_306 = arith.constant 0 : i32
    %565 = vector.broadcast %c0_i32_306 : i32 to vector<16x1xi32>
    %566 = arith.cmpi ne, %564, %565 : vector<16x1xi32>
    %c3_i32_307 = arith.constant 3 : i32
    %567 = vector.broadcast %c3_i32_307 : i32 to vector<16x1xi32>
    %568 = arith.cmpi ne, %564, %567 : vector<16x1xi32>
    %569 = vector.extract_strided_slice %559 {offsets = [0, 0], sizes = [1, 128], strides = [1, 1]} : vector<9x256xf32> to vector<1x128xf32>
    %cst_308 = arith.constant 0.000000e+00 : f32
    %570 = vector.shape_cast %566 : vector<16x1xi1> to vector<16x1xi1>
    %571 = vector.broadcast %570 : vector<16x1xi1> to vector<16x128xi1>
    %572 = vector.shape_cast %569 : vector<1x128xf32> to vector<1x128xf32>
    %573 = vector.broadcast %572 : vector<1x128xf32> to vector<16x128xf32>
    %574 = vector.broadcast %cst_308 : f32 to vector<16x128xf32>
    %575 = arith.select %571, %573, %574 : vector<16x128xi1>, vector<16x128xf32>
    %576 = vector.extract_strided_slice %559 {offsets = [1, 0], sizes = [1, 128], strides = [1, 1]} : vector<9x256xf32> to vector<1x128xf32>
    %577 = vector.extract_strided_slice %559 {offsets = [2, 0], sizes = [1, 128], strides = [1, 1]} : vector<9x256xf32> to vector<1x128xf32>
    %cst_309 = arith.constant 0.000000e+00 : f32
    %578 = vector.shape_cast %568 : vector<16x1xi1> to vector<16x1xi1>
    %579 = vector.broadcast %578 : vector<16x1xi1> to vector<16x128xi1>
    %580 = vector.shape_cast %577 : vector<1x128xf32> to vector<1x128xf32>
    %581 = vector.broadcast %580 : vector<1x128xf32> to vector<16x128xf32>
    %582 = vector.broadcast %cst_309 : f32 to vector<16x128xf32>
    %583 = arith.select %579, %581, %582 : vector<16x128xi1>, vector<16x128xf32>
    %584 = vector.extract_strided_slice %559 {offsets = [3, 0], sizes = [1, 128], strides = [1, 1]} : vector<9x256xf32> to vector<1x128xf32>
    %cst_310 = arith.constant 0.000000e+00 : f32
    %585 = vector.shape_cast %566 : vector<16x1xi1> to vector<16x1xi1>
    %586 = vector.broadcast %585 : vector<16x1xi1> to vector<16x128xi1>
    %587 = vector.shape_cast %584 : vector<1x128xf32> to vector<1x128xf32>
    %588 = vector.broadcast %587 : vector<1x128xf32> to vector<16x128xf32>
    %589 = vector.broadcast %cst_310 : f32 to vector<16x128xf32>
    %590 = arith.select %586, %588, %589 : vector<16x128xi1>, vector<16x128xf32>
    %591 = vector.extract_strided_slice %559 {offsets = [4, 0], sizes = [1, 128], strides = [1, 1]} : vector<9x256xf32> to vector<1x128xf32>
    %592 = vector.extract_strided_slice %559 {offsets = [5, 0], sizes = [1, 128], strides = [1, 1]} : vector<9x256xf32> to vector<1x128xf32>
    %cst_311 = arith.constant 0.000000e+00 : f32
    %593 = vector.shape_cast %568 : vector<16x1xi1> to vector<16x1xi1>
    %594 = vector.broadcast %593 : vector<16x1xi1> to vector<16x128xi1>
    %595 = vector.shape_cast %592 : vector<1x128xf32> to vector<1x128xf32>
    %596 = vector.broadcast %595 : vector<1x128xf32> to vector<16x128xf32>
    %597 = vector.broadcast %cst_311 : f32 to vector<16x128xf32>
    %598 = arith.select %594, %596, %597 : vector<16x128xi1>, vector<16x128xf32>
    %599 = vector.extract_strided_slice %559 {offsets = [6, 0], sizes = [1, 128], strides = [1, 1]} : vector<9x256xf32> to vector<1x128xf32>
    %cst_312 = arith.constant 0.000000e+00 : f32
    %600 = vector.shape_cast %566 : vector<16x1xi1> to vector<16x1xi1>
    %601 = vector.broadcast %600 : vector<16x1xi1> to vector<16x128xi1>
    %602 = vector.shape_cast %599 : vector<1x128xf32> to vector<1x128xf32>
    %603 = vector.broadcast %602 : vector<1x128xf32> to vector<16x128xf32>
    %604 = vector.broadcast %cst_312 : f32 to vector<16x128xf32>
    %605 = arith.select %601, %603, %604 : vector<16x128xi1>, vector<16x128xf32>
    %606 = vector.extract_strided_slice %559 {offsets = [7, 0], sizes = [1, 128], strides = [1, 1]} : vector<9x256xf32> to vector<1x128xf32>
    %607 = vector.extract_strided_slice %559 {offsets = [8, 0], sizes = [1, 128], strides = [1, 1]} : vector<9x256xf32> to vector<1x128xf32>
    %cst_313 = arith.constant 0.000000e+00 : f32
    %608 = vector.shape_cast %568 : vector<16x1xi1> to vector<16x1xi1>
    %609 = vector.broadcast %608 : vector<16x1xi1> to vector<16x128xi1>
    %610 = vector.shape_cast %607 : vector<1x128xf32> to vector<1x128xf32>
    %611 = vector.broadcast %610 : vector<1x128xf32> to vector<16x128xf32>
    %612 = vector.broadcast %cst_313 : f32 to vector<16x128xf32>
    %613 = arith.select %609, %611, %612 : vector<16x128xi1>, vector<16x128xf32>
    %614 = vector.extract_strided_slice %557 {offsets = [0, 0], sizes = [16, 128], strides = [1, 1]} : vector<32x128xf32> to vector<16x128xf32>
    %c0_314 = arith.constant 0 : index
    %c5_315 = arith.constant 5 : index
    %c0_316 = arith.constant 0 : index
    %615 = vector.load %arg12[%c0_314, %c5_315, %c0_316] : memref<2x26x128xf32, #tpu.memory_space<vmem>>, vector<1x16x128xf32>
    %616 = vector.shape_cast %615 : vector<1x16x128xf32> to vector<16x128xf32>
    %617 = vector.shape_cast %614 : vector<16x128xf32> to vector<1x16x128xf32>
    tpu.vector_store %arg12[%c0_314, %c5_315, %c0_316], %617 {strides = array<i32>} : memref<2x26x128xf32, #tpu.memory_space<vmem>>, vector<1x16x128xf32>,
    %cst_317 = arith.constant 0.000000e+00 : f32
    %618 = vector.broadcast %cst_317 : f32 to vector<16x128xf32>
    %c0_318 = arith.constant 0 : index
    %c0_319 = arith.constant 0 : index
    %c0_320 = arith.constant 0 : index
    %619 = vector.load %arg12[%c0_318, %c0_319, %c0_320] : memref<2x26x128xf32, #tpu.memory_space<vmem>>, vector<1x16x128xf32>
    %620 = vector.shape_cast %619 : vector<1x16x128xf32> to vector<16x128xf32>
    %621 = arith.mulf %620, %575 : vector<16x128xf32>
    %622 = arith.addf %618, %621 : vector<16x128xf32>
    %c0_321 = arith.constant 0 : index
    %c1_322 = arith.constant 1 : index
    %c0_323 = arith.constant 0 : index
    %623 = vector.load %arg12[%c0_321, %c1_322, %c0_323] : memref<2x26x128xf32, #tpu.memory_space<vmem>>, vector<1x16x128xf32>
    %624 = vector.shape_cast %623 : vector<1x16x128xf32> to vector<16x128xf32>
    %625 = vector.broadcast %576 : vector<1x128xf32> to vector<16x128xf32>
    %626 = arith.mulf %624, %625 : vector<16x128xf32>
    %627 = arith.addf %622, %626 : vector<16x128xf32>
    %c0_324 = arith.constant 0 : index
    %c2_325 = arith.constant 2 : index
    %c0_326 = arith.constant 0 : index
    %628 = vector.load %arg12[%c0_324, %c2_325, %c0_326] : memref<2x26x128xf32, #tpu.memory_space<vmem>>, vector<1x16x128xf32>
    %629 = vector.shape_cast %628 : vector<1x16x128xf32> to vector<16x128xf32>
    %630 = arith.mulf %629, %583 : vector<16x128xf32>
    %631 = arith.addf %627, %630 : vector<16x128xf32>
    %c0_327 = arith.constant 0 : index
    %c4_328 = arith.constant 4 : index
    %c0_329 = arith.constant 0 : index
    %632 = vector.load %arg12[%c0_327, %c4_328, %c0_329] : memref<2x26x128xf32, #tpu.memory_space<vmem>>, vector<1x16x128xf32>
    %633 = vector.shape_cast %632 : vector<1x16x128xf32> to vector<16x128xf32>
    %634 = arith.mulf %633, %590 : vector<16x128xf32>
    %635 = arith.addf %631, %634 : vector<16x128xf32>
    %c0_330 = arith.constant 0 : index
    %c5_331 = arith.constant 5 : index
    %c0_332 = arith.constant 0 : index
    %636 = vector.load %arg12[%c0_330, %c5_331, %c0_332] : memref<2x26x128xf32, #tpu.memory_space<vmem>>, vector<1x16x128xf32>
    %637 = vector.shape_cast %636 : vector<1x16x128xf32> to vector<16x128xf32>
    %638 = vector.broadcast %591 : vector<1x128xf32> to vector<16x128xf32>
    %639 = arith.mulf %637, %638 : vector<16x128xf32>
    %640 = arith.addf %635, %639 : vector<16x128xf32>
    %c0_333 = arith.constant 0 : index
    %c6_334 = arith.constant 6 : index
    %c0_335 = arith.constant 0 : index
    %641 = vector.load %arg12[%c0_333, %c6_334, %c0_335] : memref<2x26x128xf32, #tpu.memory_space<vmem>>, vector<1x16x128xf32>
    %642 = vector.shape_cast %641 : vector<1x16x128xf32> to vector<16x128xf32>
    %643 = arith.mulf %642, %598 : vector<16x128xf32>
    %644 = arith.addf %640, %643 : vector<16x128xf32>
    %c0_336 = arith.constant 0 : index
    %c8_337 = arith.constant 8 : index
    %c0_338 = arith.constant 0 : index
    %645 = vector.load %arg12[%c0_336, %c8_337, %c0_338] : memref<2x26x128xf32, #tpu.memory_space<vmem>>, vector<1x16x128xf32>
    %646 = vector.shape_cast %645 : vector<1x16x128xf32> to vector<16x128xf32>
    %647 = arith.mulf %646, %605 : vector<16x128xf32>
    %648 = arith.addf %644, %647 : vector<16x128xf32>
    %c0_339 = arith.constant 0 : index
    %c9_340 = arith.constant 9 : index
    %c0_341 = arith.constant 0 : index
    %649 = vector.load %arg12[%c0_339, %c9_340, %c0_341] : memref<2x26x128xf32, #tpu.memory_space<vmem>>, vector<1x16x128xf32>
    %650 = vector.shape_cast %649 : vector<1x16x128xf32> to vector<16x128xf32>
    %651 = vector.broadcast %606 : vector<1x128xf32> to vector<16x128xf32>
    %652 = arith.mulf %650, %651 : vector<16x128xf32>
    %653 = arith.addf %648, %652 : vector<16x128xf32>
    %c0_342 = arith.constant 0 : index
    %c10_343 = arith.constant 10 : index
    %c0_344 = arith.constant 0 : index
    %654 = vector.load %arg12[%c0_342, %c10_343, %c0_344] : memref<2x26x128xf32, #tpu.memory_space<vmem>>, vector<1x16x128xf32>
    %655 = vector.shape_cast %654 : vector<1x16x128xf32> to vector<16x128xf32>
    %656 = arith.mulf %655, %613 : vector<16x128xf32>
    %657 = arith.addf %653, %656 : vector<16x128xf32>
    %658 = vector.broadcast %560 : vector<1x128xf32> to vector<16x128xf32>
    %659 = arith.mulf %657, %658 : vector<16x128xf32>
    %660 = vector.broadcast %561 : vector<1x128xf32> to vector<16x128xf32>
    %661 = arith.addf %659, %660 : vector<16x128xf32>
    %cst_345 = arith.constant 0.000000e+00 : f32
    %cst_346 = arith.constant 6.000000e+00 : f32
    %662 = vector.broadcast %cst_345 : f32 to vector<16x128xf32>
    %663 = arith.maximumf %662, %661 : vector<16x128xf32>
    %664 = vector.broadcast %cst_346 : f32 to vector<16x128xf32>
    %665 = arith.minimumf %664, %663 : vector<16x128xf32>
    %666 = arith.truncf %665 : vector<16x128xf32> to vector<16x128xbf16>
    %c0_347 = arith.constant 0 : index
    %c0_348 = arith.constant 0 : index
    %667 = vector.load %arg7[%c0_347, %c0_348] : memref<4x16xbf16, #tpu.memory_space<vmem>>, vector<4x16xbf16>
    %cst_349 = arith.constant dense<0.000000e+00> : vector<4x128xf32>
    %668 = tpu.matmul %667, %666, %cst_349 {dimension_numbers = #tpu.dot_dimension_numbers<[1], [0], [0], [1], [0, 0, 1, 1], [], []>} : vector<4x16xbf16>, vector<16x128xbf16>, vector<4x128xf32> -> vector<4x128xf32>
    %669 = arith.truncf %668 : vector<4x128xf32> to vector<4x128xbf16>
    %c0_350 = arith.constant 0 : index
    %c0_351 = arith.constant 0 : index
    %670 = vector.load %arg17[%c0_350, %c0_351] : memref<8x128xbf16, #tpu.memory_space<vmem>>, vector<4x128xbf16>
    tpu.vector_store %arg17[%c0_350, %c0_351], %669 {strides = array<i32>} : memref<8x128xbf16, #tpu.memory_space<vmem>>, vector<4x128xbf16>,
    %671 = vector.extract_strided_slice %557 {offsets = [16, 0], sizes = [16, 128], strides = [1, 1]} : vector<32x128xf32> to vector<16x128xf32>
    %c1_352 = arith.constant 1 : index
    %c5_353 = arith.constant 5 : index
    %c0_354 = arith.constant 0 : index
    %672 = vector.load %arg12[%c1_352, %c5_353, %c0_354] : memref<2x26x128xf32, #tpu.memory_space<vmem>>, vector<1x16x128xf32>
    %673 = vector.shape_cast %672 : vector<1x16x128xf32> to vector<16x128xf32>
    %674 = vector.shape_cast %671 : vector<16x128xf32> to vector<1x16x128xf32>
    tpu.vector_store %arg12[%c1_352, %c5_353, %c0_354], %674 {strides = array<i32>} : memref<2x26x128xf32, #tpu.memory_space<vmem>>, vector<1x16x128xf32>,
    %cst_355 = arith.constant 0.000000e+00 : f32
    %675 = vector.broadcast %cst_355 : f32 to vector<16x128xf32>
    %c1_356 = arith.constant 1 : index
    %c0_357 = arith.constant 0 : index
    %c0_358 = arith.constant 0 : index
    %676 = vector.load %arg12[%c1_356, %c0_357, %c0_358] : memref<2x26x128xf32, #tpu.memory_space<vmem>>, vector<1x16x128xf32>
    %677 = vector.shape_cast %676 : vector<1x16x128xf32> to vector<16x128xf32>
    %678 = arith.mulf %677, %575 : vector<16x128xf32>
    %679 = arith.addf %675, %678 : vector<16x128xf32>
    %c1_359 = arith.constant 1 : index
    %c1_360 = arith.constant 1 : index
    %c0_361 = arith.constant 0 : index
    %680 = vector.load %arg12[%c1_359, %c1_360, %c0_361] : memref<2x26x128xf32, #tpu.memory_space<vmem>>, vector<1x16x128xf32>
    %681 = vector.shape_cast %680 : vector<1x16x128xf32> to vector<16x128xf32>
    %682 = vector.broadcast %576 : vector<1x128xf32> to vector<16x128xf32>
    %683 = arith.mulf %681, %682 : vector<16x128xf32>
    %684 = arith.addf %679, %683 : vector<16x128xf32>
    %c1_362 = arith.constant 1 : index
    %c2_363 = arith.constant 2 : index
    %c0_364 = arith.constant 0 : index
    %685 = vector.load %arg12[%c1_362, %c2_363, %c0_364] : memref<2x26x128xf32, #tpu.memory_space<vmem>>, vector<1x16x128xf32>
    %686 = vector.shape_cast %685 : vector<1x16x128xf32> to vector<16x128xf32>
    %687 = arith.mulf %686, %583 : vector<16x128xf32>
    %688 = arith.addf %684, %687 : vector<16x128xf32>
    %c1_365 = arith.constant 1 : index
    %c4_366 = arith.constant 4 : index
    %c0_367 = arith.constant 0 : index
    %689 = vector.load %arg12[%c1_365, %c4_366, %c0_367] : memref<2x26x128xf32, #tpu.memory_space<vmem>>, vector<1x16x128xf32>
    %690 = vector.shape_cast %689 : vector<1x16x128xf32> to vector<16x128xf32>
    %691 = arith.mulf %690, %590 : vector<16x128xf32>
    %692 = arith.addf %688, %691 : vector<16x128xf32>
    %c1_368 = arith.constant 1 : index
    %c5_369 = arith.constant 5 : index
    %c0_370 = arith.constant 0 : index
    %693 = vector.load %arg12[%c1_368, %c5_369, %c0_370] : memref<2x26x128xf32, #tpu.memory_space<vmem>>, vector<1x16x128xf32>
    %694 = vector.shape_cast %693 : vector<1x16x128xf32> to vector<16x128xf32>
    %695 = vector.broadcast %591 : vector<1x128xf32> to vector<16x128xf32>
    %696 = arith.mulf %694, %695 : vector<16x128xf32>
    %697 = arith.addf %692, %696 : vector<16x128xf32>
    %c1_371 = arith.constant 1 : index
    %c6_372 = arith.constant 6 : index
    %c0_373 = arith.constant 0 : index
    %698 = vector.load %arg12[%c1_371, %c6_372, %c0_373] : memref<2x26x128xf32, #tpu.memory_space<vmem>>, vector<1x16x128xf32>
    %699 = vector.shape_cast %698 : vector<1x16x128xf32> to vector<16x128xf32>
    %700 = arith.mulf %699, %598 : vector<16x128xf32>
    %701 = arith.addf %697, %700 : vector<16x128xf32>
    %c1_374 = arith.constant 1 : index
    %c8_375 = arith.constant 8 : index
    %c0_376 = arith.constant 0 : index
    %702 = vector.load %arg12[%c1_374, %c8_375, %c0_376] : memref<2x26x128xf32, #tpu.memory_space<vmem>>, vector<1x16x128xf32>
    %703 = vector.shape_cast %702 : vector<1x16x128xf32> to vector<16x128xf32>
    %704 = arith.mulf %703, %605 : vector<16x128xf32>
    %705 = arith.addf %701, %704 : vector<16x128xf32>
    %c1_377 = arith.constant 1 : index
    %c9_378 = arith.constant 9 : index
    %c0_379 = arith.constant 0 : index
    %706 = vector.load %arg12[%c1_377, %c9_378, %c0_379] : memref<2x26x128xf32, #tpu.memory_space<vmem>>, vector<1x16x128xf32>
    %707 = vector.shape_cast %706 : vector<1x16x128xf32> to vector<16x128xf32>
    %708 = vector.broadcast %606 : vector<1x128xf32> to vector<16x128xf32>
    %709 = arith.mulf %707, %708 : vector<16x128xf32>
    %710 = arith.addf %705, %709 : vector<16x128xf32>
    %c1_380 = arith.constant 1 : index
    %c10_381 = arith.constant 10 : index
    %c0_382 = arith.constant 0 : index
    %711 = vector.load %arg12[%c1_380, %c10_381, %c0_382] : memref<2x26x128xf32, #tpu.memory_space<vmem>>, vector<1x16x128xf32>
    %712 = vector.shape_cast %711 : vector<1x16x128xf32> to vector<16x128xf32>
    %713 = arith.mulf %712, %613 : vector<16x128xf32>
    %714 = arith.addf %710, %713 : vector<16x128xf32>
    %715 = vector.broadcast %560 : vector<1x128xf32> to vector<16x128xf32>
    %716 = arith.mulf %714, %715 : vector<16x128xf32>
    %717 = vector.broadcast %561 : vector<1x128xf32> to vector<16x128xf32>
    %718 = arith.addf %716, %717 : vector<16x128xf32>
    %cst_383 = arith.constant 0.000000e+00 : f32
    %cst_384 = arith.constant 6.000000e+00 : f32
    %719 = vector.broadcast %cst_383 : f32 to vector<16x128xf32>
    %720 = arith.maximumf %719, %718 : vector<16x128xf32>
    %721 = vector.broadcast %cst_384 : f32 to vector<16x128xf32>
    %722 = arith.minimumf %721, %720 : vector<16x128xf32>
    %723 = arith.truncf %722 : vector<16x128xf32> to vector<16x128xbf16>
    %c0_385 = arith.constant 0 : index
    %c0_386 = arith.constant 0 : index
    %724 = vector.load %arg7[%c0_385, %c0_386] : memref<4x16xbf16, #tpu.memory_space<vmem>>, vector<4x16xbf16>
    %cst_387 = arith.constant dense<0.000000e+00> : vector<4x128xf32>
    %725 = tpu.matmul %724, %723, %cst_387 {dimension_numbers = #tpu.dot_dimension_numbers<[1], [0], [0], [1], [0, 0, 1, 1], [], []>} : vector<4x16xbf16>, vector<16x128xbf16>, vector<4x128xf32> -> vector<4x128xf32>
    %726 = arith.truncf %725 : vector<4x128xf32> to vector<4x128xbf16>
    %c4_388 = arith.constant 4 : index
    %c0_389 = arith.constant 0 : index
    %727 = vector.load %arg17[%c4_388, %c0_389] : memref<8x128xbf16, #tpu.memory_space<vmem>>, vector<4x128xbf16>
    tpu.vector_store %arg17[%c4_388, %c0_389], %726 {strides = array<i32>} : memref<8x128xbf16, #tpu.memory_space<vmem>>, vector<4x128xbf16>,
    %c224 = arith.constant 224 : index
    %c0_390 = arith.constant 0 : index
    %728 = vector.load %arg5[%c224, %c0_390] : memref<1120x256xbf16, #tpu.memory_space<vmem>>, vector<128x256xbf16>
    %c0_391 = arith.constant 0 : index
    %c0_392 = arith.constant 0 : index
    %729 = vector.load %arg17[%c0_391, %c0_392] : memref<8x128xbf16, #tpu.memory_space<vmem>>, vector<8x128xbf16>
    %cst_393 = arith.constant dense<0.000000e+00> : vector<8x256xf32>
    %730 = tpu.matmul %729, %728, %cst_393 {dimension_numbers = #tpu.dot_dimension_numbers<[1], [0], [0], [1], [0, 0, 1, 1], [], []>} : vector<8x128xbf16>, vector<128x256xbf16>, vector<8x256xf32> -> vector<8x256xf32>
    %c16_394 = arith.constant 16 : index
    %c0_395 = arith.constant 0 : index
    %731 = vector.load %arg3[%c16_394, %c0_395] : memref<32x256xf32, #tpu.memory_space<vmem>>, vector<1x256xf32>
    %732 = vector.broadcast %731 : vector<1x256xf32> to vector<8x256xf32>
    %733 = arith.mulf %730, %732 : vector<8x256xf32>
    %c17_396 = arith.constant 17 : index
    %c0_397 = arith.constant 0 : index
    %734 = vector.load %arg3[%c17_396, %c0_397] : memref<32x256xf32, #tpu.memory_space<vmem>>, vector<1x256xf32>
    %735 = vector.broadcast %734 : vector<1x256xf32> to vector<8x256xf32>
    %736 = arith.addf %733, %735 : vector<8x256xf32>
    %cst_398 = arith.constant 0.000000e+00 : f32
    %cst_399 = arith.constant 6.000000e+00 : f32
    %737 = vector.broadcast %cst_398 : f32 to vector<8x256xf32>
    %738 = arith.maximumf %737, %736 : vector<8x256xf32>
    %739 = vector.broadcast %cst_399 : f32 to vector<8x256xf32>
    %740 = arith.minimumf %739, %738 : vector<8x256xf32>
    %c4_400 = arith.constant 4 : index
    %c0_401 = arith.constant 0 : index
    %c0_402 = arith.constant 0 : index
    %741 = vector.load %arg4[%c4_400, %c0_401, %c0_402] : memref<7x9x256xf32, #tpu.memory_space<vmem>>, vector<1x9x256xf32>
    %742 = vector.shape_cast %741 : vector<1x9x256xf32> to vector<9x256xf32>
    %c18_403 = arith.constant 18 : index
    %c0_404 = arith.constant 0 : index
    %743 = vector.load %arg3[%c18_403, %c0_404] : memref<32x256xf32, #tpu.memory_space<vmem>>, vector<1x256xf32>
    %c19 = arith.constant 19 : index
    %c0_405 = arith.constant 0 : index
    %744 = vector.load %arg3[%c19, %c0_405] : memref<32x256xf32, #tpu.memory_space<vmem>>, vector<1x256xf32>
    %745 = tpu.iota {dimensions = array<i32: 0>} : vector<4x1xi32>
    %c1_i32 = arith.constant 1 : i32
    %746 = vector.broadcast %c1_i32 : i32 to vector<4x1xi32>
    %747 = arith.andi %745, %746 : vector<4x1xi32>
    %c0_i32_406 = arith.constant 0 : i32
    %748 = vector.broadcast %c0_i32_406 : i32 to vector<4x1xi32>
    %749 = arith.cmpi ne, %747, %748 : vector<4x1xi32>
    %c1_i32_407 = arith.constant 1 : i32
    %750 = vector.broadcast %c1_i32_407 : i32 to vector<4x1xi32>
    %751 = arith.cmpi ne, %747, %750 : vector<4x1xi32>
    %752 = vector.extract_strided_slice %742 {offsets = [0, 0], sizes = [1, 256], strides = [1, 1]} : vector<9x256xf32> to vector<1x256xf32>
    %cst_408 = arith.constant 0.000000e+00 : f32
    %753 = vector.shape_cast %749 : vector<4x1xi1> to vector<4x1xi1>
    %754 = vector.broadcast %753 : vector<4x1xi1> to vector<4x256xi1>
    %755 = vector.shape_cast %752 : vector<1x256xf32> to vector<1x256xf32>
    %756 = vector.broadcast %755 : vector<1x256xf32> to vector<4x256xf32>
    %757 = vector.broadcast %cst_408 : f32 to vector<4x256xf32>
    %758 = arith.select %754, %756, %757 : vector<4x256xi1>, vector<4x256xf32>
    %759 = vector.extract_strided_slice %742 {offsets = [1, 0], sizes = [1, 256], strides = [1, 1]} : vector<9x256xf32> to vector<1x256xf32>
    %760 = vector.extract_strided_slice %742 {offsets = [2, 0], sizes = [1, 256], strides = [1, 1]} : vector<9x256xf32> to vector<1x256xf32>
    %cst_409 = arith.constant 0.000000e+00 : f32
    %761 = vector.shape_cast %751 : vector<4x1xi1> to vector<4x1xi1>
    %762 = vector.broadcast %761 : vector<4x1xi1> to vector<4x256xi1>
    %763 = vector.shape_cast %760 : vector<1x256xf32> to vector<1x256xf32>
    %764 = vector.broadcast %763 : vector<1x256xf32> to vector<4x256xf32>
    %765 = vector.broadcast %cst_409 : f32 to vector<4x256xf32>
    %766 = arith.select %762, %764, %765 : vector<4x256xi1>, vector<4x256xf32>
    %767 = vector.extract_strided_slice %742 {offsets = [3, 0], sizes = [1, 256], strides = [1, 1]} : vector<9x256xf32> to vector<1x256xf32>
    %cst_410 = arith.constant 0.000000e+00 : f32
    %768 = vector.shape_cast %749 : vector<4x1xi1> to vector<4x1xi1>
    %769 = vector.broadcast %768 : vector<4x1xi1> to vector<4x256xi1>
    %770 = vector.shape_cast %767 : vector<1x256xf32> to vector<1x256xf32>
    %771 = vector.broadcast %770 : vector<1x256xf32> to vector<4x256xf32>
    %772 = vector.broadcast %cst_410 : f32 to vector<4x256xf32>
    %773 = arith.select %769, %771, %772 : vector<4x256xi1>, vector<4x256xf32>
    %774 = vector.extract_strided_slice %742 {offsets = [4, 0], sizes = [1, 256], strides = [1, 1]} : vector<9x256xf32> to vector<1x256xf32>
    %775 = vector.extract_strided_slice %742 {offsets = [5, 0], sizes = [1, 256], strides = [1, 1]} : vector<9x256xf32> to vector<1x256xf32>
    %cst_411 = arith.constant 0.000000e+00 : f32
    %776 = vector.shape_cast %751 : vector<4x1xi1> to vector<4x1xi1>
    %777 = vector.broadcast %776 : vector<4x1xi1> to vector<4x256xi1>
    %778 = vector.shape_cast %775 : vector<1x256xf32> to vector<1x256xf32>
    %779 = vector.broadcast %778 : vector<1x256xf32> to vector<4x256xf32>
    %780 = vector.broadcast %cst_411 : f32 to vector<4x256xf32>
    %781 = arith.select %777, %779, %780 : vector<4x256xi1>, vector<4x256xf32>
    %782 = vector.extract_strided_slice %742 {offsets = [6, 0], sizes = [1, 256], strides = [1, 1]} : vector<9x256xf32> to vector<1x256xf32>
    %cst_412 = arith.constant 0.000000e+00 : f32
    %783 = vector.shape_cast %749 : vector<4x1xi1> to vector<4x1xi1>
    %784 = vector.broadcast %783 : vector<4x1xi1> to vector<4x256xi1>
    %785 = vector.shape_cast %782 : vector<1x256xf32> to vector<1x256xf32>
    %786 = vector.broadcast %785 : vector<1x256xf32> to vector<4x256xf32>
    %787 = vector.broadcast %cst_412 : f32 to vector<4x256xf32>
    %788 = arith.select %784, %786, %787 : vector<4x256xi1>, vector<4x256xf32>
    %789 = vector.extract_strided_slice %742 {offsets = [7, 0], sizes = [1, 256], strides = [1, 1]} : vector<9x256xf32> to vector<1x256xf32>
    %790 = vector.extract_strided_slice %742 {offsets = [8, 0], sizes = [1, 256], strides = [1, 1]} : vector<9x256xf32> to vector<1x256xf32>
    %cst_413 = arith.constant 0.000000e+00 : f32
    %791 = vector.shape_cast %751 : vector<4x1xi1> to vector<4x1xi1>
    %792 = vector.broadcast %791 : vector<4x1xi1> to vector<4x256xi1>
    %793 = vector.shape_cast %790 : vector<1x256xf32> to vector<1x256xf32>
    %794 = vector.broadcast %793 : vector<1x256xf32> to vector<4x256xf32>
    %795 = vector.broadcast %cst_413 : f32 to vector<4x256xf32>
    %796 = arith.select %792, %794, %795 : vector<4x256xi1>, vector<4x256xf32>
    %797 = vector.extract_strided_slice %740 {offsets = [0, 0], sizes = [4, 256], strides = [1, 1]} : vector<8x256xf32> to vector<4x256xf32>
    %c0_414 = arith.constant 0 : index
    %c3_415 = arith.constant 3 : index
    %c0_416 = arith.constant 0 : index
    %798 = vector.load %arg13[%c0_414, %c3_415, %c0_416] : memref<2x10x256xf32, #tpu.memory_space<vmem>>, vector<1x4x256xf32>
    %799 = vector.shape_cast %798 : vector<1x4x256xf32> to vector<4x256xf32>
    %800 = vector.shape_cast %797 : vector<4x256xf32> to vector<1x4x256xf32>
    tpu.vector_store %arg13[%c0_414, %c3_415, %c0_416], %800 {strides = array<i32>} : memref<2x10x256xf32, #tpu.memory_space<vmem>>, vector<1x4x256xf32>,
    %cst_417 = arith.constant 0.000000e+00 : f32
    %801 = vector.broadcast %cst_417 : f32 to vector<4x256xf32>
    %c0_418 = arith.constant 0 : index
    %c0_419 = arith.constant 0 : index
    %c0_420 = arith.constant 0 : index
    %802 = vector.load %arg13[%c0_418, %c0_419, %c0_420] : memref<2x10x256xf32, #tpu.memory_space<vmem>>, vector<1x4x256xf32>
    %803 = vector.shape_cast %802 : vector<1x4x256xf32> to vector<4x256xf32>
    %804 = arith.mulf %803, %758 : vector<4x256xf32>
    %805 = arith.addf %801, %804 : vector<4x256xf32>
    %c0_421 = arith.constant 0 : index
    %c1_422 = arith.constant 1 : index
    %c0_423 = arith.constant 0 : index
    %806 = vector.load %arg13[%c0_421, %c1_422, %c0_423] : memref<2x10x256xf32, #tpu.memory_space<vmem>>, vector<1x4x256xf32>
    %807 = vector.shape_cast %806 : vector<1x4x256xf32> to vector<4x256xf32>
    %808 = vector.broadcast %759 : vector<1x256xf32> to vector<4x256xf32>
    %809 = arith.mulf %807, %808 : vector<4x256xf32>
    %810 = arith.addf %805, %809 : vector<4x256xf32>
    %c0_424 = arith.constant 0 : index
    %c2_425 = arith.constant 2 : index
    %c0_426 = arith.constant 0 : index
    %811 = vector.load %arg13[%c0_424, %c2_425, %c0_426] : memref<2x10x256xf32, #tpu.memory_space<vmem>>, vector<1x4x256xf32>
    %812 = vector.shape_cast %811 : vector<1x4x256xf32> to vector<4x256xf32>
    %813 = arith.mulf %812, %766 : vector<4x256xf32>
    %814 = arith.addf %810, %813 : vector<4x256xf32>
    %c0_427 = arith.constant 0 : index
    %c2_428 = arith.constant 2 : index
    %c0_429 = arith.constant 0 : index
    %815 = vector.load %arg13[%c0_427, %c2_428, %c0_429] : memref<2x10x256xf32, #tpu.memory_space<vmem>>, vector<1x4x256xf32>
    %816 = vector.shape_cast %815 : vector<1x4x256xf32> to vector<4x256xf32>
    %817 = arith.mulf %816, %773 : vector<4x256xf32>
    %818 = arith.addf %814, %817 : vector<4x256xf32>
    %c0_430 = arith.constant 0 : index
    %c3_431 = arith.constant 3 : index
    %c0_432 = arith.constant 0 : index
    %819 = vector.load %arg13[%c0_430, %c3_431, %c0_432] : memref<2x10x256xf32, #tpu.memory_space<vmem>>, vector<1x4x256xf32>
    %820 = vector.shape_cast %819 : vector<1x4x256xf32> to vector<4x256xf32>
    %821 = vector.broadcast %774 : vector<1x256xf32> to vector<4x256xf32>
    %822 = arith.mulf %820, %821 : vector<4x256xf32>
    %823 = arith.addf %818, %822 : vector<4x256xf32>
    %c0_433 = arith.constant 0 : index
    %c4_434 = arith.constant 4 : index
    %c0_435 = arith.constant 0 : index
    %824 = vector.load %arg13[%c0_433, %c4_434, %c0_435] : memref<2x10x256xf32, #tpu.memory_space<vmem>>, vector<1x4x256xf32>
    %825 = vector.shape_cast %824 : vector<1x4x256xf32> to vector<4x256xf32>
    %826 = arith.mulf %825, %781 : vector<4x256xf32>
    %827 = arith.addf %823, %826 : vector<4x256xf32>
    %c0_436 = arith.constant 0 : index
    %c4_437 = arith.constant 4 : index
    %c0_438 = arith.constant 0 : index
    %828 = vector.load %arg13[%c0_436, %c4_437, %c0_438] : memref<2x10x256xf32, #tpu.memory_space<vmem>>, vector<1x4x256xf32>
    %829 = vector.shape_cast %828 : vector<1x4x256xf32> to vector<4x256xf32>
    %830 = arith.mulf %829, %788 : vector<4x256xf32>
    %831 = arith.addf %827, %830 : vector<4x256xf32>
    %c0_439 = arith.constant 0 : index
    %c5_440 = arith.constant 5 : index
    %c0_441 = arith.constant 0 : index
    %832 = vector.load %arg13[%c0_439, %c5_440, %c0_441] : memref<2x10x256xf32, #tpu.memory_space<vmem>>, vector<1x4x256xf32>
    %833 = vector.shape_cast %832 : vector<1x4x256xf32> to vector<4x256xf32>
    %834 = vector.broadcast %789 : vector<1x256xf32> to vector<4x256xf32>
    %835 = arith.mulf %833, %834 : vector<4x256xf32>
    %836 = arith.addf %831, %835 : vector<4x256xf32>
    %c0_442 = arith.constant 0 : index
    %c6_443 = arith.constant 6 : index
    %c0_444 = arith.constant 0 : index
    %837 = vector.load %arg13[%c0_442, %c6_443, %c0_444] : memref<2x10x256xf32, #tpu.memory_space<vmem>>, vector<1x4x256xf32>
    %838 = vector.shape_cast %837 : vector<1x4x256xf32> to vector<4x256xf32>
    %839 = arith.mulf %838, %796 : vector<4x256xf32>
    %840 = arith.addf %836, %839 : vector<4x256xf32>
    %841 = vector.broadcast %743 : vector<1x256xf32> to vector<4x256xf32>
    %842 = arith.mulf %840, %841 : vector<4x256xf32>
    %843 = vector.broadcast %744 : vector<1x256xf32> to vector<4x256xf32>
    %844 = arith.addf %842, %843 : vector<4x256xf32>
    %cst_445 = arith.constant 0.000000e+00 : f32
    %cst_446 = arith.constant 6.000000e+00 : f32
    %845 = vector.broadcast %cst_445 : f32 to vector<4x256xf32>
    %846 = arith.maximumf %845, %844 : vector<4x256xf32>
    %847 = vector.broadcast %cst_446 : f32 to vector<4x256xf32>
    %848 = arith.minimumf %847, %846 : vector<4x256xf32>
    %849 = arith.truncf %848 : vector<4x256xf32> to vector<4x256xbf16>
    %c0_447 = arith.constant 0 : index
    %c0_448 = arith.constant 0 : index
    %850 = vector.load %arg18[%c0_447, %c0_448] : memref<8x256xbf16, #tpu.memory_space<vmem>>, vector<4x256xbf16>
    tpu.vector_store %arg18[%c0_447, %c0_448], %849 {strides = array<i32>} : memref<8x256xbf16, #tpu.memory_space<vmem>>, vector<4x256xbf16>,
    %851 = vector.extract_strided_slice %740 {offsets = [4, 0], sizes = [4, 256], strides = [1, 1]} : vector<8x256xf32> to vector<4x256xf32>
    %c1_449 = arith.constant 1 : index
    %c3_450 = arith.constant 3 : index
    %c0_451 = arith.constant 0 : index
    %852 = vector.load %arg13[%c1_449, %c3_450, %c0_451] : memref<2x10x256xf32, #tpu.memory_space<vmem>>, vector<1x4x256xf32>
    %853 = vector.shape_cast %852 : vector<1x4x256xf32> to vector<4x256xf32>
    %854 = vector.shape_cast %851 : vector<4x256xf32> to vector<1x4x256xf32>
    tpu.vector_store %arg13[%c1_449, %c3_450, %c0_451], %854 {strides = array<i32>} : memref<2x10x256xf32, #tpu.memory_space<vmem>>, vector<1x4x256xf32>,
    %cst_452 = arith.constant 0.000000e+00 : f32
    %855 = vector.broadcast %cst_452 : f32 to vector<4x256xf32>
    %c1_453 = arith.constant 1 : index
    %c0_454 = arith.constant 0 : index
    %c0_455 = arith.constant 0 : index
    %856 = vector.load %arg13[%c1_453, %c0_454, %c0_455] : memref<2x10x256xf32, #tpu.memory_space<vmem>>, vector<1x4x256xf32>
    %857 = vector.shape_cast %856 : vector<1x4x256xf32> to vector<4x256xf32>
    %858 = arith.mulf %857, %758 : vector<4x256xf32>
    %859 = arith.addf %855, %858 : vector<4x256xf32>
    %c1_456 = arith.constant 1 : index
    %c1_457 = arith.constant 1 : index
    %c0_458 = arith.constant 0 : index
    %860 = vector.load %arg13[%c1_456, %c1_457, %c0_458] : memref<2x10x256xf32, #tpu.memory_space<vmem>>, vector<1x4x256xf32>
    %861 = vector.shape_cast %860 : vector<1x4x256xf32> to vector<4x256xf32>
    %862 = vector.broadcast %759 : vector<1x256xf32> to vector<4x256xf32>
    %863 = arith.mulf %861, %862 : vector<4x256xf32>
    %864 = arith.addf %859, %863 : vector<4x256xf32>
    %c1_459 = arith.constant 1 : index
    %c2_460 = arith.constant 2 : index
    %c0_461 = arith.constant 0 : index
    %865 = vector.load %arg13[%c1_459, %c2_460, %c0_461] : memref<2x10x256xf32, #tpu.memory_space<vmem>>, vector<1x4x256xf32>
    %866 = vector.shape_cast %865 : vector<1x4x256xf32> to vector<4x256xf32>
    %867 = arith.mulf %866, %766 : vector<4x256xf32>
    %868 = arith.addf %864, %867 : vector<4x256xf32>
    %c1_462 = arith.constant 1 : index
    %c2_463 = arith.constant 2 : index
    %c0_464 = arith.constant 0 : index
    %869 = vector.load %arg13[%c1_462, %c2_463, %c0_464] : memref<2x10x256xf32, #tpu.memory_space<vmem>>, vector<1x4x256xf32>
    %870 = vector.shape_cast %869 : vector<1x4x256xf32> to vector<4x256xf32>
    %871 = arith.mulf %870, %773 : vector<4x256xf32>
    %872 = arith.addf %868, %871 : vector<4x256xf32>
    %c1_465 = arith.constant 1 : index
    %c3_466 = arith.constant 3 : index
    %c0_467 = arith.constant 0 : index
    %873 = vector.load %arg13[%c1_465, %c3_466, %c0_467] : memref<2x10x256xf32, #tpu.memory_space<vmem>>, vector<1x4x256xf32>
    %874 = vector.shape_cast %873 : vector<1x4x256xf32> to vector<4x256xf32>
    %875 = vector.broadcast %774 : vector<1x256xf32> to vector<4x256xf32>
    %876 = arith.mulf %874, %875 : vector<4x256xf32>
    %877 = arith.addf %872, %876 : vector<4x256xf32>
    %c1_468 = arith.constant 1 : index
    %c4_469 = arith.constant 4 : index
    %c0_470 = arith.constant 0 : index
    %878 = vector.load %arg13[%c1_468, %c4_469, %c0_470] : memref<2x10x256xf32, #tpu.memory_space<vmem>>, vector<1x4x256xf32>
    %879 = vector.shape_cast %878 : vector<1x4x256xf32> to vector<4x256xf32>
    %880 = arith.mulf %879, %781 : vector<4x256xf32>
    %881 = arith.addf %877, %880 : vector<4x256xf32>
    %c1_471 = arith.constant 1 : index
    %c4_472 = arith.constant 4 : index
    %c0_473 = arith.constant 0 : index
    %882 = vector.load %arg13[%c1_471, %c4_472, %c0_473] : memref<2x10x256xf32, #tpu.memory_space<vmem>>, vector<1x4x256xf32>
    %883 = vector.shape_cast %882 : vector<1x4x256xf32> to vector<4x256xf32>
    %884 = arith.mulf %883, %788 : vector<4x256xf32>
    %885 = arith.addf %881, %884 : vector<4x256xf32>
    %c1_474 = arith.constant 1 : index
    %c5_475 = arith.constant 5 : index
    %c0_476 = arith.constant 0 : index
    %886 = vector.load %arg13[%c1_474, %c5_475, %c0_476] : memref<2x10x256xf32, #tpu.memory_space<vmem>>, vector<1x4x256xf32>
    %887 = vector.shape_cast %886 : vector<1x4x256xf32> to vector<4x256xf32>
    %888 = vector.broadcast %789 : vector<1x256xf32> to vector<4x256xf32>
    %889 = arith.mulf %887, %888 : vector<4x256xf32>
    %890 = arith.addf %885, %889 : vector<4x256xf32>
    %c1_477 = arith.constant 1 : index
    %c6_478 = arith.constant 6 : index
    %c0_479 = arith.constant 0 : index
    %891 = vector.load %arg13[%c1_477, %c6_478, %c0_479] : memref<2x10x256xf32, #tpu.memory_space<vmem>>, vector<1x4x256xf32>
    %892 = vector.shape_cast %891 : vector<1x4x256xf32> to vector<4x256xf32>
    %893 = arith.mulf %892, %796 : vector<4x256xf32>
    %894 = arith.addf %890, %893 : vector<4x256xf32>
    %895 = vector.broadcast %743 : vector<1x256xf32> to vector<4x256xf32>
    %896 = arith.mulf %894, %895 : vector<4x256xf32>
    %897 = vector.broadcast %744 : vector<1x256xf32> to vector<4x256xf32>
    %898 = arith.addf %896, %897 : vector<4x256xf32>
    %cst_480 = arith.constant 0.000000e+00 : f32
    %cst_481 = arith.constant 6.000000e+00 : f32
    %899 = vector.broadcast %cst_480 : f32 to vector<4x256xf32>
    %900 = arith.maximumf %899, %898 : vector<4x256xf32>
    %901 = vector.broadcast %cst_481 : f32 to vector<4x256xf32>
    %902 = arith.minimumf %901, %900 : vector<4x256xf32>
    %903 = arith.truncf %902 : vector<4x256xf32> to vector<4x256xbf16>
    %c4_482 = arith.constant 4 : index
    %c0_483 = arith.constant 0 : index
    %904 = vector.load %arg18[%c4_482, %c0_483] : memref<8x256xbf16, #tpu.memory_space<vmem>>, vector<4x256xbf16>
    tpu.vector_store %arg18[%c4_482, %c0_483], %903 {strides = array<i32>} : memref<8x256xbf16, #tpu.memory_space<vmem>>, vector<4x256xbf16>,
    %c352 = arith.constant 352 : index
    %c0_484 = arith.constant 0 : index
    %905 = vector.load %arg5[%c352, %c0_484] : memref<1120x256xbf16, #tpu.memory_space<vmem>>, vector<256x256xbf16>
    %c0_485 = arith.constant 0 : index
    %c0_486 = arith.constant 0 : index
    %906 = vector.load %arg18[%c0_485, %c0_486] : memref<8x256xbf16, #tpu.memory_space<vmem>>, vector<8x256xbf16>
    %cst_487 = arith.constant dense<0.000000e+00> : vector<8x256xf32>
    %907 = tpu.matmul %906, %905, %cst_487 {dimension_numbers = #tpu.dot_dimension_numbers<[1], [0], [0], [1], [0, 0, 1, 1], [], []>} : vector<8x256xbf16>, vector<256x256xbf16>, vector<8x256xf32> -> vector<8x256xf32>
    %c20 = arith.constant 20 : index
    %c0_488 = arith.constant 0 : index
    %908 = vector.load %arg3[%c20, %c0_488] : memref<32x256xf32, #tpu.memory_space<vmem>>, vector<1x256xf32>
    %909 = vector.broadcast %908 : vector<1x256xf32> to vector<8x256xf32>
    %910 = arith.mulf %907, %909 : vector<8x256xf32>
    %c21 = arith.constant 21 : index
    %c0_489 = arith.constant 0 : index
    %911 = vector.load %arg3[%c21, %c0_489] : memref<32x256xf32, #tpu.memory_space<vmem>>, vector<1x256xf32>
    %912 = vector.broadcast %911 : vector<1x256xf32> to vector<8x256xf32>
    %913 = arith.addf %910, %912 : vector<8x256xf32>
    %cst_490 = arith.constant 0.000000e+00 : f32
    %cst_491 = arith.constant 6.000000e+00 : f32
    %914 = vector.broadcast %cst_490 : f32 to vector<8x256xf32>
    %915 = arith.maximumf %914, %913 : vector<8x256xf32>
    %916 = vector.broadcast %cst_491 : f32 to vector<8x256xf32>
    %917 = arith.minimumf %916, %915 : vector<8x256xf32>
    %c5_492 = arith.constant 5 : index
    %c0_493 = arith.constant 0 : index
    %c0_494 = arith.constant 0 : index
    %918 = vector.load %arg4[%c5_492, %c0_493, %c0_494] : memref<7x9x256xf32, #tpu.memory_space<vmem>>, vector<1x9x256xf32>
    %919 = vector.shape_cast %918 : vector<1x9x256xf32> to vector<9x256xf32>
    %c22 = arith.constant 22 : index
    %c0_495 = arith.constant 0 : index
    %920 = vector.load %arg3[%c22, %c0_495] : memref<32x256xf32, #tpu.memory_space<vmem>>, vector<1x256xf32>
    %c23 = arith.constant 23 : index
    %c0_496 = arith.constant 0 : index
    %921 = vector.load %arg3[%c23, %c0_496] : memref<32x256xf32, #tpu.memory_space<vmem>>, vector<1x256xf32>
    %922 = tpu.iota {dimensions = array<i32: 0>} : vector<4x1xi32>
    %c1_i32_497 = arith.constant 1 : i32
    %923 = vector.broadcast %c1_i32_497 : i32 to vector<4x1xi32>
    %924 = arith.andi %922, %923 : vector<4x1xi32>
    %c0_i32_498 = arith.constant 0 : i32
    %925 = vector.broadcast %c0_i32_498 : i32 to vector<4x1xi32>
    %926 = arith.cmpi ne, %924, %925 : vector<4x1xi32>
    %c1_i32_499 = arith.constant 1 : i32
    %927 = vector.broadcast %c1_i32_499 : i32 to vector<4x1xi32>
    %928 = arith.cmpi ne, %924, %927 : vector<4x1xi32>
    %929 = vector.extract_strided_slice %919 {offsets = [0, 0], sizes = [1, 256], strides = [1, 1]} : vector<9x256xf32> to vector<1x256xf32>
    %cst_500 = arith.constant 0.000000e+00 : f32
    %930 = vector.shape_cast %926 : vector<4x1xi1> to vector<4x1xi1>
    %931 = vector.broadcast %930 : vector<4x1xi1> to vector<4x256xi1>
    %932 = vector.shape_cast %929 : vector<1x256xf32> to vector<1x256xf32>
    %933 = vector.broadcast %932 : vector<1x256xf32> to vector<4x256xf32>
    %934 = vector.broadcast %cst_500 : f32 to vector<4x256xf32>
    %935 = arith.select %931, %933, %934 : vector<4x256xi1>, vector<4x256xf32>
    %936 = vector.extract_strided_slice %919 {offsets = [1, 0], sizes = [1, 256], strides = [1, 1]} : vector<9x256xf32> to vector<1x256xf32>
    %937 = vector.extract_strided_slice %919 {offsets = [2, 0], sizes = [1, 256], strides = [1, 1]} : vector<9x256xf32> to vector<1x256xf32>
    %cst_501 = arith.constant 0.000000e+00 : f32
    %938 = vector.shape_cast %928 : vector<4x1xi1> to vector<4x1xi1>
    %939 = vector.broadcast %938 : vector<4x1xi1> to vector<4x256xi1>
    %940 = vector.shape_cast %937 : vector<1x256xf32> to vector<1x256xf32>
    %941 = vector.broadcast %940 : vector<1x256xf32> to vector<4x256xf32>
    %942 = vector.broadcast %cst_501 : f32 to vector<4x256xf32>
    %943 = arith.select %939, %941, %942 : vector<4x256xi1>, vector<4x256xf32>
    %944 = vector.extract_strided_slice %919 {offsets = [3, 0], sizes = [1, 256], strides = [1, 1]} : vector<9x256xf32> to vector<1x256xf32>
    %cst_502 = arith.constant 0.000000e+00 : f32
    %945 = vector.shape_cast %926 : vector<4x1xi1> to vector<4x1xi1>
    %946 = vector.broadcast %945 : vector<4x1xi1> to vector<4x256xi1>
    %947 = vector.shape_cast %944 : vector<1x256xf32> to vector<1x256xf32>
    %948 = vector.broadcast %947 : vector<1x256xf32> to vector<4x256xf32>
    %949 = vector.broadcast %cst_502 : f32 to vector<4x256xf32>
    %950 = arith.select %946, %948, %949 : vector<4x256xi1>, vector<4x256xf32>
    %951 = vector.extract_strided_slice %919 {offsets = [4, 0], sizes = [1, 256], strides = [1, 1]} : vector<9x256xf32> to vector<1x256xf32>
    %952 = vector.extract_strided_slice %919 {offsets = [5, 0], sizes = [1, 256], strides = [1, 1]} : vector<9x256xf32> to vector<1x256xf32>
    %cst_503 = arith.constant 0.000000e+00 : f32
    %953 = vector.shape_cast %928 : vector<4x1xi1> to vector<4x1xi1>
    %954 = vector.broadcast %953 : vector<4x1xi1> to vector<4x256xi1>
    %955 = vector.shape_cast %952 : vector<1x256xf32> to vector<1x256xf32>
    %956 = vector.broadcast %955 : vector<1x256xf32> to vector<4x256xf32>
    %957 = vector.broadcast %cst_503 : f32 to vector<4x256xf32>
    %958 = arith.select %954, %956, %957 : vector<4x256xi1>, vector<4x256xf32>
    %959 = vector.extract_strided_slice %919 {offsets = [6, 0], sizes = [1, 256], strides = [1, 1]} : vector<9x256xf32> to vector<1x256xf32>
    %cst_504 = arith.constant 0.000000e+00 : f32
    %960 = vector.shape_cast %926 : vector<4x1xi1> to vector<4x1xi1>
    %961 = vector.broadcast %960 : vector<4x1xi1> to vector<4x256xi1>
    %962 = vector.shape_cast %959 : vector<1x256xf32> to vector<1x256xf32>
    %963 = vector.broadcast %962 : vector<1x256xf32> to vector<4x256xf32>
    %964 = vector.broadcast %cst_504 : f32 to vector<4x256xf32>
    %965 = arith.select %961, %963, %964 : vector<4x256xi1>, vector<4x256xf32>
    %966 = vector.extract_strided_slice %919 {offsets = [7, 0], sizes = [1, 256], strides = [1, 1]} : vector<9x256xf32> to vector<1x256xf32>
    %967 = vector.extract_strided_slice %919 {offsets = [8, 0], sizes = [1, 256], strides = [1, 1]} : vector<9x256xf32> to vector<1x256xf32>
    %cst_505 = arith.constant 0.000000e+00 : f32
    %968 = vector.shape_cast %928 : vector<4x1xi1> to vector<4x1xi1>
    %969 = vector.broadcast %968 : vector<4x1xi1> to vector<4x256xi1>
    %970 = vector.shape_cast %967 : vector<1x256xf32> to vector<1x256xf32>
    %971 = vector.broadcast %970 : vector<1x256xf32> to vector<4x256xf32>
    %972 = vector.broadcast %cst_505 : f32 to vector<4x256xf32>
    %973 = arith.select %969, %971, %972 : vector<4x256xi1>, vector<4x256xf32>
    %974 = vector.extract_strided_slice %917 {offsets = [0, 0], sizes = [4, 256], strides = [1, 1]} : vector<8x256xf32> to vector<4x256xf32>
    %c0_506 = arith.constant 0 : index
    %c3_507 = arith.constant 3 : index
    %c0_508 = arith.constant 0 : index
    %975 = vector.load %arg13[%c0_506, %c3_507, %c0_508] : memref<2x10x256xf32, #tpu.memory_space<vmem>>, vector<1x4x256xf32>
    %976 = vector.shape_cast %975 : vector<1x4x256xf32> to vector<4x256xf32>
    %977 = vector.shape_cast %974 : vector<4x256xf32> to vector<1x4x256xf32>
    tpu.vector_store %arg13[%c0_506, %c3_507, %c0_508], %977 {strides = array<i32>} : memref<2x10x256xf32, #tpu.memory_space<vmem>>, vector<1x4x256xf32>,
    %cst_509 = arith.constant 0.000000e+00 : f32
    %978 = vector.broadcast %cst_509 : f32 to vector<4x256xf32>
    %c0_510 = arith.constant 0 : index
    %c0_511 = arith.constant 0 : index
    %c0_512 = arith.constant 0 : index
    %979 = vector.load %arg13[%c0_510, %c0_511, %c0_512] : memref<2x10x256xf32, #tpu.memory_space<vmem>>, vector<1x4x256xf32>
    %980 = vector.shape_cast %979 : vector<1x4x256xf32> to vector<4x256xf32>
    %981 = arith.mulf %980, %935 : vector<4x256xf32>
    %982 = arith.addf %978, %981 : vector<4x256xf32>
    %c0_513 = arith.constant 0 : index
    %c1_514 = arith.constant 1 : index
    %c0_515 = arith.constant 0 : index
    %983 = vector.load %arg13[%c0_513, %c1_514, %c0_515] : memref<2x10x256xf32, #tpu.memory_space<vmem>>, vector<1x4x256xf32>
    %984 = vector.shape_cast %983 : vector<1x4x256xf32> to vector<4x256xf32>
    %985 = vector.broadcast %936 : vector<1x256xf32> to vector<4x256xf32>
    %986 = arith.mulf %984, %985 : vector<4x256xf32>
    %987 = arith.addf %982, %986 : vector<4x256xf32>
    %c0_516 = arith.constant 0 : index
    %c2_517 = arith.constant 2 : index
    %c0_518 = arith.constant 0 : index
    %988 = vector.load %arg13[%c0_516, %c2_517, %c0_518] : memref<2x10x256xf32, #tpu.memory_space<vmem>>, vector<1x4x256xf32>
    %989 = vector.shape_cast %988 : vector<1x4x256xf32> to vector<4x256xf32>
    %990 = arith.mulf %989, %943 : vector<4x256xf32>
    %991 = arith.addf %987, %990 : vector<4x256xf32>
    %c0_519 = arith.constant 0 : index
    %c2_520 = arith.constant 2 : index
    %c0_521 = arith.constant 0 : index
    %992 = vector.load %arg13[%c0_519, %c2_520, %c0_521] : memref<2x10x256xf32, #tpu.memory_space<vmem>>, vector<1x4x256xf32>
    %993 = vector.shape_cast %992 : vector<1x4x256xf32> to vector<4x256xf32>
    %994 = arith.mulf %993, %950 : vector<4x256xf32>
    %995 = arith.addf %991, %994 : vector<4x256xf32>
    %c0_522 = arith.constant 0 : index
    %c3_523 = arith.constant 3 : index
    %c0_524 = arith.constant 0 : index
    %996 = vector.load %arg13[%c0_522, %c3_523, %c0_524] : memref<2x10x256xf32, #tpu.memory_space<vmem>>, vector<1x4x256xf32>
    %997 = vector.shape_cast %996 : vector<1x4x256xf32> to vector<4x256xf32>
    %998 = vector.broadcast %951 : vector<1x256xf32> to vector<4x256xf32>
    %999 = arith.mulf %997, %998 : vector<4x256xf32>
    %1000 = arith.addf %995, %999 : vector<4x256xf32>
    %c0_525 = arith.constant 0 : index
    %c4_526 = arith.constant 4 : index
    %c0_527 = arith.constant 0 : index
    %1001 = vector.load %arg13[%c0_525, %c4_526, %c0_527] : memref<2x10x256xf32, #tpu.memory_space<vmem>>, vector<1x4x256xf32>
    %1002 = vector.shape_cast %1001 : vector<1x4x256xf32> to vector<4x256xf32>
    %1003 = arith.mulf %1002, %958 : vector<4x256xf32>
    %1004 = arith.addf %1000, %1003 : vector<4x256xf32>
    %c0_528 = arith.constant 0 : index
    %c4_529 = arith.constant 4 : index
    %c0_530 = arith.constant 0 : index
    %1005 = vector.load %arg13[%c0_528, %c4_529, %c0_530] : memref<2x10x256xf32, #tpu.memory_space<vmem>>, vector<1x4x256xf32>
    %1006 = vector.shape_cast %1005 : vector<1x4x256xf32> to vector<4x256xf32>
    %1007 = arith.mulf %1006, %965 : vector<4x256xf32>
    %1008 = arith.addf %1004, %1007 : vector<4x256xf32>
    %c0_531 = arith.constant 0 : index
    %c5_532 = arith.constant 5 : index
    %c0_533 = arith.constant 0 : index
    %1009 = vector.load %arg13[%c0_531, %c5_532, %c0_533] : memref<2x10x256xf32, #tpu.memory_space<vmem>>, vector<1x4x256xf32>
    %1010 = vector.shape_cast %1009 : vector<1x4x256xf32> to vector<4x256xf32>
    %1011 = vector.broadcast %966 : vector<1x256xf32> to vector<4x256xf32>
    %1012 = arith.mulf %1010, %1011 : vector<4x256xf32>
    %1013 = arith.addf %1008, %1012 : vector<4x256xf32>
    %c0_534 = arith.constant 0 : index
    %c6_535 = arith.constant 6 : index
    %c0_536 = arith.constant 0 : index
    %1014 = vector.load %arg13[%c0_534, %c6_535, %c0_536] : memref<2x10x256xf32, #tpu.memory_space<vmem>>, vector<1x4x256xf32>
    %1015 = vector.shape_cast %1014 : vector<1x4x256xf32> to vector<4x256xf32>
    %1016 = arith.mulf %1015, %973 : vector<4x256xf32>
    %1017 = arith.addf %1013, %1016 : vector<4x256xf32>
    %1018 = vector.broadcast %920 : vector<1x256xf32> to vector<4x256xf32>
    %1019 = arith.mulf %1017, %1018 : vector<4x256xf32>
    %1020 = vector.broadcast %921 : vector<1x256xf32> to vector<4x256xf32>
    %1021 = arith.addf %1019, %1020 : vector<4x256xf32>
    %cst_537 = arith.constant 0.000000e+00 : f32
    %cst_538 = arith.constant 6.000000e+00 : f32
    %1022 = vector.broadcast %cst_537 : f32 to vector<4x256xf32>
    %1023 = arith.maximumf %1022, %1021 : vector<4x256xf32>
    %1024 = vector.broadcast %cst_538 : f32 to vector<4x256xf32>
    %1025 = arith.minimumf %1024, %1023 : vector<4x256xf32>
    %1026 = arith.truncf %1025 : vector<4x256xf32> to vector<4x256xbf16>
    %c0_539 = arith.constant 0 : index
    %c0_540 = arith.constant 0 : index
    %1027 = vector.load %arg18[%c0_539, %c0_540] : memref<8x256xbf16, #tpu.memory_space<vmem>>, vector<4x256xbf16>
    tpu.vector_store %arg18[%c0_539, %c0_540], %1026 {strides = array<i32>} : memref<8x256xbf16, #tpu.memory_space<vmem>>, vector<4x256xbf16>,
    %1028 = vector.extract_strided_slice %917 {offsets = [4, 0], sizes = [4, 256], strides = [1, 1]} : vector<8x256xf32> to vector<4x256xf32>
    %c1_541 = arith.constant 1 : index
    %c3_542 = arith.constant 3 : index
    %c0_543 = arith.constant 0 : index
    %1029 = vector.load %arg13[%c1_541, %c3_542, %c0_543] : memref<2x10x256xf32, #tpu.memory_space<vmem>>, vector<1x4x256xf32>
    %1030 = vector.shape_cast %1029 : vector<1x4x256xf32> to vector<4x256xf32>
    %1031 = vector.shape_cast %1028 : vector<4x256xf32> to vector<1x4x256xf32>
    tpu.vector_store %arg13[%c1_541, %c3_542, %c0_543], %1031 {strides = array<i32>} : memref<2x10x256xf32, #tpu.memory_space<vmem>>, vector<1x4x256xf32>,
    %cst_544 = arith.constant 0.000000e+00 : f32
    %1032 = vector.broadcast %cst_544 : f32 to vector<4x256xf32>
    %c1_545 = arith.constant 1 : index
    %c0_546 = arith.constant 0 : index
    %c0_547 = arith.constant 0 : index
    %1033 = vector.load %arg13[%c1_545, %c0_546, %c0_547] : memref<2x10x256xf32, #tpu.memory_space<vmem>>, vector<1x4x256xf32>
    %1034 = vector.shape_cast %1033 : vector<1x4x256xf32> to vector<4x256xf32>
    %1035 = arith.mulf %1034, %935 : vector<4x256xf32>
    %1036 = arith.addf %1032, %1035 : vector<4x256xf32>
    %c1_548 = arith.constant 1 : index
    %c1_549 = arith.constant 1 : index
    %c0_550 = arith.constant 0 : index
    %1037 = vector.load %arg13[%c1_548, %c1_549, %c0_550] : memref<2x10x256xf32, #tpu.memory_space<vmem>>, vector<1x4x256xf32>
    %1038 = vector.shape_cast %1037 : vector<1x4x256xf32> to vector<4x256xf32>
    %1039 = vector.broadcast %936 : vector<1x256xf32> to vector<4x256xf32>
    %1040 = arith.mulf %1038, %1039 : vector<4x256xf32>
    %1041 = arith.addf %1036, %1040 : vector<4x256xf32>
    %c1_551 = arith.constant 1 : index
    %c2_552 = arith.constant 2 : index
    %c0_553 = arith.constant 0 : index
    %1042 = vector.load %arg13[%c1_551, %c2_552, %c0_553] : memref<2x10x256xf32, #tpu.memory_space<vmem>>, vector<1x4x256xf32>
    %1043 = vector.shape_cast %1042 : vector<1x4x256xf32> to vector<4x256xf32>
    %1044 = arith.mulf %1043, %943 : vector<4x256xf32>
    %1045 = arith.addf %1041, %1044 : vector<4x256xf32>
    %c1_554 = arith.constant 1 : index
    %c2_555 = arith.constant 2 : index
    %c0_556 = arith.constant 0 : index
    %1046 = vector.load %arg13[%c1_554, %c2_555, %c0_556] : memref<2x10x256xf32, #tpu.memory_space<vmem>>, vector<1x4x256xf32>
    %1047 = vector.shape_cast %1046 : vector<1x4x256xf32> to vector<4x256xf32>
    %1048 = arith.mulf %1047, %950 : vector<4x256xf32>
    %1049 = arith.addf %1045, %1048 : vector<4x256xf32>
    %c1_557 = arith.constant 1 : index
    %c3_558 = arith.constant 3 : index
    %c0_559 = arith.constant 0 : index
    %1050 = vector.load %arg13[%c1_557, %c3_558, %c0_559] : memref<2x10x256xf32, #tpu.memory_space<vmem>>, vector<1x4x256xf32>
    %1051 = vector.shape_cast %1050 : vector<1x4x256xf32> to vector<4x256xf32>
    %1052 = vector.broadcast %951 : vector<1x256xf32> to vector<4x256xf32>
    %1053 = arith.mulf %1051, %1052 : vector<4x256xf32>
    %1054 = arith.addf %1049, %1053 : vector<4x256xf32>
    %c1_560 = arith.constant 1 : index
    %c4_561 = arith.constant 4 : index
    %c0_562 = arith.constant 0 : index
    %1055 = vector.load %arg13[%c1_560, %c4_561, %c0_562] : memref<2x10x256xf32, #tpu.memory_space<vmem>>, vector<1x4x256xf32>
    %1056 = vector.shape_cast %1055 : vector<1x4x256xf32> to vector<4x256xf32>
    %1057 = arith.mulf %1056, %958 : vector<4x256xf32>
    %1058 = arith.addf %1054, %1057 : vector<4x256xf32>
    %c1_563 = arith.constant 1 : index
    %c4_564 = arith.constant 4 : index
    %c0_565 = arith.constant 0 : index
    %1059 = vector.load %arg13[%c1_563, %c4_564, %c0_565] : memref<2x10x256xf32, #tpu.memory_space<vmem>>, vector<1x4x256xf32>
    %1060 = vector.shape_cast %1059 : vector<1x4x256xf32> to vector<4x256xf32>
    %1061 = arith.mulf %1060, %965 : vector<4x256xf32>
    %1062 = arith.addf %1058, %1061 : vector<4x256xf32>
    %c1_566 = arith.constant 1 : index
    %c5_567 = arith.constant 5 : index
    %c0_568 = arith.constant 0 : index
    %1063 = vector.load %arg13[%c1_566, %c5_567, %c0_568] : memref<2x10x256xf32, #tpu.memory_space<vmem>>, vector<1x4x256xf32>
    %1064 = vector.shape_cast %1063 : vector<1x4x256xf32> to vector<4x256xf32>
    %1065 = vector.broadcast %966 : vector<1x256xf32> to vector<4x256xf32>
    %1066 = arith.mulf %1064, %1065 : vector<4x256xf32>
    %1067 = arith.addf %1062, %1066 : vector<4x256xf32>
    %c1_569 = arith.constant 1 : index
    %c6_570 = arith.constant 6 : index
    %c0_571 = arith.constant 0 : index
    %1068 = vector.load %arg13[%c1_569, %c6_570, %c0_571] : memref<2x10x256xf32, #tpu.memory_space<vmem>>, vector<1x4x256xf32>
    %1069 = vector.shape_cast %1068 : vector<1x4x256xf32> to vector<4x256xf32>
    %1070 = arith.mulf %1069, %973 : vector<4x256xf32>
    %1071 = arith.addf %1067, %1070 : vector<4x256xf32>
    %1072 = vector.broadcast %920 : vector<1x256xf32> to vector<4x256xf32>
    %1073 = arith.mulf %1071, %1072 : vector<4x256xf32>
    %1074 = vector.broadcast %921 : vector<1x256xf32> to vector<4x256xf32>
    %1075 = arith.addf %1073, %1074 : vector<4x256xf32>
    %cst_572 = arith.constant 0.000000e+00 : f32
    %cst_573 = arith.constant 6.000000e+00 : f32
    %1076 = vector.broadcast %cst_572 : f32 to vector<4x256xf32>
    %1077 = arith.maximumf %1076, %1075 : vector<4x256xf32>
    %1078 = vector.broadcast %cst_573 : f32 to vector<4x256xf32>
    %1079 = arith.minimumf %1078, %1077 : vector<4x256xf32>
    %1080 = arith.truncf %1079 : vector<4x256xf32> to vector<4x256xbf16>
    %c4_574 = arith.constant 4 : index
    %c0_575 = arith.constant 0 : index
    %1081 = vector.load %arg18[%c4_574, %c0_575] : memref<8x256xbf16, #tpu.memory_space<vmem>>, vector<4x256xbf16>
    tpu.vector_store %arg18[%c4_574, %c0_575], %1080 {strides = array<i32>} : memref<8x256xbf16, #tpu.memory_space<vmem>>, vector<4x256xbf16>,
    %c608 = arith.constant 608 : index
    %c0_576 = arith.constant 0 : index
    %1082 = vector.load %arg5[%c608, %c0_576] : memref<1120x256xbf16, #tpu.memory_space<vmem>>, vector<256x256xbf16>
    %c0_577 = arith.constant 0 : index
    %c0_578 = arith.constant 0 : index
    %1083 = vector.load %arg18[%c0_577, %c0_578] : memref<8x256xbf16, #tpu.memory_space<vmem>>, vector<8x256xbf16>
    %cst_579 = arith.constant dense<0.000000e+00> : vector<8x256xf32>
    %1084 = tpu.matmul %1083, %1082, %cst_579 {dimension_numbers = #tpu.dot_dimension_numbers<[1], [0], [0], [1], [0, 0, 1, 1], [], []>} : vector<8x256xbf16>, vector<256x256xbf16>, vector<8x256xf32> -> vector<8x256xf32>
    %c24 = arith.constant 24 : index
    %c0_580 = arith.constant 0 : index
    %1085 = vector.load %arg3[%c24, %c0_580] : memref<32x256xf32, #tpu.memory_space<vmem>>, vector<1x256xf32>
    %1086 = vector.broadcast %1085 : vector<1x256xf32> to vector<8x256xf32>
    %1087 = arith.mulf %1084, %1086 : vector<8x256xf32>
    %c25 = arith.constant 25 : index
    %c0_581 = arith.constant 0 : index
    %1088 = vector.load %arg3[%c25, %c0_581] : memref<32x256xf32, #tpu.memory_space<vmem>>, vector<1x256xf32>
    %1089 = vector.broadcast %1088 : vector<1x256xf32> to vector<8x256xf32>
    %1090 = arith.addf %1087, %1089 : vector<8x256xf32>
    %cst_582 = arith.constant 0.000000e+00 : f32
    %cst_583 = arith.constant 6.000000e+00 : f32
    %1091 = vector.broadcast %cst_582 : f32 to vector<8x256xf32>
    %1092 = arith.maximumf %1091, %1090 : vector<8x256xf32>
    %1093 = vector.broadcast %cst_583 : f32 to vector<8x256xf32>
    %1094 = arith.minimumf %1093, %1092 : vector<8x256xf32>
    %c6_584 = arith.constant 6 : index
    %c0_585 = arith.constant 0 : index
    %c0_586 = arith.constant 0 : index
    %1095 = vector.load %arg4[%c6_584, %c0_585, %c0_586] : memref<7x9x256xf32, #tpu.memory_space<vmem>>, vector<1x9x256xf32>
    %1096 = vector.shape_cast %1095 : vector<1x9x256xf32> to vector<9x256xf32>
    %c26 = arith.constant 26 : index
    %c0_587 = arith.constant 0 : index
    %1097 = vector.load %arg3[%c26, %c0_587] : memref<32x256xf32, #tpu.memory_space<vmem>>, vector<1x256xf32>
    %c27 = arith.constant 27 : index
    %c0_588 = arith.constant 0 : index
    %1098 = vector.load %arg3[%c27, %c0_588] : memref<32x256xf32, #tpu.memory_space<vmem>>, vector<1x256xf32>
    %1099 = tpu.iota {dimensions = array<i32: 0>} : vector<4x1xi32>
    %c1_i32_589 = arith.constant 1 : i32
    %1100 = vector.broadcast %c1_i32_589 : i32 to vector<4x1xi32>
    %1101 = arith.andi %1099, %1100 : vector<4x1xi32>
    %c0_i32_590 = arith.constant 0 : i32
    %1102 = vector.broadcast %c0_i32_590 : i32 to vector<4x1xi32>
    %1103 = arith.cmpi ne, %1101, %1102 : vector<4x1xi32>
    %c1_i32_591 = arith.constant 1 : i32
    %1104 = vector.broadcast %c1_i32_591 : i32 to vector<4x1xi32>
    %1105 = arith.cmpi ne, %1101, %1104 : vector<4x1xi32>
    %1106 = vector.extract_strided_slice %1096 {offsets = [0, 0], sizes = [1, 256], strides = [1, 1]} : vector<9x256xf32> to vector<1x256xf32>
    %cst_592 = arith.constant 0.000000e+00 : f32
    %1107 = vector.shape_cast %1103 : vector<4x1xi1> to vector<4x1xi1>
    %1108 = vector.broadcast %1107 : vector<4x1xi1> to vector<4x256xi1>
    %1109 = vector.shape_cast %1106 : vector<1x256xf32> to vector<1x256xf32>
    %1110 = vector.broadcast %1109 : vector<1x256xf32> to vector<4x256xf32>
    %1111 = vector.broadcast %cst_592 : f32 to vector<4x256xf32>
    %1112 = arith.select %1108, %1110, %1111 : vector<4x256xi1>, vector<4x256xf32>
    %1113 = vector.extract_strided_slice %1096 {offsets = [1, 0], sizes = [1, 256], strides = [1, 1]} : vector<9x256xf32> to vector<1x256xf32>
    %1114 = vector.extract_strided_slice %1096 {offsets = [2, 0], sizes = [1, 256], strides = [1, 1]} : vector<9x256xf32> to vector<1x256xf32>
    %cst_593 = arith.constant 0.000000e+00 : f32
    %1115 = vector.shape_cast %1105 : vector<4x1xi1> to vector<4x1xi1>
    %1116 = vector.broadcast %1115 : vector<4x1xi1> to vector<4x256xi1>
    %1117 = vector.shape_cast %1114 : vector<1x256xf32> to vector<1x256xf32>
    %1118 = vector.broadcast %1117 : vector<1x256xf32> to vector<4x256xf32>
    %1119 = vector.broadcast %cst_593 : f32 to vector<4x256xf32>
    %1120 = arith.select %1116, %1118, %1119 : vector<4x256xi1>, vector<4x256xf32>
    %1121 = vector.extract_strided_slice %1096 {offsets = [3, 0], sizes = [1, 256], strides = [1, 1]} : vector<9x256xf32> to vector<1x256xf32>
    %cst_594 = arith.constant 0.000000e+00 : f32
    %1122 = vector.shape_cast %1103 : vector<4x1xi1> to vector<4x1xi1>
    %1123 = vector.broadcast %1122 : vector<4x1xi1> to vector<4x256xi1>
    %1124 = vector.shape_cast %1121 : vector<1x256xf32> to vector<1x256xf32>
    %1125 = vector.broadcast %1124 : vector<1x256xf32> to vector<4x256xf32>
    %1126 = vector.broadcast %cst_594 : f32 to vector<4x256xf32>
    %1127 = arith.select %1123, %1125, %1126 : vector<4x256xi1>, vector<4x256xf32>
    %1128 = vector.extract_strided_slice %1096 {offsets = [4, 0], sizes = [1, 256], strides = [1, 1]} : vector<9x256xf32> to vector<1x256xf32>
    %1129 = vector.extract_strided_slice %1096 {offsets = [5, 0], sizes = [1, 256], strides = [1, 1]} : vector<9x256xf32> to vector<1x256xf32>
    %cst_595 = arith.constant 0.000000e+00 : f32
    %1130 = vector.shape_cast %1105 : vector<4x1xi1> to vector<4x1xi1>
    %1131 = vector.broadcast %1130 : vector<4x1xi1> to vector<4x256xi1>
    %1132 = vector.shape_cast %1129 : vector<1x256xf32> to vector<1x256xf32>
    %1133 = vector.broadcast %1132 : vector<1x256xf32> to vector<4x256xf32>
    %1134 = vector.broadcast %cst_595 : f32 to vector<4x256xf32>
    %1135 = arith.select %1131, %1133, %1134 : vector<4x256xi1>, vector<4x256xf32>
    %1136 = vector.extract_strided_slice %1096 {offsets = [6, 0], sizes = [1, 256], strides = [1, 1]} : vector<9x256xf32> to vector<1x256xf32>
    %cst_596 = arith.constant 0.000000e+00 : f32
    %1137 = vector.shape_cast %1103 : vector<4x1xi1> to vector<4x1xi1>
    %1138 = vector.broadcast %1137 : vector<4x1xi1> to vector<4x256xi1>
    %1139 = vector.shape_cast %1136 : vector<1x256xf32> to vector<1x256xf32>
    %1140 = vector.broadcast %1139 : vector<1x256xf32> to vector<4x256xf32>
    %1141 = vector.broadcast %cst_596 : f32 to vector<4x256xf32>
    %1142 = arith.select %1138, %1140, %1141 : vector<4x256xi1>, vector<4x256xf32>
    %1143 = vector.extract_strided_slice %1096 {offsets = [7, 0], sizes = [1, 256], strides = [1, 1]} : vector<9x256xf32> to vector<1x256xf32>
    %1144 = vector.extract_strided_slice %1096 {offsets = [8, 0], sizes = [1, 256], strides = [1, 1]} : vector<9x256xf32> to vector<1x256xf32>
    %cst_597 = arith.constant 0.000000e+00 : f32
    %1145 = vector.shape_cast %1105 : vector<4x1xi1> to vector<4x1xi1>
    %1146 = vector.broadcast %1145 : vector<4x1xi1> to vector<4x256xi1>
    %1147 = vector.shape_cast %1144 : vector<1x256xf32> to vector<1x256xf32>
    %1148 = vector.broadcast %1147 : vector<1x256xf32> to vector<4x256xf32>
    %1149 = vector.broadcast %cst_597 : f32 to vector<4x256xf32>
    %1150 = arith.select %1146, %1148, %1149 : vector<4x256xi1>, vector<4x256xf32>
    %1151 = vector.extract_strided_slice %1094 {offsets = [0, 0], sizes = [4, 256], strides = [1, 1]} : vector<8x256xf32> to vector<4x256xf32>
    %c0_598 = arith.constant 0 : index
    %c3_599 = arith.constant 3 : index
    %c0_600 = arith.constant 0 : index
    %1152 = vector.load %arg13[%c0_598, %c3_599, %c0_600] : memref<2x10x256xf32, #tpu.memory_space<vmem>>, vector<1x4x256xf32>
    %1153 = vector.shape_cast %1152 : vector<1x4x256xf32> to vector<4x256xf32>
    %1154 = vector.shape_cast %1151 : vector<4x256xf32> to vector<1x4x256xf32>
    tpu.vector_store %arg13[%c0_598, %c3_599, %c0_600], %1154 {strides = array<i32>} : memref<2x10x256xf32, #tpu.memory_space<vmem>>, vector<1x4x256xf32>,
    %cst_601 = arith.constant 0.000000e+00 : f32
    %1155 = vector.broadcast %cst_601 : f32 to vector<4x256xf32>
    %c0_602 = arith.constant 0 : index
    %c0_603 = arith.constant 0 : index
    %c0_604 = arith.constant 0 : index
    %1156 = vector.load %arg13[%c0_602, %c0_603, %c0_604] : memref<2x10x256xf32, #tpu.memory_space<vmem>>, vector<1x4x256xf32>
    %1157 = vector.shape_cast %1156 : vector<1x4x256xf32> to vector<4x256xf32>
    %1158 = arith.mulf %1157, %1112 : vector<4x256xf32>
    %1159 = arith.addf %1155, %1158 : vector<4x256xf32>
    %c0_605 = arith.constant 0 : index
    %c1_606 = arith.constant 1 : index
    %c0_607 = arith.constant 0 : index
    %1160 = vector.load %arg13[%c0_605, %c1_606, %c0_607] : memref<2x10x256xf32, #tpu.memory_space<vmem>>, vector<1x4x256xf32>
    %1161 = vector.shape_cast %1160 : vector<1x4x256xf32> to vector<4x256xf32>
    %1162 = vector.broadcast %1113 : vector<1x256xf32> to vector<4x256xf32>
    %1163 = arith.mulf %1161, %1162 : vector<4x256xf32>
    %1164 = arith.addf %1159, %1163 : vector<4x256xf32>
    %c0_608 = arith.constant 0 : index
    %c2_609 = arith.constant 2 : index
    %c0_610 = arith.constant 0 : index
    %1165 = vector.load %arg13[%c0_608, %c2_609, %c0_610] : memref<2x10x256xf32, #tpu.memory_space<vmem>>, vector<1x4x256xf32>
    %1166 = vector.shape_cast %1165 : vector<1x4x256xf32> to vector<4x256xf32>
    %1167 = arith.mulf %1166, %1120 : vector<4x256xf32>
    %1168 = arith.addf %1164, %1167 : vector<4x256xf32>
    %c0_611 = arith.constant 0 : index
    %c2_612 = arith.constant 2 : index
    %c0_613 = arith.constant 0 : index
    %1169 = vector.load %arg13[%c0_611, %c2_612, %c0_613] : memref<2x10x256xf32, #tpu.memory_space<vmem>>, vector<1x4x256xf32>
    %1170 = vector.shape_cast %1169 : vector<1x4x256xf32> to vector<4x256xf32>
    %1171 = arith.mulf %1170, %1127 : vector<4x256xf32>
    %1172 = arith.addf %1168, %1171 : vector<4x256xf32>
    %c0_614 = arith.constant 0 : index
    %c3_615 = arith.constant 3 : index
    %c0_616 = arith.constant 0 : index
    %1173 = vector.load %arg13[%c0_614, %c3_615, %c0_616] : memref<2x10x256xf32, #tpu.memory_space<vmem>>, vector<1x4x256xf32>
    %1174 = vector.shape_cast %1173 : vector<1x4x256xf32> to vector<4x256xf32>
    %1175 = vector.broadcast %1128 : vector<1x256xf32> to vector<4x256xf32>
    %1176 = arith.mulf %1174, %1175 : vector<4x256xf32>
    %1177 = arith.addf %1172, %1176 : vector<4x256xf32>
    %c0_617 = arith.constant 0 : index
    %c4_618 = arith.constant 4 : index
    %c0_619 = arith.constant 0 : index
    %1178 = vector.load %arg13[%c0_617, %c4_618, %c0_619] : memref<2x10x256xf32, #tpu.memory_space<vmem>>, vector<1x4x256xf32>
    %1179 = vector.shape_cast %1178 : vector<1x4x256xf32> to vector<4x256xf32>
    %1180 = arith.mulf %1179, %1135 : vector<4x256xf32>
    %1181 = arith.addf %1177, %1180 : vector<4x256xf32>
    %c0_620 = arith.constant 0 : index
    %c4_621 = arith.constant 4 : index
    %c0_622 = arith.constant 0 : index
    %1182 = vector.load %arg13[%c0_620, %c4_621, %c0_622] : memref<2x10x256xf32, #tpu.memory_space<vmem>>, vector<1x4x256xf32>
    %1183 = vector.shape_cast %1182 : vector<1x4x256xf32> to vector<4x256xf32>
    %1184 = arith.mulf %1183, %1142 : vector<4x256xf32>
    %1185 = arith.addf %1181, %1184 : vector<4x256xf32>
    %c0_623 = arith.constant 0 : index
    %c5_624 = arith.constant 5 : index
    %c0_625 = arith.constant 0 : index
    %1186 = vector.load %arg13[%c0_623, %c5_624, %c0_625] : memref<2x10x256xf32, #tpu.memory_space<vmem>>, vector<1x4x256xf32>
    %1187 = vector.shape_cast %1186 : vector<1x4x256xf32> to vector<4x256xf32>
    %1188 = vector.broadcast %1143 : vector<1x256xf32> to vector<4x256xf32>
    %1189 = arith.mulf %1187, %1188 : vector<4x256xf32>
    %1190 = arith.addf %1185, %1189 : vector<4x256xf32>
    %c0_626 = arith.constant 0 : index
    %c6_627 = arith.constant 6 : index
    %c0_628 = arith.constant 0 : index
    %1191 = vector.load %arg13[%c0_626, %c6_627, %c0_628] : memref<2x10x256xf32, #tpu.memory_space<vmem>>, vector<1x4x256xf32>
    %1192 = vector.shape_cast %1191 : vector<1x4x256xf32> to vector<4x256xf32>
    %1193 = arith.mulf %1192, %1150 : vector<4x256xf32>
    %1194 = arith.addf %1190, %1193 : vector<4x256xf32>
    %1195 = vector.broadcast %1097 : vector<1x256xf32> to vector<4x256xf32>
    %1196 = arith.mulf %1194, %1195 : vector<4x256xf32>
    %1197 = vector.broadcast %1098 : vector<1x256xf32> to vector<4x256xf32>
    %1198 = arith.addf %1196, %1197 : vector<4x256xf32>
    %cst_629 = arith.constant 0.000000e+00 : f32
    %cst_630 = arith.constant 6.000000e+00 : f32
    %1199 = vector.broadcast %cst_629 : f32 to vector<4x256xf32>
    %1200 = arith.maximumf %1199, %1198 : vector<4x256xf32>
    %1201 = vector.broadcast %cst_630 : f32 to vector<4x256xf32>
    %1202 = arith.minimumf %1201, %1200 : vector<4x256xf32>
    %1203 = arith.truncf %1202 : vector<4x256xf32> to vector<4x256xbf16>
    %c0_631 = arith.constant 0 : index
    %c0_632 = arith.constant 0 : index
    %1204 = vector.load %arg18[%c0_631, %c0_632] : memref<8x256xbf16, #tpu.memory_space<vmem>>, vector<4x256xbf16>
    tpu.vector_store %arg18[%c0_631, %c0_632], %1203 {strides = array<i32>} : memref<8x256xbf16, #tpu.memory_space<vmem>>, vector<4x256xbf16>,
    %1205 = vector.extract_strided_slice %1094 {offsets = [4, 0], sizes = [4, 256], strides = [1, 1]} : vector<8x256xf32> to vector<4x256xf32>
    %c1_633 = arith.constant 1 : index
    %c3_634 = arith.constant 3 : index
    %c0_635 = arith.constant 0 : index
    %1206 = vector.load %arg13[%c1_633, %c3_634, %c0_635] : memref<2x10x256xf32, #tpu.memory_space<vmem>>, vector<1x4x256xf32>
    %1207 = vector.shape_cast %1206 : vector<1x4x256xf32> to vector<4x256xf32>
    %1208 = vector.shape_cast %1205 : vector<4x256xf32> to vector<1x4x256xf32>
    tpu.vector_store %arg13[%c1_633, %c3_634, %c0_635], %1208 {strides = array<i32>} : memref<2x10x256xf32, #tpu.memory_space<vmem>>, vector<1x4x256xf32>,
    %cst_636 = arith.constant 0.000000e+00 : f32
    %1209 = vector.broadcast %cst_636 : f32 to vector<4x256xf32>
    %c1_637 = arith.constant 1 : index
    %c0_638 = arith.constant 0 : index
    %c0_639 = arith.constant 0 : index
    %1210 = vector.load %arg13[%c1_637, %c0_638, %c0_639] : memref<2x10x256xf32, #tpu.memory_space<vmem>>, vector<1x4x256xf32>
    %1211 = vector.shape_cast %1210 : vector<1x4x256xf32> to vector<4x256xf32>
    %1212 = arith.mulf %1211, %1112 : vector<4x256xf32>
    %1213 = arith.addf %1209, %1212 : vector<4x256xf32>
    %c1_640 = arith.constant 1 : index
    %c1_641 = arith.constant 1 : index
    %c0_642 = arith.constant 0 : index
    %1214 = vector.load %arg13[%c1_640, %c1_641, %c0_642] : memref<2x10x256xf32, #tpu.memory_space<vmem>>, vector<1x4x256xf32>
    %1215 = vector.shape_cast %1214 : vector<1x4x256xf32> to vector<4x256xf32>
    %1216 = vector.broadcast %1113 : vector<1x256xf32> to vector<4x256xf32>
    %1217 = arith.mulf %1215, %1216 : vector<4x256xf32>
    %1218 = arith.addf %1213, %1217 : vector<4x256xf32>
    %c1_643 = arith.constant 1 : index
    %c2_644 = arith.constant 2 : index
    %c0_645 = arith.constant 0 : index
    %1219 = vector.load %arg13[%c1_643, %c2_644, %c0_645] : memref<2x10x256xf32, #tpu.memory_space<vmem>>, vector<1x4x256xf32>
    %1220 = vector.shape_cast %1219 : vector<1x4x256xf32> to vector<4x256xf32>
    %1221 = arith.mulf %1220, %1120 : vector<4x256xf32>
    %1222 = arith.addf %1218, %1221 : vector<4x256xf32>
    %c1_646 = arith.constant 1 : index
    %c2_647 = arith.constant 2 : index
    %c0_648 = arith.constant 0 : index
    %1223 = vector.load %arg13[%c1_646, %c2_647, %c0_648] : memref<2x10x256xf32, #tpu.memory_space<vmem>>, vector<1x4x256xf32>
    %1224 = vector.shape_cast %1223 : vector<1x4x256xf32> to vector<4x256xf32>
    %1225 = arith.mulf %1224, %1127 : vector<4x256xf32>
    %1226 = arith.addf %1222, %1225 : vector<4x256xf32>
    %c1_649 = arith.constant 1 : index
    %c3_650 = arith.constant 3 : index
    %c0_651 = arith.constant 0 : index
    %1227 = vector.load %arg13[%c1_649, %c3_650, %c0_651] : memref<2x10x256xf32, #tpu.memory_space<vmem>>, vector<1x4x256xf32>
    %1228 = vector.shape_cast %1227 : vector<1x4x256xf32> to vector<4x256xf32>
    %1229 = vector.broadcast %1128 : vector<1x256xf32> to vector<4x256xf32>
    %1230 = arith.mulf %1228, %1229 : vector<4x256xf32>
    %1231 = arith.addf %1226, %1230 : vector<4x256xf32>
    %c1_652 = arith.constant 1 : index
    %c4_653 = arith.constant 4 : index
    %c0_654 = arith.constant 0 : index
    %1232 = vector.load %arg13[%c1_652, %c4_653, %c0_654] : memref<2x10x256xf32, #tpu.memory_space<vmem>>, vector<1x4x256xf32>
    %1233 = vector.shape_cast %1232 : vector<1x4x256xf32> to vector<4x256xf32>
    %1234 = arith.mulf %1233, %1135 : vector<4x256xf32>
    %1235 = arith.addf %1231, %1234 : vector<4x256xf32>
    %c1_655 = arith.constant 1 : index
    %c4_656 = arith.constant 4 : index
    %c0_657 = arith.constant 0 : index
    %1236 = vector.load %arg13[%c1_655, %c4_656, %c0_657] : memref<2x10x256xf32, #tpu.memory_space<vmem>>, vector<1x4x256xf32>
    %1237 = vector.shape_cast %1236 : vector<1x4x256xf32> to vector<4x256xf32>
    %1238 = arith.mulf %1237, %1142 : vector<4x256xf32>
    %1239 = arith.addf %1235, %1238 : vector<4x256xf32>
    %c1_658 = arith.constant 1 : index
    %c5_659 = arith.constant 5 : index
    %c0_660 = arith.constant 0 : index
    %1240 = vector.load %arg13[%c1_658, %c5_659, %c0_660] : memref<2x10x256xf32, #tpu.memory_space<vmem>>, vector<1x4x256xf32>
    %1241 = vector.shape_cast %1240 : vector<1x4x256xf32> to vector<4x256xf32>
    %1242 = vector.broadcast %1143 : vector<1x256xf32> to vector<4x256xf32>
    %1243 = arith.mulf %1241, %1242 : vector<4x256xf32>
    %1244 = arith.addf %1239, %1243 : vector<4x256xf32>
    %c1_661 = arith.constant 1 : index
    %c6_662 = arith.constant 6 : index
    %c0_663 = arith.constant 0 : index
    %1245 = vector.load %arg13[%c1_661, %c6_662, %c0_663] : memref<2x10x256xf32, #tpu.memory_space<vmem>>, vector<1x4x256xf32>
    %1246 = vector.shape_cast %1245 : vector<1x4x256xf32> to vector<4x256xf32>
    %1247 = arith.mulf %1246, %1150 : vector<4x256xf32>
    %1248 = arith.addf %1244, %1247 : vector<4x256xf32>
    %1249 = vector.broadcast %1097 : vector<1x256xf32> to vector<4x256xf32>
    %1250 = arith.mulf %1248, %1249 : vector<4x256xf32>
    %1251 = vector.broadcast %1098 : vector<1x256xf32> to vector<4x256xf32>
    %1252 = arith.addf %1250, %1251 : vector<4x256xf32>
    %cst_664 = arith.constant 0.000000e+00 : f32
    %cst_665 = arith.constant 6.000000e+00 : f32
    %1253 = vector.broadcast %cst_664 : f32 to vector<4x256xf32>
    %1254 = arith.maximumf %1253, %1252 : vector<4x256xf32>
    %1255 = vector.broadcast %cst_665 : f32 to vector<4x256xf32>
    %1256 = arith.minimumf %1255, %1254 : vector<4x256xf32>
    %1257 = arith.truncf %1256 : vector<4x256xf32> to vector<4x256xbf16>
    %c4_666 = arith.constant 4 : index
    %c0_667 = arith.constant 0 : index
    %1258 = vector.load %arg18[%c4_666, %c0_667] : memref<8x256xbf16, #tpu.memory_space<vmem>>, vector<4x256xbf16>
    tpu.vector_store %arg18[%c4_666, %c0_667], %1257 {strides = array<i32>} : memref<8x256xbf16, #tpu.memory_space<vmem>>, vector<4x256xbf16>,
    %c864 = arith.constant 864 : index
    %c0_668 = arith.constant 0 : index
    %1259 = vector.load %arg5[%c864, %c0_668] : memref<1120x256xbf16, #tpu.memory_space<vmem>>, vector<256x256xbf16>
    %c0_669 = arith.constant 0 : index
    %c0_670 = arith.constant 0 : index
    %1260 = vector.load %arg18[%c0_669, %c0_670] : memref<8x256xbf16, #tpu.memory_space<vmem>>, vector<8x256xbf16>
    %cst_671 = arith.constant dense<0.000000e+00> : vector<8x256xf32>
    %1261 = tpu.matmul %1260, %1259, %cst_671 {dimension_numbers = #tpu.dot_dimension_numbers<[1], [0], [0], [1], [0, 0, 1, 1], [], []>} : vector<8x256xbf16>, vector<256x256xbf16>, vector<8x256xf32> -> vector<8x256xf32>
    %c28 = arith.constant 28 : index
    %c0_672 = arith.constant 0 : index
    %1262 = vector.load %arg3[%c28, %c0_672] : memref<32x256xf32, #tpu.memory_space<vmem>>, vector<1x256xf32>
    %1263 = vector.broadcast %1262 : vector<1x256xf32> to vector<8x256xf32>
    %1264 = arith.mulf %1261, %1263 : vector<8x256xf32>
    %c29 = arith.constant 29 : index
    %c0_673 = arith.constant 0 : index
    %1265 = vector.load %arg3[%c29, %c0_673] : memref<32x256xf32, #tpu.memory_space<vmem>>, vector<1x256xf32>
    %1266 = vector.broadcast %1265 : vector<1x256xf32> to vector<8x256xf32>
    %1267 = arith.addf %1264, %1266 : vector<8x256xf32>
    %cst_674 = arith.constant 0.000000e+00 : f32
    %cst_675 = arith.constant 6.000000e+00 : f32
    %1268 = vector.broadcast %cst_674 : f32 to vector<8x256xf32>
    %1269 = arith.maximumf %1268, %1267 : vector<8x256xf32>
    %1270 = vector.broadcast %cst_675 : f32 to vector<8x256xf32>
    %1271 = arith.minimumf %1270, %1269 : vector<8x256xf32>
    %1272 = vector.extract_strided_slice %1271 {offsets = [0, 0], sizes = [4, 256], strides = [1, 1]} : vector<8x256xf32> to vector<4x256xf32>
    %cst_676 = arith.constant dense<0.000000e+00> : vector<256xf32>
    %1273 = vector.multi_reduction <add>, %1272, %cst_676 [0] : vector<4x256xf32> to vector<256xf32>
    %1274 = vector.shape_cast %1273 : vector<256xf32> to vector<1x256xf32>
    %cst_677 = arith.constant 4.000000e+00 : f32
    %1275 = vector.broadcast %cst_677 : f32 to vector<1x256xf32>
    %1276 = arith.divf %1274, %1275 : vector<1x256xf32>
    %c0_678 = arith.constant 0 : index
    %c0_679 = arith.constant 0 : index
    %1277 = vector.load %arg19[%c0_678, %c0_679] : memref<2x256xf32, #tpu.memory_space<vmem>>, vector<1x256xf32>
    tpu.vector_store %arg19[%c0_678, %c0_679], %1276 {strides = array<i32>} : memref<2x256xf32, #tpu.memory_space<vmem>>, vector<1x256xf32>,
    %1278 = vector.extract_strided_slice %1271 {offsets = [4, 0], sizes = [4, 256], strides = [1, 1]} : vector<8x256xf32> to vector<4x256xf32>
    %cst_680 = arith.constant dense<0.000000e+00> : vector<256xf32>
    %1279 = vector.multi_reduction <add>, %1278, %cst_680 [0] : vector<4x256xf32> to vector<256xf32>
    %1280 = vector.shape_cast %1279 : vector<256xf32> to vector<1x256xf32>
    %cst_681 = arith.constant 4.000000e+00 : f32
    %1281 = vector.broadcast %cst_681 : f32 to vector<1x256xf32>
    %1282 = arith.divf %1280, %1281 : vector<1x256xf32>
    %c1_682 = arith.constant 1 : index
    %c0_683 = arith.constant 0 : index
    %1283 = vector.load %arg19[%c1_682, %c0_683] : memref<2x256xf32, #tpu.memory_space<vmem>>, vector<1x256xf32>
    tpu.vector_store %arg19[%c1_682, %c0_683], %1282 {strides = array<i32>} : memref<2x256xf32, #tpu.memory_space<vmem>>, vector<1x256xf32>,
    %c0_684 = arith.constant 0 : index
    %c0_685 = arith.constant 0 : index
    %1284 = vector.load %arg19[%c0_684, %c0_685] : memref<2x256xf32, #tpu.memory_space<vmem>>, vector<2x256xf32>
    %1285 = arith.truncf %1284 : vector<2x256xf32> to vector<2x256xbf16>
    %c0_686 = arith.constant 0 : index
    %c0_687 = arith.constant 0 : index
    %1286 = vector.load %arg8[%c0_686, %c0_687] : memref<256x128xbf16, #tpu.memory_space<vmem>>, vector<256x128xbf16>
    %cst_688 = arith.constant dense<0.000000e+00> : vector<2x128xf32>
    %1287 = tpu.matmul %1285, %1286, %cst_688 {dimension_numbers = #tpu.dot_dimension_numbers<[1], [0], [0], [1], [0, 0, 1, 1], [], []>} : vector<2x256xbf16>, vector<256x128xbf16>, vector<2x128xf32> -> vector<2x128xf32>
    %c30 = arith.constant 30 : index
    %c0_689 = arith.constant 0 : index
    %1288 = vector.load %arg3[%c30, %c0_689] : memref<32x256xf32, #tpu.memory_space<vmem>>, vector<1x128xf32>
    %1289 = vector.broadcast %1288 : vector<1x128xf32> to vector<2x128xf32>
    %1290 = arith.addf %1287, %1289 : vector<2x128xf32>
    %c0_690 = arith.constant 0 : index
    %c0_691 = arith.constant 0 : index
    %c0_692 = arith.constant 0 : index
    %1291 = vector.load %arg9[%c0_690, %c0_691, %c0_692] : memref<1x2x128xf32, #tpu.memory_space<vmem>>, vector<1x2x128xf32>
    %1292 = vector.shape_cast %1291 : vector<1x2x128xf32> to vector<2x128xf32>
    %1293 = vector.shape_cast %1290 : vector<2x128xf32> to vector<1x2x128xf32>
    tpu.vector_store %arg9[%c0_690, %c0_691, %c0_692], %1293 {strides = array<i32>} : memref<1x2x128xf32, #tpu.memory_space<vmem>>, vector<1x2x128xf32>,
    return
  }
  func.func @transform_0(%arg0: i32) -> (i32, i32) {
    %c0_i32 = arith.constant 0 : i32
    %c0_i32_0 = arith.constant 0 : i32
    return %arg0, %c0_i32 : i32, i32
  }
  func.func @transform_1(%arg0: i32) -> (i32, i32) {
    %c0_i32 = arith.constant 0 : i32
    %c0_i32_0 = arith.constant 0 : i32
    %c0_i32_1 = arith.constant 0 : i32
    return %c0_i32, %c0_i32_0 : i32, i32
  }
  func.func @transform_2(%arg0: i32) -> (i32, i32) {
    %c0_i32 = arith.constant 0 : i32
    %c0_i32_0 = arith.constant 0 : i32
    %c0_i32_1 = arith.constant 0 : i32
    return %c0_i32, %c0_i32_0 : i32, i32
  }
  func.func @transform_3(%arg0: i32) -> (i32, i32, i32) {
    %c0_i32 = arith.constant 0 : i32
    %c0_i32_0 = arith.constant 0 : i32
    %c0_i32_1 = arith.constant 0 : i32
    %c0_i32_2 = arith.constant 0 : i32
    return %c0_i32, %c0_i32_0, %c0_i32_1 : i32, i32, i32
  }
  func.func @transform_4(%arg0: i32) -> (i32, i32) {
    %c0_i32 = arith.constant 0 : i32
    %c0_i32_0 = arith.constant 0 : i32
    %c0_i32_1 = arith.constant 0 : i32
    return %c0_i32, %c0_i32_0 : i32, i32
  }
  func.func @transform_5(%arg0: i32) -> (i32, i32) {
    %c0_i32 = arith.constant 0 : i32
    %c0_i32_0 = arith.constant 0 : i32
    %c0_i32_1 = arith.constant 0 : i32
    return %c0_i32, %c0_i32_0 : i32, i32
  }
  func.func @transform_6(%arg0: i32) -> (i32, i32) {
    %c0_i32 = arith.constant 0 : i32
    %c0_i32_0 = arith.constant 0 : i32
    %c0_i32_1 = arith.constant 0 : i32
    return %c0_i32, %c0_i32_0 : i32, i32
  }
  func.func @transform_7(%arg0: i32) -> (i32, i32) {
    %c0_i32 = arith.constant 0 : i32
    %c0_i32_0 = arith.constant 0 : i32
    %c0_i32_1 = arith.constant 0 : i32
    return %c0_i32, %c0_i32_0 : i32, i32
  }
  func.func @transform_8(%arg0: i32) -> (i32, i32, i32) {
    %c0_i32 = arith.constant 0 : i32
    %c0_i32_0 = arith.constant 0 : i32
    %c0_i32_1 = arith.constant 0 : i32
    return %arg0, %c0_i32, %c0_i32_0 : i32, i32, i32
  }
}

</mosaic_0001>

<bundles_post_ra>
// kernel: student_net_forward.1
= control target key start
LH: loop header
LB: loop body
LE: loop exit
PB: predicated region body
PF: predicated region fallthrough
CT: control target
= control target key end

     0   :  { %vm191_vm0 = vcmask 1044480   ;;  %vm192_vm1 = vcmask 1045504   ;;  %v5756_v2 = vmov 65535   ;;  %vm166_vm2 = vcmask 220160   ;;  %s8905_s0 = inlined_call_operand.vmem [shape: bf16[128,27], index: 0, kind: input, shape index: {}]   ;;  %s8906_s1 = inlined_call_operand.vmem [shape: bf16[27,32], index: 1, kind: input, shape index: {}]   ;;  %s8907_s2 = inlined_call_operand.vmem [shape: f32[32,256], index: 2, kind: input, shape index: {}]   ;;  %s8908_s3 = inlined_call_operand.vmem [shape: f32[7,9,256], index: 3, kind: input, shape index: {}]   ;;  %s8909_s4 = inlined_call_operand.vmem [shape: bf16[1120,256], index: 4, kind: input, shape index: {}]   ;;  %s8910_s5 = inlined_call_operand.vmem [shape: bf16[16,64], index: 5, kind: input, shape index: {}]   ;;  %s8911_s6 = inlined_call_operand.vmem [shape: bf16[4,16], index: 6, kind: input, shape index: {}]   ;;  %s8912_s7 = inlined_call_operand.vmem [shape: bf16[256,128], index: 7, kind: input, shape index: {}]   ;;  %s8913_s8 = inlined_call_operand.hbm [shape: f32[1,2,128], index: 8, kind: output, shape index: {}]  }
   0x1   :  { %v5514_v0 = vld [vmem:[%s8906_s1] sm:$0xff]   ;;  %v5515_v1 = vld [vmem:[%s8906_s1 + $0x8] sm:$0x3f]   ;;  %v193_v3 = vsel %vm191_vm0, 4294967295, %v5756_v2  ;;  %vm8923_vm3 = vcmask 261120   ;;  %v5518_v8 = vld [vmem:[%s8905_s0 + $0x10] sm:$0xff]  }
   0x2   :  { %5400 = vmatprep.subr.bf16.mxu0 %v5514_v0  ;;  %v5516_v4 = vld [vmem:[%s8905_s0] sm:$0xff]   ;;  %v194_v5 = vsel %vm192_vm1, %v193_v3, 0  ;;  %v5517_v7 = vld [vmem:[%s8905_s0 + $0x8] sm:$0xff]   ;;  %v8916_v9 = vmov 0.0   ;;  %v5519_v10 = vld [vmem:[%s8905_s0 + $0x18] sm:$0xff]  }
   0x3   :  { %5401 = vmatpush3.bf16.msra.mxu0 %v5514_v0  ;;  %v196_v6 = vand.u32 %v5515_v1, %v194_v5  ;;  %5404 = vmatprep.mubr.msk.bf16.mxu0 %vm166_vm2, %v5516_v4  ;;  %35 = vst.msk [vmem:[#allocation2 + $0x18] sm:$0xff] %vm8923_vm3, %v8916_v9  ;;  %36 = vst.msk [vmem:[#allocation2 + $0x20] sm:$0xff] %vm8923_vm3, %v8916_v9  ;;  %v5520_v11 = vld [vmem:[%s8905_s0 + $0x20] sm:$0xff]   ;;  %v5521_v12 = vld [vmem:[%s8905_s0 + $0x28] sm:$0xff]  }
   0x4   :  { %32 = vst.msk [vmem:[#allocation2] sm:$0xff] %vm8923_vm3, %v8916_v9  ;;  %33 = vst.msk [vmem:[#allocation2 + $0x8] sm:$0xff] %vm8923_vm3, %v8916_v9  ;;  %v5522_v13 = vld [vmem:[%s8905_s0 + $0x30] sm:$0xff]   ;;  %v5523_v14 = vld [vmem:[%s8905_s0 + $0x38] sm:$0xff]  }
   0x5   :  { %5402 = vmatprep.subr.bf16.mxu0 %v196_v6  ;;  %34 = vst.msk [vmem:[#allocation2 + $0x10] sm:$0xff] %vm8923_vm3, %v8916_v9  ;;  %37 = vst.msk [vmem:[#allocation2 + $0x28] sm:$0xff] %vm8923_vm3, %v8916_v9 }
   0x6   :  { %38 = vst.msk [vmem:[#allocation2 + $0x30] sm:$0xff] %vm8923_vm3, %v8916_v9  ;;  %39 = vst.msk [vmem:[#allocation2 + $0x38] sm:$0xff] %vm8923_vm3, %v8916_v9 }
   0x7   :  { %5403 = vmatpush3.bf16.msra.mxu0 %v196_v6  ;;  %40 = vst.msk [vmem:[#allocation2 + $0x40] sm:$0xff] %vm8923_vm3, %v8916_v9  ;;  %41 = vst.msk [vmem:[#allocation2 + $0x48] sm:$0xff] %vm8923_vm3, %v8916_v9 }
   0x8   :  { %44 = vst.msk [vmem:[#allocation2 + $0x58] sm:$0xff] %vm8923_vm3, %v8916_v9  ;;  %45 = vst.msk [vmem:[#allocation2 + $0x60] sm:$0xff] %vm8923_vm3, %v8916_v9  ;;  %5440 = vmatprep.subr.bf16.mxu0 %v8916_v9 }
   0x9   :  { %46 = vst.msk [vmem:[#allocation2 + $0x68] sm:$0xff] %vm8923_vm3, %v8916_v9  ;;  %47 = vst.msk [vmem:[#allocation2 + $0x70] sm:$0xff] %vm8923_vm3, %v8916_v9 }
   0xa   :  { %48 = vst.msk [vmem:[#allocation2 + $0x78] sm:$0xff] %vm8923_vm3, %v8916_v9  ;;  %49 = vst.msk [vmem:[#allocation2 + $0x80] sm:$0xff] %vm8923_vm3, %v8916_v9  ;;  %5405 = vmatmul.mubr.msk.bf16.vlgmr.msra.gmra.mrb[0].mxu0 %vm166_vm2, %v5517_v7 }
   0xb   :  { %50 = vst.msk [vmem:[#allocation2 + $0x88] sm:$0xff] %vm8923_vm3, %v8916_v9  ;;  %51 = vst.msk [vmem:[#allocation2 + $0x90] sm:$0xff] %vm8923_vm3, %v8916_v9  ;;  %5408 = vmatprep.mubr.msk.bf16.mxu0 %vm166_vm2, %v5518_v8 }
   0xc   :  { %52 = vst.msk [vmem:[#allocation2 + $0x98] sm:$0xff] %vm8923_vm3, %v8916_v9  ;;  %53 = vst.msk [vmem:[#allocation2 + $0xa0] sm:$0xff] %vm8923_vm3, %v8916_v9 }
   0xd   :  { %79 = vst [vmem:[#allocation4] sm:$0xff] %v8916_v9  ;;  %80 = vst [vmem:[#allocation4 + $0x8] sm:$0xff] %v8916_v9 }
   0xe   :  { %81 = vst [vmem:[#allocation4 + $0x10] sm:$0xff] %v8916_v9  ;;  %82 = vst [vmem:[#allocation4 + $0x18] sm:$0x3] %v8916_v9 }
   0xf   :  { %83 = vst [vmem:[#allocation4 + $0x20] sm:$0xff] %v8916_v9  ;;  %84 = vst [vmem:[#allocation4 + $0x28] sm:$0xff] %v8916_v9 }
  0x10   :  { %85 = vst [vmem:[#allocation4 + $0x30] sm:$0xff] %v8916_v9  ;;  %86 = vst [vmem:[#allocation4 + $0x38] sm:$0x3] %v8916_v9 }
  0x11   :  { %87 = vst [vmem:[#allocation5] sm:$0xff] %v8916_v9  ;;  %88 = vst [vmem:[#allocation5 + $0x8] sm:$0xff] %v8916_v9 }
  0x12   :  { %89 = vst [vmem:[#allocation5 + $0x10] sm:$0x3] %v8916_v9  ;;  %90 = vst [vmem:[#allocation5 + $0x18] sm:$0x3] %v8916_v9  ;;  %5409 = vmatmul.mubr.msk.bf16.gmra.mrb[4].mxu0 %vm166_vm2, %v5519_v10 }
  0x13   :  { %91 = vst [vmem:[#allocation5 + $0x20] sm:$0xff] %v8916_v9  ;;  %92 = vst [vmem:[#allocation5 + $0x28] sm:$0xff] %v8916_v9  ;;  %5412 = vmatprep.mubr.msk.bf16.mxu0 %vm166_vm2, %v5520_v11 }
  0x14   :  { %93 = vst [vmem:[#allocation5 + $0x30] sm:$0x3] %v8916_v9  ;;  %94 = vst [vmem:[#allocation5 + $0x38] sm:$0x3] %v8916_v9 }
  0x1a   :  { %5413 = vmatmul.mubr.msk.bf16.gmra.mrb[8].mxu0 %vm166_vm2, %v5521_v12 }
  0x1b   :  { %5416 = vmatprep.mubr.msk.bf16.mxu0 %vm166_vm2, %v5522_v13 }
  0x22   :  { %5417 = vmatmul.mubr.msk.bf16.gmra.mrb[12].mxu0 %vm166_vm2, %v5523_v14 }
  0x23   :  { %13 = vsyncpa [#allocation13], 0  ;;  %v5524_v15 = vld [vmem:[%s8909_s4] ss:$8 sps:$4 sm:$0xff]   ;;  %v5525_v16 = vld [vmem:[%s8909_s4 + $0x10] ss:$8 sps:$4 sm:$0xff]   ;;  %v8914_v17 = vlaneseq }
  0x24   :  { %5420 = vmatprep.subr.bf16.mxu1 %v5524_v15  ;;  %vm42_vm4 = vcmask 254976   ;;  %v361_v20 = vld [vmem:[%s8908_s3] sm:$0xff]  ;;  %v9082_v27 = vmov 0  ;;  %v9089_v39 = vmov 0  ;;  %v9093_v46 = vmov 0  ;;  %s5761_s27 = smov [#allocation12]  }
  0x25   :  { %5421 = vmatpush3.bf16.msra.mxu1 %v5524_v15  ;;  %43 = vst.msk [vmem:[#allocation2 + $0x50] sm:$0x3] %vm42_vm4, %v8916_v9  ;;  %54 = vst.msk [vmem:[#allocation2 + $0xa8] sm:$0x3] %vm42_vm4, %v8916_v9  ;;  %v5912_v18 = vshrl.u32 %v8914_v17, 7  ;;  %v510_v35 = vld [vmem:[#allocation2] sm:$0xff] }
  0x26   :  { %5422 = vmatprep.subr.bf16.mxu1 %v5525_v16  ;;  %v534_v36 = vld [vmem:[#allocation2 + $0x1] sm:$0xff]  ;;  %v9097_v51 = vmov 0  ;;  %v9101_v54 = vmov 0  ;;  %v9104_v55 = vmov 0  ;;  %v9107_v56 = vmov 0  ;;  %s5081_s0 = sshll.u32 %s5761_s27, 4  ;;  %s5082_s0 = int_to_ptr.vmem [resolvable:$true] %s5081_s0 }
  0x27   :  { %9078 = vst [vmem:[#allocation15_spill] sm:$0xff] %v5912_v18  ;;  %v5915_v19 = vsub.s32 0, %v5912_v18  ;;  %v5921_v21 = vadd.s32 8, %v5912_v18  ;;  %v374_v22 = vand.u32 7, %v5912_v18  ;;  %v5925_v23 = vsub.s32 1, %v5912_v18  ;;  %s5732_s28 = scalar_lea.vmem %s5082_s0, 32  ;;  %p5737_p1 = scmp.lt.s32.totalorder %s5082_s0, %s5082_s0 }
  0x28   :  { %v368_v25 = vadd.s32 16, %v5912_v18  ;;  %v369_v28 = vadd.s32 24, %v5912_v18  ;;  %v5938_v29 = vsub.s32 4, %v5912_v18  ;;  %v5941_v30 = vsub.s32 2, %v5912_v18  ;;  %v6087_v15 = vld [vmem:[%s8907_s2] ss:$0 sm:$0xff]  ;;  %p5733_p0 = scmp.ne.s32.totalorder %s5082_s0, %s5732_s28  ;;  %p5738_p2 = scmp.lt.s32.totalorder %s5732_s28, %s5732_s28 }
  0x29   :  { %5423 = vmatpush3.bf16.msra.mxu1 %v5525_v16  ;;  %9079 = vst [vmem:[#allocation16_spill] sm:$0xff] %v5915_v19  ;;  %9080 = vst [vmem:[#allocation17_spill] sm:$0xff] %v5921_v21  ;;  %v5928_v24 = vrot.slane %v361_v20, %v5915_v19  ;;  %v375_v26 = vand.u32 7, %v5921_v21  ;;  %vm5932_vm5 = vcmp.ne.s32.totalorder %v374_v22, 0  ;;  %v370_v31 = vadd.s32 32, %v5912_v18 }
  0x2a   :  { %5452 = vmatprep.subr.bf16.mxu1 %v8916_v9  ;;  %9081 = vst [vmem:[#allocation18_spill] sm:$0xff] %v5925_v23  ;;  %v9083_v27 = vsel %vm5932_vm5, 4294967295, %v9082_v27  ;;  %9085 = vst [vmem:[#allocation20_spill] sm:$0xff] %v5938_v29  ;;  %v5945_v32 = vrot.slane %v361_v20, %v5925_v23  ;;  %v5948_v33 = vsub.s32 3, %v5912_v18  ;;  %v376_v37 = vand.u32 7, %v368_v25  ;;  %p5739_p3 = por %p5738_p2, %p5737_p1 }
  0x2b   :  { %9084 = vst [vmem:[#allocation19_spill] sm:$0xff] %v9083_v27  ;;  %9086 = vst [vmem:[#allocation21_spill] sm:$0xff] %v5941_v30  ;;  %v5953_v34 = vsel %vm5932_vm5, %v5928_v24, 0.0  ;;  %v5956_v38 = vsub.s32 5, %v5912_v18  ;;  %vm5958_vm6 = vcmp.ne.s32.totalorder %v375_v26, 0  ;;  %v377_v40 = vand.u32 7, %v369_v28 }
  0x2c   :  { %9087 = vst [vmem:[#allocation22_spill] sm:$0xff] %v5948_v33  ;;  %v9090_v39 = vsel %vm5958_vm6, 4294967295, %v9089_v39  ;;  %v5963_v41 = vsub.s32 6, %v5912_v18  ;;  %v5966_v42 = vrot.slane %v361_v20, %v5938_v29  ;;  %v5969_v43 = vrot.slane %v361_v20, %v5941_v30  ;;  %p5740_p4 = pnand %p5739_p3, %p5733_p0 }
  0x2d   :  { %9088 = vst [vmem:[#allocation23_spill] sm:$0xff] %v5956_v38  ;;  %9091 = vst [vmem:[#allocation24_spill] sm:$0xff] %v9090_v39  ;;  %v378_v44 = vand.u32 7, %v370_v31  ;;  %v5972_v45 = vadd.s32 40, %v5912_v18  ;;  %vm5974_vm7 = vcmp.ne.s32.totalorder %v374_v22, 7  ;;  %v5979_v47 = vrot.slane %v361_v20, %v5948_v33 }
  0x2e   :  { %9092 = vst [vmem:[#allocation25_spill] sm:$0xff] %v5963_v41  ;;  %v9094_v46 = vsel %vm5974_vm7, 4294967295, %v9093_v46  ;;  %v518_v48 = vmul.f32 %v510_v35, %v5953_v34  ;;  %v546_v49 = vmul.f32 %v5945_v32, %v534_v36  ;;  %v5986_v50 = vsel %vm5958_vm6, %v5928_v24, 0.0 }
  0x2f   :  { %9095 = vst [vmem:[#allocation26_spill] sm:$0xff] %v9094_v46  ;;  %9096 = vst [vmem:[#allocation27_spill] sm:$0xff] %v5986_v50  ;;  %vm5988_vm8 = vcmp.ne.s32.totalorder %v376_v37, 0  ;;  %v5993_v52 = vrot.slane %v361_v20, %v5956_v38  ;;  %v5996_v53 = vsub.s32 7, %v5912_v18  ;;  %vm5998_vm9 = vcmp.ne.s32.totalorder %v377_v40, 0 }
  0x30   :  { %v9098_v51 = vsel %vm5988_vm8, 4294967295, %v9097_v51  ;;  %v9102_v54 = vsel %vm5998_vm9, 4294967295, %v9101_v54  ;;  %vm6002_vm10 = vcmp.ne.s32.totalorder %v376_v37, 7  ;;  %vm6006_vm11 = vcmp.ne.s32.totalorder %v377_v40, 7 }
  0x31   :  { %9099 = vst [vmem:[#allocation28_spill] sm:$0xff] %v9098_v51  ;;  %9100 = vst [vmem:[#allocation29_spill] sm:$0xff] %v5996_v53  ;;  %v9105_v55 = vsel %vm6002_vm10, 4294967295, %v9104_v55  ;;  %v9108_v56 = vsel %vm6006_vm11, 4294967295, %v9107_v56  ;;  %v6011_v57 = vrot.slane %v361_v20, %v5963_v41  ;;  %vm6013_vm12 = vcmp.ne.s32.totalorder %v378_v44, 0 }
  0x32   :  { %9103 = vst [vmem:[#allocation30_spill] sm:$0xff] %v9102_v54  ;;  %9106 = vst [vmem:[#allocation31_spill] sm:$0xff] %v9105_v55  ;;  %v9110_v58 = vmov 0  ;;  %v8915_v59 = vand.u32 7, %v5972_v45  ;;  %v372_v60 = vadd.s32 48, %v5912_v18  ;;  %v373_v61 = vadd.s32 56, %v5912_v18 }
  0x33   :  { %9109 = vst [vmem:[#allocation32_spill] sm:$0xff] %v9108_v56  ;;  %v9111_v58 = vsel %vm6013_vm12, 4294967295, %v9110_v58  ;;  %v6023_v62 = vsel %vm5974_vm7, %v5969_v43, 0.0  ;;  %v6028_v63 = vsel %vm5932_vm5, %v5979_v47, 0.0  ;;  %v6030_v0 = vadd.f32 %v546_v49, %v518_v48  ;;  %v6167_v18 = vld [vmem:[%s8908_s3 + $0x10] ss:$0 sm:$0xff] }
  0x34   :  { %9112 = vst [vmem:[#allocation33_spill] sm:$0xff] %v9111_v58  ;;  %9113 = vst [vmem:[#allocation34_spill] sm:$0xff] %v6023_v62  ;;  %vm6032_vm13 = vcmp.ne.s32.totalorder %v375_v26, 7  ;;  %v9114_v1 = vmov 0  ;;  %v6039_v2 = vsel %vm6006_vm11, %v5969_v43, 0.0  ;;  %v6044_v3 = vsel %vm5998_vm9, %v5979_v47, 0.0 }
  0x35   :  { %v9115_v1 = vsel %vm6032_vm13, 4294967295, %v9114_v1  ;;  %9117 = vst [vmem:[#allocation36_spill] sm:$0xff] %v6044_v3  ;;  %v6049_v4 = vsel %vm6002_vm10, %v5993_v52, 0.0  ;;  %v6052_v5 = vrot.slane %v361_v20, %v5996_v53  ;;  %v6057_v6 = vsel %vm6013_vm12, %v5928_v24, 0.0  ;;  %v6112_v26 = vld [vmem:[%s8907_s2 + $0x1] ss:$0 sm:$0xff] }
  0x36   :  { %9116 = vst [vmem:[#allocation35_spill] sm:$0xff] %v9115_v1  ;;  %9118 = vst [vmem:[#allocation37_spill] sm:$0xff] %v6057_v6  ;;  %v6062_v7 = vsel %vm5988_vm8, %v6011_v57, 0.0  ;;  %v6067_v8 = vsel %vm5988_vm8, %v5928_v24, 0.0  ;;  %v6072_v10 = vsel %vm5998_vm9, %v5928_v24, 0.0  ;;  %vm6076_vm14 = vcmp.ne.s32.totalorder %v8915_v59, 0 }
  0x37   :  { %9119 = vst [vmem:[#allocation38_spill] sm:$0xff] %v6067_v8  ;;  %9120 = vst [vmem:[#allocation39_spill] sm:$0xff] %v6072_v10  ;;  %v9121_v11 = vmov 0  ;;  %vm6080_vm15 = vcmp.ne.s32.totalorder %v378_v44, 7  ;;  %v9124_v12 = vmov 0  ;;  %v380_v13 = vand.u32 7, %v372_v60 }
  0x38   :  { %v9122_v11 = vsel %vm6076_vm14, 4294967295, %v9121_v11  ;;  %v9125_v12 = vsel %vm6080_vm15, 4294967295, %v9124_v12  ;;  %v381_v14 = vand.u32 7, %v373_v61  ;;  %v6092_v16 = vsel %vm6032_vm13, %v5969_v43, 0.0 }
  0x39   :  { %9123 = vst [vmem:[#allocation40_spill] sm:$0xff] %v9122_v11  ;;  %9126 = vst [vmem:[#allocation41_spill] sm:$0xff] %v9125_v12  ;;  %v6097_v20 = vsel %vm6002_vm10, %v5969_v43, 0.0  ;;  %v6102_v22 = vsel %vm5958_vm6, %v5979_v47, 0.0  ;;  %v6107_v25 = vsel %vm5988_vm8, %v5979_v47, 0.0  ;;  %v6117_v28 = vsel %vm5974_vm7, %v5993_v52, 0.0 }
  0x3a   :  { %9127 = vst [vmem:[#allocation42_spill] sm:$0xff] %v6092_v16  ;;  %9128 = vst [vmem:[#allocation43_spill] sm:$0xff] %v6102_v22  ;;  %v6122_v31 = vsel %vm6032_vm13, %v5993_v52, 0.0  ;;  %v6127_v35 = vsel %vm5932_vm5, %v6011_v57, 0.0  ;;  %v6132_v36 = vsel %vm5958_vm6, %v6011_v57, 0.0  ;;  %v6137_v40 = vsel %vm6076_vm14, %v5928_v24, 0.0 }
  0x3b   :  { %9129 = vst [vmem:[#allocation44_spill] sm:$0xff] %v6107_v25  ;;  %9130 = vst [vmem:[#allocation45_spill] sm:$0xff] %v6117_v28  ;;  %v6142_v44 = vsel %vm6080_vm15, %v5969_v43, 0.0  ;;  %v6147_v48 = vsel %vm6013_vm12, %v5979_v47, 0.0  ;;  %v6152_v49 = vsel %vm6006_vm11, %v5993_v52, 0.0  ;;  %vm6155_vm0 = vcmp.ne.s32.totalorder %v381_v14, 0 }
  0x3c   :  { %9131 = vst [vmem:[#allocation46_spill] sm:$0xff] %v6122_v31  ;;  %9132 = vst [vmem:[#allocation47_spill] sm:$0xff] %v6127_v35  ;;  %v9136_v17 = vmov 0  ;;  %vm6159_vm1 = vcmp.ne.s32.totalorder %v380_v13, 7  ;;  %v9139_v59 = vmov 0  ;;  %vm8952_vm2 = vcmask 523264  }
  0x3d   :  { %9133 = vst [vmem:[#allocation48_spill] sm:$0xff] %v6132_v36  ;;  %9134 = vst [vmem:[#allocation49_spill] sm:$0xff] %v6137_v40  ;;  %v9137_v17 = vsel %vm6155_vm0, 4294967295, %v9136_v17  ;;  %v9140_v59 = vsel %vm6159_vm1, 4294967295, %v9139_v59  ;;  %vm6174_vm4 = vcmp.ne.s32.totalorder %v380_v13, 0  ;;  %v9142_v53 = vmov 0 }
  0x3e   :  { %9135 = vst [vmem:[#allocation50_spill] sm:$0xff] %v6142_v44  ;;  %9138 = vst [vmem:[#allocation51_spill] sm:$0xff] %v9137_v17  ;;  %v9143_v53 = vsel %vm6174_vm4, 4294967295, %v9142_v53  ;;  %vm6178_vm3 = vcmp.ne.s32.totalorder %v381_v14, 7  ;;  %v9145_v51 = vmov 0  ;;  %v6227_v29 = vsel %vm6002_vm10, %v6167_v18, 0.0 }
  0x3f   :  { %9141 = vst [vmem:[#allocation52_spill] sm:$0xff] %v9140_v59  ;;  %9144 = vst [vmem:[#allocation53_spill] sm:$0xff] %v9143_v53  ;;  %v9146_v51 = vsel %vm6178_vm3, 4294967295, %v9145_v51  ;;  %v9149_v41 = vand.u32 7, %v5972_v45  ;;  %v9150_v39 = vmov 0  ;;  %v6251_v45 = vsel %vm6178_vm3, %v5969_v43, 0.0 }
  0x40   :  { %9147 = vst [vmem:[#allocation54_spill] sm:$0xff] %v9146_v51  ;;  %v6262_v30 = vsel %vm6178_vm3, %v5993_v52, 0.0  ;;  %v769_v17 = vld [vmem:[#allocation2 + $0x59] sm:$0xff] }
  0x41   :  { %9154 = vst [vmem:[#allocation57_spill] sm:$0xff] %v6262_v30  ;;  %v6282_v30 = vsel %vm6174_vm4, %v5928_v24, 0.0 }
  0x42   :  { %9158 = vst [vmem:[#allocation61_spill] sm:$0xff] %v6282_v30  ;;  %v745_v30 = vld [vmem:[#allocation2 + $0x58] sm:$0xff] }
  0xdd   :  { %v5406_v37 = vpop.f32.mrb[0].mxu0 }
  0xde   :  { %v298_v60 = vmul.f32 %v5406_v37, %v6087_v15  ;;  %v232_v61 = vpop.f32.mrb[1].mxu0  ;;  %v6172_v37 = vsel %vm5998_vm9, %v6011_v57, 0.0  ;;  %vm6231_vm9 = vcmp.ne.s32.totalorder %v9149_v41, 7 }
  0xdf   :  { %v296_v9 = vmul.f32 %v6087_v15, %v232_v61  ;;  %v5407_v21 = vpop.f32.mrb[2].mxu0  ;;  %v9148_v61 = vmov 0.0   ;;  %v9151_v39 = vsel %vm6231_vm9, 4294967295, %v9150_v39  ;;  %v6272_v23 = vsel %vm6231_vm9, %v6167_v18, 0.0 }
  0xe0   :  { %59 = vst.msk [vmem:[#allocation3 + $0x18] sm:$0xff] %vm8952_vm2, %v9148_v61  ;;  %60 = vst.msk [vmem:[#allocation3 + $0x20] sm:$0xff] %vm8952_vm2, %v9148_v61  ;;  %v315_v13 = vadd.f32 %v6112_v26, %v298_v60  ;;  %v299_v14 = vmul.f32 %v5407_v21, %v6087_v15  ;;  %v235_v54 = vpop.f32.mrb[3].mxu0  ;;  %v6240_v21 = vsel %vm6155_vm0, %v5979_v47, 0.0  ;;  %v6245_v60 = vsel %vm6159_vm1, %v5993_v52, 0.0 }
  0xe1   :  { %56 = vst.msk [vmem:[#allocation3] sm:$0xff] %vm8952_vm2, %v9148_v61  ;;  %57 = vst.msk [vmem:[#allocation3 + $0x8] sm:$0xff] %vm8952_vm2, %v9148_v61  ;;  %v313_v38 = vadd.f32 %v6112_v26, %v296_v9  ;;  %v6256_v9 = vsel %vm6174_vm4, %v6011_v57, 0.0  ;;  %v6324_v59 = vsel %vm6231_vm9, %v5993_v52, 0.0 }
  0xe2   :  { %58 = vst.msk [vmem:[#allocation3 + $0x10] sm:$0xff] %vm8952_vm2, %v9148_v61  ;;  %61 = vst.msk [vmem:[#allocation3 + $0x28] sm:$0xff] %vm8952_vm2, %v9148_v61  ;;  %v331_v55 = vmax.f32 %v315_v13, 0.0  ;;  %v316_v41 = vadd.f32 %v6112_v26, %v299_v14  ;;  %v6267_v13 = vsel %vm6155_vm0, %v6011_v57, 0.0 }
  0xe3   :  { %62 = vst.msk [vmem:[#allocation3 + $0x30] sm:$0xff] %vm8952_vm2, %v9148_v61  ;;  %63 = vst.msk [vmem:[#allocation3 + $0x38] sm:$0xff] %vm8952_vm2, %v9148_v61 }
  0xe4   :  { %64 = vst.msk [vmem:[#allocation3 + $0x40] sm:$0xff] %vm8952_vm2, %v9148_v61  ;;  %65 = vst.msk [vmem:[#allocation3 + $0x48] sm:$0xff] %vm8952_vm2, %v9148_v61  ;;  %v347_v14 = vmin.f32 %v331_v55, 6.0  ;;  %v332_v27 = vmax.f32 %v316_v41, 0.0  ;;  %v6287_v55 = vsel %vm6155_vm0, %v5928_v24, 0.0 }
  0xe5   :  { %68 = vst.msk [vmem:[#allocation3 + $0x58] sm:$0xff] %vm8952_vm2, %v9148_v61  ;;  %69 = vst.msk [vmem:[#allocation3 + $0x60] sm:$0xff] %vm8952_vm2, %v9148_v61 }
  0xe6   :  { %70 = vst.msk [vmem:[#allocation3 + $0x68] sm:$0xff] %vm8952_vm2, %v9148_v61  ;;  %71 = vst.msk [vmem:[#allocation3 + $0x70] sm:$0xff] %vm8952_vm2, %v9148_v61  ;;  %v348_v41 = vmin.f32 %v332_v27, 6.0 }
  0xe7   :  { %72 = vst.msk [vmem:[#allocation3 + $0x78] sm:$0xff] %vm8952_vm2, %v9148_v61  ;;  %73 = vst.msk [vmem:[#allocation3 + $0x80] sm:$0xff] %vm8952_vm2, %v9148_v61 }
  0xe8   :  { %74 = vst.msk [vmem:[#allocation3 + $0x88] sm:$0xff] %vm8952_vm2, %v9148_v61  ;;  %75 = vst.msk [vmem:[#allocation3 + $0x90] sm:$0xff] %vm8952_vm2, %v9148_v61 }
  0xe9   :  { %76 = vst.msk [vmem:[#allocation3 + $0x98] sm:$0xff] %vm8952_vm2, %v9148_v61  ;;  %77 = vst.msk [vmem:[#allocation3 + $0xa0] sm:$0xff] %vm8952_vm2, %v9148_v61  ;;  %v297_v61 = vmul.f32 %v6087_v15, %v235_v54  ;;  %v329_v54 = vmax.f32 %v313_v38, 0.0  ;;  %v6277_v38 = vsel %vm6159_vm1, %v6167_v18, 0.0  ;;  %vm9159_vm2 = vcmask 261120  }
  0xea   :  { %9152 = vst [vmem:[#allocation55_spill] sm:$0xff] %v9151_v39  ;;  %9153 = vst [vmem:[#allocation56_spill] sm:$0xff] %v6256_v9  ;;  %v5410_v9 = vpop.f32.mrb[4].mxu0 }
  0xeb   :  { %v314_v33 = vadd.f32 %v6112_v26, %v297_v61  ;;  %9155 = vst [vmem:[#allocation58_spill] sm:$0xff] %v6267_v13  ;;  %9156 = vst [vmem:[#allocation59_spill] sm:$0xff] %v6272_v23  ;;  %v345_v61 = vmin.f32 %v329_v54, 6.0  ;;  %v302_v23 = vmul.f32 %v5410_v9, %v6087_v15  ;;  %v248_v13 = vpop.f32.mrb[5].mxu0  ;;  %v6299_v54 = vsel %vm6159_vm1, %v5969_v43, 0.0 }
  0xec   :  { %9157 = vst [vmem:[#allocation60_spill] sm:$0xff] %v6277_v38  ;;  %504 = vst.msk [vmem:[#allocation2 + $0x19] sm:$0xff] %vm9159_vm2, %v347_v14  ;;  %v300_v27 = vmul.f32 %v6087_v15, %v248_v13  ;;  %v5411_v14 = vpop.f32.mrb[6].mxu0  ;;  %v6306_v9 = vsel %vm6076_vm14, %v5979_v47, 0.0  ;;  %v6319_v13 = vsel %vm6080_vm15, %v5993_v52, 0.0  ;;  %v6340_v52 = vsel %vm6076_vm14, %v6011_v57, 0.0 }
  0xed   :  { %v330_v19 = vmax.f32 %v314_v33, 0.0  ;;  %v6294_v33 = vsel %vm6231_vm9, %v5969_v43, 0.0  ;;  %9161 = vst [vmem:[#allocation63_spill] sm:$0xff] %v6299_v54  ;;  %vm9162_vm0 = vmmov %vm9159_vm2  ;;  %v319_v43 = vadd.f32 %v6112_v26, %v302_v23  ;;  %v753_v23 = vmul.f32 %v745_v30, %v5953_v34  ;;  %v679_v34 = vld [vmem:[#allocation2 + $0x4a] sm:$0xff] }
  0xee   :  { %9160 = vst [vmem:[#allocation62_spill] sm:$0xff] %v6294_v33  ;;  %502 = vst.msk [vmem:[#allocation2 + $0x9] sm:$0xff] %vm9162_vm0, %v345_v61  ;;  %v6311_v33 = vsel %vm6174_vm4, %v5979_v47, 0.0  ;;  %v303_v61 = vmul.f32 %v5411_v14, %v6087_v15  ;;  %v317_v47 = vadd.f32 %v6112_v26, %v300_v27  ;;  %v777_v14 = vmul.f32 %v769_v17, %v5945_v32 }
  0xef   :  { %v346_v24 = vmin.f32 %v330_v19, 6.0  ;;  %9163 = vst [vmem:[#allocation64_spill] sm:$0xff] %v6306_v9  ;;  %9164 = vst [vmem:[#allocation65_spill] sm:$0xff] %v6311_v33  ;;  %v251_v19 = vpop.f32.mrb[7].mxu0  ;;  %v335_v53 = vmax.f32 %v319_v43, 0.0  ;;  %v6348_v17 = vsel %vm6006_vm11, %v6167_v18, 0.0 }
  0xf0   :  { %vm9165_vm2 = vmmov %vm9162_vm0  ;;  %9166 = vst [vmem:[#allocation66_spill] sm:$0xff] %v6319_v13  ;;  %v320_v33 = vadd.f32 %v6112_v26, %v303_v61  ;;  %v6335_v13 = vsel %vm6013_vm12, %v6011_v57, 0.0  ;;  %v333_v27 = vmax.f32 %v317_v47, 0.0  ;;  %v6353_v30 = vsel %vm6178_vm3, %v6167_v18, 0.0  ;;  %v885_v43 = vld [vmem:[#allocation2 + $0xa1] sm:$0xff]  ;;  %v5414_v51 = vpop.f32.mrb[8].mxu0 }
  0xf1   :  { %505 = vst.msk [vmem:[#allocation2 + $0x21] sm:$0xff] %vm9165_vm2, %v348_v41  ;;  %9167 = vst [vmem:[#allocation67_spill] sm:$0xff] %v6324_v59  ;;  %v301_v41 = vmul.f32 %v6087_v15, %v251_v19  ;;  %v351_v61 = vmin.f32 %v335_v53, 6.0  ;;  %v6358_v47 = vsel %vm6080_vm15, %v6167_v18, 0.0  ;;  %v6367_v58 = vadd.f32 %v777_v14, %v753_v23 }
  0xf2   :  { %503 = vst.msk [vmem:[#allocation2 + $0x11] sm:$0xff] %vm9162_vm0, %v346_v24  ;;  %9168 = vst [vmem:[#allocation68_spill] sm:$0xff] %v6335_v13  ;;  %v658_v24 = vld [vmem:[#allocation2 + $0x49] sm:$0xff]  ;;  %v336_v57 = vmax.f32 %v320_v33, 0.0  ;;  %v349_v11 = vmin.f32 %v333_v27, 6.0  ;;  %v6372_v53 = vsel %vm5974_vm7, %v6167_v18, 0.0  ;;  %v6382_v23 = vmul.f32 %v679_v34, %v6353_v30 }
  0xf3   :  { %9169 = vst [vmem:[#allocation69_spill] sm:$0xff] %v6340_v52  ;;  %v6343_v19 = vadd.f32 %v6112_v26, %v301_v41  ;;  %9170 = vst [vmem:[#allocation70_spill] sm:$0xff] %v6348_v17  ;;  %v6363_v41 = vsel %vm6032_vm13, %v6167_v18, 0.0  ;;  %v6365_v39 = vld [vmem:[#allocation2 + $0x19] sm:$0xff]  ;;  %v6375_v33 = vmul.f32 %v6052_v5, %v658_v24  ;;  %v6379_v27 = vpop.f32.mrb[9].mxu0  ;;  %v6385_v14 = vmul.f32 %v885_v43, %v6052_v5 }
  0xf4   :  { %9171 = vst [vmem:[#allocation71_spill] sm:$0xff] %v6353_v30  ;;  %9172 = vst [vmem:[#allocation72_spill] sm:$0xff] %v6358_v47  ;;  %v352_v1 = vmin.f32 %v336_v57, 6.0  ;;  %v549_v18 = vmul.f32 %v5945_v32, %v6365_v39  ;;  %v6395_v34 = vpop.f32.mrb[10].mxu0  ;;  %v6399_v43 = vmul.f32 %v5966_v42, %v6365_v39  ;;  %vm66_vm15 = vcmask 517120  }
  0xf5   :  { %9173 = vst [vmem:[#allocation73_spill] sm:$0xff] %v6363_v41  ;;  %9174 = vst [vmem:[#allocation74_spill] sm:$0xff] %v6365_v39  ;;  %v511_v12 = vld [vmem:[#allocation2 + $0x8] sm:$0xff] }
  0xf6   :  { %9175 = vst [vmem:[#allocation75_spill] sm:$0xff] %v6367_v58  ;;  %9176 = vst [vmem:[#allocation76_spill] sm:$0xff] %v6372_v53  ;;  %v535_v56 = vld [vmem:[#allocation2 + $0x9] sm:$0xff]  ;;  %v519_v24 = vmul.f32 %v511_v12, %v5986_v50  ;;  %v587_v17 = vmul.f32 %v511_v12, %v6028_v63 }
  0xf7   :  { %9177 = vst [vmem:[#allocation77_spill] sm:$0xff] %v6375_v33  ;;  %v562_v47 = vld [vmem:[#allocation2 + $0x2] sm:$0xff]  ;;  %vm9178_vm2 = vmmov %vm9162_vm0  ;;  %v547_v46 = vmul.f32 %v5945_v32, %v535_v56  ;;  %v608_v52 = vmul.f32 %v5966_v42, %v535_v56 }
  0xf8   :  { %508 = vst.msk [vmem:[#allocation2 + $0x39] sm:$0xff] %vm9178_vm2, %v351_v61  ;;  %9179 = vst [vmem:[#allocation78_spill] sm:$0xff] %v6382_v23  ;;  %v570_v61 = vmul.f32 %v562_v47, %v6023_v62  ;;  %v514_v57 = vld [vmem:[#allocation2 + $0x20] sm:$0xff]  ;;  %v6407_v47 = vmul.f32 %v5414_v51, %v6087_v15 }
  0xf9   :  { %9180 = vst [vmem:[#allocation79_spill] sm:$0xff] %v6385_v14  ;;  %v538_v33 = vld [vmem:[#allocation2 + $0x21] sm:$0xff]  ;;  %506 = vst.msk [vmem:[#allocation2 + $0x29] sm:$0xff] %vm9162_vm0, %v349_v11  ;;  %v522_v14 = vmul.f32 %v514_v57, %v6057_v6  ;;  %v512_v23 = vld [vmem:[#allocation2 + $0x10] sm:$0xff]  ;;  %v6409_v11 = vpop.f32.mrb[11].mxu0  ;;  %v555_v59 = vadd.f32 %v547_v46, %v519_v24  ;;  %v590_v53 = vmul.f32 %v514_v57, %v6044_v3 }
  0xfa   :  { %v6392_v41 = vld [vmem:[#allocation2 + $0x1a] sm:$0xff]  ;;  %v550_v30 = vmul.f32 %v5945_v32, %v538_v33  ;;  %v6403_v50 = vld [vmem:[#allocation2 + $0x11] sm:$0xff]  ;;  %vm9182_vm2 = vmmov %vm9162_vm0  ;;  %v578_v62 = vadd.f32 %v570_v61, %v6030_v0  ;;  %v520_v9 = vmul.f32 %v512_v23, %v6067_v8  ;;  %v6429_v46 = vmul.f32 %v514_v57, %v6062_v7  ;;  %v5418_v8 = vpop.f32.mrb[12].mxu0 }
  0xfb   :  { %9181 = vst [vmem:[#allocation80_spill] sm:$0xff] %v6392_v41  ;;  %v513_v58 = vld [vmem:[#allocation2 + $0x18] sm:$0xff]  ;;  %509 = vst.msk [vmem:[#allocation2 + $0x41] sm:$0xff] %vm9182_vm2, %v352_v1  ;;  %v573_v6 = vmul.f32 %v6392_v41, %v6039_v2  ;;  %v563_v13 = vld [vmem:[#allocation2 + $0xa] sm:$0xff]  ;;  %v611_v1 = vmul.f32 %v5966_v42, %v538_v33  ;;  %v548_v56 = vmul.f32 %v5945_v32, %v6403_v50 }
  0xfc   :  { %v558_v54 = vadd.f32 %v550_v30, %v522_v14  ;;  %v6418_v51 = vld [vmem:[#allocation2 + $0x12] sm:$0xff]  ;;  %v595_v39 = vadd.f32 %v587_v17, %v578_v62  ;;  %v521_v0 = vmul.f32 %v513_v58, %v6072_v10  ;;  %v6426_v12 = vmul.f32 %v6392_v41, %v6049_v4  ;;  %9184 = vst [vmem:[#allocation82_spill] sm:$0xff] %v6429_v46  ;;  %vm9200_vm2 = vmmov %vm9162_vm0 }
  0xfd   :  { %v6432_v30 = vmul.f32 %v6052_v5, %v538_v33  ;;  %v571_v14 = vmul.f32 %v563_v13, %v6092_v16  ;;  %v556_v62 = vadd.f32 %v548_v56, %v520_v9  ;;  %v572_v24 = vmul.f32 %v6418_v51, %v6097_v20  ;;  %v280_v16 = vpop.f32.mrb[13].mxu0  ;;  %vm9206_vm4 = vmmov %vm9162_vm0 }
  0xfe   :  { %9183 = vst [vmem:[#allocation81_spill] sm:$0xff] %v6426_v12  ;;  %v557_v17 = vadd.f32 %v549_v18, %v521_v0  ;;  %v588_v61 = vmul.f32 %v512_v23, %v6102_v22  ;;  %v616_v3 = vadd.f32 %v608_v52, %v595_v39  ;;  %v589_v12 = vmul.f32 %v513_v58, %v6107_v25  ;;  %v5419_v22 = vpop.f32.mrb[14].mxu0  ;;  %vm9207_vm1 = vmmov %vm9162_vm0 }
  0xff   :  { %9185 = vst [vmem:[#allocation83_spill] sm:$0xff] %v6432_v30  ;;  %v541_v10 = vld [vmem:[#allocation2 + $0x39] sm:$0xff]  ;;  %v579_v41 = vadd.f32 %v571_v14, %v555_v59  ;;  %v609_v57 = vmul.f32 %v5966_v42, %v6403_v50  ;;  %v580_v9 = vadd.f32 %v572_v24, %v556_v62  ;;  %v625_v0 = vmul.f32 %v563_v13, %v6117_v28  ;;  %v283_v25 = vpop.f32.mrb[15].mxu0  ;;  %vm9300_vm3 = vmmov %vm9162_vm0 }
 0x100   :  { %v515_v33 = vld [vmem:[#allocation2 + $0x28] sm:$0xff]  ;;  %v581_v18 = vadd.f32 %v573_v6, %v557_v17  ;;  %v6444_v56 = vmul.f32 %v6418_v51, %v6122_v31  ;;  %v6447_v59 = vmul.f32 %v512_v23, %v6127_v35  ;;  %v6450_v52 = vmul.f32 %v513_v58, %v6132_v36  ;;  %vm9301_vm9 = vmmov %vm9162_vm0 }
 0x101   :  { %v539_v30 = vld [vmem:[#allocation2 + $0x29] sm:$0xff]  ;;  %v596_v39 = vadd.f32 %v588_v61, %v579_v41  ;;  %v6453_v14 = vmul.f32 %v5945_v32, %v541_v10  ;;  %v597_v62 = vadd.f32 %v589_v12, %v580_v9  ;;  %v523_v6 = vmul.f32 %v515_v33, %v6137_v40 }
 0x102   :  { %v566_v46 = vld [vmem:[#allocation2 + $0x22] sm:$0xff]  ;;  %v551_v13 = vmul.f32 %v5945_v32, %v539_v30  ;;  %v6458_v24 = vadd.f32 %v625_v0, %v616_v3  ;;  %v6461_v41 = vmul.f32 %v5966_v42, %v541_v10  ;;  %v6464_v23 = vmul.f32 %v6052_v5, %v541_v10  ;;  %v569_v9 = vld [vmem:[#allocation2 + $0x3a] sm:$0xff] }
 0x103   :  { %v574_v17 = vmul.f32 %v566_v46, %v6142_v44  ;;  %v598_v58 = vadd.f32 %v590_v53, %v581_v18  ;;  %v617_v61 = vadd.f32 %v609_v57, %v596_v39  ;;  %v591_v35 = vmul.f32 %v515_v33, %v6147_v48  ;;  %v586_v40 = vld [vmem:[#allocation2 + $0x40] sm:$0xff]  ;;  %v641_v18 = vld [vmem:[#allocation2 + $0x48] sm:$0xff] }
 0x104   :  { %9186 = vst [vmem:[#allocation84_spill] sm:$0xff] %v6464_v23  ;;  %v612_v12 = vmul.f32 %v5966_v42, %v539_v30  ;;  %v603_v31 = vld [vmem:[#allocation2 + $0x41] sm:$0xff]  ;;  %v6469_v44 = vadd.f32 %v6399_v43, %v597_v62  ;;  %v6471_v3 = vadd.f32 %v551_v13, %v523_v6  ;;  %v628_v28 = vmul.f32 %v566_v46, %v6152_v49 }
 0x105   :  { %v582_v36 = vadd.f32 %v574_v17, %v558_v54  ;;  %v619_v0 = vadd.f32 %v611_v1, %v598_v58  ;;  %v624_v10 = vld [vmem:[#allocation2 + $0x42] sm:$0xff]  ;;  %v645_v53 = vmul.f32 %v515_v33, %v6172_v37  ;;  %v6476_v54 = vmul.f32 %v6052_v5, %v539_v30  ;;  %v9192_v30 = vld [vmem:[#allocation57_spill] sm:$0xff] }
 0x106   :  { %9187 = vst [vmem:[#allocation85_spill] sm:$0xff] %v6469_v44  ;;  %v6479_v57 = vmul.f32 %v566_v46, %v6227_v29  ;;  %v6482_v43 = vmul.f32 %v569_v9, %v6251_v45  ;;  %v6485_v62 = vmul.f32 %v586_v40, %v6240_v21  ;;  %v6488_v1 = vmul.f32 %v5966_v42, %v603_v31  ;;  %v9194_v46 = vld [vmem:[#allocation56_spill] sm:$0xff] }
 0x107   :  { %v599_v23 = vadd.f32 %v591_v35, %v582_v36  ;;  %9188 = vst [vmem:[#allocation86_spill] sm:$0xff] %v6476_v54  ;;  %v636_v39 = vadd.f32 %v628_v28, %v619_v0  ;;  %v6493_v36 = vmul.f32 %v569_v9, %v6245_v60  ;;  %v6496_v33 = vmul.f32 %v624_v10, %v9192_v30  ;;  %v9196_v28 = vld [vmem:[#allocation58_spill] sm:$0xff]  ;;  %v9228_v44 = vld [vmem:[#allocation72_spill] sm:$0xff] }
 0x108   :  { %9189 = vst [vmem:[#allocation87_spill] sm:$0xff] %v6479_v57  ;;  %9190 = vst [vmem:[#allocation88_spill] sm:$0xff] %v6488_v1  ;;  %v6499_v6 = vmul.f32 %v586_v40, %v9194_v46  ;;  %v6502_v13 = vmul.f32 %v641_v18, %v9196_v28  ;;  %v6505_v17 = vmul.f32 %v6052_v5, %v603_v31  ;;  %v9199_v58 = vmax.f32 %v6343_v19, 0.0 }
 0x109   :  { %v6490_v35 = vadd.f32 %v612_v12, %v599_v23  ;;  %9191 = vst [vmem:[#allocation89_spill] sm:$0xff] %v6493_v36  ;;  %9193 = vst [vmem:[#allocation57_spill] sm:$0xff] %v6496_v33  ;;  %v323_v23 = vadd.f32 %v6112_v26, %v6407_v47  ;;  %v304_v12 = vmul.f32 %v6087_v15, %v6379_v27 }
 0x10a   :  { %9195 = vst [vmem:[#allocation56_spill] sm:$0xff] %v6499_v6  ;;  %9197 = vst [vmem:[#allocation90_spill] sm:$0xff] %v6502_v13  ;;  %v350_v0 = vmin.f32 %v9199_v58, 6.0  ;;  %v307_v57 = vmul.f32 %v6395_v34, %v6087_v15  ;;  %v305_v40 = vmul.f32 %v6087_v15, %v6409_v11  ;;  %v310_v18 = vmul.f32 %v5418_v8, %v6087_v15 }
 0x10b   :  { %9198 = vst [vmem:[#allocation91_spill] sm:$0xff] %v6505_v17  ;;  %v339_v31 = vmax.f32 %v323_v23, 0.0  ;;  %v308_v19 = vmul.f32 %v6087_v15, %v280_v16  ;;  %v311_v58 = vmul.f32 %v5419_v22, %v6087_v15  ;;  %v309_v47 = vmul.f32 %v6087_v15, %v283_v25 }
 0x10c   :  { %507 = vst.msk [vmem:[#allocation2 + $0x31] sm:$0xff] %vm9162_vm0, %v350_v0  ;;  %v321_v28 = vadd.f32 %v6112_v26, %v304_v12  ;;  %v324_v27 = vadd.f32 %v6112_v26, %v307_v57  ;;  %v322_v34 = vadd.f32 %v6112_v26, %v305_v40  ;;  %v327_v17 = vadd.f32 %v6112_v26, %v310_v18 }
 0x10d   :  { %v355_v11 = vmin.f32 %v339_v31, 6.0  ;;  %v325_v8 = vadd.f32 %v6112_v26, %v308_v19  ;;  %v328_v0 = vadd.f32 %v6112_v26, %v311_v58  ;;  %v326_v23 = vadd.f32 %v6112_v26, %v309_v47  ;;  %v9201_v19 = vld [vmem:[#allocation59_spill] sm:$0xff] }
 0x10e   :  { %v337_v16 = vmax.f32 %v321_v28, 0.0  ;;  %v340_v13 = vmax.f32 %v324_v27, 0.0  ;;  %v338_v22 = vmax.f32 %v322_v34, 0.0  ;;  %v343_v6 = vmax.f32 %v327_v17, 0.0 }
 0x10f   :  { %739 = vst.msk [vmem:[#allocation2 + $0x71] sm:$0xff] %vm9200_vm2, %v355_v11  ;;  %v341_v15 = vmax.f32 %v325_v8, 0.0  ;;  %v344_v25 = vmax.f32 %v328_v0, 0.0  ;;  %v342_v57 = vmax.f32 %v326_v23, 0.0  ;;  %v634_v12 = vadd.f32 %v6444_v56, %v617_v61  ;;  %vm9205_vm2 = vmmov %vm9162_vm0  ;;  %v9215_v0 = vld [vmem:[#allocation74_spill] sm:$0xff] }
 0x110   :  { %v353_v40 = vmin.f32 %v337_v16, 6.0  ;;  %v356_v18 = vmin.f32 %v340_v13, 6.0  ;;  %v354_v31 = vmin.f32 %v338_v22, 6.0  ;;  %v359_v33 = vmin.f32 %v343_v6, 6.0  ;;  %v9217_v16 = vld [vmem:[#allocation76_spill] sm:$0xff] }
 0x111   :  { %v6532_v36 = vmul.f32 %v569_v9, %v9201_v19  ;;  %v357_v58 = vmin.f32 %v341_v15, 6.0  ;;  %v360_v26 = vmin.f32 %v344_v25, 6.0  ;;  %v358_v28 = vmin.f32 %v342_v57, 6.0  ;;  %v9209_v9 = vld [vmem:[#allocation61_spill] sm:$0xff]  ;;  %v9219_v57 = vld [vmem:[#allocation63_spill] sm:$0xff] }
 0x112   :  { %v6534_v47 = vadd.f32 %v645_v53, %v636_v39  ;;  %v6537_v17 = vmul.f32 %v624_v10, %v6277_v38  ;;  %737 = vst.msk [vmem:[#allocation2 + $0x61] sm:$0xff] %vm9162_vm0, %v353_v40  ;;  %v6545_v56 = vadd.f32 %v6447_v59, %v6458_v24  ;;  %v6548_v61 = vadd.f32 %v6450_v52, %v634_v12  ;;  %v9213_v52 = vld [vmem:[#allocation62_spill] sm:$0xff] }
 0x113   :  { %9202 = vst [vmem:[#allocation59_spill] sm:$0xff] %v6532_v36  ;;  %v516_v27 = vld [vmem:[#allocation2 + $0x30] sm:$0xff]  ;;  %v517_v34 = vld [vmem:[#allocation2 + $0x38] sm:$0xff]  ;;  %740 = vst.msk [vmem:[#allocation2 + $0x79] sm:$0xff] %vm9205_vm2, %v356_v18  ;;  %v6558_v59 = vmul.f32 %v6052_v5, %v6403_v50  ;;  %v6564_v23 = vmul.f32 %v6052_v5, %v9215_v0  ;;  %v6568_v22 = vmul.f32 %v6418_v51, %v9217_v16 }
 0x114   :  { %9203 = vst [vmem:[#allocation92_spill] sm:$0xff] %v6534_v47  ;;  %9204 = vst [vmem:[#allocation93_spill] sm:$0xff] %v6537_v17  ;;  %v540_v11 = vld [vmem:[#allocation2 + $0x31] sm:$0xff]  ;;  %v524_v10 = vmul.f32 %v516_v27, %v9209_v9  ;;  %v525_v53 = vmul.f32 %v517_v34, %v6287_v55  ;;  %v9220_v40 = vld [vmem:[#allocation66_spill] sm:$0xff] }
 0x115   :  { %738 = vst.msk [vmem:[#allocation2 + $0x69] sm:$0xff] %vm9206_vm4, %v354_v31  ;;  %9208 = vst [vmem:[#allocation94_spill] sm:$0xff] %v6548_v61  ;;  %v552_v39 = vmul.f32 %v5945_v32, %v540_v11  ;;  %v567_v6 = vld [vmem:[#allocation2 + $0x2a] sm:$0xff]  ;;  %v568_v13 = vld [vmem:[#allocation2 + $0x32] sm:$0xff]  ;;  %v6582_v54 = vmul.f32 %v6052_v5, %v540_v11 }
 0x116   :  { %743 = vst.msk [vmem:[#allocation2 + $0x91] sm:$0xff] %vm9207_vm1, %v359_v33  ;;  %vm9210_vm4 = vmmov %vm9162_vm0  ;;  %v575_v24 = vmul.f32 %v567_v6, %v9213_v52  ;;  %v9214_v33 = vld [vmem:[#allocation64_spill] sm:$0xff]  ;;  %v561_v25 = vadd.f32 %v6453_v14, %v525_v53  ;;  %v576_v12 = vmul.f32 %v568_v13, %v9219_v57  ;;  %v629_v50 = vmul.f32 %v567_v6, %v9220_v40  ;;  %v9221_v31 = vld [vmem:[#allocation65_spill] sm:$0xff] }
 0x117   :  { %741 = vst.msk [vmem:[#allocation2 + $0x81] sm:$0xff] %vm9162_vm0, %v357_v58  ;;  %vm9211_vm1 = vmmov %vm9162_vm0  ;;  %v592_v8 = vmul.f32 %v516_v27, %v9214_v33  ;;  %v560_v15 = vadd.f32 %v552_v39, %v524_v10  ;;  %v593_v58 = vmul.f32 %v517_v34, %v9221_v31  ;;  %v772_v38 = vld [vmem:[#allocation2 + $0x71] sm:$0xff] }
 0x118   :  { %744 = vst.msk [vmem:[#allocation2 + $0x99] sm:$0xff] %vm9210_vm4, %v360_v26  ;;  %9212 = vst [vmem:[#allocation61_spill] sm:$0xff] %v6558_v59  ;;  %v583_v18 = vadd.f32 %v575_v24, %v6471_v3  ;;  %v613_v26 = vmul.f32 %v5966_v42, %v540_v11  ;;  %v585_v51 = vadd.f32 %v6482_v43, %v561_v25  ;;  %v9223_v39 = vld [vmem:[#allocation68_spill] sm:$0xff]  ;;  %v9224_v36 = vld [vmem:[#allocation69_spill] sm:$0xff] }
 0x119   :  { %742 = vst.msk [vmem:[#allocation2 + $0x89] sm:$0xff] %vm9211_vm1, %v358_v28  ;;  %9216 = vst [vmem:[#allocation62_spill] sm:$0xff] %v6564_v23  ;;  %v9222_v28 = vld [vmem:[#allocation67_spill] sm:$0xff]  ;;  %v584_v17 = vadd.f32 %v576_v12, %v560_v15  ;;  %v637_v10 = vadd.f32 %v629_v50, %v6490_v35  ;;  %v646_v14 = vmul.f32 %v516_v27, %v9223_v39  ;;  %v9226_v3 = vld [vmem:[#allocation70_spill] sm:$0xff] }
 0x11a   :  { %9218 = vst [vmem:[#allocation64_spill] sm:$0xff] %v6568_v22  ;;  %v630_v0 = vmul.f32 %v568_v13, %v9222_v28  ;;  %v600_v53 = vadd.f32 %v592_v8, %v583_v18  ;;  %v647_v1 = vmul.f32 %v517_v34, %v9224_v36  ;;  %9225 = vst [vmem:[#allocation74_spill] sm:$0xff] %v6582_v54  ;;  %v746_v35 = vld [vmem:[#allocation2 + $0x60] sm:$0xff]  ;;  %v749_v18 = vld [vmem:[#allocation2 + $0x78] sm:$0xff] }
 0x11b   :  { %v6585_v24 = vmul.f32 %v567_v6, %v9226_v3  ;;  %v601_v47 = vadd.f32 %v593_v58, %v584_v17  ;;  %v6588_v22 = vmul.f32 %v568_v13, %v9228_v44  ;;  %v780_v15 = vmul.f32 %v772_v38, %v5945_v32  ;;  %v770_v27 = vld [vmem:[#allocation2 + $0x61] sm:$0xff]  ;;  %v773_v17 = vld [vmem:[#allocation2 + $0x79] sm:$0xff]  ;;  %vm9284_vm2 = vmmov %vm9162_vm0 }
 0x11c   :  { %v6592_v43 = vmul.f32 %v772_v38, %v5966_v42  ;;  %v793_v8 = vld [vmem:[#allocation2 + $0x5a] sm:$0xff]  ;;  %v621_v25 = vadd.f32 %v613_v26, %v600_v53  ;;  %v9230_v34 = vld [vmem:[#allocation27_spill] sm:$0xff]  ;;  %v778_v11 = vmul.f32 %v770_v27, %v5945_v32  ;;  %v6597_v58 = vld [vmem:[#allocation2 + $0x72] sm:$0xff]  ;;  %v6600_v13 = vadd.f32 %v6485_v62, %v585_v51 }
 0x11d   :  { %9227 = vst [vmem:[#allocation63_spill] sm:$0xff] %v6585_v24  ;;  %9229 = vst [vmem:[#allocation66_spill] sm:$0xff] %v6588_v22  ;;  %v754_v12 = vmul.f32 %v746_v35, %v9230_v34  ;;  %v9231_v50 = vld [vmem:[#allocation34_spill] sm:$0xff]  ;;  %v6602_v22 = vadd.f32 %v646_v14, %v637_v10  ;;  %v6605_v24 = vmul.f32 %v772_v38, %v6052_v5  ;;  %v9234_v34 = vld [vmem:[#allocation75_spill] sm:$0xff] }
 0x11e   :  { %v801_v6 = vmul.f32 %v793_v8, %v9231_v50  ;;  %9232 = vst [vmem:[#allocation65_spill] sm:$0xff] %v6600_v13  ;;  %v818_v26 = vmul.f32 %v746_v35, %v6028_v63  ;;  %v638_v53 = vadd.f32 %v630_v0, %v621_v25  ;;  %v9235_v16 = vld [vmem:[#allocation37_spill] sm:$0xff]  ;;  %v781_v8 = vmul.f32 %v773_v17, %v5945_v32  ;;  %v747_v50 = vld [vmem:[#allocation2 + $0x68] sm:$0xff]  ;;  %vm9287_vm4 = vmmov %vm9162_vm0 }
 0x11f   :  { %9233 = vst [vmem:[#allocation67_spill] sm:$0xff] %v6605_v24  ;;  %v757_v23 = vmul.f32 %v749_v18, %v9235_v16  ;;  %v748_v61 = vld [vmem:[#allocation2 + $0x70] sm:$0xff]  ;;  %v6612_v62 = vadd.f32 %v6461_v41, %v601_v47  ;;  %v786_v51 = vadd.f32 %v778_v11, %v754_v12  ;;  %v835_v10 = vmul.f32 %v770_v27, %v5966_v42  ;;  %v794_v63 = vld [vmem:[#allocation2 + $0x62] sm:$0xff]  ;;  %v9240_v47 = vld [vmem:[#allocation38_spill] sm:$0xff] }
 0x120   :  { %v809_v54 = vadd.f32 %v801_v6, %v9234_v34  ;;  %v771_v59 = vld [vmem:[#allocation2 + $0x69] sm:$0xff]  ;;  %v804_v38 = vmul.f32 %v6597_v58, %v6039_v2  ;;  %v838_v16 = vmul.f32 %v773_v17, %v5966_v42  ;;  %v6621_v25 = vmul.f32 %v6597_v58, %v6049_v4  ;;  %vm9288_vm1 = vmmov %vm9162_vm0 }
 0x121   :  { %9236 = vst [vmem:[#allocation68_spill] sm:$0xff] %v6612_v62  ;;  %v9237_v14 = vld [vmem:[#allocation36_spill] sm:$0xff]  ;;  %v6625_v41 = vadd.f32 %v647_v1, %v638_v53  ;;  %v755_v12 = vmul.f32 %v747_v50, %v9240_v47  ;;  %v9241_v27 = vld [vmem:[#allocation39_spill] sm:$0xff]  ;;  %v779_v2 = vmul.f32 %v771_v59, %v5945_v32  ;;  %v6635_v4 = vmul.f32 %v773_v17, %v6052_v5  ;;  %v9247_v17 = vld [vmem:[#allocation46_spill] sm:$0xff] }
 0x122   :  { %v826_v0 = vadd.f32 %v818_v26, %v809_v54  ;;  %v821_v35 = vmul.f32 %v749_v18, %v9237_v14  ;;  %9238 = vst [vmem:[#allocation69_spill] sm:$0xff] %v6621_v25  ;;  %v6623_v6 = vld [vmem:[#allocation2 + $0x6a] sm:$0xff]  ;;  %v756_v11 = vmul.f32 %v748_v61, %v9241_v27  ;;  %v789_v54 = vadd.f32 %v781_v8, %v757_v23  ;;  %v9242_v14 = vld [vmem:[#allocation42_spill] sm:$0xff]  ;;  %v9244_v47 = vld [vmem:[#allocation43_spill] sm:$0xff] }
 0x123   :  { %9239 = vst [vmem:[#allocation70_spill] sm:$0xff] %v6625_v41  ;;  %v6631_v26 = vmul.f32 %v749_v18, %v6062_v7  ;;  %v802_v24 = vmul.f32 %v794_v63, %v9242_v14  ;;  %9243 = vst [vmem:[#allocation72_spill] sm:$0xff] %v6635_v4  ;;  %v787_v25 = vadd.f32 %v779_v2, %v755_v12  ;;  %v9245_v13 = vld [vmem:[#allocation44_spill] sm:$0xff]  ;;  %v750_v8 = vld [vmem:[#allocation2 + $0x80] sm:$0xff] }
 0x124   :  { %v843_v34 = vadd.f32 %v835_v10, %v826_v0  ;;  %v788_v62 = vadd.f32 %v780_v15, %v756_v11  ;;  %v803_v1 = vmul.f32 %v6623_v6, %v6097_v20  ;;  %v819_v27 = vmul.f32 %v747_v50, %v9244_v47  ;;  %v9246_v10 = vld [vmem:[#allocation45_spill] sm:$0xff]  ;;  %v774_v7 = vld [vmem:[#allocation2 + $0x81] sm:$0xff]  ;;  %v9249_v47 = vld [vmem:[#allocation48_spill] sm:$0xff] }
 0x125   :  { %v810_v53 = vadd.f32 %v802_v24, %v786_v51  ;;  %v820_v41 = vmul.f32 %v748_v61, %v9245_v13  ;;  %v852_v23 = vmul.f32 %v794_v63, %v9246_v10  ;;  %v836_v14 = vmul.f32 %v771_v59, %v5966_v42  ;;  %v776_v15 = vld [vmem:[#allocation2 + $0x91] sm:$0xff]  ;;  %v797_v11 = vld [vmem:[#allocation2 + $0x7a] sm:$0xff]  ;;  %v9248_v24 = vld [vmem:[#allocation47_spill] sm:$0xff] }
 0x126   :  { %v811_v18 = vadd.f32 %v803_v1, %v787_v25  ;;  %v812_v0 = vadd.f32 %v804_v38, %v788_v62  ;;  %v853_v12 = vmul.f32 %v6623_v6, %v9247_v17  ;;  %v869_v51 = vmul.f32 %v747_v50, %v9248_v24  ;;  %v9250_v10 = vld [vmem:[#allocation49_spill] sm:$0xff] }
 0x127   :  { %v827_v2 = vadd.f32 %v819_v27, %v810_v53  ;;  %v860_v20 = vadd.f32 %v852_v23, %v843_v34  ;;  %v870_v4 = vmul.f32 %v748_v61, %v9249_v47  ;;  %v6648_v63 = vmul.f32 %v771_v59, %v6052_v5  ;;  %v9251_v53 = vld [vmem:[#allocation50_spill] sm:$0xff] }
 0x128   :  { %v828_v13 = vadd.f32 %v820_v41, %v811_v18  ;;  %v758_v25 = vmul.f32 %v750_v8, %v9250_v10  ;;  %v782_v62 = vmul.f32 %v774_v7, %v5945_v32  ;;  %v784_v1 = vmul.f32 %v776_v15, %v5945_v32  ;;  %v800_v41 = vld [vmem:[#allocation2 + $0x92] sm:$0xff] }
 0x129   :  { %v844_v38 = vadd.f32 %v836_v14, %v827_v2  ;;  %v6654_v17 = vmul.f32 %v776_v15, %v5966_v42  ;;  %v805_v34 = vmul.f32 %v797_v11, %v9251_v53  ;;  %v6657_v27 = vadd.f32 %v869_v51, %v860_v20  ;;  %v817_v24 = vld [vmem:[#allocation2 + $0x98] sm:$0xff] }
 0x12a   :  { %v6660_v61 = vmul.f32 %v776_v15, %v6052_v5  ;;  %v822_v59 = vmul.f32 %v750_v8, %v6147_v48  ;;  %v829_v50 = vadd.f32 %v821_v35, %v812_v0  ;;  %v6664_v23 = vadd.f32 %v6592_v43, %v828_v13  ;;  %v6666_v47 = vld [vmem:[#allocation2 + $0x99] sm:$0xff]  ;;  %v751_v0 = vld [vmem:[#allocation2 + $0x88] sm:$0xff] }
 0x12b   :  { %v861_v18 = vadd.f32 %v853_v12, %v844_v38  ;;  %v790_v14 = vadd.f32 %v782_v62, %v758_v25  ;;  %v813_v2 = vadd.f32 %v805_v34, %v789_v54  ;;  %v839_v10 = vmul.f32 %v774_v7, %v5966_v42  ;;  %v6671_v53 = vld [vmem:[#allocation2 + $0x9a] sm:$0xff]  ;;  %v752_v12 = vld [vmem:[#allocation2 + $0x90] sm:$0xff]  ;;  %v798_v25 = vld [vmem:[#allocation2 + $0x82] sm:$0xff] }
 0x12c   :  { %v846_v20 = vadd.f32 %v838_v16, %v829_v50  ;;  %v855_v51 = vmul.f32 %v797_v11, %v6152_v49  ;;  %v872_v15 = vmul.f32 %v750_v8, %v6172_v37  ;;  %v6674_v35 = vmul.f32 %v774_v7, %v6052_v5  ;;  %v775_v8 = vld [vmem:[#allocation2 + $0x89] sm:$0xff] }
 0x12d   :  { %v830_v48 = vadd.f32 %v822_v59, %v813_v2  ;;  %v6677_v43 = vmul.f32 %v797_v11, %v6227_v29  ;;  %v808_v54 = vmul.f32 %v800_v41, %v6251_v45  ;;  %v6680_v13 = vadd.f32 %v870_v4, %v861_v18  ;;  %v799_v7 = vld [vmem:[#allocation2 + $0x8a] sm:$0xff] }
 0x12e   :  { %v863_v16 = vadd.f32 %v855_v51, %v846_v20  ;;  %v825_v49 = vmul.f32 %v817_v24, %v6240_v21  ;;  %v6685_v37 = vmul.f32 %v6666_v47, %v5966_v42  ;;  %v6688_v29 = vmul.f32 %v800_v41, %v6245_v60  ;;  %v9253_v20 = vld [vmem:[#allocation94_spill] sm:$0xff] }
 0x12f   :  { %v847_v62 = vadd.f32 %v839_v10, %v830_v48  ;;  %v6692_v45 = vmul.f32 %v6671_v53, %v9192_v30  ;;  %v6695_v4 = vmul.f32 %v817_v24, %v9194_v46  ;;  %v6700_v21 = vmul.f32 %v800_v41, %v9201_v19 }
 0x130   :  { %v6697_v11 = vadd.f32 %v872_v15, %v863_v16  ;;  %v759_v38 = vmul.f32 %v751_v0, %v9209_v9  ;;  %v760_v34 = vmul.f32 %v752_v12, %v6287_v55  ;;  %v783_v59 = vmul.f32 %v775_v8, %v5945_v32 }
 0x131   :  { %v806_v60 = vmul.f32 %v798_v25, %v9213_v52  ;;  %v807_v50 = vmul.f32 %v799_v7, %v9219_v57  ;;  %v823_v30 = vmul.f32 %v751_v0, %v9214_v33  ;;  %v824_v46 = vmul.f32 %v752_v12, %v9221_v31 }
 0x132   :  { %v792_v18 = vadd.f32 %v784_v1, %v760_v34  ;;  %v840_v2 = vmul.f32 %v775_v8, %v5966_v42  ;;  %v856_v19 = vmul.f32 %v798_v25, %v9220_v40  ;;  %v791_v41 = vadd.f32 %v783_v59, %v759_v38  ;;  %v9261_v38 = vld [vmem:[#allocation92_spill] sm:$0xff]  ;;  %v9262_v34 = vld [vmem:[#allocation86_spill] sm:$0xff] }
 0x133   :  { %v814_v24 = vadd.f32 %v806_v60, %v790_v14  ;;  %v857_v9 = vmul.f32 %v799_v7, %v9222_v28  ;;  %v873_v55 = vmul.f32 %v751_v0, %v9223_v39  ;;  %v874_v52 = vmul.f32 %v752_v12, %v9224_v36  ;;  %v9252_v39 = vld [vmem:[#allocation61_spill] sm:$0xff]  ;;  %v9254_v36 = vld [vmem:[#allocation62_spill] sm:$0xff]  ;;  %v9257_v12 = vld [vmem:[#allocation76_spill] sm:$0xff] }
 0x134   :  { %v816_v32 = vadd.f32 %v808_v54, %v792_v18  ;;  %v864_v10 = vadd.f32 %v856_v19, %v847_v62  ;;  %v6715_v57 = vmul.f32 %v775_v8, %v6052_v5  ;;  %v815_v33 = vadd.f32 %v807_v50, %v791_v41  ;;  %v9255_v54 = vld [vmem:[#allocation73_spill] sm:$0xff]  ;;  %v9263_v18 = vld [vmem:[#allocation74_spill] sm:$0xff]  ;;  %v9265_v41 = vld [vmem:[#allocation63_spill] sm:$0xff] }
 0x135   :  { %v831_v1 = vadd.f32 %v823_v30, %v814_v24  ;;  %v6718_v31 = vmul.f32 %v798_v25, %v9226_v3  ;;  %v6721_v42 = vmul.f32 %v799_v7, %v9228_v44  ;;  %v671_v14 = vadd.f32 %v9252_v39, %v6545_v56  ;;  %v6734_v3 = vld [vmem:[%s8907_s2 + $0x2] ss:$0 sm:$0xff]  ;;  %v9256_v44 = vld [vmem:[#allocation80_spill] sm:$0xff]  ;;  %v9259_v25 = vld [vmem:[#allocation85_spill] sm:$0xff] }
 0x136   :  { %v6723_v40 = vadd.f32 %v825_v49, %v816_v32  ;;  %v6725_v28 = vadd.f32 %v873_v55, %v864_v10  ;;  %v672_v51 = vadd.f32 %v9254_v36, %v9253_v20  ;;  %v832_v15 = vadd.f32 %v824_v46, %v815_v33  ;;  %v9258_v49 = vld [vmem:[#allocation64_spill] sm:$0xff]  ;;  %v9260_v7 = vld [vmem:[#allocation81_spill] sm:$0xff]  ;;  %v6753_v30 = vld [vmem:[%s8907_s2 + $0x3] ss:$0 sm:$0xff] }
 0x137   :  { %v848_v48 = vadd.f32 %v840_v2, %v831_v1  ;;  %v681_v0 = vmul.f32 %v9256_v44, %v9255_v54  ;;  %v903_v16 = vmul.f32 %v6623_v6, %v9257_v12  ;;  %v688_v8 = vadd.f32 %v9258_v49, %v671_v14  ;;  %v9264_v2 = vld [vmem:[#allocation82_spill] sm:$0xff]  ;;  %v9267_v32 = vld [vmem:[#allocation84_spill] sm:$0xff]  ;;  %v9269_v39 = vld [vmem:[#allocation65_spill] sm:$0xff] }
 0x138   :  { %v904_v56 = vmul.f32 %v6597_v58, %v9255_v54  ;;  %v635_v62 = vadd.f32 %v9260_v7, %v9259_v25  ;;  %v674_v59 = vadd.f32 %v9262_v34, %v9261_v38  ;;  %v6748_v60 = vadd.f32 %v6654_v17, %v832_v15  ;;  %v9266_v55 = vld [vmem:[#allocation70_spill] sm:$0xff]  ;;  %v9270_v14 = vld [vmem:[#allocation88_spill] sm:$0xff]  ;;  %v9271_v36 = vld [vmem:[#allocation83_spill] sm:$0xff] }
 0x139   :  { %v865_v50 = vadd.f32 %v857_v9, %v848_v48  ;;  %v689_v6 = vadd.f32 %v681_v0, %v672_v51  ;;  %v675_v46 = vadd.f32 %v9263_v18, %v6602_v22  ;;  %v696_v58 = vmul.f32 %v688_v8, %v6734_v3  ;;  %v9268_v33 = vld [vmem:[#allocation66_spill] sm:$0xff]  ;;  %v9272_v48 = vld [vmem:[#allocation59_spill] sm:$0xff]  ;;  %v9273_v0 = vld [vmem:[#allocation68_spill] sm:$0xff] }
 0x13a   :  { %v652_v19 = vadd.f32 %v9264_v2, %v635_v62  ;;  %v691_v24 = vadd.f32 %v9265_v41, %v674_v59  ;;  %v676_v17 = vadd.f32 %v9267_v32, %v9266_v55  ;;  %v623_v20 = vadd.f32 %v9270_v14, %v9269_v39  ;;  %v9274_v12 = vld [vmem:[#allocation89_spill] sm:$0xff]  ;;  %v9276_v62 = vld [vmem:[#allocation87_spill] sm:$0xff]  ;;  %v9277_v18 = vld [vmem:[#allocation56_spill] sm:$0xff] }
 0x13b   :  { %v6762_v10 = vadd.f32 %v874_v52, %v865_v50  ;;  %v697_v9 = vmul.f32 %v689_v6, %v6734_v3  ;;  %v692_v1 = vadd.f32 %v9268_v33, %v675_v46  ;;  %v704_v22 = vadd.f32 %v696_v58, %v6753_v30  ;;  %v9275_v8 = vld [vmem:[#allocation57_spill] sm:$0xff]  ;;  %v9278_v58 = vld [vmem:[#allocation90_spill] sm:$0xff] }
 0x13c   :  { %v673_v51 = vadd.f32 %v9271_v36, %v652_v19  ;;  %v699_v15 = vmul.f32 %v691_v24, %v6734_v3  ;;  %v693_v54 = vadd.f32 %v9272_v48, %v676_v17  ;;  %v639_v49 = vadd.f32 %v9274_v12, %v9273_v0  ;;  %v9281_v48 = vld [vmem:[#allocation93_spill] sm:$0xff] }
 0x13d   :  { %v705_v44 = vadd.f32 %v697_v9, %v6753_v30  ;;  %v700_v52 = vmul.f32 %v692_v1, %v6734_v3  ;;  %v640_v25 = vadd.f32 %v9275_v8, %v623_v20  ;;  %v712_v7 = vmax.f32 %v704_v22, 0.0  ;;  %v9279_v9 = vld [vmem:[#allocation91_spill] sm:$0xff]  ;;  %v9280_v1 = vld [vmem:[#allocation77_spill] sm:$0xff] }
 0x13e   :  { %v690_v38 = vadd.f32 %v9276_v62, %v673_v51  ;;  %v707_v34 = vadd.f32 %v699_v15, %v6753_v30  ;;  %v701_v59 = vmul.f32 %v693_v54, %v6734_v3  ;;  %v656_v46 = vadd.f32 %v9277_v18, %v639_v49  ;;  %v9283_v49 = vld [vmem:[#allocation67_spill] sm:$0xff] }
 0x13f   :  { %v713_v50 = vmax.f32 %v705_v44, 0.0  ;;  %v708_v6 = vadd.f32 %v700_v52, %v6753_v30  ;;  %v657_v2 = vadd.f32 %v9278_v58, %v640_v25  ;;  %v720_v19 = vmin.f32 %v712_v7, 6.0  ;;  %v9282_v44 = vld [vmem:[#allocation78_spill] sm:$0xff] }
 0x140   :  { %v698_v41 = vmul.f32 %v690_v38, %v6734_v3  ;;  %v715_v24 = vmax.f32 %v707_v34, 0.0  ;;  %v709_v55 = vadd.f32 %v701_v59, %v6753_v30  ;;  %v677_v33 = vadd.f32 %v9279_v9, %v656_v46 }
 0x141   :  { %v721_v32 = vmin.f32 %v713_v50, 6.0  ;;  %v716_v17 = vmax.f32 %v708_v6, 0.0  ;;  %v678_v39 = vadd.f32 %v9280_v1, %v657_v2  ;;  %v894_v36 = vadd.f32 %v6648_v63, %v6657_v27  ;;  %v9285_v63 = vld [vmem:[#allocation69_spill] sm:$0xff] }
 0x142   :  { %v706_v14 = vadd.f32 %v698_v41, %v6753_v30  ;;  %v723_v20 = vmin.f32 %v715_v24, 6.0  ;;  %v717_v22 = vmax.f32 %v709_v55, 0.0  ;;  %v694_v54 = vadd.f32 %v9281_v48, %v677_v33  ;;  %v868_v33 = vld [vmem:[#allocation2 + $0xa0] sm:$0xff] }
 0x143   :  { %v728_v51 = vpack.c.bf16 %v721_v32, %v720_v19  ;;  %v724_v15 = vmin.f32 %v716_v17, 6.0  ;;  %v695_v52 = vadd.f32 %v9282_v44, %v678_v39  ;;  %v895_v8 = vadd.f32 %v9283_v49, %v6680_v13  ;;  %v9286_v19 = vld [vmem:[#allocation72_spill] sm:$0xff] }
 0x144   :  { %v714_v0 = vmax.f32 %v706_v14, 0.0  ;;  %v725_v12 = vmin.f32 %v717_v22, 6.0  ;;  %v911_v25 = vadd.f32 %v903_v16, %v894_v36  ;;  %v702_v7 = vmul.f32 %v694_v54, %v6734_v3  ;;  %v9289_v54 = vld [vmem:[#allocation58_spill] sm:$0xff] }
 0x145   :  { %732 = vst.msk [vmem:[#allocation6] sm:$0xff] %vm9284_vm2, %v728_v51  ;;  %v703_v62 = vmul.f32 %v695_v52, %v6734_v3  ;;  %v862_v27 = vadd.f32 %v9285_v63, %v6664_v23  ;;  %v897_v38 = vadd.f32 %v6674_v35, %v6697_v11  ;;  %v912_v50 = vadd.f32 %v904_v56, %v895_v8  ;;  %vm9290_vm2 = vmmov %vm9162_vm0  ;;  %v9291_v63 = vld [vmem:[#allocation71_spill] sm:$0xff] }
 0x146   :  { %v722_v34 = vmin.f32 %v714_v0, 6.0  ;;  %v730_v59 = vpack.c.bf16 %v725_v12, %v724_v15  ;;  %v919_v6 = vmul.f32 %v911_v25, %v6734_v3  ;;  %v710_v13 = vadd.f32 %v702_v7, %v6753_v30 }
 0x147   :  { %v711_v16 = vadd.f32 %v703_v62, %v6753_v30  ;;  %v879_v18 = vadd.f32 %v6631_v26, %v862_v27  ;;  %v914_v46 = vadd.f32 %v6718_v31, %v897_v38  ;;  %v920_v23 = vmul.f32 %v912_v50, %v6734_v3 }
 0x148   :  { %v729_v58 = vpack.c.bf16 %v723_v20, %v722_v34  ;;  %734 = vst.msk [vmem:[#allocation6 + $0x10] sm:$0xff] %vm9162_vm0, %v730_v59  ;;  %v927_v35 = vadd.f32 %v919_v6, %v6753_v30  ;;  %v898_v11 = vadd.f32 %v6715_v57, %v6725_v28  ;;  %v718_v56 = vmax.f32 %v710_v13, 0.0  ;;  %v9295_v59 = vld [vmem:[#allocation79_spill] sm:$0xff] }
 0x149   :  { %v719_v2 = vmax.f32 %v711_v16, 0.0  ;;  %v896_v41 = vadd.f32 %v9286_v19, %v879_v18  ;;  %v922_v24 = vmul.f32 %v914_v46, %v6734_v3  ;;  %v928_v26 = vadd.f32 %v920_v23, %v6753_v30 }
 0x14a   :  { %733 = vst.msk [vmem:[#allocation6 + $0x8] sm:$0xff] %vm9287_vm4, %v729_v58  ;;  %v935_v31 = vmax.f32 %v927_v35, 0.0  ;;  %v899_v55 = vadd.f32 %v6660_v61, %v6762_v10  ;;  %v915_v32 = vadd.f32 %v6721_v42, %v898_v11  ;;  %v726_v17 = vmin.f32 %v718_v56, 6.0  ;;  %vm9293_vm4 = vmmov %vm9162_vm0 }
 0x14b   :  { %v727_v9 = vmin.f32 %v719_v2, 6.0  ;;  %v913_v57 = vadd.f32 %v6677_v43, %v896_v41  ;;  %v930_v28 = vadd.f32 %v922_v24, %v6753_v30  ;;  %v936_v39 = vmax.f32 %v928_v26, 0.0 }
 0x14c   :  { %v963_v1 = vld [vmem:[#allocation6] sm:$0xff]  ;;  %v943_v14 = vmin.f32 %v935_v31, 6.0  ;;  %v916_v20 = vadd.f32 %v6700_v21, %v899_v55  ;;  %v923_v22 = vmul.f32 %v915_v32, %v6734_v3  ;;  %v850_v10 = vadd.f32 %v6685_v37, %v6723_v40 }
 0x14d   :  { %5424 = vmatprep.mubr.msk.bf16.mxu1 %vm9288_vm1, %v963_v1  ;;  %v731_v36 = vpack.c.bf16 %v727_v9, %v726_v17  ;;  %v921_v61 = vmul.f32 %v913_v57, %v6734_v3  ;;  %v938_v42 = vmax.f32 %v930_v28, 0.0  ;;  %v944_v43 = vmin.f32 %v936_v39, 6.0  ;;  %v902_v21 = vld [vmem:[#allocation2 + $0xa2] sm:$0xff]  ;;  %vm9294_vm1 = vmmov %vm9162_vm0  ;;  %v9303_v17 = vld [vmem:[#allocation16_spill] sm:$0xff] }
 0x14e   :  { %v924_v51 = vmul.f32 %v916_v20, %v6734_v3  ;;  %v931_v15 = vadd.f32 %v923_v22, %v6753_v30  ;;  %v866_v48 = vadd.f32 %v6688_v29, %v6748_v60  ;;  %v876_v44 = vmul.f32 %v868_v33, %v9289_v54  ;;  %v5118_v32 = vld [vmem:[%s8908_s3 + $0x20] sm:$0xff]  ;;  %v1255_v39 = vld [vmem:[#allocation3] sm:$0xff] }
 0x14f   :  { %v892_v52 = vmul.f32 %v6666_v47, %v6052_v5  ;;  %735 = vst.msk [vmem:[#allocation6 + $0x18] sm:$0xff] %vm9290_vm2, %v731_v36  ;;  %v929_v0 = vadd.f32 %v921_v61, %v6753_v30  ;;  %v867_v37 = vadd.f32 %v6692_v45, %v850_v10  ;;  %v965_v40 = vld [vmem:[#allocation6 + $0x10] sm:$0xff]  ;;  %v951_v12 = vpack.c.bf16 %v944_v43, %v943_v14  ;;  %vm9296_vm2 = vmmov %vm9162_vm0  ;;  %v9304_v57 = vld [vmem:[#allocation18_spill] sm:$0xff] }
 0x150   :  { %v932_v49 = vadd.f32 %v924_v51, %v6753_v30  ;;  %v939_v8 = vmax.f32 %v931_v15, 0.0  ;;  %v883_v25 = vadd.f32 %v6695_v4, %v866_v48  ;;  %v946_v7 = vmin.f32 %v938_v42, 6.0  ;;  %v9292_v5 = vld [vmem:[#allocation60_spill] sm:$0xff]  ;;  %v9306_v20 = vld [vmem:[#allocation21_spill] sm:$0xff]  ;;  %v9307_v36 = vld [vmem:[#allocation22_spill] sm:$0xff] }
 0x151   :  { %v964_v29 = vld [vmem:[#allocation6 + $0x8] sm:$0xff]  ;;  %v937_v60 = vmax.f32 %v929_v0, 0.0  ;;  %v884_v62 = vadd.f32 %v876_v44, %v867_v37  ;;  %v910_v27 = vmul.f32 %v902_v21, %v9291_v63  ;;  %v909_v47 = vmul.f32 %v6671_v53, %v9292_v5  ;;  %955 = vst.msk [vmem:[#allocation6 + $0x20] sm:$0xff] %vm9293_vm4, %v951_v12  ;;  %vm9297_vm4 = vmmov %vm9162_vm0  ;;  %v1279_v14 = vld [vmem:[#allocation3 + $0x1] sm:$0xff] }
 0x152   :  { %5425 = vmatmul.mubr.msk.bf16.vlgmr.msra.gmra.mrb[0].mxu1 %vm9162_vm0, %v964_v29  ;;  %v940_v45 = vmax.f32 %v932_v49, 0.0  ;;  %v900_v38 = vadd.f32 %v892_v52, %v883_v25  ;;  %v947_v50 = vmin.f32 %v939_v8, 6.0  ;;  %v6865_v9 = vrot.slane %v5118_v32, %v9303_v17  ;;  %v9308_v42 = vld [vmem:[#allocation23_spill] sm:$0xff]  ;;  %v6887_v43 = vld [vmem:[%s8908_s3 + $0x30] ss:$0 sm:$0xff]  ;;  %v9313_v52 = vld [vmem:[#allocation25_spill] sm:$0xff] }
 0x153   :  { %5428 = vmatprep.mubr.msk.bf16.mxu1 %vm9294_vm1, %v965_v40  ;;  %v945_v34 = vmin.f32 %v937_v60, 6.0  ;;  %v901_v4 = vadd.f32 %v9295_v59, %v884_v62  ;;  %vm9298_vm1 = vmmov %vm9162_vm0  ;;  %v6868_v28 = vrot.slane %v5118_v32, %v9304_v57  ;;  %v6876_v22 = vrot.slane %v5118_v32, %v9306_v20  ;;  %v9314_v37 = vld [vmem:[#allocation20_spill] sm:$0xff]  ;;  %v6934_v62 = vld [vmem:[%s8907_s2 + $0x4] ss:$0 sm:$0xff] }
 0x154   :  { %v948_v6 = vmin.f32 %v940_v45, 6.0  ;;  %v917_v13 = vadd.f32 %v909_v47, %v900_v38  ;;  %v6873_v1 = vsel %vm5932_vm5, %v6865_v9, 0.0  ;;  %v6879_v61 = vrot.slane %v5118_v32, %v9307_v36  ;;  %v9320_v5 = vld [vmem:[#allocation30_spill] sm:$0xff]  ;;  %v9343_v57 = vld [vmem:[#allocation53_spill] sm:$0xff] }
 0x155   :  { %v952_v16 = vpack.c.bf16 %v946_v7, %v945_v34  ;;  %v918_v18 = vadd.f32 %v910_v27, %v901_v4  ;;  %v6882_v10 = vrot.slane %v5118_v32, %v9308_v42  ;;  %v1263_v51 = vmul.f32 %v1255_v39, %v6873_v1  ;;  %v6956_v34 = vld [vmem:[%s8907_s2 + $0x5] ss:$0 sm:$0xff] }
 0x156   :  { %v953_v46 = vpack.c.bf16 %v948_v6, %v947_v50  ;;  %v925_v58 = vmul.f32 %v917_v13, %v6734_v3  ;;  %v966_v53 = vld [vmem:[#allocation6 + $0x18] sm:$0xff]  ;;  %v1291_v15 = vmul.f32 %v6868_v28, %v1279_v14  ;;  %v6898_v21 = vsel %vm5958_vm6, %v6865_v9, 0.0 }
 0x157   :  { %956 = vst.msk [vmem:[#allocation6 + $0x28] sm:$0xff] %vm9296_vm2, %v952_v16  ;;  %v926_v23 = vmul.f32 %v918_v18, %v6734_v3  ;;  %vm9299_vm2 = vmmov %vm9162_vm0  ;;  %v6903_v44 = vsel %vm5974_vm7, %v6876_v22, 0.0  ;;  %v6906_v0 = vrot.slane %v5118_v32, %v9313_v52  ;;  %v6909_v40 = vrot.slane %v5118_v32, %v9314_v37  ;;  %v9339_v52 = vld [vmem:[#allocation52_spill] sm:$0xff] }
 0x158   :  { %957 = vst.msk [vmem:[#allocation6 + $0x30] sm:$0xff] %vm9162_vm0, %v953_v46  ;;  %v933_v35 = vadd.f32 %v925_v58, %v6753_v30  ;;  %v967_v11 = vld [vmem:[#allocation6 + $0x20] sm:$0xff]  ;;  %9310 = vst [vmem:[#allocation34_spill] sm:$0xff] %v6898_v21  ;;  %v6914_v49 = vsel %vm6006_vm11, %v6876_v22, 0.0  ;;  %v6919_v8 = vsel %vm5932_vm5, %v6879_v61, 0.0  ;;  %v6924_v29 = vsel %vm6002_vm10, %v6882_v10, 0.0 }
 0x159   :  { %v934_v56 = vadd.f32 %v926_v23, %v6753_v30  ;;  %v6857_v30 = vld [vmem:[#allocation4] sm:$0xff]  ;;  %9312 = vst [vmem:[#allocation75_spill] sm:$0xff] %v6903_v44  ;;  %v6929_v7 = vsel %vm6032_vm13, %v6887_v43, 0.0  ;;  %v6939_v27 = vsel %vm5988_vm8, %v6865_v9, 0.0  ;;  %v6949_v45 = vsel %vm6032_vm13, %v6876_v22, 0.0 }
 0x15a   :  { %5429 = vmatmul.mubr.msk.bf16.gmra.mrb[4].mxu1 %vm9297_vm4, %v966_v53  ;;  %v941_v2 = vmax.f32 %v933_v35, 0.0  ;;  %9302 = vst [vmem:[#allocation27_spill] sm:$0xff] %v6857_v30  ;;  %67 = vst.msk [vmem:[#allocation3 + $0x50] sm:$0x3] %vm66_vm15, %v6857_v30  ;;  %v6951_v38 = vadd.f32 %v1291_v15, %v1263_v51  ;;  %v6961_v59 = vsel %vm6002_vm10, %v6876_v22, 0.0  ;;  %v6966_v4 = vsel %vm5958_vm6, %v6879_v61, 0.0 }
 0x15b   :  { %5432 = vmatprep.mubr.msk.bf16.mxu1 %vm9298_vm1, %v967_v11  ;;  %v942_v19 = vmax.f32 %v934_v56, 0.0  ;;  %78 = vst.msk [vmem:[#allocation3 + $0xa8] sm:$0x3] %vm66_vm15, %v6857_v30  ;;  %9319 = vst [vmem:[#allocation37_spill] sm:$0xff] %v6939_v27  ;;  %v6971_v50 = vsel %vm5988_vm8, %v6879_v61, 0.0  ;;  %v6976_v6 = vsel %vm5974_vm7, %v6882_v10, 0.0 }
 0x15c   :  { %v949_v41 = vmin.f32 %v941_v2, 6.0  ;;  %9323 = vst [vmem:[#allocation38_spill] sm:$0xff] %v6949_v45  ;;  %v6981_v16 = vsel %vm6032_vm13, %v6882_v10, 0.0  ;;  %v6986_v18 = vsel %vm5932_vm5, %v6906_v0, 0.0  ;;  %v6991_v46 = vsel %vm5958_vm6, %v6906_v0, 0.0  ;;  %v9324_v35 = vld [vmem:[#allocation29_spill] sm:$0xff] }
 0x15d   :  { %v950_v24 = vmin.f32 %v942_v19, 6.0  ;;  %v6996_v58 = vsel %vm5974_vm7, %v6887_v43, 0.0  ;;  %v7000_v11 = vrot.slane %v5118_v32, %v9324_v35  ;;  %v7005_v2 = vsel %vm6013_vm12, %v6865_v9, 0.0 }
 0x15e   :  { %v968_v26 = vld [vmem:[#allocation6 + $0x28] sm:$0xff]  ;;  %v7026_v32 = vsel %vm5988_vm8, %v6906_v0, 0.0  ;;  %v7033_v51 = vsel %vm6013_vm12, %v6879_v61, 0.0  ;;  %v7038_v15 = vsel %vm6006_vm11, %v6882_v10, 0.0  ;;  %v7050_v63 = vsel %vm6002_vm10, %v6887_v43, 0.0 }
 0x15f   :  { %v954_v31 = vpack.c.bf16 %v950_v24, %v949_v41  ;;  %v969_v55 = vld [vmem:[#allocation6 + $0x30] sm:$0xff]  ;;  %9329 = vst [vmem:[#allocation39_spill] sm:$0xff] %v7026_v32  ;;  %9331 = vst [vmem:[#allocation43_spill] sm:$0xff] %v7050_v63  ;;  %v7067_v25 = vsel %vm6006_vm11, %v6887_v43, 0.0  ;;  %vm9340_vm8 = vnez %v9339_v52  ;;  %vm9344_vm10 = vnez %v9343_v57 }
 0x160   :  { %9335 = vst [vmem:[#allocation45_spill] sm:$0xff] %v7067_v25  ;;  %v7077_v42 = vsel %vm9340_vm8, %v6882_v10, 0.0  ;;  %v7087_v20 = vsel %vm9344_vm10, %v6865_v9, 0.0  ;;  %vm9349_vm13 = vcmask 523264  }
 0x161   :  { %958 = vst.msk [vmem:[#allocation6 + $0x38] sm:$0xff] %vm9299_vm2, %v954_v31  ;;  %v7016_v31 = vsel %vm6076_vm14, %v6865_v9, 0.0  ;;  %9341 = vst [vmem:[#allocation47_spill] sm:$0xff] %v7077_v42 }
 0x162   :  { %5433 = vmatmul.mubr.msk.bf16.gmra.mrb[8].mxu1 %vm9300_vm3, %v968_v26  ;;  %vm5758_vm3 = vmmov 0   ;;  %9345 = vst [vmem:[#allocation49_spill] sm:$0xff] %v7087_v20  ;;  %vm9352_vm15 = vmmov %vm9349_vm13 }
 0x163   :  { %5436 = vmatprep.mubr.msk.bf16.mxu1 %vm9162_vm0, %v969_v55  ;;  %5448 = vmatprep.mubr.msk.bf16.mxu0 %vm5758_vm3, %v6857_v30  ;;  %v9327_v55 = vld [vmem:[#allocation41_spill] sm:$0xff]  ;;  %vm9355_vm4 = vmmov %vm9349_vm13 }
 0x164   :  { %vm9328_vm5 = vnez %v9327_v55  ;;  %vm9358_vm1 = vmmov %vm9355_vm4  ;;  %v1403_v55 = vld [vmem:[#allocation3 + $0x49] sm:$0xff] }
 0x165   :  { %vm9371_vm2 = vmmov %vm9358_vm1 }
 0x166   :  { %vm9372_vm0 = vmmov %vm9358_vm1 }
 0x168   :  { %v970_v3 = vld [vmem:[#allocation6 + $0x38] sm:$0xff] }
 0x16a   :  { %5437 = vmatmul.mubr.msk.bf16.gmra.mrb[12].mxu1 %vm9301_vm9, %v970_v3  ;;  %vm9321_vm9 = vnez %v9320_v5  ;;  %v7021_v3 = vsel %vm9328_vm5, %v6876_v22, 0.0 }
 0x16b   :  { %5460 = vmatprep.mubr.msk.bf16.mxu1 %vm5758_vm3, %v6857_v30  ;;  %v6944_v47 = vsel %vm9321_vm9, %v6865_v9, 0.0  ;;  %v7010_v19 = vsel %vm9321_vm9, %v6879_v61, 0.0  ;;  %v7045_v60 = vsel %vm9321_vm9, %v6906_v0, 0.0  ;;  %vm9373_vm9 = vmmov %vm9372_vm0 }
 0x16c   :  { %9322 = vst [vmem:[#allocation36_spill] sm:$0xff] %v6944_v47  ;;  %9330 = vst [vmem:[#allocation42_spill] sm:$0xff] %v7045_v60 }
 0x225   :  { %v5426_v13 = vpop.f32.mrb[0].mxu1 }
 0x226   :  { %v1107_v53 = vmul.f32 %v5426_v13, %v6934_v62  ;;  %v1041_v23 = vpop.f32.mrb[1].mxu1 }
 0x227   :  { %v1105_v41 = vmul.f32 %v6934_v62, %v1041_v23  ;;  %v5427_v24 = vpop.f32.mrb[2].mxu1  ;;  %v9332_v23 = vld [vmem:[#allocation55_spill] sm:$0xff] }
 0x228   :  { %v1124_v33 = vadd.f32 %v6956_v34, %v1107_v53  ;;  %v1108_v39 = vmul.f32 %v5427_v24, %v6934_v62  ;;  %v1044_v14 = vpop.f32.mrb[3].mxu1  ;;  %vm9333_vm6 = vnez %v9332_v23 }
 0x229   :  { %v1122_v48 = vadd.f32 %v6956_v34, %v1105_v41  ;;  %v1106_v54 = vmul.f32 %v6934_v62, %v1044_v14  ;;  %v7056_v24 = vsel %vm9333_vm6, %v6876_v22, 0.0  ;;  %v7061_v41 = vsel %vm9328_vm5, %v6882_v10, 0.0 }
 0x22a   :  { %v1140_v13 = vmax.f32 %v1124_v33, 0.0  ;;  %v1125_v53 = vadd.f32 %v6956_v34, %v1108_v39  ;;  %9334 = vst [vmem:[#allocation44_spill] sm:$0xff] %v7061_v41  ;;  %v9336_v33 = vld [vmem:[#allocation54_spill] sm:$0xff] }
 0x22b   :  { %v1138_v5 = vmax.f32 %v1122_v48, 0.0  ;;  %v1123_v14 = vadd.f32 %v6956_v34, %v1106_v54  ;;  %vm9337_vm7 = vnez %v9336_v33  ;;  %v7082_v48 = vsel %vm9333_vm6, %v6887_v43, 0.0 }
 0x22c   :  { %v7072_v39 = vsel %vm9337_vm7, %v6876_v22, 0.0  ;;  %v1156_v35 = vmin.f32 %v1140_v13, 6.0  ;;  %v1141_v37 = vmax.f32 %v1125_v53, 0.0  ;;  %9342 = vst [vmem:[#allocation48_spill] sm:$0xff] %v7082_v48  ;;  %v9346_v13 = vld [vmem:[#allocation51_spill] sm:$0xff] }
 0x22d   :  { %9338 = vst [vmem:[#allocation46_spill] sm:$0xff] %v7072_v39  ;;  %v1154_v12 = vmin.f32 %v1138_v5, 6.0  ;;  %v1139_v54 = vmax.f32 %v1123_v14, 0.0  ;;  %v5430_v36 = vpop.f32.mrb[4].mxu1  ;;  %vm9347_vm11 = vnez %v9346_v13  ;;  %v7099_v5 = vsel %vm9340_vm8, %v6876_v22, 0.0  ;;  %v1539_v48 = vld [vmem:[#allocation3 + $0x58] sm:$0xff] }
 0x22e   :  { %v7092_v53 = vsel %vm9347_vm11, %v6865_v9, 0.0  ;;  %1249 = vst.msk [vmem:[#allocation3 + $0x19] sm:$0xff] %vm9349_vm13, %v1156_v35  ;;  %v1157_v17 = vmin.f32 %v1141_v37, 6.0  ;;  %v1111_v42 = vmul.f32 %v5430_v36, %v6934_v62  ;;  %v1057_v30 = vpop.f32.mrb[5].mxu1  ;;  %9350 = vst [vmem:[#allocation61_spill] sm:$0xff] %v7099_v5  ;;  %v7104_v14 = vsel %vm6076_vm14, %v6879_v61, 0.0 }
 0x22f   :  { %9348 = vst [vmem:[#allocation50_spill] sm:$0xff] %v7092_v53  ;;  %9351 = vst [vmem:[#allocation94_spill] sm:$0xff] %v7104_v14  ;;  %v1563_v39 = vld [vmem:[#allocation3 + $0x59] sm:$0xff]  ;;  %v1155_v9 = vmin.f32 %v1139_v54, 6.0  ;;  %v1109_v37 = vmul.f32 %v6934_v62, %v1057_v30  ;;  %v5431_v35 = vpop.f32.mrb[6].mxu1  ;;  %v7111_v36 = vsel %vm9344_vm10, %v6879_v61, 0.0 }
 0x230   :  { %1247 = vst.msk [vmem:[#allocation3 + $0x9] sm:$0xff] %vm9352_vm15, %v1154_v12  ;;  %9353 = vst [vmem:[#allocation62_spill] sm:$0xff] %v7111_v36  ;;  %v7116_v22 = vsel %vm9333_vm6, %v6882_v10, 0.0  ;;  %v1128_v5 = vadd.f32 %v6956_v34, %v1111_v42  ;;  %v1112_v12 = vmul.f32 %v5431_v35, %v6934_v62  ;;  %v1060_v54 = vpop.f32.mrb[7].mxu1  ;;  %v7124_v30 = vsel %vm6013_vm12, %v6906_v0, 0.0 }
 0x231   :  { %9354 = vst [vmem:[#allocation73_spill] sm:$0xff] %v7116_v22  ;;  %1250 = vst.msk [vmem:[#allocation3 + $0x21] sm:$0xff] %vm9355_vm4, %v1157_v17  ;;  %v7129_v36 = vsel %vm6076_vm14, %v6906_v0, 0.0  ;;  %v1126_v23 = vadd.f32 %v6956_v34, %v1109_v37  ;;  %v1110_v17 = vmul.f32 %v6934_v62, %v1060_v54  ;;  %v1547_v42 = vmul.f32 %v1539_v48, %v6873_v1  ;;  %v1424_v48 = vld [vmem:[#allocation3 + $0x4a] sm:$0xff] }
 0x232   :  { %9356 = vst [vmem:[#allocation80_spill] sm:$0xff] %v7124_v30  ;;  %9357 = vst [vmem:[#allocation76_spill] sm:$0xff] %v7129_v36  ;;  %v1571_v35 = vmul.f32 %v1563_v39, %v6868_v28  ;;  %v1144_v22 = vmax.f32 %v1128_v5, 0.0  ;;  %v1129_v56 = vadd.f32 %v6956_v34, %v1112_v12  ;;  %v7140_v30 = vsel %vm9328_vm5, %v6887_v43, 0.0 }
 0x233   :  { %1248 = vst.msk [vmem:[#allocation3 + $0x11] sm:$0xff] %vm9358_vm1, %v1155_v9  ;;  %9359 = vst [vmem:[#allocation64_spill] sm:$0xff] %v7140_v30  ;;  %v7145_v26 = vsel %vm9347_vm11, %v6879_v61, 0.0  ;;  %v1142_v9 = vmax.f32 %v1126_v23, 0.0  ;;  %v1127_v37 = vadd.f32 %v6956_v34, %v1110_v17  ;;  %v7151_v1 = vsel %vm9337_vm7, %v6882_v10, 0.0 }
 0x234   :  { %9360 = vst [vmem:[#allocation85_spill] sm:$0xff] %v7145_v26  ;;  %9361 = vst [vmem:[#allocation81_spill] sm:$0xff] %v7151_v1  ;;  %v7156_v39 = vsel %vm9337_vm7, %v6887_v43, 0.0  ;;  %v1160_v5 = vmin.f32 %v1144_v22, 6.0  ;;  %v1145_v12 = vmax.f32 %v1129_v56, 0.0  ;;  %v7161_v61 = vsel %vm9344_vm10, %v6906_v0, 0.0 }
 0x235   :  { %9362 = vst [vmem:[#allocation92_spill] sm:$0xff] %v7156_v39  ;;  %9363 = vst [vmem:[#allocation86_spill] sm:$0xff] %v7161_v61  ;;  %v7166_v54 = vsel %vm9347_vm11, %v6906_v0, 0.0  ;;  %v1158_v10 = vmin.f32 %v1142_v9, 6.0  ;;  %v1143_v23 = vmax.f32 %v1127_v37, 0.0  ;;  %v5434_v17 = vpop.f32.mrb[8].mxu1  ;;  %v7175_v56 = vadd.f32 %v1571_v35, %v1547_v42 }
 0x236   :  { %9364 = vst [vmem:[#allocation74_spill] sm:$0xff] %v7166_v54  ;;  %v7168_v33 = vld [vmem:[#allocation3 + $0x19] sm:$0xff]  ;;  %v7173_v22 = vsel %vm9340_vm8, %v6887_v43, 0.0  ;;  %vm9367_vm12 = vmmov %vm9358_vm1  ;;  %v1161_v57 = vmin.f32 %v1145_v12, 6.0  ;;  %v1115_v61 = vmul.f32 %v5434_v17, %v6934_v62  ;;  %v1073_v13 = vpop.f32.mrb[9].mxu1  ;;  %v7180_v37 = vmul.f32 %v7000_v11, %v1403_v55 }
 0x237   :  { %9365 = vst [vmem:[#allocation82_spill] sm:$0xff] %v7173_v22  ;;  %9366 = vst [vmem:[#allocation63_spill] sm:$0xff] %v7175_v56  ;;  %v1256_v0 = vld [vmem:[#allocation3 + $0x8] sm:$0xff]  ;;  %v7183_v1 = vmul.f32 %v1424_v48, %v7156_v39  ;;  %v1159_v43 = vmin.f32 %v1143_v23, 6.0  ;;  %v1113_v52 = vmul.f32 %v6934_v62, %v1073_v13  ;;  %v5435_v42 = vpop.f32.mrb[10].mxu1  ;;  %v1294_v23 = vmul.f32 %v6868_v28, %v7168_v33 }
 0x238   :  { %1253 = vst.msk [vmem:[#allocation3 + $0x39] sm:$0xff] %vm9367_vm12, %v1160_v5  ;;  %v1280_v54 = vld [vmem:[#allocation3 + $0x9] sm:$0xff]  ;;  %9368 = vst [vmem:[#allocation70_spill] sm:$0xff] %v7180_v37  ;;  %v1264_v35 = vmul.f32 %v1256_v0, %v6898_v21  ;;  %v1132_v12 = vadd.f32 %v6956_v34, %v1115_v61  ;;  %v1116_v55 = vmul.f32 %v5435_v42, %v6934_v62  ;;  %v1076_v17 = vpop.f32.mrb[11].mxu1  ;;  %v7208_v37 = vld [vmem:[#allocation3 + $0x1a] sm:$0xff] }
 0x239   :  { %v1307_v9 = vld [vmem:[#allocation3 + $0x2] sm:$0xff]  ;;  %9369 = vst [vmem:[#allocation84_spill] sm:$0xff] %v7183_v1  ;;  %vm9370_vm14 = vmmov %vm9358_vm1  ;;  %v1292_v5 = vmul.f32 %v6868_v28, %v1280_v54  ;;  %v1114_v61 = vmul.f32 %v6934_v62, %v1076_v17 }
 0x23a   :  { %1251 = vst.msk [vmem:[#allocation3 + $0x29] sm:$0xff] %vm9370_vm14, %v1158_v10  ;;  %v7192_v56 = vld [vmem:[#allocation3 + $0x10] sm:$0xff]  ;;  %v7194_v48 = vld [vmem:[#allocation3 + $0x18] sm:$0xff]  ;;  %v1315_v13 = vmul.f32 %v1307_v9, %v6903_v44  ;;  %v1148_v22 = vmax.f32 %v1132_v12, 0.0  ;;  %v1133_v21 = vadd.f32 %v6956_v34, %v1116_v55  ;;  %v1318_v55 = vmul.f32 %v7208_v37, %v6914_v49  ;;  %vm9374_vm5 = vmmov %vm9372_vm0 }
 0x23b   :  { %1254 = vst.msk [vmem:[#allocation3 + $0x41] sm:$0xff] %vm9371_vm2, %v1161_v57  ;;  %v7196_v10 = vld [vmem:[#allocation3 + $0x11] sm:$0xff]  ;;  %v1130_v57 = vadd.f32 %v6956_v34, %v1113_v52  ;;  %v1265_v42 = vmul.f32 %v7192_v56, %v6939_v27  ;;  %v1266_v39 = vmul.f32 %v7194_v48, %v6944_v47  ;;  %v1131_v52 = vadd.f32 %v6956_v34, %v1114_v61  ;;  %vm9375_vm6 = vmmov %vm9372_vm0 }
 0x23c   :  { %1252 = vst.msk [vmem:[#allocation3 + $0x31] sm:$0xff] %vm9372_vm0, %v1159_v43  ;;  %v1308_v1 = vld [vmem:[#allocation3 + $0xa] sm:$0xff]  ;;  %v1293_v9 = vmul.f32 %v6868_v28, %v7196_v10  ;;  %v1300_v43 = vadd.f32 %v1292_v5, %v1264_v35  ;;  %v7214_v17 = vld [vmem:[#allocation3 + $0x12] sm:$0xff]  ;;  %v7219_v47 = vmul.f32 %v6909_v40, %v7168_v33  ;;  %v1164_v26 = vmin.f32 %v1148_v22, 6.0  ;;  %vm9376_vm7 = vmmov %vm9372_vm0 }
 0x23d   :  { %v1146_v44 = vmax.f32 %v1130_v57, 0.0  ;;  %v1316_v27 = vmul.f32 %v1308_v1, %v6949_v45  ;;  %v1149_v30 = vmax.f32 %v1133_v21, 0.0  ;;  %v1147_v14 = vmax.f32 %v1131_v52, 0.0  ;;  %v5438_v35 = vpop.f32.mrb[12].mxu1  ;;  %vm9377_vm8 = vmmov %vm9372_vm0 }
 0x23e   :  { %v1301_v12 = vadd.f32 %v1293_v9, %v1265_v42  ;;  %v1323_v5 = vadd.f32 %v1315_v13, %v6951_v38  ;;  %1533 = vst.msk [vmem:[#allocation3 + $0x71] sm:$0xff] %vm9373_vm9, %v1164_v26  ;;  %v1119_v45 = vmul.f32 %v5438_v35, %v6934_v62  ;;  %v1089_v25 = vpop.f32.mrb[13].mxu1  ;;  %v1302_v63 = vadd.f32 %v1294_v23, %v1266_v39  ;;  %vm9378_vm10 = vmmov %vm9372_vm0 }
 0x23f   :  { %v1162_v36 = vmin.f32 %v1146_v44, 6.0  ;;  %v1324_v57 = vadd.f32 %v1316_v27, %v1300_v43  ;;  %v1165_v61 = vmin.f32 %v1149_v30, 6.0  ;;  %v1317_v21 = vmul.f32 %v7214_v17, %v6961_v59  ;;  %v5439_v42 = vpop.f32.mrb[14].mxu1  ;;  %vm9379_vm11 = vmmov %vm9372_vm0 }
 0x240   :  { %v1163_v22 = vmin.f32 %v1147_v14, 6.0  ;;  %v1117_v44 = vmul.f32 %v6934_v62, %v1089_v25  ;;  %v1332_v9 = vmul.f32 %v1256_v0, %v6919_v8  ;;  %v1333_v27 = vmul.f32 %v7192_v56, %v6966_v4  ;;  %v1092_v26 = vpop.f32.mrb[15].mxu1  ;;  %vm9380_vm13 = vmmov %vm9372_vm0 }
 0x241   :  { %1531 = vst.msk [vmem:[#allocation3 + $0x61] sm:$0xff] %vm9374_vm5, %v1162_v36  ;;  %v1136_v38 = vadd.f32 %v6956_v34, %v1119_v45  ;;  %v1120_v30 = vmul.f32 %v5439_v42, %v6934_v62  ;;  %v1325_v39 = vadd.f32 %v1317_v21, %v1301_v12  ;;  %v1353_v23 = vmul.f32 %v6909_v40, %v1280_v54  ;;  %vm9407_vm15 = vmmov %vm9372_vm0 }
 0x242   :  { %1534 = vst.msk [vmem:[#allocation3 + $0x79] sm:$0xff] %vm9375_vm6, %v1165_v61  ;;  %v1134_v25 = vadd.f32 %v6956_v34, %v1117_v44  ;;  %v1118_v14 = vmul.f32 %v6934_v62, %v1092_v26  ;;  %v1340_v36 = vadd.f32 %v1332_v9, %v1323_v5  ;;  %v1341_v0 = vadd.f32 %v1333_v27, %v1324_v57  ;;  %v1260_v9 = vld [vmem:[#allocation3 + $0x28] sm:$0xff]  ;;  %vm9429_vm4 = vmmov %vm9372_vm0 }
 0x243   :  { %1532 = vst.msk [vmem:[#allocation3 + $0x69] sm:$0xff] %vm9376_vm7, %v1163_v22  ;;  %v1152_v13 = vmax.f32 %v1136_v38, 0.0  ;;  %v1137_v43 = vadd.f32 %v6956_v34, %v1120_v30  ;;  %v1326_v52 = vadd.f32 %v1318_v55, %v1302_v63  ;;  %v1354_v45 = vmul.f32 %v6909_v40, %v7196_v10  ;;  %v1259_v55 = vld [vmem:[#allocation3 + $0x20] sm:$0xff]  ;;  %v1284_v26 = vld [vmem:[#allocation3 + $0x29] sm:$0xff]  ;;  %vm9430_vm1 = vmmov %vm9372_vm0 }
 0x244   :  { %v1150_v35 = vmax.f32 %v1134_v25, 0.0  ;;  %v1135_v12 = vadd.f32 %v6956_v34, %v1118_v14  ;;  %v1361_v61 = vadd.f32 %v1353_v23, %v1340_v36  ;;  %v1370_v54 = vmul.f32 %v1308_v1, %v6976_v6  ;;  %v1283_v30 = vld [vmem:[#allocation3 + $0x21] sm:$0xff]  ;;  %vm9431_vm12 = vmmov %vm9372_vm0 }
 0x245   :  { %v1168_v21 = vmin.f32 %v1152_v13, 6.0  ;;  %v1153_v22 = vmax.f32 %v1137_v43, 0.0  ;;  %v1362_v44 = vadd.f32 %v1354_v45, %v1341_v0  ;;  %v1371_v62 = vmul.f32 %v7214_v17, %v6981_v16  ;;  %v1311_v36 = vld [vmem:[#allocation3 + $0x22] sm:$0xff]  ;;  %v1312_v45 = vld [vmem:[#allocation3 + $0x2a] sm:$0xff]  ;;  %vm9432_vm14 = vmmov %vm9372_vm0 }
 0x246   :  { %v1166_v5 = vmin.f32 %v1150_v35, 6.0  ;;  %v1151_v57 = vmax.f32 %v1135_v12, 0.0  ;;  %v1378_v42 = vadd.f32 %v1370_v54, %v1361_v61  ;;  %v1387_v63 = vmul.f32 %v7192_v56, %v6986_v18  ;;  %v7272_v54 = vld [vmem:[%s8907_s2 + $0x6] ss:$0 sm:$0xff]  ;;  %vm9433_vm2 = vmmov %vm9372_vm0 }
 0x247   :  { %1537 = vst.msk [vmem:[#allocation3 + $0x91] sm:$0xff] %vm9377_vm8, %v1168_v21  ;;  %v1169_v34 = vmin.f32 %v1153_v22, 6.0  ;;  %v1334_v1 = vmul.f32 %v7194_v48, %v6971_v50  ;;  %v1379_v27 = vadd.f32 %v1371_v62, %v1362_v44  ;;  %v1388_v38 = vmul.f32 %v7194_v48, %v6991_v46 }
 0x248   :  { %1535 = vst.msk [vmem:[#allocation3 + $0x81] sm:$0xff] %vm9378_vm10, %v1166_v5  ;;  %v1167_v23 = vmin.f32 %v1151_v57, 6.0  ;;  %v1372_v56 = vmul.f32 %v7208_v37, %v6924_v29  ;;  %v1395_v25 = vadd.f32 %v1387_v63, %v1378_v42  ;;  %v1408_v14 = vmul.f32 %v7000_v11, %v7196_v10  ;;  %v7282_v42 = vld [vmem:[%s8907_s2 + $0x7] ss:$0 sm:$0xff] }
 0x249   :  { %1538 = vst.msk [vmem:[#allocation3 + $0x99] sm:$0xff] %vm9379_vm11, %v1169_v34  ;;  %v1396_v0 = vadd.f32 %v1388_v38, %v1379_v27  ;;  %v1409_v13 = vmul.f32 %v7000_v11, %v7168_v33  ;;  %v1267_v48 = vmul.f32 %v1259_v55, %v7005_v2  ;;  %v1268_v43 = vmul.f32 %v1260_v9, %v7016_v31 }
 0x24a   :  { %1536 = vst.msk [vmem:[#allocation3 + $0x89] sm:$0xff] %vm9380_vm13, %v1167_v23  ;;  %v1416_v35 = vadd.f32 %v1408_v14, %v1395_v25  ;;  %v1425_v12 = vmul.f32 %v7214_v17, %v6996_v58  ;;  %v1295_v10 = vmul.f32 %v6868_v28, %v1283_v30  ;;  %v1296_v61 = vmul.f32 %v6868_v28, %v1284_v26 }
 0x24b   :  { %v1417_v33 = vadd.f32 %v1409_v13, %v1396_v0  ;;  %v1426_v21 = vmul.f32 %v7208_v37, %v6929_v7  ;;  %v1319_v22 = vmul.f32 %v1311_v36, %v7021_v3  ;;  %v1335_v44 = vmul.f32 %v1259_v55, %v7010_v19 }
 0x24c   :  { %v1433_v62 = vadd.f32 %v1425_v12, %v1416_v35  ;;  %v1304_v5 = vadd.f32 %v1296_v61, %v1268_v43  ;;  %v1320_v17 = vmul.f32 %v1312_v45, %v7056_v24  ;;  %v1342_v57 = vadd.f32 %v1334_v1, %v1325_v39  ;;  %v1261_v12 = vld [vmem:[#allocation3 + $0x30] sm:$0xff] }
 0x24d   :  { %v1434_v63 = vadd.f32 %v1426_v21, %v1417_v33  ;;  %v1303_v34 = vadd.f32 %v1295_v10, %v1267_v48  ;;  %v1343_v27 = vadd.f32 %v1335_v44, %v1326_v52  ;;  %v1356_v38 = vmul.f32 %v6909_v40, %v1283_v30  ;;  %v1262_v10 = vld [vmem:[#allocation3 + $0x38] sm:$0xff] }
 0x24e   :  { %v1441_v37 = vmul.f32 %v1433_v62, %v7272_v54  ;;  %v1336_v23 = vmul.f32 %v1260_v9, %v7033_v51  ;;  %v1357_v25 = vmul.f32 %v6909_v40, %v1284_v26  ;;  %v1363_v14 = vadd.f32 %v7219_v47, %v1342_v57  ;;  %v1285_v44 = vld [vmem:[#allocation3 + $0x31] sm:$0xff] }
 0x24f   :  { %v1442_v39 = vmul.f32 %v1434_v63, %v7272_v54  ;;  %v1327_v1 = vadd.f32 %v1319_v22, %v1303_v34  ;;  %v1364_v0 = vadd.f32 %v1356_v38, %v1343_v27  ;;  %v1373_v13 = vmul.f32 %v1311_v36, %v7038_v15  ;;  %v1286_v22 = vld [vmem:[#allocation3 + $0x39] sm:$0xff] }
 0x250   :  { %v1449_v43 = vadd.f32 %v1441_v37, %v7282_v42  ;;  %v1328_v48 = vadd.f32 %v1320_v17, %v1304_v5  ;;  %v1380_v52 = vadd.f32 %v1372_v56, %v1363_v14  ;;  %v1389_v35 = vmul.f32 %v1259_v55, %v7026_v32  ;;  %v9381_v38 = vld [vmem:[#allocation43_spill] sm:$0xff] }
 0x251   :  { %v1450_v61 = vadd.f32 %v1442_v39, %v7282_v42  ;;  %v1374_v33 = vmul.f32 %v1312_v45, %v7061_v41  ;;  %v1381_v21 = vadd.f32 %v1373_v13, %v1364_v0  ;;  %v1390_v47 = vmul.f32 %v1260_v9, %v7045_v60  ;;  %v1313_v39 = vld [vmem:[#allocation3 + $0x32] sm:$0xff]  ;;  %v9385_v60 = vld [vmem:[#allocation46_spill] sm:$0xff] }
 0x252   :  { %v1457_v62 = vmax.f32 %v1449_v43, 0.0  ;;  %v1397_v57 = vadd.f32 %v1389_v35, %v1380_v52  ;;  %v1410_v63 = vmul.f32 %v7000_v11, %v1283_v30  ;;  %v1411_v5 = vmul.f32 %v7000_v11, %v1284_v26  ;;  %v9382_v30 = vld [vmem:[#allocation45_spill] sm:$0xff]  ;;  %v1314_v26 = vld [vmem:[#allocation3 + $0x3a] sm:$0xff] }
 0x253   :  { %v1458_v56 = vmax.f32 %v1450_v61, 0.0  ;;  %v1398_v17 = vadd.f32 %v1390_v47, %v1381_v21  ;;  %v1269_v55 = vmul.f32 %v1261_v12, %v7087_v20  ;;  %v1270_v34 = vmul.f32 %v1262_v10, %v7092_v53  ;;  %v9383_v47 = vld [vmem:[#allocation94_spill] sm:$0xff] }
 0x254   :  { %v1418_v27 = vadd.f32 %v1410_v63, %v1397_v57  ;;  %v1427_v37 = vmul.f32 %v1311_v36, %v9381_v38  ;;  %v1297_v14 = vmul.f32 %v6868_v28, %v1285_v44  ;;  %v1298_v9 = vmul.f32 %v6868_v28, %v1286_v22  ;;  %v9384_v63 = vld [vmem:[#allocation61_spill] sm:$0xff] }
 0x255   :  { %v1465_v0 = vmin.f32 %v1457_v62, 6.0  ;;  %v1466_v13 = vmin.f32 %v1458_v56, 6.0  ;;  %v1419_v43 = vadd.f32 %v1411_v5, %v1398_v17  ;;  %v1428_v52 = vmul.f32 %v1312_v45, %v9382_v30  ;;  %v9386_v62 = vld [vmem:[#allocation62_spill] sm:$0xff] }
 0x256   :  { %v1435_v35 = vadd.f32 %v1427_v37, %v1418_v27  ;;  %v1305_v61 = vadd.f32 %v1297_v14, %v1269_v55  ;;  %v1306_v21 = vadd.f32 %v1298_v9, %v1270_v34  ;;  %v1337_v41 = vmul.f32 %v1261_v12, %v9383_v47  ;;  %v9387_v27 = vld [vmem:[#allocation27_spill] sm:$0xff] }
 0x257   :  { %v1473_v53 = vpack.c.bf16 %v1466_v13, %v1465_v0  ;;  %v1436_v57 = vadd.f32 %v1428_v52, %v1419_v43  ;;  %v1321_v36 = vmul.f32 %v1313_v39, %v9384_v63  ;;  %v1344_v20 = vadd.f32 %v1336_v23, %v1327_v1  ;;  %v9388_v1 = vld [vmem:[#allocation73_spill] sm:$0xff] }
 0x258   :  { %v1443_v38 = vmul.f32 %v1435_v35, %v7272_v54  ;;  %v1322_v32 = vmul.f32 %v1314_v26, %v9385_v60  ;;  %v1338_v56 = vmul.f32 %v1262_v10, %v9386_v62  ;;  %v1345_v5 = vadd.f32 %v1337_v41, %v1328_v48  ;;  %v1331_v43 = vld [vmem:[#allocation3 + $0x40] sm:$0xff]  ;;  %v9390_v35 = vld [vmem:[#allocation47_spill] sm:$0xff] }
 0x259   :  { %5441 = vmatpush3.bf16.msra.mxu0 %v1473_v53  ;;  %v1444_v45 = vmul.f32 %v1436_v57, %v7272_v54  ;;  %v1329_v17 = vadd.f32 %v1321_v36, %v1305_v61  ;;  %v1358_v55 = vmul.f32 %v6909_v40, %v1285_v44  ;;  %v1365_v34 = vadd.f32 %v1357_v25, %v1344_v20  ;;  %v9389_v53 = vld [vmem:[#allocation80_spill] sm:$0xff]  ;;  %v1369_v62 = vld [vmem:[#allocation3 + $0x42] sm:$0xff] }
 0x25a   :  { %5442 = vmatprep.subr.bf16.mxu0 %v9387_v27  ;;  %v1451_v37 = vadd.f32 %v1443_v38, %v7282_v42  ;;  %v1330_v14 = vadd.f32 %v1322_v32, %v1306_v21  ;;  %v1359_v23 = vmul.f32 %v6909_v40, %v1286_v22  ;;  %v1375_v9 = vmul.f32 %v1313_v39, %v9388_v1  ;;  %v9391_v20 = vld [vmem:[#allocation76_spill] sm:$0xff] }
 0x25b   :  { %v1452_v0 = vadd.f32 %v1444_v45, %v7282_v42  ;;  %v1366_v13 = vadd.f32 %v1358_v55, %v1345_v5  ;;  %v1382_v41 = vadd.f32 %v1374_v33, %v1365_v34  ;;  %v1391_v48 = vmul.f32 %v1261_v12, %v9389_v53  ;;  %v1348_v1 = vld [vmem:[#allocation3 + $0x41] sm:$0xff] }
 0x25c   :  { %v1459_v52 = vmax.f32 %v1451_v37, 0.0  ;;  %v1376_v61 = vmul.f32 %v1314_v26, %v9390_v35  ;;  %v1392_v25 = vmul.f32 %v1262_v10, %v9391_v20  ;;  %v1412_v57 = vmul.f32 %v7000_v11, %v1285_v44  ;;  %v9392_v5 = vld [vmem:[#allocation64_spill] sm:$0xff]  ;;  %v9393_v55 = vld [vmem:[#allocation85_spill] sm:$0xff] }
 0x25d   :  { %v1460_v38 = vmax.f32 %v1452_v0, 0.0  ;;  %v1383_v32 = vadd.f32 %v1375_v9, %v1366_v13  ;;  %v1399_v21 = vadd.f32 %v1391_v48, %v1382_v41  ;;  %v1413_v36 = vmul.f32 %v7000_v11, %v1286_v22  ;;  %v9394_v60 = vld [vmem:[#allocation48_spill] sm:$0xff]  ;;  %v1386_v20 = vld [vmem:[#allocation3 + $0x48] sm:$0xff] }
 0x25e   :  { %v1467_v45 = vmin.f32 %v1459_v52, 6.0  ;;  %v1429_v33 = vmul.f32 %v1313_v39, %v9392_v5  ;;  %v1339_v12 = vmul.f32 %v1331_v43, %v9393_v55  ;;  %v1346_v34 = vadd.f32 %v1338_v56, %v1329_v17  ;;  %v1540_v44 = vld [vmem:[#allocation3 + $0x60] sm:$0xff]  ;;  %v7326_v48 = vld [vmem:[#allocation3 + $0x68] sm:$0xff] }
 0x25f   :  { %v1468_v37 = vmin.f32 %v1460_v38, 6.0  ;;  %v1400_v53 = vadd.f32 %v1392_v25, %v1383_v32  ;;  %v1420_v35 = vadd.f32 %v1412_v57, %v1399_v21  ;;  %v1430_v10 = vmul.f32 %v1314_v26, %v9394_v60  ;;  %v9395_v22 = vld [vmem:[#allocation81_spill] sm:$0xff]  ;;  %v9396_v55 = vld [vmem:[#allocation86_spill] sm:$0xff] }
 0x260   :  { %v1347_v0 = vadd.f32 %v1339_v12, %v1330_v14  ;;  %v1360_v9 = vmul.f32 %v6909_v40, %v1348_v1  ;;  %v1367_v13 = vadd.f32 %v1359_v23, %v1346_v34  ;;  %v1377_v41 = vmul.f32 %v1369_v62, %v9395_v22  ;;  %v1564_v17 = vld [vmem:[#allocation3 + $0x61] sm:$0xff]  ;;  %v7329_v25 = vld [vmem:[#allocation3 + $0x69] sm:$0xff] }
 0x261   :  { %v1474_v52 = vpack.c.bf16 %v1468_v37, %v1467_v45  ;;  %v1421_v39 = vadd.f32 %v1413_v36, %v1400_v53  ;;  %v1437_v5 = vadd.f32 %v1429_v33, %v1420_v35  ;;  %v1393_v56 = vmul.f32 %v1331_v43, %v9396_v55  ;;  %v9397_v38 = vld [vmem:[#allocation74_spill] sm:$0xff]  ;;  %v1587_v12 = vld [vmem:[#allocation3 + $0x5a] sm:$0xff]  ;;  %v9399_v35 = vld [vmem:[#allocation37_spill] sm:$0xff] }
 0x262   :  { %v1368_v57 = vadd.f32 %v1360_v9, %v1347_v0  ;;  %v1384_v26 = vadd.f32 %v1376_v61, %v1367_v13  ;;  %v1394_v32 = vmul.f32 %v1386_v20, %v9397_v38  ;;  %v7332_v14 = vld [vmem:[#allocation3 + $0x70] sm:$0xff]  ;;  %v1414_v53 = vmul.f32 %v7000_v11, %v1348_v1  ;;  %v1588_v0 = vld [vmem:[#allocation3 + $0x62] sm:$0xff]  ;;  %v9400_v1 = vld [vmem:[#allocation36_spill] sm:$0xff] }
 0x263   :  { %v9398_v21 = vld [vmem:[#allocation34_spill] sm:$0xff]  ;;  %5443 = vmatpush3.bf16.msra.mxu0 %v1474_v52  ;;  %v1438_v34 = vadd.f32 %v1430_v10, %v1421_v39  ;;  %v1445_v45 = vmul.f32 %v1437_v5, %v7272_v54  ;;  %v1549_v43 = vmul.f32 %v7326_v48, %v9399_v35  ;;  %v1572_v20 = vmul.f32 %v1564_v17, %v6868_v28  ;;  %v9401_v13 = vld [vmem:[#allocation75_spill] sm:$0xff] }
 0x264   :  { %v1548_v23 = vmul.f32 %v1540_v44, %v9398_v21  ;;  %5444 = vmatprep.subr.bf16.mxu0 %v9387_v27  ;;  %v1385_v36 = vadd.f32 %v1377_v41, %v1368_v57  ;;  %v1401_v61 = vadd.f32 %v1393_v56, %v1384_v26  ;;  %v7340_v33 = vld [vmem:[#allocation3 + $0x71] sm:$0xff]  ;;  %v1573_v37 = vmul.f32 %v7329_v25, %v6868_v28 }
 0x265   :  { %v1446_v10 = vmul.f32 %v1438_v34, %v7272_v54  ;;  %v1453_v5 = vadd.f32 %v1445_v45, %v7282_v42  ;;  %v1550_v9 = vmul.f32 %v7332_v14, %v9400_v1  ;;  %v1595_v52 = vmul.f32 %v1587_v12, %v9401_v13  ;;  %v9402_v56 = vld [vmem:[#allocation82_spill] sm:$0xff]  ;;  %v7354_v34 = vld [vmem:[#allocation3 + $0x72] sm:$0xff] }
 0x266   :  { %v1402_v39 = vadd.f32 %v1394_v32, %v1385_v36  ;;  %v1422_v41 = vadd.f32 %v1414_v53, %v1401_v61  ;;  %v1431_v57 = vmul.f32 %v1369_v62, %v9402_v56  ;;  %v1580_v26 = vadd.f32 %v1572_v20, %v1548_v23  ;;  %v1589_v55 = vld [vmem:[#allocation3 + $0x6a] sm:$0xff]  ;;  %v9405_v36 = vld [vmem:[#allocation63_spill] sm:$0xff]  ;;  %v9406_v61 = vld [vmem:[#allocation84_spill] sm:$0xff] }
 0x267   :  { %v1454_v21 = vadd.f32 %v1446_v10, %v7282_v42  ;;  %v1461_v35 = vmax.f32 %v1453_v5, 0.0  ;;  %v1574_v38 = vmul.f32 %v7340_v33, %v6868_v28  ;;  %v9403_v45 = vld [vmem:[#allocation38_spill] sm:$0xff]  ;;  %v1581_v12 = vadd.f32 %v1573_v37, %v1549_v43 }
 0x268   :  { %v1596_v22 = vmul.f32 %v1588_v0, %v9403_v45  ;;  %v9404_v60 = vld [vmem:[#allocation70_spill] sm:$0xff]  ;;  %v1439_v63 = vadd.f32 %v1431_v57, %v1422_v41  ;;  %v1603_v62 = vadd.f32 %v1595_v52, %v9405_v36  ;;  %v1597_v5 = vmul.f32 %v1589_v55, %v6961_v59 }
 0x269   :  { %v1423_v1 = vadd.f32 %v9404_v60, %v1402_v39  ;;  %v1462_v32 = vmax.f32 %v1454_v21, 0.0  ;;  %v1582_v53 = vadd.f32 %v1574_v38, %v1550_v9  ;;  %v1598_v13 = vmul.f32 %v7354_v34, %v6914_v49  ;;  %v1544_v21 = vld [vmem:[#allocation3 + $0x80] sm:$0xff] }
 0x26a   :  { %v1604_v23 = vadd.f32 %v1596_v22, %v1580_v26  ;;  %v1447_v10 = vmul.f32 %v1439_v63, %v7272_v54  ;;  %v1469_v56 = vmin.f32 %v1461_v35, 6.0  ;;  %v1612_v60 = vmul.f32 %v1540_v44, %v6919_v8 }
 0x26b   :  { %v1440_v20 = vadd.f32 %v9406_v61, %v1423_v1  ;;  %v1470_v45 = vmin.f32 %v1462_v32, 6.0  ;;  %v1613_v43 = vmul.f32 %v7326_v48, %v6966_v4  ;;  %v1605_v37 = vadd.f32 %v1597_v5, %v1581_v12  ;;  %v5528_v5 = vld [vmem:[%s8909_s4 + $0x20] ss:$8 sps:$4 sm:$0xff]  }
 0x26c   :  { %v1455_v22 = vadd.f32 %v1447_v10, %v7282_v42  ;;  %v1629_v9 = vmul.f32 %v1564_v17, %v6909_v40  ;;  %v1620_v52 = vadd.f32 %v1612_v60, %v1603_v62  ;;  %v1630_v49 = vmul.f32 %v7329_v25, %v6909_v40 }
 0x26d   :  { %v1448_v38 = vmul.f32 %v1440_v20, %v7272_v54  ;;  %v1475_v63 = vpack.c.bf16 %v1470_v45, %v1469_v56  ;;  %v1621_v59 = vadd.f32 %v1613_v43, %v1604_v23  ;;  %v1606_v8 = vadd.f32 %v1598_v13, %v1582_v53  ;;  %v1543_v56 = vld [vmem:[#allocation3 + $0x78] sm:$0xff]  ;;  %v7382_v53 = vld [vmem:[#allocation3 + $0x81] sm:$0xff] }
 0x26e   :  { %v1463_v41 = vmax.f32 %v1455_v22, 0.0  ;;  %v1614_v4 = vmul.f32 %v7332_v14, %v6971_v50  ;;  %v1637_v44 = vadd.f32 %v1629_v9, %v1620_v52  ;;  %v1646_v26 = vmul.f32 %v1588_v0, %v6976_v6  ;;  %v1567_v50 = vld [vmem:[#allocation3 + $0x79] sm:$0xff] }
 0x26f   :  { %v1456_v39 = vadd.f32 %v1448_v38, %v7282_v42  ;;  %5445 = vmatpush3.bf16.msra.mxu0 %v1475_v63  ;;  %v1638_v57 = vadd.f32 %v1630_v49, %v1621_v59  ;;  %v1647_v17 = vmul.f32 %v1589_v55, %v6981_v16  ;;  %v1663_v12 = vmul.f32 %v7326_v48, %v6986_v18  ;;  %v1591_v0 = vld [vmem:[#allocation3 + $0x7a] sm:$0xff]  ;;  %v5526_v38 = vld [vmem:[%s8910_s5] sm:$0xff]  }
 0x270   :  { %5446 = vmatprep.subr.bf16.mxu0 %v9387_v27  ;;  %v1471_v1 = vmin.f32 %v1463_v41, 6.0  ;;  %v1664_v32 = vmul.f32 %v7332_v14, %v6991_v46  ;;  %v1654_v36 = vadd.f32 %v1646_v26, %v1637_v44  ;;  %v1680_v6 = vmul.f32 %v7329_v25, %v7000_v11  ;;  %v7391_v46 = vld [vmem:[#allocation3 + $0x82] sm:$0xff] }
 0x271   :  { %v1464_v35 = vmax.f32 %v1456_v39, 0.0  ;;  %v1655_v62 = vadd.f32 %v1647_v17, %v1638_v57  ;;  %v1681_v16 = vmul.f32 %v7340_v33, %v7000_v11  ;;  %v1697_v61 = vmul.f32 %v1589_v55, %v6996_v58  ;;  %v9408_v57 = vld [vmem:[#allocation39_spill] sm:$0xff]  ;;  %v9409_v17 = vld [vmem:[#allocation42_spill] sm:$0xff] }
 0x272   :  { %v1551_v18 = vmul.f32 %v1543_v56, %v7005_v2  ;;  %v1552_v48 = vmul.f32 %v1544_v21, %v7016_v31  ;;  %v1671_v14 = vadd.f32 %v1663_v12, %v1654_v36  ;;  %v1575_v10 = vmul.f32 %v1567_v50, %v6868_v28 }
 0x273   :  { %v1472_v23 = vmin.f32 %v1464_v35, 6.0  ;;  %v1672_v20 = vadd.f32 %v1664_v32, %v1655_v62  ;;  %v1576_v25 = vmul.f32 %v7382_v53, %v6868_v28  ;;  %v1698_v58 = vmul.f32 %v7354_v34, %v6929_v7  ;;  %v1570_v62 = vld [vmem:[#allocation3 + $0x91] sm:$0xff] }
 0x274   :  { %v1599_v2 = vmul.f32 %v1591_v0, %v7021_v3  ;;  %v1615_v31 = vmul.f32 %v1543_v56, %v7010_v19  ;;  %v1688_v55 = vadd.f32 %v1680_v6, %v1671_v14  ;;  %v1600_v43 = vmul.f32 %v7391_v46, %v7056_v24  ;;  %v9412_v14 = vld [vmem:[#allocation50_spill] sm:$0xff] }
 0x275   :  { %v1476_v13 = vpack.c.bf16 %v1472_v23, %v1471_v1  ;;  %v1689_v45 = vadd.f32 %v1681_v16, %v1672_v20  ;;  %v1584_v60 = vadd.f32 %v1576_v25, %v1552_v48  ;;  %v1631_v22 = vmul.f32 %v7340_v33, %v6909_v40  ;;  %v1569_v1 = vld [vmem:[#allocation3 + $0x89] sm:$0xff]  ;;  %v9410_v23 = vld [vmem:[#allocation43_spill] sm:$0xff] }
 0x276   :  { %v1622_v9 = vadd.f32 %v1614_v4, %v1605_v37  ;;  %v1623_v7 = vadd.f32 %v1615_v31, %v1606_v8  ;;  %v1632_v3 = vmul.f32 %v1567_v50, %v6909_v40  ;;  %v1648_v19 = vmul.f32 %v7354_v34, %v6924_v29  ;;  %v1545_v4 = vld [vmem:[#allocation3 + $0x88] sm:$0xff] }
 0x277   :  { %5447 = vmatpush3.bf16.msra.mxu0 %v1476_v13  ;;  %v1705_v63 = vadd.f32 %v1697_v61, %v1688_v55  ;;  %v1706_v52 = vadd.f32 %v1698_v58, %v1689_v45  ;;  %v1583_v59 = vadd.f32 %v1575_v10, %v1551_v18  ;;  %v1616_v24 = vmul.f32 %v1544_v21, %v7033_v51  ;;  %v1546_v51 = vld [vmem:[#allocation3 + $0x90] sm:$0xff] }
 0x278   :  { %5464 = vmatprep.subr.bf16.mxu0 %v5528_v5  ;;  %v1639_v49 = vadd.f32 %v1631_v22, %v1622_v9  ;;  %v1640_v39 = vadd.f32 %v1632_v3, %v1623_v7  ;;  %v1649_v41 = vmul.f32 %v1591_v0, %v7038_v15  ;;  %v1608_v8 = vadd.f32 %v1600_v43, %v1584_v60  ;;  %v1593_v58 = vld [vmem:[#allocation3 + $0x8a] sm:$0xff]  ;;  %v1594_v45 = vld [vmem:[#allocation3 + $0x92] sm:$0xff]  ;;  %v9413_v7 = vld [vmem:[#allocation44_spill] sm:$0xff] }
 0x279   :  { %v1713_v44 = vmul.f32 %v1705_v63, %v7272_v54  ;;  %v1714_v33 = vmul.f32 %v1706_v52, %v7272_v54  ;;  %v1607_v37 = vadd.f32 %v1599_v2, %v1583_v59  ;;  %v1665_v26 = vmul.f32 %v1543_v56, %v9408_v57  ;;  %v9411_v56 = vld [vmem:[#allocation49_spill] sm:$0xff]  ;;  %v9415_v59 = vld [vmem:[#allocation46_spill] sm:$0xff] }
 0x27a   :  { %5449 = vmatmul.mubr.msk.bf16.vlgmr.msra.gmra.mrb[16].mxu0 %vm9407_vm15, %v5526_v38  ;;  %v1656_v29 = vadd.f32 %v1648_v19, %v1639_v49  ;;  %v1657_v34 = vadd.f32 %v1649_v41, %v1640_v39  ;;  %v1666_v35 = vmul.f32 %v1544_v21, %v9409_v17  ;;  %v1682_v32 = vmul.f32 %v1567_v50, %v7000_v11  ;;  %v9416_v41 = vld [vmem:[#allocation62_spill] sm:$0xff] }
 0x27b   :  { %5465 = vmatpush3.bf16.msra.mxu0 %v5528_v5  ;;  %v1721_v15 = vadd.f32 %v1713_v44, %v7282_v42  ;;  %v1722_v12 = vadd.f32 %v1714_v33, %v7282_v42  ;;  %v1683_v36 = vmul.f32 %v7382_v53, %v7000_v11  ;;  %v1699_v61 = vmul.f32 %v1591_v0, %v9410_v23 }
 0x27c   :  { %v1673_v6 = vadd.f32 %v1665_v26, %v1656_v29  ;;  %v1674_v16 = vadd.f32 %v1666_v35, %v1657_v34  ;;  %v1553_v18 = vmul.f32 %v1545_v4, %v9411_v56  ;;  %v1554_v20 = vmul.f32 %v1546_v51, %v9412_v14  ;;  %v1611_v34 = vld [vmem:[#allocation3 + $0x98] sm:$0xff]  ;;  %v9417_v26 = vld [vmem:[#allocation73_spill] sm:$0xff] }
 0x27d   :  { %v1729_v21 = vmax.f32 %v1721_v15, 0.0  ;;  %v1730_v48 = vmax.f32 %v1722_v12, 0.0  ;;  %v1577_v10 = vmul.f32 %v1569_v1, %v6868_v28  ;;  %v1700_v50 = vmul.f32 %v7391_v46, %v9382_v30  ;;  %v9414_v30 = vld [vmem:[#allocation61_spill] sm:$0xff]  ;;  %v9418_v35 = vld [vmem:[#allocation80_spill] sm:$0xff] }
 0x27e   :  { %v1690_v25 = vadd.f32 %v1682_v32, %v1673_v6  ;;  %v1691_v5 = vadd.f32 %v1683_v36, %v1674_v16  ;;  %v1578_v13 = vmul.f32 %v1570_v62, %v6868_v28  ;;  %v1633_v0 = vmul.f32 %v7382_v53, %v6909_v40  ;;  %v9419_v36 = vld [vmem:[#allocation76_spill] sm:$0xff] }
 0x27f   :  { %v1737_v2 = vmin.f32 %v1729_v21, 6.0  ;;  %v1738_v31 = vmin.f32 %v1730_v48, 6.0  ;;  %v1585_v55 = vadd.f32 %v1577_v10, %v1553_v18  ;;  %v1617_v22 = vmul.f32 %v1545_v4, %v9383_v47  ;;  %v1628_v16 = vld [vmem:[#allocation3 + $0x99] sm:$0xff]  ;;  %v9420_v18 = vld [vmem:[#allocation85_spill] sm:$0xff] }
 0x280   :  { %v1707_v60 = vadd.f32 %v1699_v61, %v1690_v25  ;;  %v1708_v43 = vadd.f32 %v1700_v50, %v1691_v5  ;;  %v1586_v38 = vadd.f32 %v1578_v13, %v1554_v20  ;;  %v1650_v3 = vmul.f32 %v7391_v46, %v9413_v7  ;;  %v9421_v20 = vld [vmem:[#allocation64_spill] sm:$0xff]  ;;  %v9424_v7 = vld [vmem:[#allocation81_spill] sm:$0xff] }
 0x281   :  { %v1745_v9 = vpack.c.bf16 %v1738_v31, %v1737_v2  ;;  %v1601_v19 = vmul.f32 %v1593_v58, %v9414_v30  ;;  %v1624_v28 = vadd.f32 %v1616_v24, %v1607_v37  ;;  %v1602_v53 = vmul.f32 %v1594_v45, %v9415_v59  ;;  %v1645_v5 = vld [vmem:[#allocation3 + $0x9a] sm:$0xff]  ;;  %v9422_v31 = vld [vmem:[#allocation47_spill] sm:$0xff]  ;;  %v9425_v30 = vld [vmem:[#allocation86_spill] sm:$0xff] }
 0x282   :  { %v1715_v63 = vmul.f32 %v1707_v60, %v7272_v54  ;;  %v1716_v52 = vmul.f32 %v1708_v43, %v7272_v54  ;;  %v1625_v49 = vadd.f32 %v1617_v22, %v1608_v8  ;;  %v1618_v44 = vmul.f32 %v1546_v51, %v9416_v41  ;;  %v1679_v2 = vld [vmem:[#allocation3 + $0xa1] sm:$0xff] }
 0x283   :  { %5453 = vmatpush3.bf16.msra.mxu1 %v1745_v9  ;;  %v1609_v39 = vadd.f32 %v1601_v19, %v1585_v55  ;;  %v1634_v47 = vmul.f32 %v1569_v1, %v6909_v40  ;;  %v1641_v33 = vadd.f32 %v1633_v0, %v1624_v28  ;;  %v1610_v37 = vadd.f32 %v1602_v53, %v1586_v38  ;;  %v9423_v55 = vld [vmem:[#allocation48_spill] sm:$0xff]  ;;  %v9426_v53 = vld [vmem:[#allocation74_spill] sm:$0xff] }
 0x284   :  { %5454 = vmatprep.subr.bf16.mxu1 %v9387_v27  ;;  %v1723_v46 = vadd.f32 %v1715_v63, %v7282_v42  ;;  %v1724_v24 = vadd.f32 %v1716_v52, %v7282_v42  ;;  %v1635_v29 = vmul.f32 %v1570_v62, %v6909_v40  ;;  %v1651_v8 = vmul.f32 %v1593_v58, %v9417_v26  ;;  %v1662_v43 = vld [vmem:[#allocation3 + $0xa0] sm:$0xff]  ;;  %v7460_v63 = vld [vmem:[#allocation4] sm:$0xff] }
 0x285   :  { %v1642_v57 = vadd.f32 %v1634_v47, %v1625_v49  ;;  %v1658_v17 = vadd.f32 %v1650_v3, %v1641_v33  ;;  %v1667_v15 = vmul.f32 %v1545_v4, %v9418_v35  ;;  %v1668_v6 = vmul.f32 %v1546_v51, %v9419_v36 }
 0x286   :  { %v1731_v12 = vmax.f32 %v1723_v46, 0.0  ;;  %v1732_v32 = vmax.f32 %v1724_v24, 0.0  ;;  %v1684_v27 = vmul.f32 %v1569_v1, %v7000_v11  ;;  %v1685_v56 = vmul.f32 %v1570_v62, %v7000_v11  ;;  %v9427_v46 = vld [vmem:[#allocation92_spill] sm:$0xff] }
 0x287   :  { %v1659_v23 = vadd.f32 %v1651_v8, %v1642_v57  ;;  %v1675_v61 = vadd.f32 %v1667_v15, %v1658_v17  ;;  %v1619_v21 = vmul.f32 %v1611_v34, %v9420_v18  ;;  %v1701_v10 = vmul.f32 %v1593_v58, %v9421_v20 }
 0x288   :  { %v1739_v48 = vmin.f32 %v1731_v12, 6.0  ;;  %v1740_v14 = vmin.f32 %v1732_v32, 6.0  ;;  %v1626_v25 = vadd.f32 %v1618_v44, %v1609_v39  ;;  %v1636_v51 = vmul.f32 %v1628_v16, %v6909_v40  ;;  %v1696_v40 = vld [vmem:[#allocation3 + $0xa2] sm:$0xff] }
 0x289   :  { %v1676_v4 = vadd.f32 %v1668_v6, %v1659_v23  ;;  %v1692_v50 = vadd.f32 %v1684_v27, %v1675_v61  ;;  %v1627_v13 = vadd.f32 %v1619_v21, %v1610_v37  ;;  %v1652_v0 = vmul.f32 %v1594_v45, %v9422_v31 }
 0x28a   :  { %v1746_v1 = vpack.c.bf16 %v1740_v14, %v1739_v48  ;;  %v1702_v60 = vmul.f32 %v1594_v45, %v9423_v55  ;;  %v1643_v62 = vadd.f32 %v1635_v29, %v1626_v25  ;;  %v1653_v58 = vmul.f32 %v1645_v5, %v9424_v7  ;;  %v9428_v29 = vld [vmem:[#allocation82_spill] sm:$0xff] }
 0x28b   :  { %v1693_v38 = vadd.f32 %v1685_v56, %v1676_v4  ;;  %v1709_v22 = vadd.f32 %v1701_v10, %v1692_v50  ;;  %v1644_v9 = vadd.f32 %v1636_v51, %v1627_v13  ;;  %v1669_v19 = vmul.f32 %v1611_v34, %v9425_v30  ;;  %v5527_v48 = vld [vmem:[%s8910_s5] sm:$0xff]   ;;  %v5531_v14 = vld [vmem:[%s8909_s4 + $0x50] ss:$8 sps:$4 sm:$0xff]  }
 0x28c   :  { %5455 = vmatpush3.bf16.msra.mxu1 %v1746_v1  ;;  %v1660_v3 = vadd.f32 %v1652_v0, %v1643_v62  ;;  %v1687_v28 = vmul.f32 %v1679_v2, %v7000_v11  ;;  %v1670_v49 = vmul.f32 %v1662_v43, %v9426_v53  ;;  %v1686_v41 = vmul.f32 %v1628_v16, %v7000_v11  ;;  %v5532_v55 = vld [vmem:[%s8909_s4 + $0x60] ss:$8 sps:$4 sm:$0xff]   ;;  %v5535_v43 = vld [vmem:[%s8909_s4 + $0x90] ss:$8 sps:$4 sm:$0xff]  }
 0x28d   :  { %5456 = vmatprep.subr.bf16.mxu1 %v7460_v63  ;;  %v1710_v52 = vadd.f32 %v1702_v60, %v1693_v38  ;;  %v1717_v45 = vmul.f32 %v1709_v22, %v7272_v54  ;;  %v1661_v59 = vadd.f32 %v1653_v58, %v1644_v9  ;;  %v1704_v24 = vmul.f32 %v1696_v40, %v9427_v46  ;;  %v5533_v60 = vld [vmem:[%s8909_s4 + $0x70] ss:$8 sps:$4 sm:$0xff]   ;;  %v5534_v62 = vld [vmem:[%s8909_s4 + $0x80] ss:$8 sps:$4 sm:$0xff]  }
 0x28e   :  { %v1677_v39 = vadd.f32 %v1669_v19, %v1660_v3  ;;  %v1703_v34 = vmul.f32 %v1645_v5, %v9428_v29  ;;  %v5536_v38 = vld [vmem:[%s8909_s4 + $0xa0] ss:$8 sps:$4 sm:$0xff]   ;;  %v5537_v22 = vld [vmem:[%s8909_s4 + $0xb0] ss:$8 sps:$4 sm:$0xff]   ;;  %vm2352_vm7 = vcmask 130048   ;;  %vm2901_vm10 = vcmask 1042432  }
 0x28f   :  { %v1718_v44 = vmul.f32 %v1710_v52, %v7272_v54  ;;  %v1725_v47 = vadd.f32 %v1717_v45, %v7282_v42  ;;  %v1678_v33 = vadd.f32 %v1670_v49, %v1661_v59  ;;  %v5538_v9 = vld [vmem:[%s8909_s4 + $0xc0] ss:$8 sps:$4 sm:$0xff]   ;;  %v5539_v7 = vld [vmem:[%s8909_s4 + $0xd0] ss:$8 sps:$4 sm:$0xff]   ;;  %vm2930_vm11 = vcmask 1041408  }
 0x290   :  { %v1694_v37 = vadd.f32 %v1686_v41, %v1677_v39  ;;  %v1891_v58 = vld [vmem:[%s8907_s2 + $0x10] ss:$0 sm:$0xff]  ;;  %v1896_v30 = vld [vmem:[%s8907_s2 + $0x11] ss:$0 sm:$0xff]  ;;  %vm4808_vm13 = vcmask 1043456  }
 0x291   :  { %v1726_v57 = vadd.f32 %v1718_v44, %v7282_v42  ;;  %v1733_v26 = vmax.f32 %v1725_v47, 0.0  ;;  %v1695_v8 = vadd.f32 %v1687_v28, %v1678_v33 }
 0x292   :  { %v1711_v17 = vadd.f32 %v1703_v34, %v1694_v37  ;;  %v9434_v34 = vld [vmem:[#allocation15_spill] sm:$0xff] }
 0x293   :  { %v1734_v35 = vmax.f32 %v1726_v57, 0.0  ;;  %v1712_v15 = vadd.f32 %v1704_v24, %v1695_v8  ;;  %v1741_v11 = vmin.f32 %v1733_v26, 6.0  ;;  %v1914_v57 = vand.u32 3, %v9434_v34 }
 0x294   :  { %v1719_v12 = vmul.f32 %v1711_v17, %v7272_v54  ;;  %v5131_v17 = vld [vmem:[%s8908_s3 + $0x40] sm:$0xff] }
 0x295   :  { %v1742_v32 = vmin.f32 %v1734_v35, 6.0  ;;  %v1720_v36 = vmul.f32 %v1712_v15, %v7272_v54  ;;  %v5529_v54 = vld [vmem:[%s8909_s4 + $0x30] ss:$8 sps:$4 sm:$0xff]   ;;  %vm7538_vm0 = vcmp.ne.s32.totalorder %v1914_v57, 0  ;;  %vm7547_vm5 = vcmp.ne.s32.totalorder %v1914_v57, 3 }
 0x296   :  { %v1727_v6 = vadd.f32 %v1719_v12, %v7282_v42  ;;  %5466 = vmatprep.subr.bf16.mxu0 %v5529_v54  ;;  %v9435_v35 = vld [vmem:[#allocation17_spill] sm:$0xff]  ;;  %v9436_v12 = vld [vmem:[#allocation16_spill] sm:$0xff] }
 0x297   :  { %v1747_v27 = vpack.c.bf16 %v1742_v32, %v1741_v11  ;;  %v1728_v16 = vadd.f32 %v1720_v36, %v7282_v42  ;;  %5467 = vmatpush3.bf16.msra.mxu0 %v5529_v54  ;;  %v5530_v42 = vld [vmem:[%s8909_s4 + $0x40] ss:$8 sps:$4 sm:$0xff]   ;;  %v1915_v15 = vand.u32 3, %v9435_v35  ;;  %v1927_v11 = vrot.slane %v5131_v17, %v9436_v12  ;;  %v9439_v36 = vld [vmem:[#allocation21_spill] sm:$0xff] }
 0x298   :  { %v1735_v23 = vmax.f32 %v1727_v6, 0.0  ;;  %5468 = vmatprep.subr.bf16.mxu0 %v5530_v42  ;;  %v1937_v6 = vrot.slane %v5131_v17, %v9439_v36 }
 0x299   :  { %5457 = vmatpush3.bf16.msra.mxu1 %v1747_v27  ;;  %v1736_v61 = vmax.f32 %v1728_v16, 0.0  ;;  %vm7543_vm9 = vcmp.ne.s32.totalorder %v1915_v15, 0  ;;  %vm7555_vm6 = vcmp.ne.s32.totalorder %v1915_v15, 3 }
 0x29a   :  { %5458 = vmatprep.subr.bf16.mxu1 %v7460_v63  ;;  %v1743_v56 = vmin.f32 %v1735_v23, 6.0  ;;  %v9444_v23 = vld [vmem:[#allocation18_spill] sm:$0xff]  ;;  %v1929_v54 = vsel %vm7543_vm9, %v1927_v11, 0.0 }
 0x29b   :  { %v1744_v18 = vmin.f32 %v1736_v61, 6.0  ;;  %5469 = vmatpush3.bf16.msra.mxu0 %v5530_v42  ;;  %v1977_v61 = vrot.slane %v5131_v17, %v9444_v23  ;;  %v1938_v42 = vsel %vm7547_vm5, %v1937_v6, 0.0 }
 0x29c   :  { %5470 = vmatprep.subr.bf16.mxu0 %v5531_v14 }
 0x29d   :  { %v1748_v21 = vpack.c.bf16 %v1744_v18, %v1743_v56  ;;  %v1928_v56 = vsel %vm7538_vm0, %v1927_v11, 0.0  ;;  %v9445_v18 = vld [vmem:[#allocation22_spill] sm:$0xff] }
 0x29f   :  { %5459 = vmatpush3.bf16.msra.mxu1 %v1748_v21  ;;  %5471 = vmatpush3.bf16.msra.mxu0 %v5531_v14  ;;  %v1943_v21 = vrot.slane %v5131_v17, %v9445_v18  ;;  %v9448_v14 = vld [vmem:[#allocation23_spill] sm:$0xff] }
 0x2a0   :  { %5496 = vmatprep.subr.bf16.mxu0 %v7460_v63  ;;  %5476 = vmatprep.subr.bf16.mxu1 %v5532_v55 }
 0x2a2   :  { %5461 = vmatmul.mubr.msk.bf16.vlgmr.msra.gmra.mrb[16].mxu1 %vm9429_vm4, %v5527_v48 }
 0x2a3   :  { %5477 = vmatpush3.bf16.msra.mxu1 %v5532_v55 }
 0x2a4   :  { %5478 = vmatprep.subr.bf16.mxu1 %v5533_v60 }
 0x2a7   :  { %5479 = vmatpush3.bf16.msra.mxu1 %v5533_v60 }
 0x2a8   :  { %5480 = vmatprep.subr.bf16.mxu1 %v5534_v62 }
 0x2ab   :  { %5481 = vmatpush3.bf16.msra.mxu1 %v5534_v62 }
 0x2ac   :  { %5482 = vmatprep.subr.bf16.mxu1 %v5535_v43 }
 0x2af   :  { %5483 = vmatpush3.bf16.msra.mxu1 %v5535_v43  ;;  %v9450_v43 = vld [vmem:[#allocation20_spill] sm:$0xff] }
 0x2b0   :  { %5484 = vmatprep.subr.bf16.mxu1 %v5536_v38 }
 0x2b3   :  { %5485 = vmatpush3.bf16.msra.mxu1 %v5536_v38  ;;  %v7575_v38 = vrot.slane %v5131_v17, %v9450_v43 }
 0x2b4   :  { %5486 = vmatprep.subr.bf16.mxu1 %v5537_v22 }
 0x2b7   :  { %5487 = vmatpush3.bf16.msra.mxu1 %v5537_v22 }
 0x2b8   :  { %5488 = vmatprep.subr.bf16.mxu1 %v5538_v9 }
 0x2bb   :  { %5489 = vmatpush3.bf16.msra.mxu1 %v5538_v9 }
 0x2bc   :  { %5490 = vmatprep.subr.bf16.mxu1 %v5539_v7 }
 0x2bf   :  { %5491 = vmatpush3.bf16.msra.mxu1 %v5539_v7 }
 0x34d   :  { %v1521_v20 = vpop.f32.mrb[16].mxu0 }
 0x34e   :  { %v5450_v10 = vpop.f32.mrb[17].mxu0 }
 0x34f   :  { %v1524_v25 = vpop.f32.mrb[18].mxu0  ;;  %v9449_v10 = vld [vmem:[#allocation25_spill] sm:$0xff] }
 0x350   :  { %v1528_v5 = vpack.c.bf16 %v1524_v25, %v1521_v20  ;;  %v5451_v4 = vpop.f32.mrb[19].mxu0  ;;  %v1949_v20 = vrot.slane %v5131_v17, %v9448_v14  ;;  %v1955_v25 = vrot.slane %v5131_v17, %v9449_v10 }
 0x352   :  { %1529 = vst.msk [vmem:[#allocation7] sm:$0xff] %vm9430_vm1, %v1528_v5 }
 0x359   :  { %v1810_v50 = vld [vmem:[#allocation7] sm:$0xff] }
 0x35a   :  { %5472 = vmatprep.mubr.msk.bf16.mxu0 %vm9431_vm12, %v1810_v50 }
 0x375   :  { %v1793_v13 = vpop.f32.mrb[16].mxu1 }
 0x376   :  { %v5462_v51 = vpop.f32.mrb[17].mxu1 }
 0x377   :  { %v1796_v2 = vpop.f32.mrb[18].mxu1 }
 0x378   :  { %v1800_v1 = vpack.c.bf16 %v1796_v2, %v1793_v13  ;;  %v5463_v31 = vpop.f32.mrb[19].mxu1  ;;  %v5133_v13 = vld [vmem:[%s8908_s3 + $0x50] ss:$0 sm:$0xff] }
 0x379   :  { %v1939_v31 = vsel %vm7555_vm6, %v1937_v6, 0.0 }
 0x37a   :  { %1801 = vst.msk [vmem:[#allocation7 + $0x8] sm:$0xff] %vm9432_vm14, %v1800_v1 }
 0x381   :  { %v1811_v0 = vld [vmem:[#allocation7 + $0x8] sm:$0xff] }
 0x382   :  { %5473 = vmatmul.mubr.msk.bf16.vlgmr.msra.gmra.mrb[20].mxu0 %vm9433_vm2, %v1811_v0  ;;  %v1944_v0 = vsel %vm7538_vm0, %v1943_v21, 0.0 }
 0x383   :  { %5498 = vmatprep.mubr.msk.bf16.mxu0 %vm5758_vm3, %v7460_v63 }
 0x455   :  { %v5474_v3 = vpop.f32.mrb[20].mxu0 }
 0x456   :  { %v1894_v19 = vmul.f32 %v5474_v3, %v1891_v58  ;;  %v1876_v28 = vpop.f32.mrb[21].mxu0 }
 0x457   :  { %v1892_v40 = vmul.f32 %v1891_v58, %v1876_v28  ;;  %v5475_v52 = vpop.f32.mrb[22].mxu0  ;;  %v7585_v28 = vsel %vm7538_vm0, %v1955_v25, 0.0 }
 0x458   :  { %v1899_v45 = vadd.f32 %v1896_v30, %v1894_v19  ;;  %v1895_v59 = vmul.f32 %v5475_v52, %v1891_v58  ;;  %v1879_v53 = vpop.f32.mrb[23].mxu0  ;;  %v7581_v19 = vsel %vm7547_vm5, %v1949_v20, 0.0 }
 0x459   :  { %v1897_v49 = vadd.f32 %v1896_v30, %v1892_v40  ;;  %v1893_v39 = vmul.f32 %v1891_v58, %v1879_v53  ;;  %v7589_v40 = vsel %vm7547_vm5, %v5133_v13, 0.0 }
 0x45a   :  { %v1903_v41 = vmax.f32 %v1899_v45, 0.0  ;;  %v1900_v44 = vadd.f32 %v1896_v30, %v1895_v59 }
 0x45b   :  { %v1901_v47 = vmax.f32 %v1897_v49, 0.0  ;;  %v1898_v33 = vadd.f32 %v1896_v30, %v1893_v39  ;;  %v1945_v30 = vsel %vm7543_vm9, %v1943_v21, 0.0 }
 0x45c   :  { %v7526_v46 = vmin.f32 %v1903_v41, 6.0  ;;  %v1904_v24 = vmax.f32 %v1900_v44, 0.0  ;;  %v1951_v41 = vsel %vm7555_vm6, %v1949_v20, 0.0  ;;  %v7598_v44 = vsel %vm7543_vm9, %v1955_v25, 0.0 }
 0x45d   :  { %v1905_v37 = vmin.f32 %v1901_v47, 6.0  ;;  %v1902_v29 = vmax.f32 %v1898_v33, 0.0  ;;  %v7606_v20 = vsel %vm7555_vm6, %v5133_v13, 0.0 }
 0x45e   :  { %2040 = vst [vmem:[#allocation4 + $0x25] sm:$0xff] %v7526_v46  ;;  %v7530_v26 = vmin.f32 %v1904_v24, 6.0 }
 0x45f   :  { %1964 = vst [vmem:[#allocation4 + $0x5] sm:$0xff] %v1905_v37  ;;  %v1906_v8 = vmin.f32 %v1902_v29, 6.0  ;;  %v2000_v47 = vmul.f32 %v7575_v38, %v1905_v37  ;;  %v9451_v37 = vld [vmem:[#allocation29_spill] sm:$0xff] }
 0x460   :  { %2041 = vst [vmem:[#allocation4 + $0x2d] sm:$0xff] %v7530_v26 }
 0x461   :  { %1965 = vst [vmem:[#allocation4 + $0xd] sm:$0xff] %v1906_v8  ;;  %v2001_v25 = vmul.f32 %v7575_v38, %v1906_v8 }
 0x465   :  { %v2042_v3 = vld [vmem:[#allocation4 + $0x20] sm:$0xff] }
 0x466   :  { %v1966_v5 = vld [vmem:[#allocation4] sm:$0xff]  ;;  %v2044_v24 = vmul.f32 %v2042_v3, %v1928_v56 }
 0x467   :  { %v1972_v4 = vld [vmem:[#allocation4 + $0x1] sm:$0xff]  ;;  %v1968_v51 = vmul.f32 %v1966_v5, %v1928_v56  ;;  %v7602_v5 = vld [vmem:[#allocation4 + $0x2a] sm:$0xff] }
 0x468   :  { %v1982_v50 = vld [vmem:[#allocation4 + $0x2] sm:$0xff]  ;;  %v1978_v2 = vmul.f32 %v1977_v61, %v1972_v4  ;;  %v7572_v62 = vld [vmem:[#allocation4 + $0xa] sm:$0xff]  ;;  %v2057_v3 = vmul.f32 %v7602_v5, %v1939_v31 }
 0x469   :  { %v1988_v1 = vld [vmem:[#allocation4 + $0x4] sm:$0xff]  ;;  %v1984_v58 = vmul.f32 %v1982_v50, %v1938_v42  ;;  %v1989_v52 = vld [vmem:[#allocation4 + $0xc] sm:$0xff]  ;;  %v1985_v53 = vmul.f32 %v7572_v62, %v1939_v31  ;;  %v2019_v50 = vrot.slane %v5131_v17, %v9451_v37 }
 0x46a   :  { %v1967_v55 = vld [vmem:[#allocation4 + $0x8] sm:$0xff]  ;;  %v1980_v7 = vadd.f32 %v1978_v2, %v1968_v51  ;;  %v1990_v39 = vmul.f32 %v1988_v1, %v1944_v0  ;;  %v1991_v15 = vmul.f32 %v1989_v52, %v1945_v30 }
 0x46b   :  { %v1973_v60 = vld [vmem:[#allocation4 + $0x9] sm:$0xff]  ;;  %v1969_v22 = vmul.f32 %v1967_v55, %v1929_v54  ;;  %v2048_v57 = vld [vmem:[#allocation4 + $0x21] sm:$0xff]  ;;  %v2011_v8 = vmul.f32 %v1967_v55, %v7585_v28  ;;  %v2069_v55 = vmul.f32 %v7575_v38, %v7530_v26 }
 0x46c   :  { %v1979_v9 = vmul.f32 %v1977_v61, %v1973_v60  ;;  %v7591_v45 = vld [vmem:[#allocation4 + $0x28] sm:$0xff]  ;;  %v1986_v49 = vadd.f32 %v1984_v58, %v1980_v7  ;;  %v2050_v56 = vmul.f32 %v2048_v57, %v1977_v61 }
 0x46d   :  { %v2004_v33 = vld [vmem:[#allocation4 + $0x6] sm:$0xff]  ;;  %v2005_v6 = vld [vmem:[#allocation4 + $0xe] sm:$0xff]  ;;  %v2045_v21 = vmul.f32 %v7591_v45, %v1929_v54 }
 0x46e   :  { %v1981_v59 = vadd.f32 %v1979_v9, %v1969_v22  ;;  %v2054_v29 = vld [vmem:[#allocation4 + $0x22] sm:$0xff]  ;;  %v1992_v11 = vadd.f32 %v1990_v39, %v1986_v49  ;;  %v2006_v1 = vmul.f32 %v2004_v33, %v7581_v19  ;;  %v2010_v22 = vld [vmem:[#allocation4 + $0x10] sm:$0xff]  ;;  %v2007_v54 = vmul.f32 %v2005_v6, %v1951_v41 }
 0x46f   :  { %v2049_v4 = vld [vmem:[#allocation4 + $0x29] sm:$0xff]  ;;  %v2056_v58 = vmul.f32 %v2054_v29, %v1938_v42  ;;  %v2015_v49 = vld [vmem:[#allocation4 + $0x11] sm:$0xff]  ;;  %v2012_v39 = vmul.f32 %v2010_v22, %v7598_v44 }
 0x470   :  { %v1987_v35 = vadd.f32 %v1985_v53, %v1981_v59  ;;  %v2002_v2 = vadd.f32 %v2000_v47, %v1992_v11  ;;  %v2060_v9 = vld [vmem:[#allocation4 + $0x24] sm:$0xff]  ;;  %v2051_v7 = vmul.f32 %v2049_v4, %v1977_v61  ;;  %v2061_v52 = vld [vmem:[#allocation4 + $0x2c] sm:$0xff]  ;;  %v2052_v59 = vadd.f32 %v2050_v56, %v2044_v24 }
 0x471   :  { %v2020_v47 = vmul.f32 %v2019_v50, %v1973_v60  ;;  %v2062_v57 = vmul.f32 %v2060_v9, %v1944_v0  ;;  %v2024_v61 = vld [vmem:[#allocation4 + $0x12] sm:$0xff]  ;;  %v2063_v11 = vmul.f32 %v2061_v52, %v1945_v30  ;;  %v2072_v42 = vld [vmem:[#allocation4 + $0x26] sm:$0xff]  ;;  %v2021_v31 = vmul.f32 %v2019_v50, %v2015_v49 }
 0x472   :  { %v1993_v51 = vadd.f32 %v1991_v15, %v1987_v35  ;;  %v2008_v53 = vadd.f32 %v2006_v1, %v2002_v2  ;;  %v2053_v17 = vadd.f32 %v2051_v7, %v2045_v21  ;;  %v2058_v33 = vadd.f32 %v2056_v58, %v2052_v59  ;;  %v2073_v6 = vld [vmem:[#allocation4 + $0x2e] sm:$0xff] }
 0x473   :  { %v2025_v0 = vmul.f32 %v7572_v62, %v7589_v40  ;;  %v1912_v30 = vld [vmem:[%s8907_s2 + $0x12] ss:$0 sm:$0xff]  ;;  %v2074_v2 = vmul.f32 %v2072_v42, %v7581_v19  ;;  %v2075_v7 = vmul.f32 %v2073_v6, %v1951_v41  ;;  %v2079_v62 = vmul.f32 %v7591_v45, %v7585_v28 }
 0x474   :  { %v2003_v13 = vadd.f32 %v2001_v25, %v1993_v51  ;;  %v2013_v15 = vadd.f32 %v2011_v8, %v2008_v53  ;;  %v2059_v29 = vadd.f32 %v2057_v3, %v2053_v17  ;;  %v2064_v24 = vadd.f32 %v2062_v57, %v2058_v33  ;;  %v2078_v1 = vld [vmem:[#allocation4 + $0x30] sm:$0xff] }
 0x475   :  { %v2068_v25 = vmul.f32 %v7575_v38, %v7526_v46  ;;  %v2026_v51 = vmul.f32 %v2024_v61, %v7606_v20  ;;  %v1913_v38 = vld [vmem:[%s8907_s2 + $0x13] ss:$0 sm:$0xff]  ;;  %v2080_v59 = vmul.f32 %v2078_v1, %v7598_v44  ;;  %v2084_v8 = vmul.f32 %v2049_v4, %v2019_v50 }
 0x476   :  { %v2009_v35 = vadd.f32 %v2007_v54, %v2003_v13  ;;  %v2022_v56 = vadd.f32 %v2020_v47, %v2013_v15  ;;  %v2065_v60 = vadd.f32 %v2063_v11, %v2059_v29  ;;  %v2083_v58 = vld [vmem:[#allocation4 + $0x31] sm:$0xff]  ;;  %v2089_v47 = vmul.f32 %v7602_v5, %v7589_v40 }
 0x477   :  { %v2070_v22 = vadd.f32 %v2068_v25, %v2064_v24  ;;  %v2088_v13 = vld [vmem:[#allocation4 + $0x32] sm:$0xff] }
 0x478   :  { %v2014_v21 = vadd.f32 %v2012_v39, %v2009_v35  ;;  %v2027_v9 = vadd.f32 %v2025_v0, %v2022_v56  ;;  %v2071_v26 = vadd.f32 %v2069_v55, %v2065_v60  ;;  %v2085_v39 = vmul.f32 %v2083_v58, %v2019_v50  ;;  %v2223_v56 = vld [vmem:[%s8907_s2 + $0x15] ss:$0 sm:$0xff] }
 0x479   :  { %v2076_v54 = vadd.f32 %v2074_v2, %v2070_v22  ;;  %v2090_v45 = vmul.f32 %v2088_v13, %v7606_v20  ;;  %v2218_v20 = vld [vmem:[%s8907_s2 + $0x14] ss:$0 sm:$0xff] }
 0x47a   :  { %v2023_v46 = vadd.f32 %v2021_v31, %v2014_v21  ;;  %v2029_v52 = vmul.f32 %v2027_v9, %v1912_v30  ;;  %v2077_v19 = vadd.f32 %v2075_v7, %v2071_v26 }
 0x47b   :  { %v2081_v53 = vadd.f32 %v2079_v62, %v2076_v54 }
 0x47c   :  { %v2028_v3 = vadd.f32 %v2026_v51, %v2023_v46  ;;  %v2031_v41 = vadd.f32 %v2029_v52, %v1913_v38  ;;  %v2082_v17 = vadd.f32 %v2080_v59, %v2077_v19  ;;  %v7648_v19 = vld [vmem:[%s8908_s3 + $0x60] sm:$0xff] }
 0x47d   :  { %v2086_v57 = vadd.f32 %v2084_v8, %v2081_v53  ;;  %v2244_v53 = vrot.slane %v7648_v19, %v9436_v12  ;;  %v2250_v8 = vrot.slane %v7648_v19, %v9439_v36 }
 0x47e   :  { %v2030_v49 = vmul.f32 %v2028_v3, %v1912_v30  ;;  %v2033_v28 = vmax.f32 %v2031_v41, 0.0  ;;  %v2087_v35 = vadd.f32 %v2085_v39, %v2082_v17  ;;  %v2290_v41 = vrot.slane %v7648_v19, %v9444_v23 }
 0x47f   :  { %v2091_v15 = vadd.f32 %v2089_v47, %v2086_v57  ;;  %v2245_v17 = vsel %vm7538_vm0, %v2244_v53, 0.0  ;;  %v2256_v39 = vrot.slane %v7648_v19, %v9445_v18  ;;  %v2262_v47 = vrot.slane %v7648_v19, %v9448_v14 }
 0x480   :  { %v2032_v33 = vadd.f32 %v2030_v49, %v1913_v38  ;;  %v2092_v44 = vadd.f32 %v2090_v45, %v2087_v35  ;;  %v2035_v42 = vmin.f32 %v2033_v28, 6.0  ;;  %v5144_v49 = vld [vmem:[%s8908_s3 + $0x70] ss:$0 sm:$0xff]  ;;  %v2246_v57 = vsel %vm7543_vm9, %v2244_v53, 0.0 }
 0x481   :  { %v2093_v11 = vmul.f32 %v2091_v15, %v1912_v30  ;;  %v2268_v28 = vrot.slane %v7648_v19, %v9449_v10  ;;  %v7677_v45 = vsel %vm7547_vm5, %v5144_v49, 0.0 }
 0x482   :  { %v2034_v61 = vmax.f32 %v2032_v33, 0.0  ;;  %v2094_v4 = vmul.f32 %v2092_v44, %v1912_v30  ;;  %v2251_v33 = vsel %vm7547_vm5, %v2250_v8, 0.0  ;;  %v7681_v44 = vsel %vm7555_vm6, %v5144_v49, 0.0 }
 0x483   :  { %v2095_v31 = vadd.f32 %v2093_v11, %v1913_v38 }
 0x484   :  { %v2036_v29 = vmin.f32 %v2034_v61, 6.0  ;;  %v2096_v24 = vadd.f32 %v2094_v4, %v1913_v38  ;;  %v2312_v4 = vrot.slane %v7648_v19, %v9450_v43 }
 0x485   :  { %v2097_v50 = vmax.f32 %v2095_v31, 0.0 }
 0x486   :  { %v2037_v6 = vpack.c.bf16 %v2036_v29, %v2035_v42  ;;  %v2098_v25 = vmax.f32 %v2096_v24, 0.0  ;;  %v2252_v24 = vsel %vm7555_vm6, %v2250_v8, 0.0 }
 0x487   :  { %v2099_v40 = vmin.f32 %v2097_v50, 6.0  ;;  %v2257_v50 = vsel %vm7538_vm0, %v2256_v39, 0.0 }
 0x488   :  { %5492 = vmatprep.mubr.bf16.mxu1 %v2037_v6  ;;  %v2100_v5 = vmin.f32 %v2098_v25, 6.0 }
 0x48a   :  { %v2101_v55 = vpack.c.bf16 %v2100_v5, %v2099_v40 }
 0x48c   :  { %5493 = vmatmul.mubr.bf16.vlgmr.msra.gmra.mrb[20].mxu1 %v2101_v55 }
 0x55f   :  { %v5494_v21 = vpop.f32.mrb[20].mxu1 }
 0x560   :  { %v2221_v0 = vmul.f32 %v5494_v21, %v2218_v20  ;;  %v2203_v60 = vpop.f32.mrb[21].mxu1  ;;  %v2258_v21 = vsel %vm7543_vm9, %v2256_v39, 0.0 }
 0x561   :  { %v2219_v30 = vmul.f32 %v2218_v20, %v2203_v60  ;;  %v5495_v51 = vpop.f32.mrb[22].mxu1 }
 0x562   :  { %v2226_v2 = vadd.f32 %v2223_v56, %v2221_v0  ;;  %v2222_v1 = vmul.f32 %v5495_v51, %v2218_v20  ;;  %v2206_v22 = vpop.f32.mrb[23].mxu1 }
 0x563   :  { %v2224_v46 = vadd.f32 %v2223_v56, %v2219_v30  ;;  %v2220_v9 = vmul.f32 %v2218_v20, %v2206_v22 }
 0x564   :  { %v2230_v7 = vmax.f32 %v2226_v2, 0.0  ;;  %v2227_v26 = vadd.f32 %v2223_v56, %v2222_v1 }
 0x565   :  { %v2228_v38 = vmax.f32 %v2224_v46, 0.0  ;;  %v2225_v62 = vadd.f32 %v2223_v56, %v2220_v9 }
 0x566   :  { %v7640_v54 = vmin.f32 %v2230_v7, 6.0  ;;  %v2231_v58 = vmax.f32 %v2227_v26, 0.0  ;;  %v2263_v26 = vsel %vm7547_vm5, %v2262_v47, 0.0 }
 0x567   :  { %v2232_v3 = vmin.f32 %v2228_v38, 6.0  ;;  %v2229_v52 = vmax.f32 %v2225_v62, 0.0  ;;  %v2264_v38 = vsel %vm7555_vm6, %v2262_v47, 0.0  ;;  %v2269_v62 = vsel %vm7538_vm0, %v2268_v28, 0.0 }
 0x568   :  { %2398 = vst [vmem:[#allocation4 + $0x25] sm:$0xff] %v7640_v54  ;;  %v7643_v59 = vmin.f32 %v2231_v58, 6.0 }
 0x569   :  { %2277 = vst [vmem:[#allocation4 + $0x5] sm:$0xff] %v2232_v3  ;;  %v7650_v13 = vmin.f32 %v2229_v52, 6.0  ;;  %v2313_v16 = vmul.f32 %v2312_v4, %v2232_v3 }
 0x56a   :  { %2399 = vst [vmem:[#allocation4 + $0x2d] sm:$0xff] %v7643_v59 }
 0x56b   :  { %2278 = vst [vmem:[#allocation4 + $0xd] sm:$0xff] %v7650_v13 }
 0x56f   :  { %v2400_v35 = vld [vmem:[#allocation4 + $0x20] sm:$0xff] }
 0x570   :  { %v2412_v15 = vld [vmem:[#allocation4 + $0x22] sm:$0xff]  ;;  %v2402_v31 = vmul.f32 %v2400_v35, %v2245_v17 }
 0x571   :  { %v2406_v61 = vld [vmem:[#allocation4 + $0x21] sm:$0xff]  ;;  %v7691_v20 = vld [vmem:[#allocation4 + $0x29] sm:$0xff]  ;;  %v2414_v58 = vmul.f32 %v2412_v15, %v2251_v33 }
 0x572   :  { %v2279_v11 = vld [vmem:[#allocation4] sm:$0xff]  ;;  %v2408_v6 = vmul.f32 %v2406_v61, %v2290_v41  ;;  %v7689_v55 = vld [vmem:[#allocation4 + $0x28] sm:$0xff]  ;;  %v2409_v2 = vmul.f32 %v7691_v20, %v2290_v41  ;;  %v2323_v27 = vld [vmem:[#allocation4 + $0x10] sm:$0xff] }
 0x573   :  { %v2285_v42 = vld [vmem:[#allocation4 + $0x1] sm:$0xff]  ;;  %v2281_v25 = vmul.f32 %v2279_v11, %v2245_v17  ;;  %v2286_v0 = vld [vmem:[#allocation4 + $0x9] sm:$0xff]  ;;  %v2403_v51 = vmul.f32 %v7689_v55, %v2246_v57 }
 0x574   :  { %v2295_v29 = vld [vmem:[#allocation4 + $0x2] sm:$0xff]  ;;  %v2291_v40 = vmul.f32 %v2290_v41, %v2285_v42  ;;  %v2296_v60 = vld [vmem:[#allocation4 + $0xa] sm:$0xff]  ;;  %v2292_v22 = vmul.f32 %v2290_v41, %v2286_v0  ;;  %v2410_v7 = vadd.f32 %v2408_v6, %v2402_v31  ;;  %v2332_v31 = vrot.slane %v7648_v19, %v9451_v37 }
 0x575   :  { %v2301_v5 = vld [vmem:[#allocation4 + $0x4] sm:$0xff]  ;;  %v2297_v30 = vmul.f32 %v2295_v29, %v2251_v33  ;;  %v2302_v9 = vld [vmem:[#allocation4 + $0xc] sm:$0xff]  ;;  %v2298_v53 = vmul.f32 %v2296_v60, %v2252_v24  ;;  %v2411_v61 = vadd.f32 %v2409_v2, %v2403_v51  ;;  %v2314_v33 = vmul.f32 %v2312_v4, %v7650_v13 }
 0x576   :  { %v2280_v56 = vld [vmem:[#allocation4 + $0x8] sm:$0xff]  ;;  %v2293_v46 = vadd.f32 %v2291_v40, %v2281_v25  ;;  %v2303_v49 = vmul.f32 %v2301_v5, %v2257_v50  ;;  %v2304_v35 = vmul.f32 %v2302_v9, %v2258_v21  ;;  %v2416_v29 = vadd.f32 %v2414_v58, %v2410_v7  ;;  %v2328_v9 = vld [vmem:[#allocation4 + $0x11] sm:$0xff] }
 0x577   :  { %v2282_v1 = vmul.f32 %v2280_v56, %v2246_v57  ;;  %v2317_v17 = vld [vmem:[#allocation4 + $0x6] sm:$0xff]  ;;  %v2270_v57 = vsel %vm7543_vm9, %v2268_v28, 0.0  ;;  %v2318_v42 = vld [vmem:[#allocation4 + $0xe] sm:$0xff]  ;;  %v2426_v2 = vmul.f32 %v2312_v4, %v7640_v54  ;;  %v2338_v54 = vmul.f32 %v2296_v60, %v7677_v45 }
 0x578   :  { %v2299_v8 = vadd.f32 %v2297_v30, %v2293_v46  ;;  %v2413_v39 = vld [vmem:[#allocation4 + $0x2a] sm:$0xff]  ;;  %v2319_v15 = vmul.f32 %v2317_v17, %v2263_v26  ;;  %v2320_v30 = vmul.f32 %v2318_v42, %v2264_v38  ;;  %v2324_v46 = vmul.f32 %v2280_v56, %v2269_v62  ;;  %v2446_v42 = vld [vmem:[#allocation4 + $0x32] sm:$0xff] }
 0x579   :  { %v2294_v52 = vadd.f32 %v2292_v22, %v2282_v1  ;;  %v2418_v41 = vld [vmem:[#allocation4 + $0x24] sm:$0xff]  ;;  %v2419_v11 = vld [vmem:[#allocation4 + $0x2c] sm:$0xff]  ;;  %v2415_v32 = vmul.f32 %v2413_v39, %v2252_v24  ;;  %v2427_v24 = vmul.f32 %v2312_v4, %v7643_v59  ;;  %v2325_v19 = vmul.f32 %v2323_v27, %v2270_v57 }
 0x57a   :  { %v2305_v47 = vadd.f32 %v2303_v49, %v2299_v8  ;;  %v2420_v6 = vmul.f32 %v2418_v41, %v2257_v50  ;;  %v2421_v5 = vmul.f32 %v2419_v11, %v2258_v21  ;;  %v2430_v3 = vld [vmem:[#allocation4 + $0x26] sm:$0xff]  ;;  %v2431_v1 = vld [vmem:[#allocation4 + $0x2e] sm:$0xff]  ;;  %v2333_v50 = vmul.f32 %v2332_v31, %v2286_v0  ;;  %v2239_v0 = vld [vmem:[%s8907_s2 + $0x16] ss:$0 sm:$0xff] }
 0x57b   :  { %v2300_v48 = vadd.f32 %v2298_v53, %v2294_v52  ;;  %v2417_v28 = vadd.f32 %v2415_v32, %v2411_v61  ;;  %v2432_v52 = vmul.f32 %v2430_v3, %v2263_v26  ;;  %v2436_v53 = vld [vmem:[#allocation4 + $0x30] sm:$0xff]  ;;  %v2433_v41 = vmul.f32 %v2431_v1, %v2264_v38 }
 0x57c   :  { %v2315_v40 = vadd.f32 %v2313_v16, %v2305_v47  ;;  %v2422_v51 = vadd.f32 %v2420_v6, %v2416_v29  ;;  %v2337_v49 = vld [vmem:[#allocation4 + $0x12] sm:$0xff]  ;;  %v2437_v4 = vmul.f32 %v7689_v55, %v2269_v62  ;;  %v2442_v38 = vmul.f32 %v7691_v20, %v2332_v31 }
 0x57d   :  { %v2306_v25 = vadd.f32 %v2304_v35, %v2300_v48  ;;  %v2423_v7 = vadd.f32 %v2421_v5, %v2417_v28  ;;  %v2334_v35 = vmul.f32 %v2332_v31, %v2328_v9  ;;  %v2441_v16 = vld [vmem:[#allocation4 + $0x31] sm:$0xff]  ;;  %v2438_v48 = vmul.f32 %v2436_v53, %v2270_v57 }
 0x57e   :  { %v2321_v13 = vadd.f32 %v2319_v15, %v2315_v40  ;;  %v2428_v58 = vadd.f32 %v2426_v2, %v2422_v51  ;;  %v2339_v26 = vmul.f32 %v2337_v49, %v7681_v44  ;;  %v2240_v55 = vld [vmem:[%s8907_s2 + $0x17] ss:$0 sm:$0xff]  ;;  %v2447_v57 = vmul.f32 %v2413_v39, %v7677_v45 }
 0x57f   :  { %v2316_v22 = vadd.f32 %v2314_v33, %v2306_v25  ;;  %v2429_v17 = vadd.f32 %v2427_v24, %v2423_v7  ;;  %v2443_v33 = vmul.f32 %v2441_v16, %v2332_v31  ;;  %v2448_v40 = vmul.f32 %v2446_v42, %v7681_v44  ;;  %v2351_v44 = vld [vmem:[%s8911_s6] sm:$0x3]  ;;  %v5545_v53 = vld [vmem:[%s8909_s4 + $0xf4] ss:$8 sps:$4 sm:$0xff]  }
 0x580   :  { %v2326_v21 = vadd.f32 %v2324_v46, %v2321_v13  ;;  %v2434_v59 = vadd.f32 %v2432_v52, %v2428_v58  ;;  %v2460_v58 = vld [vmem:[%s8911_s6] sm:$0x3]  ;;  %v5551_v49 = vld [vmem:[%s8909_s4 + $0x114] ss:$8 sps:$4 sm:$0xff]  }
 0x581   :  { %v2322_v8 = vadd.f32 %v2320_v30, %v2316_v22  ;;  %v2435_v11 = vadd.f32 %v2433_v41, %v2429_v17  ;;  %v5540_v52 = vld [vmem:[%s8909_s4 + $0xe0] ss:$8 sps:$4 sm:$0xff]   ;;  %v5549_v17 = vld [vmem:[%s8909_s4 + $0x110] ss:$8 sps:$4 sm:$0xff]  }
 0x582   :  { %v2335_v61 = vadd.f32 %v2333_v50, %v2326_v21  ;;  %v2439_v47 = vadd.f32 %v2437_v4, %v2434_v59  ;;  %v5542_v50 = vld [vmem:[%s8909_s4 + $0xe4] ss:$8 sps:$4 sm:$0xff]   ;;  %v5546_v21 = vld [vmem:[%s8909_s4 + $0x100] ss:$8 sps:$4 sm:$0xff]   ;;  %v5557_v59 = vld [vmem:[%s8909_s4 + $0x134] ss:$8 sps:$4 sm:$0xff]  }
 0x583   :  { %v2327_v56 = vadd.f32 %v2325_v19, %v2322_v8  ;;  %v2440_v29 = vadd.f32 %v2438_v48, %v2435_v11  ;;  %v5543_v8 = vld [vmem:[%s8909_s4 + $0xf0] ss:$8 sps:$4 sm:$0xff]   ;;  %v5552_v41 = vld [vmem:[%s8909_s4 + $0x120] ss:$8 sps:$4 sm:$0xff]   ;;  %v5560_v4 = vld [vmem:[%s8909_s4 + $0x144] ss:$8 sps:$4 sm:$0xff]  }
 0x584   :  { %v2340_v60 = vadd.f32 %v2338_v54, %v2335_v61  ;;  %v2444_v62 = vadd.f32 %v2442_v38, %v2439_v47  ;;  %v5555_v54 = vld [vmem:[%s8909_s4 + $0x130] ss:$8 sps:$4 sm:$0xff]   ;;  %v5558_v16 = vld [vmem:[%s8909_s4 + $0x140] ss:$8 sps:$4 sm:$0xff]   ;;  %v5563_v61 = vld [vmem:[%s8909_s4 + $0x154] ss:$8 sps:$4 sm:$0xff]  }
 0x585   :  { %v2336_v32 = vadd.f32 %v2334_v35, %v2327_v56  ;;  %v2445_v25 = vadd.f32 %v2443_v33, %v2440_v29  ;;  %v5554_v35 = vld [vmem:[%s8909_s4 + $0x124] ss:$8 sps:$4 sm:$0xff]   ;;  %v5759_v56 = vmov 0   ;;  %v5561_v11 = vld [vmem:[%s8909_s4 + $0x150] ss:$8 sps:$4 sm:$0xff]  }
 0x586   :  { %v2342_v6 = vmul.f32 %v2340_v60, %v2239_v0  ;;  %v2449_v27 = vadd.f32 %v2447_v57, %v2444_v62  ;;  %v5564_v48 = vld [vmem:[%s8909_s4 + $0x160] ss:$8 sps:$4 sm:$0xff]  }
 0x587   :  { %v2341_v15 = vadd.f32 %v2339_v26, %v2336_v32  ;;  %v2450_v5 = vadd.f32 %v2448_v40, %v2445_v25  ;;  %v5567_v25 = vld [vmem:[%s8909_s4 + $0x170] ss:$8 sps:$4 sm:$0xff]   ;;  %v5572_v40 = vld [vmem:[%s8909_s4 + $0x184] ss:$8 sps:$4 sm:$0xff]  }
 0x588   :  { %v2344_v20 = vadd.f32 %v2342_v6, %v2240_v55  ;;  %v2451_v3 = vmul.f32 %v2449_v27, %v2239_v0  ;;  %v5569_v6 = vld [vmem:[%s8909_s4 + $0x174] ss:$8 sps:$4 sm:$0xff]   ;;  %v5570_v27 = vld [vmem:[%s8909_s4 + $0x180] ss:$8 sps:$4 sm:$0xff]  }
 0x589   :  { %v2343_v28 = vmul.f32 %v2341_v15, %v2239_v0  ;;  %v2452_v31 = vmul.f32 %v2450_v5, %v2239_v0  ;;  %v5566_v0 = vld [vmem:[%s8909_s4 + $0x164] ss:$8 sps:$4 sm:$0xff]  }
 0x58a   :  { %v2346_v51 = vmax.f32 %v2344_v20, 0.0  ;;  %v2453_v2 = vadd.f32 %v2451_v3, %v2240_v55  ;;  %3323 = vmatprep.subr.bf16.mxu1 %v5566_v0  ;;  %v5573_v20 = vld [vmem:[%s8909_s4 + $0x190] ss:$8 sps:$4 sm:$0xff]   ;;  %v5578_v5 = vld [vmem:[%s8909_s4 + $0x1a4] ss:$8 sps:$4 sm:$0xff]  }
 0x58b   :  { %v2345_v30 = vadd.f32 %v2343_v28, %v2240_v55  ;;  %v2454_v1 = vadd.f32 %v2452_v31, %v2240_v55  ;;  %3324 = vmatpush1.bf16.msra.mxu1 %v5564_v48  ;;  %v5575_v28 = vld [vmem:[%s8909_s4 + $0x194] ss:$8 sps:$4 sm:$0xff]   ;;  %v5576_v3 = vld [vmem:[%s8909_s4 + $0x1a0] ss:$8 sps:$4 sm:$0xff]   ;;  %v5584_v31 = vld [vmem:[%s8909_s4 + $0x1c4] ss:$8 sps:$4 sm:$0xff]  }
 0x58c   :  { %v2455_v22 = vmax.f32 %v2453_v2, 0.0  ;;  %v2348_v13 = vmin.f32 %v2346_v51, 6.0  ;;  %3325 = vmatprep.subr.bf16.mxu1 %v5569_v6  ;;  %v5579_v51 = vld [vmem:[%s8909_s4 + $0x1b0] ss:$8 sps:$4 sm:$0xff]   ;;  %v5582_v2 = vld [vmem:[%s8909_s4 + $0x1c0] ss:$8 sps:$4 sm:$0xff]  }
 0x58d   :  { %v2347_v24 = vmax.f32 %v2345_v30, 0.0  ;;  %v2456_v45 = vmax.f32 %v2454_v1, 0.0  ;;  %v5581_v30 = vld [vmem:[%s8909_s4 + $0x1b4] ss:$8 sps:$4 sm:$0xff]   ;;  %v5585_v1 = vld [vmem:[%s8909_s4 + $0x1d0] ss:$8 sps:$4 sm:$0xff]  }
 0x58e   :  { %v2457_v9 = vmin.f32 %v2455_v22, 6.0  ;;  %v5590_v22 = vld [vmem:[%s8909_s4 + $0x1e4] ss:$8 sps:$4 sm:$0xff]  }
 0x58f   :  { %v2349_v46 = vmin.f32 %v2347_v24, 6.0  ;;  %v2458_v7 = vmin.f32 %v2456_v45, 6.0  ;;  %3326 = vmatpush1.bf16.msra.mxu1 %v5567_v25  ;;  %v5587_v24 = vld [vmem:[%s8909_s4 + $0x1d4] ss:$8 sps:$4 sm:$0xff]   ;;  %v5591_v45 = vld [vmem:[%s8909_s4 + $0x1f0] ss:$8 sps:$4 sm:$0xff]  }
 0x590   :  { %3327 = vmatprep.subr.bf16.mxu1 %v5572_v40 }
 0x591   :  { %v2350_v39 = vpack.c.bf16 %v2349_v46, %v2348_v13  ;;  %v2459_v19 = vpack.c.bf16 %v2458_v7, %v2457_v9  ;;  %v5588_v13 = vld [vmem:[%s8909_s4 + $0x1e0] ss:$8 sps:$4 sm:$0xff]   ;;  %v5593_v46 = vld [vmem:[%s8909_s4 + $0x1f4] ss:$8 sps:$4 sm:$0xff]  }
 0x592   :  { %v5594_v9 = vld [vmem:[%s8909_s4 + $0x200] ss:$8 sps:$4 sm:$0xff]   ;;  %v5599_v7 = vld [vmem:[%s8909_s4 + $0x214] ss:$8 sps:$4 sm:$0xff]  }
 0x593   :  { %5497 = vmatpush3.bf16.msra.mxu0 %v2350_v39  ;;  %3328 = vmatpush1.bf16.msra.mxu1 %v5570_v27  ;;  %v5596_v39 = vld [vmem:[%s8909_s4 + $0x204] ss:$8 sps:$4 sm:$0xff]  }
 0x594   :  { %5502 = vmatprep.subr.bf16.mxu0 %v7460_v63  ;;  %3329 = vmatprep.subr.bf16.mxu1 %v5575_v28  ;;  %v7916_v27 = vld [vmem:[%s8908_s3 + $0x88] sm:$0xff] }
 0x596   :  { %5499 = vmatmul.mubr.msk.bf16.vlgmr.msra.gmra.mrb[24].mxu0 %vm2352_vm7, %v2351_v44  ;;  %v5597_v44 = vld [vmem:[%s8909_s4 + $0x210] ss:$8 sps:$4 sm:$0xff]  }
 0x597   :  { %5503 = vmatpush3.bf16.msra.mxu0 %v2459_v19  ;;  %5504 = vmatprep.mubr.msk.bf16.mxu0 %vm5758_vm3, %v7460_v63  ;;  %v5548_v63 = vld [vmem:[%s8909_s4 + $0x104] ss:$8 sps:$4 sm:$0xff]  }
 0x598   :  { %2608 = vmatprep.subr.bf16.mxu0 %v5542_v50  ;;  %3330 = vmatpush1.bf16.msra.mxu1 %v5573_v20  ;;  %v5602_v19 = vld [vmem:[%s8909_s4 + $0x224] ss:$8 sps:$4 sm:$0xff]   ;;  %v5600_v50 = vld [vmem:[%s8909_s4 + $0x220] ss:$8 sps:$4 sm:$0xff]  }
 0x599   :  { %3331 = vmatprep.subr.bf16.mxu1 %v5578_v5 }
 0x59c   :  { %3332 = vmatpush1.bf16.msra.mxu1 %v5576_v3 }
 0x59d   :  { %3333 = vmatprep.subr.bf16.mxu1 %v5581_v30 }
 0x59e   :  { %5505 = vmatmul.mubr.msk.bf16.vlgmr.msra.gmra.mrb[28].mxu0 %vm2352_vm7, %v2460_v58  ;;  %v5605_v58 = vld [vmem:[%s8909_s4 + $0x234] ss:$8 sps:$4 sm:$0xff]  }
 0x59f   :  { %2609 = vmatpush1.bf16.msra.mxu0 %v5540_v52  ;;  %2640 = vmatprep.mubr.bf16.mxu0 %v5759_v56  ;;  %v5603_v52 = vld [vmem:[%s8909_s4 + $0x230] ss:$8 sps:$4 sm:$0xff]   ;;  %v5166_v56 = vld [vmem:[%s8908_s3 + $0x80] sm:$0xff] }
 0x5a0   :  { %2610 = vmatprep.subr.bf16.mxu0 %v5545_v53  ;;  %3334 = vmatpush1.bf16.msra.mxu1 %v5579_v51  ;;  %v5608_v53 = vld [vmem:[%s8909_s4 + $0x244] ss:$8 sps:$4 sm:$0xff]   ;;  %v2700_v0 = vrot.slane %v5166_v56, %v9436_v12 }
 0x5a1   :  { %3335 = vmatprep.subr.bf16.mxu1 %v5584_v31 }
 0x5a3   :  { %2611 = vmatpush1.bf16.msra.mxu0 %v5543_v8  ;;  %v5606_v8 = vld [vmem:[%s8909_s4 + $0x240] ss:$8 sps:$4 sm:$0xff]  }
 0x5a4   :  { %2612 = vmatprep.subr.bf16.mxu0 %v5548_v63  ;;  %3336 = vmatpush1.bf16.msra.mxu1 %v5582_v2  ;;  %v5611_v63 = vld [vmem:[%s8909_s4 + $0x254] ss:$8 sps:$4 sm:$0xff]   ;;  %v7939_v2 = vrot.slane %v5166_v56, %v9451_v37 }
 0x5a5   :  { %3337 = vmatprep.subr.bf16.mxu1 %v5587_v24  ;;  %v5173_v24 = vld [vmem:[%s8908_s3 + $0x98] ss:$0 sm:$0xff] }
 0x5a7   :  { %2613 = vmatpush1.bf16.msra.mxu0 %v5546_v21  ;;  %v5609_v21 = vld [vmem:[%s8909_s4 + $0x250] ss:$8 sps:$4 sm:$0xff]  }
 0x5a8   :  { %2614 = vmatprep.subr.bf16.mxu0 %v5551_v49  ;;  %3338 = vmatpush1.bf16.msra.mxu1 %v5585_v1  ;;  %v5614_v49 = vld [vmem:[%s8909_s4 + $0x260] ss:$8 sps:$4 sm:$0xff]   ;;  %v2883_v1 = vld [vmem:[#allocation5 + $0x10] sm:$0x1] }
 0x5a9   :  { %3339 = vmatprep.subr.bf16.mxu1 %v5590_v22  ;;  %v2914_v22 = vld [vmem:[#allocation5 + $0x10] sm:$0x3] }
 0x5ab   :  { %2615 = vmatpush1.bf16.msra.mxu0 %v5549_v17  ;;  %v5616_v17 = vld [vmem:[%s8909_s4 + $0x264] ss:$8 sps:$4 sm:$0xff]  }
 0x5ac   :  { %2616 = vmatprep.subr.bf16.mxu0 %v5554_v35  ;;  %3340 = vmatpush1.bf16.msra.mxu1 %v5588_v13  ;;  %v5165_v35 = vld [vmem:[%s8907_s2 + $0x21] ss:$8 sm:$0x3] }
 0x5ad   :  { %3341 = vmatprep.subr.bf16.mxu1 %v5593_v46 }
 0x5af   :  { %2617 = vmatpush1.bf16.msra.mxu0 %v5552_v41  ;;  %v5164_v41 = vld [vmem:[%s8907_s2 + $0x20] ss:$8 sm:$0x3] }
 0x5b0   :  { %2618 = vmatprep.subr.bf16.mxu0 %v5557_v59  ;;  %3342 = vmatpush1.bf16.msra.mxu1 %v5591_v45  ;;  %v2692_v59 = vand.u32 1, %v9434_v34  ;;  %v2716_v45 = vrot.slane %v7916_v27, %v9439_v36 }
 0x5b1   :  { %3343 = vmatprep.subr.bf16.mxu1 %v5596_v39 }
 0x5b2   :  { %vm7899_vm3 = vcmp.ne.s32.totalorder %v2692_v59, 1  ;;  %vm7905_vm8 = vcmp.ne.s32.totalorder %v2692_v59, 0 }
 0x5b3   :  { %2619 = vmatpush1.bf16.msra.mxu0 %v5555_v54  ;;  %v2655_v54 = vrot.slane %v5164_v41, %v9436_v12  ;;  %v7920_v28 = vsel %vm7905_vm8, %v2700_v0, 0.0  ;;  %v7976_v59 = vsel %vm7899_vm3, %v2716_v45, 0.0 }
 0x5b4   :  { %2620 = vmatprep.subr.bf16.mxu0 %v5560_v4  ;;  %3344 = vmatpush1.bf16.msra.mxu1 %v5594_v9  ;;  %v2659_v4 = vrot.slane %v5164_v41, %v9444_v23  ;;  %v7949_v9 = vrot.slane %v5166_v56, %v9444_v23 }
 0x5b5   :  { %3345 = vmatprep.subr.bf16.mxu1 %v5599_v7 }
 0x5b7   :  { %2621 = vmatpush1.bf16.msra.mxu0 %v5558_v16  ;;  %v2670_v16 = vrot.slane %v5165_v35, %v9436_v12 }
 0x5b8   :  { %2622 = vmatprep.subr.bf16.mxu0 %v5563_v61  ;;  %3346 = vmatpush1.bf16.msra.mxu1 %v5597_v44  ;;  %v3063_v44 = vld [vmem:[#allocation5 + $0x30] sm:$0x1] }
 0x5b9   :  { %3347 = vmatprep.subr.bf16.mxu1 %v5602_v19  ;;  %v3085_v19 = vld [vmem:[#allocation5 + $0x30] sm:$0x3] }
 0x5bb   :  { %2623 = vmatpush1.bf16.msra.mxu0 %v5561_v11  ;;  %v2674_v11 = vrot.slane %v5165_v35, %v9444_v23  ;;  %v7969_v35 = vmul.f32 %v3063_v44, %v7939_v2 }
 0x5bc   :  { %3348 = vmatpush1.bf16.msra.mxu1 %v5600_v50  ;;  %4028 = vmatprep.subr.bf16.mxu0 %v5616_v17  ;;  %v2726_v50 = vrot.slane %v7916_v27, %v9445_v18  ;;  %v2758_v17 = vsel %vm7899_vm3, %v5173_v24, 0.0 }
 0x5bd   :  { %3349 = vmatprep.subr.bf16.mxu1 %v5605_v58  ;;  %v2736_v58 = vrot.slane %v7916_v27, %v9448_v14 }
 0x5bf   :  { %v7993_v0 = vsel %vm7899_vm3, %v2736_v58, 0.0  ;;  %v8039_v58 = vrot.slane %v7916_v27, %v9450_v43 }
 0x5c0   :  { %3350 = vmatpush1.bf16.msra.mxu1 %v5603_v52  ;;  %v2746_v52 = vrot.slane %v7916_v27, %v9449_v10 }
 0x5c1   :  { %3351 = vmatprep.subr.bf16.mxu1 %v5608_v53 }
 0x5c4   :  { %3352 = vmatpush1.bf16.msra.mxu1 %v5606_v8 }
 0x5c5   :  { %3353 = vmatprep.subr.bf16.mxu1 %v5611_v63 }
 0x5c8   :  { %3354 = vmatpush1.bf16.msra.mxu1 %v5609_v21  ;;  %v7959_v21 = vmul.f32 %v7939_v2, %v2883_v1 }
 0x669   :  { %v2390_v26 = vpop.f32.mrb[24].mxu0 }
 0x66a   :  { %v2396_v47 = vpack.c.bf16 %v2390_v26, %v2390_v26  ;;  %v5500_v38 = vpop.f32.mrb[25].mxu0 }
 0x66b   :  { %v2393_v42 = vpop.f32.mrb[26].mxu0  ;;  %v9452_v38 = vmov 0 }
 0x66c   :  { %2397 = vst [vmem:[#allocation9] sm:$0x3] %v2396_v47  ;;  %v5501_v32 = vpop.f32.mrb[27].mxu0  ;;  %v5172_v47 = vld [vmem:[%s8908_s3 + $0x90] ss:$0 sm:$0xff]  ;;  %v9453_v38 = vsel %vm7899_vm3, 4294967295, %v9452_v38  ;;  %v2712_v42 = vrot.slane %v5166_v56, %v9439_v36 }
 0x66d   :  { %9454 = vst [vmem:[#allocation66_spill] sm:$0xff] %v9453_v38  ;;  %v2722_v32 = vrot.slane %v5166_v56, %v9445_v18  ;;  %v2757_v40 = vsel %vm7899_vm3, %v5172_v47, 0.0  ;;  %v7999_v47 = vrot.slane %v2758_v17, 2 }
 0x66e   :  { %v7924_v20 = vsel %vm7899_vm3, %v2712_v42, 0.0  ;;  %v7944_v13 = vrot.slane %v2757_v40, 2 }
 0x66f   :  { %v7928_v5 = vsel %vm7905_vm8, %v2722_v32, 0.0  ;;  %v2797_v63 = vrot.slane %v7924_v20, 6  ;;  %v2903_v32 = vrot.slane %v7959_v21, 5 }
 0x670   :  { %v7966_v41 = vmul.f32 %v7944_v13, %v2914_v22 }
 0x671   :  { %v2498_v60 = vpop.f32.mrb[28].mxu0 }
 0x672   :  { %v5321_v29 = vpack.c.bf16 %v2498_v60, %v2498_v60  ;;  %v5506_v33 = vpop.f32.mrb[29].mxu0 }
 0x673   :  { %v2501_v55 = vpop.f32.mrb[30].mxu0 }
 0x674   :  { %v2508_v62 = vrot.slane %v5321_v29, 6  ;;  %v5507_v57 = vpop.f32.mrb[31].mxu0  ;;  %v9455_v55 = vmov 0 }
 0x675   :  { %v9456_v55 = vsel %vm7905_vm8, 4294967295, %v9455_v55  ;;  %v2742_v57 = vrot.slane %v5166_v56, %v9449_v10 }
 0x676   :  { %2510 = vst [vmem:[#allocation9] sm:$0xc] %v2508_v62  ;;  %9457 = vst [vmem:[#allocation65_spill] sm:$0xff] %v9456_v55  ;;  %v2732_v62 = vrot.slane %v5166_v56, %v9448_v14 }
 0x677   :  { %v7936_v31 = vsel %vm7905_vm8, %v2742_v57, 0.0 }
 0x678   :  { %v7932_v51 = vsel %vm7899_vm3, %v2732_v62, 0.0  ;;  %v9051_v42 = vrot.slane %v7936_v31, 4 }
 0x67d   :  { %v2527_v15 = vld [vmem:[#allocation9] sm:$0xf] }
 0x67e   :  { %2641 = vmatmul.mubr.bf16.vlgmr.msra.gmra.mrb[32].mxu0 %v2527_v15 }
 0x67f   :  { %4029 = vmatpush1.bf16.msra.mxu0 %v5614_v49  ;;  %v2704_v49 = vrot.slane %v7916_v27, %v9436_v12 }
 0x751   :  { %v2642_v61 = vpop.f32.mrb[32].mxu0 }
 0x752   :  { %v2662_v48 = vmul.f32 %v2655_v54, %v2642_v61  ;;  %v2644_v26 = vpop.f32.mrb[33].mxu0  ;;  %v7972_v54 = vmul.f32 %v3085_v19, %v7944_v13  ;;  %v9052_v61 = vrot.slane %v7932_v51, 4 }
 0x753   :  { %v2663_v60 = vmul.f32 %v2659_v4, %v2644_v26  ;;  %v2646_v29 = vpop.f32.mrb[34].mxu0  ;;  %v2813_v4 = vrot.slane %v7928_v5, 6  ;;  %v7997_v26 = vsel %vm7905_vm8, %v2746_v52, 0.0 }
 0x754   :  { %v2677_v33 = vadd.f32 %v2670_v16, %v2662_v48  ;;  %v2647_v15 = vpop.f32.mrb[35].mxu0  ;;  %v7980_v16 = vrot.slane %v5166_v56, %v9450_v43  ;;  %v7989_v48 = vsel %vm7905_vm8, %v2726_v50, 0.0  ;;  %v2884_v56 = vld [vmem:[#allocation5 + $0x18] sm:$0x1]  ;;  %v8035_v50 = vrot.slane %v7916_v27, %v9444_v23 }
 0x755   :  { %v2678_v6 = vadd.f32 %v2674_v11, %v2663_v60  ;;  %v7985_v11 = vrot.slane %v7916_v27, %v9451_v37  ;;  %v8005_v60 = vsel %vm7905_vm8, %v2704_v49, 0.0 }
 0x756   :  { %v2679_v25 = vmax.f32 %v2677_v33, 0.0  ;;  %v2915_v33 = vld [vmem:[#allocation5 + $0x18] sm:$0x3] }
 0x757   :  { %v2680_v3 = vmax.f32 %v2678_v6, 0.0  ;;  %v8014_v6 = vld [vmem:[%s8907_s2 + $0x22] ss:$8 sm:$0x3]  ;;  %v8023_v22 = vmul.f32 %v7999_v47, %v2915_v33 }
 0x758   :  { %v2681_v30 = vmin.f32 %v2679_v25, 6.0  ;;  %v8045_v49 = vrot.slane %v8014_v6, %v9436_v12 }
 0x759   :  { %v2682_v46 = vmin.f32 %v2680_v3, 6.0  ;;  %v8020_v3 = vmul.f32 %v7985_v11, %v2884_v56 }
 0x75a   :  { %v2761_v39 = vrot.slane %v2681_v30, 5  ;;  %v2980_v7 = vrot.slane %v2681_v30, 1 }
 0x75b   :  { %v2762_v53 = vrot.slane %v2682_v46, 5  ;;  %v2981_v8 = vrot.slane %v2682_v46, 1  ;;  %v8028_v46 = vld [vmem:[%s8907_s2 + $0x23] ss:$8 sm:$0x3] }
 0x75c   :  { %2765 = vst [vmem:[#allocation5] sm:$0x78] %v2761_v39  ;;  %2985 = vst [vmem:[#allocation5 + $0x20] sm:$0x78] %v2980_v7  ;;  %v8058_v25 = vrot.slane %v8028_v46, %v9436_v12 }
 0x75d   :  { %2766 = vst [vmem:[#allocation5 + $0x8] sm:$0x78] %v2762_v53  ;;  %2986 = vst [vmem:[#allocation5 + $0x28] sm:$0x78] %v2981_v8 }
 0x763   :  { %v2767_v30 = vld [vmem:[#allocation5] sm:$0xf]  ;;  %v2847_v44 = vld [vmem:[#allocation5] sm:$0xf0] }
 0x764   :  { %v2773_v24 = vld [vmem:[#allocation5] sm:$0x1e]  ;;  %v2881_v19 = vld [vmem:[#allocation5] sm:$0xe0]  ;;  %v2769_v56 = vmul.f32 %v2767_v30, %v7920_v28 }
 0x765   :  { %v2793_v1 = vld [vmem:[#allocation5] sm:$0x3c]  ;;  %v2783_v45 = vmul.f32 %v7949_v9, %v2773_v24  ;;  %v2893_v8 = vmul.f32 %v7939_v2, %v2881_v19  ;;  %v2912_v21 = vld [vmem:[#allocation5] sm:$0xc0]  ;;  %v2855_v24 = vmul.f32 %v9052_v61, %v2847_v44 }
 0x766   :  { %v2801_v39 = vmul.f32 %v2797_v63, %v2793_v1  ;;  %v2827_v7 = vld [vmem:[#allocation5] sm:$0x78]  ;;  %v2817_v52 = vmul.f32 %v2813_v4, %v2793_v1  ;;  %v2922_v15 = vmul.f32 %v7944_v13, %v2912_v21 }
 0x767   :  { %v2837_v53 = vmul.f32 %v7980_v16, %v2827_v7  ;;  %v2993_v17 = vld [vmem:[#allocation5 + $0x20] sm:$0x1e]  ;;  %v2787_v33 = vrot.slane %v2783_v45, 1  ;;  %v2871_v7 = vmul.f32 %v9051_v42, %v2847_v44  ;;  %v2902_v19 = vrot.slane %v2893_v8, 5  ;;  %v3061_v42 = vld [vmem:[#allocation5 + $0x20] sm:$0xe0] }
 0x768   :  { %v3005_v27 = vld [vmem:[#allocation5 + $0x20] sm:$0x3c]  ;;  %v2805_v62 = vrot.slane %v2801_v39, 2  ;;  %v2995_v30 = vmul.f32 %v2993_v17, %v7949_v9  ;;  %v2821_v29 = vrot.slane %v2817_v52, 2  ;;  %v2859_v61 = vrot.slane %v2855_v24, 4 }
 0x769   :  { %v2987_v5 = vld [vmem:[#allocation5 + $0x20] sm:$0xf]  ;;  %v2791_v57 = vadd.f32 %v2787_v33, %v2769_v56  ;;  %v2841_v1 = vrot.slane %v2837_v53, 3  ;;  %v3007_v44 = vmul.f32 %v3005_v27, %v2797_v63  ;;  %v3017_v8 = vmul.f32 %v3005_v27, %v2813_v4  ;;  %v3039_v39 = vld [vmem:[#allocation5 + $0x20] sm:$0xf0] }
 0x76a   :  { %v3027_v45 = vld [vmem:[#allocation5 + $0x20] sm:$0x78]  ;;  %v2989_v40 = vmul.f32 %v2987_v5, %v7920_v28  ;;  %v2999_v56 = vrot.slane %v2995_v30, 1  ;;  %v2774_v33 = vld [vmem:[#allocation5 + $0x8] sm:$0x1e]  ;;  %v2875_v9 = vrot.slane %v2871_v7, 4  ;;  %v2904_v17 = vsel %vm2901_vm10, %v2902_v19, %v2903_v32 }
 0x76b   :  { %v2809_v21 = vadd.f32 %v2805_v62, %v2791_v57  ;;  %v2931_v34 = vrot.slane %v2922_v15, 6  ;;  %v3029_v43 = vmul.f32 %v3027_v45, %v7980_v16  ;;  %v3083_v52 = vld [vmem:[#allocation5 + $0x20] sm:$0xc0]  ;;  %v2794_v53 = vld [vmem:[#allocation5 + $0x8] sm:$0x3c]  ;;  %v3011_v63 = vrot.slane %v3007_v44, 2 }
 0x76c   :  { %v3003_v20 = vadd.f32 %v2999_v56, %v2989_v40  ;;  %v3065_v4 = vmul.f32 %v3061_v42, %v7939_v2  ;;  %v2768_v62 = vld [vmem:[#allocation5 + $0x8] sm:$0xf]  ;;  %v3021_v57 = vrot.slane %v3017_v8, 2  ;;  %v9458_v28 = vrot.slane %v7932_v51, 4 }
 0x76d   :  { %v2825_v37 = vadd.f32 %v2821_v29, %v2809_v21  ;;  %v9459_v24 = vrot.slane %v7936_v31, 4  ;;  %v2784_v32 = vmul.f32 %v8035_v50, %v2774_v33  ;;  %v3087_v16 = vmul.f32 %v3083_v52, %v7944_v13  ;;  %v2828_v19 = vld [vmem:[#allocation5 + $0x8] sm:$0x78] }
 0x76e   :  { %v3041_v5 = vmul.f32 %v3039_v39, %v9458_v28  ;;  %v3015_v7 = vadd.f32 %v3011_v63, %v3003_v20  ;;  %v9460_v29 = vrot.slane %v7976_v59, 6  ;;  %v3073_v30 = vrot.slane %v3065_v4, 5  ;;  %v2848_v21 = vld [vmem:[#allocation5 + $0x8] sm:$0xf0] }
 0x76f   :  { %v3051_v27 = vmul.f32 %v3039_v39, %v9459_v24  ;;  %v2845_v15 = vadd.f32 %v2841_v1, %v2825_v37  ;;  %v2770_v2 = vmul.f32 %v2768_v62, %v8005_v60  ;;  %v2788_v42 = vrot.slane %v2784_v32, 1  ;;  %v2882_v52 = vld [vmem:[#allocation5 + $0x8] sm:$0xe0]  ;;  %v2988_v24 = vld [vmem:[#allocation5 + $0x28] sm:$0xf] }
 0x770   :  { %v2802_v40 = vmul.f32 %v9460_v29, %v2794_v53  ;;  %v9461_v51 = vrot.slane %v7989_v48, 6  ;;  %v9462_v31 = vrot.slane %v7966_v41, 6  ;;  %v3025_v37 = vadd.f32 %v3021_v57, %v3015_v7  ;;  %v2913_v28 = vld [vmem:[#allocation5 + $0x8] sm:$0xc0]  ;;  %v3006_v32 = vld [vmem:[#allocation5 + $0x28] sm:$0x3c] }
 0x771   :  { %v2863_v44 = vadd.f32 %v2859_v61, %v2845_v15  ;;  %v3033_v1 = vrot.slane %v3029_v43, 3  ;;  %v3045_v13 = vrot.slane %v3041_v5, 4  ;;  %v2792_v56 = vadd.f32 %v2788_v42, %v2770_v2 }
 0x772   :  { %v2818_v45 = vmul.f32 %v9461_v51, %v2794_v53  ;;  %v2933_v8 = vsel %vm2930_vm11, %v2931_v34, %v9462_v31  ;;  %v2806_v39 = vrot.slane %v2802_v40, 2  ;;  %v2838_v33 = vmul.f32 %v8039_v58, %v2828_v19  ;;  %v2994_v53 = vld [vmem:[#allocation5 + $0x28] sm:$0x1e] }
 0x773   :  { %v2879_v20 = vadd.f32 %v2875_v9, %v2863_v44  ;;  %v3037_v63 = vadd.f32 %v3033_v1, %v3025_v37  ;;  %v3055_v4 = vrot.slane %v3051_v27, 4  ;;  %v3095_v62 = vrot.slane %v3087_v16, 6 }
 0x774   :  { %v9463_v61 = vrot.slane %v7969_v35, 5  ;;  %v2810_v34 = vadd.f32 %v2806_v39, %v2792_v56  ;;  %v2822_v57 = vrot.slane %v2818_v45, 2  ;;  %v9464_v43 = vrot.slane %v7993_v0, 4 }
 0x775   :  { %v2910_v15 = vadd.f32 %v2904_v17, %v2879_v20  ;;  %v3049_v7 = vadd.f32 %v3045_v13, %v3037_v63  ;;  %v9465_v9 = vrot.slane %v7997_v26, 4  ;;  %v2894_v27 = vmul.f32 %v7985_v11, %v2882_v52  ;;  %v3028_v17 = vld [vmem:[#allocation5 + $0x28] sm:$0x78]  ;;  %v3064_v13 = vld [vmem:[#allocation5 + $0x38] sm:$0x1] }
 0x776   :  { %v3075_v41 = vsel %vm2901_vm10, %v3073_v30, %v9463_v61  ;;  %v2856_v5 = vmul.f32 %v9464_v43, %v2848_v21  ;;  %v2826_v16 = vadd.f32 %v2822_v57, %v2810_v34  ;;  %v2842_v40 = vrot.slane %v2838_v33, 3  ;;  %v3062_v63 = vld [vmem:[#allocation5 + $0x28] sm:$0xe0] }
 0x777   :  { %v2872_v29 = vmul.f32 %v9465_v9, %v2848_v21  ;;  %v2923_v35 = vmul.f32 %v7999_v47, %v2913_v28  ;;  %v2996_v19 = vmul.f32 %v2994_v53, %v8035_v50  ;;  %v2939_v30 = vadd.f32 %v2933_v8, %v2910_v15  ;;  %v3040_v8 = vld [vmem:[#allocation5 + $0x28] sm:$0xf0] }
 0x778   :  { %v3059_v2 = vadd.f32 %v3055_v4, %v3049_v7  ;;  %v2990_v42 = vmul.f32 %v2988_v24, %v8005_v60  ;;  %v9466_v51 = vrot.slane %v7976_v59, 6  ;;  %v2846_v44 = vadd.f32 %v2842_v40, %v2826_v16  ;;  %v3084_v24 = vld [vmem:[#allocation5 + $0x28] sm:$0xc0] }
 0x779   :  { %v2860_v31 = vrot.slane %v2856_v5, 4  ;;  %v3000_v37 = vrot.slane %v2996_v19, 1  ;;  %v9467_v1 = vrot.slane %v7989_v48, 6  ;;  %v2952_v56 = vmul.f32 %v8045_v49, %v2939_v30 }
 0x77a   :  { %v3008_v45 = vmul.f32 %v3006_v32, %v9466_v51  ;;  %v3081_v39 = vadd.f32 %v3075_v41, %v3059_v2  ;;  %v2876_v33 = vrot.slane %v2872_v29, 4  ;;  %v2905_v50 = vrot.slane %v2894_v27, 5 }
 0x77b   :  { %v3018_v21 = vmul.f32 %v3006_v32, %v9467_v1  ;;  %v2864_v52 = vadd.f32 %v2860_v31, %v2846_v44  ;;  %v3004_v20 = vadd.f32 %v3000_v37, %v2990_v42  ;;  %v3030_v59 = vmul.f32 %v3028_v17, %v8039_v58  ;;  %v3086_v32 = vld [vmem:[#allocation5 + $0x38] sm:$0x3] }
 0x77c   :  { %v3012_v60 = vrot.slane %v3008_v45, 2  ;;  %v9468_v4 = vrot.slane %v7972_v54, 6  ;;  %v2934_v53 = vrot.slane %v2923_v35, 6  ;;  %v2949_v48 = vrot.slane %v8014_v6, %v9444_v23 }
 0x77d   :  { %v3068_v61 = vmul.f32 %v3064_v13, %v7985_v11  ;;  %v2880_v41 = vadd.f32 %v2876_v33, %v2864_v52  ;;  %v3022_v57 = vrot.slane %v3018_v21, 2  ;;  %v3042_v5 = vmul.f32 %v3040_v8, %v9464_v43  ;;  %v5620_v43 = vld [vmem:[%s8909_s4 + $0x280] ss:$8 sps:$4 sm:$0xff]  }
 0x77e   :  { %v3097_v28 = vsel %vm2930_vm11, %v3095_v62, %v9468_v4  ;;  %v3016_v34 = vadd.f32 %v3012_v60, %v3004_v20  ;;  %v9469_v15 = vrot.slane %v8020_v3, 5  ;;  %v9470_v62 = vmov %v9465_v9 }
 0x77f   :  { %v3103_v58 = vadd.f32 %v3097_v28, %v3081_v39  ;;  %v3052_v7 = vmul.f32 %v3040_v8, %v9470_v62  ;;  %v3066_v6 = vmul.f32 %v3062_v63, %v7985_v11  ;;  %v3034_v27 = vrot.slane %v3030_v59, 3  ;;  %v5634_v62 = vld [vmem:[%s8909_s4 + $0x2c4] ss:$8 sps:$4 sm:$0xff]  }
 0x780   :  { %v2907_v54 = vsel %vm2901_vm10, %v2905_v50, %v9469_v15  ;;  %v3026_v29 = vadd.f32 %v3022_v57, %v3016_v34  ;;  %v2965_v16 = vadd.f32 %v8058_v25, %v2952_v56  ;;  %v9471_v0 = vrot.slane %v8023_v22, 6  ;;  %v5622_v57 = vld [vmem:[%s8909_s4 + $0x284] ss:$8 sps:$4 sm:$0xff]   ;;  %v5631_v15 = vld [vmem:[%s8909_s4 + $0x2b4] ss:$8 sps:$4 sm:$0xff]  }
 0x781   :  { %v2911_v9 = vadd.f32 %v2907_v54, %v2880_v41  ;;  %v3088_v35 = vmul.f32 %v3084_v24, %v7999_v47  ;;  %v3090_v3 = vmul.f32 %v3086_v32, %v7999_v47  ;;  %v3046_v2 = vrot.slane %v3042_v5, 4  ;;  %v5625_v5 = vld [vmem:[%s8909_s4 + $0x294] ss:$8 sps:$4 sm:$0xff]   ;;  %v5623_v24 = vld [vmem:[%s8909_s4 + $0x290] ss:$8 sps:$4 sm:$0xff]  }
 0x782   :  { %v2936_v40 = vsel %vm2930_vm11, %v2934_v53, %v9471_v0  ;;  %v3038_v30 = vadd.f32 %v3034_v27, %v3026_v29  ;;  %v2962_v26 = vrot.slane %v8028_v46, %v9444_v23  ;;  %v3105_v11 = vmul.f32 %v3103_v58, %v8045_v49  ;;  %v5628_v32 = vld [vmem:[%s8909_s4 + $0x2a4] ss:$8 sps:$4 sm:$0xff]   ;;  %v5626_v58 = vld [vmem:[%s8909_s4 + $0x2a0] ss:$8 sps:$4 sm:$0xff]   ;;  %v5629_v54 = vld [vmem:[%s8909_s4 + $0x2b0] ss:$8 sps:$4 sm:$0xff]  }
 0x783   :  { %v2940_v19 = vadd.f32 %v2936_v40, %v2911_v9  ;;  %v3076_v42 = vrot.slane %v3066_v6, 5  ;;  %v3077_v51 = vrot.slane %v3068_v61, 5  ;;  %v3056_v44 = vrot.slane %v3052_v7, 4  ;;  %v5632_v7 = vld [vmem:[%s8909_s4 + $0x2c0] ss:$8 sps:$4 sm:$0xff]  }
 0x784   :  { %v3050_v17 = vadd.f32 %v3046_v2, %v3038_v30  ;;  %v2967_v22 = vmax.f32 %v2965_v16, 0.0  ;;  %v3098_v31 = vrot.slane %v3088_v35, 6  ;;  %v3099_v37 = vrot.slane %v3090_v3, 6  ;;  %v5637_v6 = vld [vmem:[%s8909_s4 + $0x2d4] ss:$8 sps:$4 sm:$0xff]  }
 0x785   :  { %v2953_v45 = vmul.f32 %v2949_v48, %v2940_v19  ;;  %v3078_v47 = vsel %vm2901_vm10, %v3076_v42, %v3077_v51  ;;  %v3107_v33 = vadd.f32 %v3105_v11, %v8058_v25  ;;  %v5619_v25 = vld [vmem:[%s8909_s4 + $0x274] ss:$8 sps:$4 sm:$0xff]   ;;  %v5635_v9 = vld [vmem:[%s8909_s4 + $0x2d0] ss:$8 sps:$4 sm:$0xff]   ;;  %v5640_v29 = vld [vmem:[%s8909_s4 + $0x2e4] ss:$8 sps:$4 sm:$0xff]  }
 0x786   :  { %v3060_v1 = vadd.f32 %v3056_v44, %v3050_v17  ;;  %v2969_v39 = vmin.f32 %v2967_v22, 6.0  ;;  %v3100_v46 = vsel %vm2930_vm11, %v3098_v31, %v3099_v37  ;;  %4030 = vmatprep.subr.bf16.mxu0 %v5619_v25  ;;  %v5638_v27 = vld [vmem:[%s8909_s4 + $0x2e0] ss:$8 sps:$4 sm:$0xff]   ;;  %v5643_v16 = vld [vmem:[%s8909_s4 + $0x2f4] ss:$8 sps:$4 sm:$0xff]  }
 0x787   :  { %v2966_v21 = vadd.f32 %v2962_v26, %v2953_v45  ;;  %v3109_v20 = vmax.f32 %v3107_v33, 0.0  ;;  %v5641_v0 = vld [vmem:[%s8909_s4 + $0x2f0] ss:$8 sps:$4 sm:$0xff]   ;;  %v5646_v40 = vld [vmem:[%s8909_s4 + $0x304] ss:$8 sps:$4 sm:$0xff]  }
 0x788   :  { %v3082_v13 = vadd.f32 %v3078_v47, %v3060_v1  ;;  %v5644_v35 = vld [vmem:[%s8909_s4 + $0x300] ss:$8 sps:$4 sm:$0xff]   ;;  %v5649_v3 = vld [vmem:[%s8909_s4 + $0x314] ss:$8 sps:$4 sm:$0xff]   ;;  %v5647_v19 = vld [vmem:[%s8909_s4 + $0x310] ss:$8 sps:$4 sm:$0xff]  }
 0x789   :  { %v2968_v56 = vmax.f32 %v2966_v21, 0.0  ;;  %v3111_v63 = vmin.f32 %v3109_v20, 6.0  ;;  %v5652_v30 = vld [vmem:[%s8909_s4 + $0x324] ss:$8 sps:$4 sm:$0xff]   ;;  %v5650_v2 = vld [vmem:[%s8909_s4 + $0x320] ss:$8 sps:$4 sm:$0xff]  }
 0x78a   :  { %v3104_v49 = vadd.f32 %v3100_v46, %v3082_v13  ;;  %v5653_v11 = vld [vmem:[%s8909_s4 + $0x330] ss:$8 sps:$4 sm:$0xff]   ;;  %v5658_v42 = vld [vmem:[%s8909_s4 + $0x344] ss:$8 sps:$4 sm:$0xff]   ;;  %v5656_v51 = vld [vmem:[%s8909_s4 + $0x340] ss:$8 sps:$4 sm:$0xff]  }
 0x78b   :  { %v2970_v50 = vmin.f32 %v2968_v56, 6.0  ;;  %v5661_v45 = vld [vmem:[%s8909_s4 + $0x354] ss:$8 sps:$4 sm:$0xff]   ;;  %v5659_v17 = vld [vmem:[%s8909_s4 + $0x350] ss:$8 sps:$4 sm:$0xff]   ;;  %v8230_v21 = vld [vmem:[%s8908_s3 + $0xa0] sm:$0xff] }
 0x78c   :  { %v3106_v8 = vmul.f32 %v3104_v49, %v2949_v48  ;;  %v5617_v48 = vld [vmem:[%s8909_s4 + $0x270] ss:$8 sps:$4 sm:$0xff]   ;;  %v5664_v44 = vld [vmem:[%s8909_s4 + $0x360] ss:$8 sps:$4 sm:$0xff]   ;;  %v5666_v22 = vld [vmem:[%s8909_s4 + $0x364] ss:$8 sps:$4 sm:$0xff]   ;;  %v3420_v49 = vrot.slane %v8230_v21, %v9439_v36 }
 0x78d   :  { %v5322_v52 = vpack.c.bf16 %v2970_v50, %v2969_v39  ;;  %4031 = vmatpush1.bf16.msra.mxu0 %v5617_v48  ;;  %4733 = vmatprep.subr.bf16.mxu1 %v5666_v22  ;;  %v5210_v31 = vld [vmem:[%s8907_s2 + $0x24] ss:$8 sm:$0x3]  ;;  %v5211_v37 = vld [vmem:[%s8907_s2 + $0x25] ss:$8 sm:$0x3]  ;;  %v3410_v39 = vrot.slane %v8230_v21, %v9436_v12  ;;  %v3430_v50 = vrot.slane %v8230_v21, %v9445_v18 }
 0x78e   :  { %v3108_v60 = vadd.f32 %v3106_v8, %v2962_v26  ;;  %4032 = vmatprep.subr.bf16.mxu0 %v5622_v57  ;;  %v5655_v26 = vld [vmem:[%s8909_s4 + $0x334] ss:$8 sps:$4 sm:$0xff]   ;;  %v3370_v1 = vrot.slane %v5210_v31, %v9436_v12  ;;  %v3374_v47 = vrot.slane %v5210_v31, %v9444_v23  ;;  %v3385_v13 = vrot.slane %v5211_v37, %v9436_v12  ;;  %v8237_v56 = vld [vmem:[%s8908_s3 + $0xa8] sm:$0xff] }
 0x78f   :  { %2979 = vst [vmem:[#allocation10] sm:$0x33] %v5322_v52  ;;  %v3389_v46 = vrot.slane %v5211_v37, %v9444_v23  ;;  %v3440_v8 = vrot.slane %v8230_v21, %v9448_v14  ;;  %v8264_v48 = vsel %vm7905_vm8, %v3410_v39, 0.0  ;;  %v8316_v37 = vrot.slane %v8230_v21, %v9444_v23 }
 0x790   :  { %v3110_v59 = vmax.f32 %v3108_v60, 0.0  ;;  %v3414_v60 = vrot.slane %v8237_v56, %v9436_v12 }
 0x791   :  { %4033 = vmatpush1.bf16.msra.mxu0 %v5620_v43  ;;  %v8268_v43 = vsel %vm7899_vm3, %v3420_v49, 0.0 }
 0x792   :  { %v3112_v4 = vmin.f32 %v3110_v59, 6.0  ;;  %4034 = vmatprep.subr.bf16.mxu0 %v5625_v5  ;;  %v8272_v5 = vsel %vm7905_vm8, %v3430_v50, 0.0 }
 0x794   :  { %v5323_v28 = vpack.c.bf16 %v3112_v4, %v3111_v63  ;;  %v5218_v4 = vld [vmem:[%s8908_s3 + $0xb0] ss:$0 sm:$0xff] }
 0x795   :  { %4035 = vmatpush1.bf16.msra.mxu0 %v5623_v24  ;;  %v8276_v24 = vsel %vm7899_vm3, %v3440_v8, 0.0 }
 0x796   :  { %v3120_v53 = vrot.slane %v5323_v28, 6  ;;  %4036 = vmatprep.subr.bf16.mxu0 %v5628_v32  ;;  %v5219_v28 = vld [vmem:[%s8908_s3 + $0xb8] ss:$0 sm:$0xff] }
 0x798   :  { %3122 = vst [vmem:[#allocation10] sm:$0xcc] %v3120_v53  ;;  %v3424_v53 = vrot.slane %v8237_v56, %v9439_v36 }
 0x799   :  { %4037 = vmatpush1.bf16.msra.mxu0 %v5626_v58  ;;  %v8280_v58 = vsel %vm7905_vm8, %v3414_v60, 0.0  ;;  %v5216_v60 = vld [vmem:[%s8907_s2 + $0x26] ss:$8 sm:$0x3] }
 0x79a   :  { %4038 = vmatprep.subr.bf16.mxu0 %v5631_v15  ;;  %v3465_v15 = vsel %vm7899_vm3, %v5218_v4, 0.0 }
 0x79d   :  { %4039 = vmatpush1.bf16.msra.mxu0 %v5629_v54  ;;  %v3466_v54 = vsel %vm7899_vm3, %v5219_v28, 0.0 }
 0x79e   :  { %4040 = vmatprep.subr.bf16.mxu0 %v5634_v62 }
 0x79f   :  { %v3155_v61 = vld [vmem:[#allocation10] sm:$0xff] }
 0x7a0   :  { %v5177_v41 = vcombine.high %v3155_v61, %v3155_v61  ;;  %v5176_v34 = vcombine.low %v3155_v61, %v3155_v61  ;;  %v3434_v61 = vrot.slane %v8237_v56, %v9445_v18 }
 0x7a1   :  { %4041 = vmatpush1.bf16.msra.mxu0 %v5632_v7  ;;  %v8288_v7 = vsel %vm7899_vm3, %v3424_v53, 0.0  ;;  %v5217_v53 = vld [vmem:[%s8907_s2 + $0x27] ss:$8 sm:$0x3] }
 0x7a2   :  { %3355 = vmatprep.mubr.bf16.mxu1 %v5177_v41  ;;  %4042 = vmatprep.subr.bf16.mxu0 %v5637_v6  ;;  %v3444_v41 = vrot.slane %v8237_v56, %v9448_v14  ;;  %v8292_v6 = vsel %vm7905_vm8, %v3434_v61, 0.0  ;;  %v9059_v49 = vrot.slane %v8288_v7, 6  ;;  %v9057_v61 = vrot.slane %v8272_v5, 6 }
 0x7a3   :  { %3356 = vmatmul.mubr.bf16.vlgmr.msra.gmra.mrb[24].mxu1 %v5176_v34 }
 0x7a4   :  { %4734 = vmatpush1.bf16.msra.mxu1 %v5664_v44  ;;  %v3769_v44 = vld [vmem:[#allocation5 + $0x38] sm:$0x1] }
 0x7a5   :  { %4043 = vmatpush1.bf16.msra.mxu0 %v5635_v9  ;;  %v8296_v9 = vsel %vm7899_vm3, %v3444_v41, 0.0  ;;  %v9061_v41 = vrot.slane %v8292_v6, 6 }
 0x7a6   :  { %4044 = vmatprep.subr.bf16.mxu0 %v5640_v29 }
 0x7a9   :  { %4045 = vmatpush1.bf16.msra.mxu0 %v5638_v27  ;;  %v3450_v27 = vrot.slane %v8230_v21, %v9449_v10 }
 0x7aa   :  { %4046 = vmatprep.subr.bf16.mxu0 %v5643_v16  ;;  %v3454_v16 = vrot.slane %v8237_v56, %v9449_v10 }
 0x7ab   :  { %v8324_v39 = vsel %vm7905_vm8, %v3450_v27, 0.0 }
 0x7ad   :  { %4047 = vmatpush1.bf16.msra.mxu0 %v5641_v0  ;;  %v3591_v0 = vld [vmem:[#allocation5 + $0x10] sm:$0x1] }
 0x7ae   :  { %4048 = vmatprep.subr.bf16.mxu0 %v5646_v40  ;;  %v3592_v40 = vld [vmem:[#allocation5 + $0x18] sm:$0x1] }
 0x7b1   :  { %4049 = vmatpush1.bf16.msra.mxu0 %v5644_v35  ;;  %v9472_v35 = vld [vmem:[#allocation29_spill] sm:$0xff] }
 0x7b2   :  { %4050 = vmatprep.subr.bf16.mxu0 %v5649_v3  ;;  %v8304_v3 = vrot.slane %v8230_v21, %v9472_v35 }
 0x7b4   :  { %v8333_v50 = vmul.f32 %v8304_v3, %v3591_v0 }
 0x7b5   :  { %4051 = vmatpush1.bf16.msra.mxu0 %v5647_v19  ;;  %v3621_v19 = vld [vmem:[#allocation5 + $0x10] sm:$0x3] }
 0x7b6   :  { %4052 = vmatprep.subr.bf16.mxu0 %v5652_v30 }
 0x7b9   :  { %4053 = vmatpush1.bf16.msra.mxu0 %v5650_v2  ;;  %v8308_v2 = vrot.slane %v8237_v56, %v9472_v35  ;;  %v9474_v35 = vrot.slane %v8276_v24, 4 }
 0x7ba   :  { %4054 = vmatprep.subr.bf16.mxu0 %v5655_v26  ;;  %v3622_v26 = vld [vmem:[#allocation5 + $0x18] sm:$0x3] }
 0x7bb   :  { %v8336_v8 = vmul.f32 %v8308_v2, %v3592_v40 }
 0x7bd   :  { %4055 = vmatpush1.bf16.msra.mxu0 %v5653_v11  ;;  %v8310_v11 = vrot.slane %v3465_v15, 2 }
 0x7be   :  { %4056 = vmatprep.subr.bf16.mxu0 %v5658_v42  ;;  %v8312_v42 = vrot.slane %v3466_v54, 2 }
 0x7c1   :  { %4057 = vmatpush1.bf16.msra.mxu0 %v5656_v51 }
 0x7c2   :  { %4058 = vmatprep.subr.bf16.mxu0 %v5661_v45 }
 0x7c5   :  { %4059 = vmatpush1.bf16.msra.mxu0 %v5659_v17  ;;  %v3768_v17 = vld [vmem:[#allocation5 + $0x30] sm:$0x1] }
 0x876   :  { %v3357_v33 = vpop.f32.mrb[24].mxu1 }
 0x877   :  { %v3377_v52 = vmul.f32 %v3370_v1, %v3357_v33  ;;  %v3359_v20 = vpop.f32.mrb[25].mxu1  ;;  %v8320_v1 = vrot.slane %v8237_v56, %v9444_v23  ;;  %v8328_v33 = vsel %vm7905_vm8, %v3454_v16, 0.0 }
 0x878   :  { %v3378_v59 = vmul.f32 %v3374_v47, %v3359_v20  ;;  %v3361_v63 = vpop.f32.mrb[26].mxu1  ;;  %v3790_v47 = vld [vmem:[#allocation5 + $0x30] sm:$0x3]  ;;  %v8342_v20 = vmul.f32 %v8312_v42, %v3622_v26 }
 0x879   :  { %v3392_v34 = vadd.f32 %v3385_v13, %v3377_v52  ;;  %v3362_v25 = vpop.f32.mrb[27].mxu1  ;;  %v3791_v13 = vld [vmem:[#allocation5 + $0x38] sm:$0x3]  ;;  %v8339_v52 = vmul.f32 %v8310_v11, %v3621_v19  ;;  %v8351_v63 = vmul.f32 %v3769_v44, %v8308_v2  ;;  %v8354_v4 = vmul.f32 %v3790_v47, %v8310_v11 }
 0x87a   :  { %v3393_v57 = vadd.f32 %v3389_v46, %v3378_v59  ;;  %v9056_v46 = vrot.slane %v8268_v43, 6  ;;  %v8348_v59 = vmul.f32 %v3768_v17, %v8304_v3  ;;  %v8357_v28 = vmul.f32 %v3791_v13, %v8312_v42 }
 0x87b   :  { %v3394_v32 = vmax.f32 %v3392_v34, 0.0  ;;  %v9473_v34 = vld [vmem:[#allocation20_spill] sm:$0xff]  ;;  %v8388_v17 = vrot.slane %v5216_v60, %v9444_v23  ;;  %v8391_v44 = vrot.slane %v5217_v53, %v9436_v12 }
 0x87c   :  { %v3395_v62 = vmax.f32 %v3393_v57, 0.0  ;;  %v8366_v25 = vrot.slane %v8230_v21, %v9473_v34  ;;  %v8370_v57 = vrot.slane %v8237_v56, %v9473_v34 }
 0x87d   :  { %v3396_v29 = vmin.f32 %v3394_v32, 6.0 }
 0x87e   :  { %v3397_v30 = vmin.f32 %v3395_v62, 6.0 }
 0x87f   :  { %v3469_v51 = vrot.slane %v3396_v29, 5  ;;  %v3686_v45 = vrot.slane %v3396_v29, 1 }
 0x880   :  { %v3470_v22 = vrot.slane %v3397_v30, 5  ;;  %v3687_v31 = vrot.slane %v3397_v30, 1 }
 0x881   :  { %3473 = vst [vmem:[#allocation5] sm:$0x78] %v3469_v51  ;;  %3690 = vst [vmem:[#allocation5 + $0x20] sm:$0x78] %v3686_v45  ;;  %v8385_v45 = vrot.slane %v5216_v60, %v9436_v12 }
 0x882   :  { %3474 = vst [vmem:[#allocation5 + $0x8] sm:$0x78] %v3470_v22  ;;  %3691 = vst [vmem:[#allocation5 + $0x28] sm:$0x78] %v3687_v31  ;;  %v8394_v22 = vrot.slane %v5217_v53, %v9444_v23 }
 0x888   :  { %v3475_v30 = vld [vmem:[#allocation5] sm:$0xf]  ;;  %v3589_v32 = vld [vmem:[#allocation5] sm:$0xe0] }
 0x889   :  { %v3481_v26 = vld [vmem:[#allocation5] sm:$0x1e]  ;;  %v3476_v31 = vld [vmem:[#allocation5 + $0x8] sm:$0xf]  ;;  %v3477_v47 = vmul.f32 %v3475_v30, %v8264_v48  ;;  %v3556_v15 = vld [vmem:[#allocation5 + $0x8] sm:$0xf0] }
 0x88a   :  { %v3501_v51 = vld [vmem:[#allocation5] sm:$0x3c]  ;;  %v3482_v13 = vld [vmem:[#allocation5 + $0x8] sm:$0x1e]  ;;  %v3491_v19 = vmul.f32 %v8316_v37, %v3481_v26  ;;  %v3478_v0 = vmul.f32 %v3476_v31, %v8280_v58 }
 0x88b   :  { %v3502_v40 = vld [vmem:[#allocation5 + $0x8] sm:$0x3c]  ;;  %v3509_v56 = vmul.f32 %v9056_v46, %v3501_v51  ;;  %v3525_v60 = vmul.f32 %v9057_v61, %v3501_v51  ;;  %v3492_v21 = vmul.f32 %v8320_v1, %v3482_v13  ;;  %v3535_v16 = vld [vmem:[#allocation5] sm:$0x78] }
 0x88c   :  { %v3510_v53 = vmul.f32 %v9059_v49, %v3502_v40  ;;  %v3526_v30 = vmul.f32 %v9061_v41, %v3502_v40  ;;  %v3536_v27 = vld [vmem:[#allocation5 + $0x8] sm:$0x78]  ;;  %v3555_v26 = vld [vmem:[#allocation5] sm:$0xf0]  ;;  %v3495_v29 = vrot.slane %v3491_v19, 1  ;;  %v3545_v46 = vmul.f32 %v8366_v25, %v3535_v16 }
 0x88d   :  { %v3513_v62 = vrot.slane %v3509_v56, 2  ;;  %v3529_v54 = vrot.slane %v3525_v60, 2  ;;  %v3496_v51 = vrot.slane %v3492_v21, 1  ;;  %v3546_v13 = vmul.f32 %v8370_v57, %v3536_v27  ;;  %v3590_v19 = vld [vmem:[#allocation5 + $0x8] sm:$0xe0] }
 0x88e   :  { %v3514_v61 = vrot.slane %v3510_v53, 2  ;;  %v3530_v31 = vrot.slane %v3526_v30, 2  ;;  %v3499_v34 = vadd.f32 %v3495_v29, %v3477_v47  ;;  %v3549_v49 = vrot.slane %v3545_v46, 3  ;;  %v3619_v30 = vld [vmem:[#allocation5] sm:$0xc0] }
 0x88f   :  { %v3563_v40 = vmul.f32 %v9474_v35, %v3555_v26  ;;  %v9475_v41 = vrot.slane %v8296_v9, 4  ;;  %v3500_v56 = vadd.f32 %v3496_v51, %v3478_v0  ;;  %v3550_v60 = vrot.slane %v3546_v13, 3  ;;  %v3620_v27 = vld [vmem:[#allocation5 + $0x8] sm:$0xc0]  ;;  %v3692_v35 = vld [vmem:[#allocation5 + $0x20] sm:$0xf] }
 0x890   :  { %v9476_v16 = vrot.slane %v8324_v39, 4  ;;  %v9477_v21 = vrot.slane %v8328_v33, 4  ;;  %v3517_v55 = vadd.f32 %v3513_v62, %v3499_v34  ;;  %v3601_v47 = vmul.f32 %v8304_v3, %v3589_v32  ;;  %v3693_v14 = vld [vmem:[#allocation5 + $0x28] sm:$0xf] }
 0x891   :  { %v3564_v10 = vmul.f32 %v9475_v41, %v3556_v15  ;;  %v3567_v29 = vrot.slane %v3563_v40, 4  ;;  %v3518_v18 = vadd.f32 %v3514_v61, %v3500_v56  ;;  %v3602_v0 = vmul.f32 %v8308_v2, %v3590_v19  ;;  %v3710_v40 = vld [vmem:[#allocation5 + $0x20] sm:$0x3c]  ;;  %v3711_v56 = vld [vmem:[#allocation5 + $0x28] sm:$0x3c] }
 0x892   :  { %v3579_v38 = vmul.f32 %v9476_v16, %v3555_v26  ;;  %v3580_v53 = vmul.f32 %v9477_v21, %v3556_v15  ;;  %v3533_v51 = vadd.f32 %v3529_v54, %v3517_v55  ;;  %v3609_v13 = vrot.slane %v3601_v47, 5  ;;  %v3698_v16 = vld [vmem:[#allocation5 + $0x20] sm:$0x1e]  ;;  %v3699_v21 = vld [vmem:[#allocation5 + $0x28] sm:$0x1e] }
 0x893   :  { %v3568_v46 = vrot.slane %v3564_v10, 4  ;;  %v3629_v26 = vmul.f32 %v8310_v11, %v3619_v30  ;;  %v3630_v15 = vmul.f32 %v8312_v42, %v3620_v27  ;;  %v3534_v34 = vadd.f32 %v3530_v31, %v3518_v18 }
 0x894   :  { %v3583_v41 = vrot.slane %v3579_v38, 4  ;;  %v3584_v36 = vrot.slane %v3580_v53, 4  ;;  %v3612_v62 = vrot.slane %v3602_v0, 5  ;;  %v3694_v10 = vmul.f32 %v3692_v35, %v8264_v48 }
 0x895   :  { %v3695_v32 = vmul.f32 %v3693_v14, %v8280_v58  ;;  %v3553_v61 = vadd.f32 %v3549_v49, %v3533_v51  ;;  %v9478_v38 = vrot.slane %v8333_v50, 5  ;;  %v3637_v55 = vrot.slane %v3629_v26, 6 }
 0x896   :  { %v3640_v54 = vrot.slane %v3630_v15, 6  ;;  %v3554_v53 = vadd.f32 %v3550_v60, %v3534_v34  ;;  %v9479_v30 = vrot.slane %v8336_v8, 5  ;;  %v3700_v18 = vmul.f32 %v3698_v16, %v8316_v37  ;;  %v3733_v16 = vld [vmem:[#allocation5 + $0x28] sm:$0x78] }
 0x897   :  { %v3611_v19 = vsel %vm2901_vm10, %v3609_v13, %v9478_v38  ;;  %v3701_v48 = vmul.f32 %v3699_v21, %v8320_v1  ;;  %v3571_v31 = vadd.f32 %v3567_v29, %v3553_v61  ;;  %v9480_v14 = vrot.slane %v8339_v52, 6  ;;  %v3732_v13 = vld [vmem:[#allocation5 + $0x20] sm:$0x78]  ;;  %v3745_v61 = vld [vmem:[#allocation5 + $0x28] sm:$0xf0] }
 0x898   :  { %v3614_v27 = vsel %vm2901_vm10, %v3612_v62, %v9479_v30  ;;  %v9481_v49 = vrot.slane %v8342_v20, 6  ;;  %v9482_v47 = vrot.slane %v8268_v43, 6  ;;  %v3572_v35 = vadd.f32 %v3568_v46, %v3554_v53  ;;  %v3744_v46 = vld [vmem:[#allocation5 + $0x20] sm:$0xf0] }
 0x899   :  { %v3639_v58 = vsel %vm2930_vm11, %v3637_v55, %v9480_v14  ;;  %v3704_v8 = vrot.slane %v3700_v18, 1  ;;  %v3705_v0 = vrot.slane %v3701_v48, 1  ;;  %v9483_v51 = vrot.slane %v8288_v7, 6  ;;  %v3766_v14 = vld [vmem:[#allocation5 + $0x20] sm:$0xe0] }
 0x89a   :  { %v3642_v50 = vsel %vm2930_vm11, %v3640_v54, %v9481_v49  ;;  %v3712_v60 = vmul.f32 %v3710_v40, %v9482_v47  ;;  %v3587_v1 = vadd.f32 %v3583_v41, %v3571_v31  ;;  %v9484_v52 = vrot.slane %v8272_v5, 6  ;;  %v3767_v49 = vld [vmem:[#allocation5 + $0x28] sm:$0xe0] }
 0x89b   :  { %v3713_v37 = vmul.f32 %v3711_v56, %v9483_v51  ;;  %v9485_v15 = vrot.slane %v8292_v6, 6  ;;  %v3588_v21 = vadd.f32 %v3584_v36, %v3572_v35  ;;  %v3708_v34 = vadd.f32 %v3704_v8, %v3694_v10 }
 0x89c   :  { %v3716_v29 = vrot.slane %v3712_v60, 2  ;;  %v3722_v26 = vmul.f32 %v3710_v40, %v9484_v52  ;;  %v3709_v43 = vadd.f32 %v3705_v0, %v3695_v32  ;;  %v3617_v38 = vadd.f32 %v3611_v19, %v3587_v1  ;;  %v3789_v1 = vld [vmem:[#allocation5 + $0x28] sm:$0xc0] }
 0x89d   :  { %v3723_v20 = vmul.f32 %v3711_v56, %v9485_v15  ;;  %v3717_v62 = vrot.slane %v3713_v37, 2  ;;  %v3734_v54 = vmul.f32 %v3732_v13, %v8366_v25  ;;  %v3618_v41 = vadd.f32 %v3614_v27, %v3588_v21 }
 0x89e   :  { %v3726_v55 = vrot.slane %v3722_v26, 2  ;;  %v3720_v53 = vadd.f32 %v3716_v29, %v3708_v34  ;;  %v3735_v5 = vmul.f32 %v3733_v16, %v8370_v57  ;;  %v3645_v40 = vadd.f32 %v3639_v58, %v3617_v38 }
 0x89f   :  { %v3727_v7 = vrot.slane %v3723_v20, 2  ;;  %v3721_v30 = vadd.f32 %v3717_v62, %v3709_v43  ;;  %v3738_v6 = vrot.slane %v3734_v54, 3  ;;  %v9486_v56 = vrot.slane %v8276_v24, 4 }
 0x8a0   :  { %v9487_v10 = vrot.slane %v8296_v9, 4  ;;  %v3646_v18 = vadd.f32 %v3642_v50, %v3618_v41  ;;  %v3730_v48 = vadd.f32 %v3726_v55, %v3720_v53  ;;  %v3739_v31 = vrot.slane %v3735_v5, 3  ;;  %v3788_v50 = vld [vmem:[#allocation5 + $0x20] sm:$0xc0] }
 0x8a1   :  { %v3746_v36 = vmul.f32 %v3744_v46, %v9486_v56  ;;  %v3731_v19 = vadd.f32 %v3727_v7, %v3721_v30  ;;  %v3658_v25 = vmul.f32 %v8385_v45, %v3645_v40  ;;  %v9488_v57 = vrot.slane %v8324_v39, 4 }
 0x8a2   :  { %v3747_v32 = vmul.f32 %v3745_v61, %v9487_v10  ;;  %v3659_v60 = vmul.f32 %v8388_v17, %v3646_v18  ;;  %v3742_v24 = vadd.f32 %v3738_v6, %v3730_v48  ;;  %v9489_v9 = vrot.slane %v8328_v33, 4 }
 0x8a3   :  { %v3750_v27 = vrot.slane %v3746_v36, 4  ;;  %v3756_v58 = vmul.f32 %v3744_v46, %v9488_v57  ;;  %v3743_v35 = vadd.f32 %v3739_v31, %v3731_v19  ;;  %v3671_v0 = vadd.f32 %v8391_v44, %v3658_v25  ;;  %v5675_v25 = vld [vmem:[%s8909_s4 + $0x394] ss:$8 sps:$4 sm:$0xff]   ;;  %v5676_v57 = vld [vmem:[%s8909_s4 + $0x3a0] ss:$8 sps:$4 sm:$0xff]  }
 0x8a4   :  { %v3751_v47 = vrot.slane %v3747_v32, 4  ;;  %v3757_v8 = vmul.f32 %v3745_v61, %v9489_v9  ;;  %v3770_v37 = vmul.f32 %v3766_v14, %v8304_v3  ;;  %v3771_v13 = vmul.f32 %v3767_v49, %v8308_v2  ;;  %v5687_v9 = vld [vmem:[%s8909_s4 + $0x3d4] ss:$8 sps:$4 sm:$0xff]  }
 0x8a5   :  { %v3760_v51 = vrot.slane %v3756_v58, 4  ;;  %v3672_v29 = vadd.f32 %v8394_v22, %v3659_v60  ;;  %v3754_v39 = vadd.f32 %v3750_v27, %v3742_v24  ;;  %v3673_v15 = vmax.f32 %v3671_v0, 0.0  ;;  %v5673_v27 = vld [vmem:[%s8909_s4 + $0x390] ss:$8 sps:$4 sm:$0xff]   ;;  %v5681_v58 = vld [vmem:[%s8909_s4 + $0x3b4] ss:$8 sps:$4 sm:$0xff]  }
 0x8a6   :  { %v3755_v52 = vadd.f32 %v3751_v47, %v3743_v35  ;;  %v3761_v26 = vrot.slane %v3757_v8, 4  ;;  %v3778_v20 = vrot.slane %v3770_v37, 5  ;;  %v3781_v16 = vrot.slane %v3771_v13, 5  ;;  %v5678_v47 = vld [vmem:[%s8909_s4 + $0x3a4] ss:$8 sps:$4 sm:$0xff]  }
 0x8a7   :  { %v3792_v33 = vmul.f32 %v3788_v50, %v8310_v11  ;;  %v3674_v21 = vmax.f32 %v3672_v29, 0.0  ;;  %v3764_v34 = vadd.f32 %v3760_v51, %v3754_v39  ;;  %v3793_v62 = vmul.f32 %v3789_v1, %v8312_v42  ;;  %v5679_v60 = vld [vmem:[%s8909_s4 + $0x3b0] ss:$8 sps:$4 sm:$0xff]   ;;  %v5684_v24 = vld [vmem:[%s8909_s4 + $0x3c4] ss:$8 sps:$4 sm:$0xff]  }
 0x8a8   :  { %v3765_v43 = vadd.f32 %v3761_v26, %v3755_v52  ;;  %v3675_v46 = vmin.f32 %v3673_v15, 6.0  ;;  %v9490_v3 = vrot.slane %v8348_v59, 5  ;;  %v9491_v61 = vrot.slane %v8351_v63, 5  ;;  %v5682_v35 = vld [vmem:[%s8909_s4 + $0x3c0] ss:$8 sps:$4 sm:$0xff]  }
 0x8a9   :  { %v3800_v55 = vrot.slane %v3792_v33, 6  ;;  %v3676_v7 = vmin.f32 %v3674_v21, 6.0  ;;  %v3803_v53 = vrot.slane %v3793_v62, 6  ;;  %v9492_v11 = vrot.slane %v8354_v4, 6  ;;  %v5685_v8 = vld [vmem:[%s8909_s4 + $0x3d0] ss:$8 sps:$4 sm:$0xff]  }
 0x8aa   :  { %v3780_v2 = vsel %vm2901_vm10, %v3778_v20, %v9490_v3  ;;  %v3783_v38 = vsel %vm2901_vm10, %v3781_v16, %v9491_v61  ;;  %v9493_v42 = vrot.slane %v8357_v28, 6  ;;  %v5690_v50 = vld [vmem:[%s8909_s4 + $0x3e4] ss:$8 sps:$4 sm:$0xff]   ;;  %v5688_v0 = vld [vmem:[%s8909_s4 + $0x3e0] ss:$8 sps:$4 sm:$0xff]  }
 0x8ab   :  { %v3786_v54 = vadd.f32 %v3780_v2, %v3764_v34  ;;  %v3787_v41 = vadd.f32 %v3783_v38, %v3765_v43  ;;  %v3802_v30 = vsel %vm2930_vm11, %v3800_v55, %v9492_v11  ;;  %v5324_v5 = vpack.c.bf16 %v3676_v7, %v3675_v46  ;;  %v5693_v51 = vld [vmem:[%s8909_s4 + $0x3f4] ss:$8 sps:$4 sm:$0xff]   ;;  %v5691_v37 = vld [vmem:[%s8909_s4 + $0x3f0] ss:$8 sps:$4 sm:$0xff]   ;;  %v5696_v13 = vld [vmem:[%s8909_s4 + $0x404] ss:$8 sps:$4 sm:$0xff]  }
 0x8ac   :  { %v3805_v59 = vsel %vm2930_vm11, %v3803_v53, %v9493_v42  ;;  %v5694_v1 = vld [vmem:[%s8909_s4 + $0x400] ss:$8 sps:$4 sm:$0xff]   ;;  %v5699_v29 = vld [vmem:[%s8909_s4 + $0x414] ss:$8 sps:$4 sm:$0xff]   ;;  %v5697_v39 = vld [vmem:[%s8909_s4 + $0x410] ss:$8 sps:$4 sm:$0xff]  }
 0x8ad   :  { %v3808_v40 = vadd.f32 %v3802_v30, %v3786_v54  ;;  %v3809_v6 = vadd.f32 %v3805_v59, %v3787_v41  ;;  %3685 = vst [vmem:[#allocation10] sm:$0x33] %v5324_v5  ;;  %v5702_v52 = vld [vmem:[%s8909_s4 + $0x424] ss:$8 sps:$4 sm:$0xff]   ;;  %v5700_v26 = vld [vmem:[%s8909_s4 + $0x420] ss:$8 sps:$4 sm:$0xff]  }
 0x8ae   :  { %v5705_v15 = vld [vmem:[%s8909_s4 + $0x434] ss:$8 sps:$4 sm:$0xff]   ;;  %v5703_v20 = vld [vmem:[%s8909_s4 + $0x430] ss:$8 sps:$4 sm:$0xff]   ;;  %v5708_v16 = vld [vmem:[%s8909_s4 + $0x444] ss:$8 sps:$4 sm:$0xff]  }
 0x8af   :  { %v3810_v63 = vmul.f32 %v3808_v40, %v8385_v45  ;;  %v3811_v56 = vmul.f32 %v3809_v6, %v8388_v17  ;;  %v5667_v45 = vld [vmem:[%s8909_s4 + $0x370] ss:$8 sps:$4 sm:$0xff]   ;;  %v5669_v17 = vld [vmem:[%s8909_s4 + $0x374] ss:$8 sps:$4 sm:$0xff]   ;;  %v5706_v33 = vld [vmem:[%s8909_s4 + $0x440] ss:$8 sps:$4 sm:$0xff]  }
 0x8b0   :  { %4735 = vmatprep.subr.bf16.mxu1 %v5669_v17  ;;  %v5711_v21 = vld [vmem:[%s8909_s4 + $0x454] ss:$8 sps:$4 sm:$0xff]   ;;  %v5709_v34 = vld [vmem:[%s8909_s4 + $0x450] ss:$8 sps:$4 sm:$0xff]   ;;  %v8580_v3 = vld [vmem:[%s8908_s3 + $0xc0] sm:$0xff] }
 0x8b1   :  { %v3812_v36 = vadd.f32 %v3810_v63, %v8391_v44  ;;  %v3813_v10 = vadd.f32 %v3811_v56, %v8394_v22  ;;  %v5672_v44 = vld [vmem:[%s8909_s4 + $0x384] ss:$8 sps:$4 sm:$0xff]   ;;  %4736 = vmatpush1.bf16.msra.mxu1 %v5667_v45  ;;  %v5670_v22 = vld [vmem:[%s8909_s4 + $0x380] ss:$8 sps:$4 sm:$0xff]   ;;  %v4115_v55 = vrot.slane %v8580_v3, %v9436_v12  ;;  %v9494_v53 = vld [vmem:[#allocation21_spill] sm:$0xff] }
 0x8b2   :  { %4737 = vmatprep.subr.bf16.mxu1 %v5672_v44  ;;  %v5256_v43 = vld [vmem:[%s8907_s2 + $0x30] ss:$8 sm:$0x3]  ;;  %v5257_v62 = vld [vmem:[%s8907_s2 + $0x31] ss:$8 sm:$0x3]  ;;  %v4125_v11 = vrot.slane %v8580_v3, %v9494_v53 }
 0x8b3   :  { %v3814_v32 = vmax.f32 %v3812_v36, 0.0  ;;  %v3815_v4 = vmax.f32 %v3813_v10, 0.0  ;;  %v4075_v46 = vrot.slane %v5256_v43, %v9436_v12  ;;  %v8585_v2 = vld [vmem:[%s8908_s3 + $0xc8] sm:$0xff]  ;;  %v4079_v61 = vrot.slane %v5256_v43, %v9444_v23  ;;  %v9495_v59 = vld [vmem:[#allocation22_spill] sm:$0xff]  ;;  %v5264_v56 = vld [vmem:[%s8908_s3 + $0xd0] ss:$0 sm:$0xff] }
 0x8b4   :  { %v4090_v38 = vrot.slane %v5257_v62, %v9436_v12  ;;  %v4094_v54 = vrot.slane %v5257_v62, %v9444_v23  ;;  %v4119_v41 = vrot.slane %v8585_v2, %v9436_v12  ;;  %v4129_v30 = vrot.slane %v8585_v2, %v9494_v53  ;;  %v5265_v36 = vld [vmem:[%s8908_s3 + $0xd8] ss:$0 sm:$0xff] }
 0x8b5   :  { %v3816_v18 = vmin.f32 %v3814_v32, 6.0  ;;  %v3817_v48 = vmin.f32 %v3815_v4, 6.0  ;;  %4738 = vmatpush1.bf16.msra.mxu1 %v5670_v22  ;;  %v4135_v40 = vrot.slane %v8580_v3, %v9495_v59  ;;  %v4139_v10 = vrot.slane %v8585_v2, %v9495_v59  ;;  %v9496_v32 = vld [vmem:[#allocation23_spill] sm:$0xff] }
 0x8b6   :  { %4739 = vmatprep.subr.bf16.mxu1 %v5675_v25  ;;  %v4145_v4 = vrot.slane %v8580_v3, %v9496_v32  ;;  %v8622_v17 = vsel %vm7899_vm3, %v4125_v11, 0.0  ;;  %v8626_v44 = vsel %vm7899_vm3, %v4129_v30, 0.0  ;;  %v8666_v62 = vrot.slane %v8580_v3, %v9444_v23 }
 0x8b7   :  { %v5325_v19 = vpack.c.bf16 %v3817_v48, %v3816_v18  ;;  %v4149_v18 = vrot.slane %v8585_v2, %v9496_v32  ;;  %v8630_v25 = vsel %vm7905_vm8, %v4135_v40, 0.0  ;;  %v9501_v32 = vld [vmem:[#allocation20_spill] sm:$0xff] }
 0x8b9   :  { %v3825_v31 = vrot.slane %v5325_v19, 6  ;;  %4740 = vmatpush1.bf16.msra.mxu1 %v5673_v27  ;;  %v4170_v27 = vsel %vm7899_vm3, %v5264_v56, 0.0  ;;  %v5263_v56 = vld [vmem:[%s8907_s2 + $0x33] ss:$8 sm:$0x3] }
 0x8ba   :  { %4741 = vmatprep.subr.bf16.mxu1 %v5678_v47  ;;  %v4171_v47 = vsel %vm7899_vm3, %v5265_v36, 0.0  ;;  %v9070_v36 = vrot.slane %v8630_v25, 6 }
 0x8bb   :  { %3827 = vst [vmem:[#allocation10] sm:$0xcc] %v3825_v31 }
 0x8bd   :  { %4742 = vmatpush1.bf16.msra.mxu1 %v5676_v57 }
 0x8be   :  { %4743 = vmatprep.subr.bf16.mxu1 %v5681_v58  ;;  %v8638_v58 = vsel %vm7905_vm8, %v4139_v10, 0.0 }
 0x8bf   :  { %v9073_v10 = vrot.slane %v8638_v58, 6 }
 0x8c1   :  { %4744 = vmatpush1.bf16.msra.mxu1 %v5679_v60  ;;  %v8642_v60 = vsel %vm7899_vm3, %v4145_v4, 0.0  ;;  %v8716_v4 = vrot.slane %v8580_v3, %v9501_v32 }
 0x8c2   :  { %v3860_v28 = vld [vmem:[#allocation10] sm:$0xff]  ;;  %4745 = vmatprep.subr.bf16.mxu1 %v5684_v24  ;;  %v8646_v24 = vsel %vm7899_vm3, %v4149_v18, 0.0  ;;  %v8720_v18 = vrot.slane %v8585_v2, %v9501_v32 }
 0x8c3   :  { %v5223_v14 = vcombine.high %v3860_v28, %v3860_v28  ;;  %v5222_v49 = vcombine.low %v3860_v28, %v3860_v28  ;;  %v8614_v28 = vsel %vm7905_vm8, %v4115_v55, 0.0 }
 0x8c5   :  { %4060 = vmatprep.mubr.bf16.mxu0 %v5223_v14  ;;  %4746 = vmatpush1.bf16.msra.mxu1 %v5682_v35 }
 0x8c6   :  { %4061 = vmatmul.mubr.bf16.vlgmr.msra.gmra.mrb[36].mxu0 %v5222_v49  ;;  %4747 = vmatprep.subr.bf16.mxu1 %v5687_v9  ;;  %v8618_v49 = vsel %vm7905_vm8, %v4119_v41, 0.0  ;;  %v9499_v9 = vld [vmem:[#allocation25_spill] sm:$0xff]  ;;  %v9072_v41 = vrot.slane %v8626_v44, 6 }
 0x8c9   :  { %4748 = vmatpush1.bf16.msra.mxu1 %v5685_v8  ;;  %v4155_v8 = vrot.slane %v8580_v3, %v9499_v9 }
 0x8ca   :  { %4749 = vmatprep.subr.bf16.mxu1 %v5690_v50  ;;  %v4159_v50 = vrot.slane %v8585_v2, %v9499_v9 }
 0x8cb   :  { %v8674_v55 = vsel %vm7905_vm8, %v4155_v8, 0.0 }
 0x8cc   :  { %v9077_v31 = vrot.slane %v8674_v55, 4 }
 0x8cd   :  { %4750 = vmatpush1.bf16.msra.mxu1 %v5688_v0  ;;  %v4296_v0 = vld [vmem:[#allocation5 + $0x10] sm:$0x1] }
 0x8ce   :  { %4751 = vmatprep.subr.bf16.mxu1 %v5693_v51  ;;  %v4297_v51 = vld [vmem:[#allocation5 + $0x18] sm:$0x1] }
 0x8d1   :  { %4752 = vmatpush1.bf16.msra.mxu1 %v5691_v37  ;;  %v9500_v37 = vld [vmem:[#allocation29_spill] sm:$0xff] }
 0x8d2   :  { %4753 = vmatprep.subr.bf16.mxu1 %v5696_v13  ;;  %v8654_v13 = vrot.slane %v8580_v3, %v9500_v37 }
 0x8d4   :  { %v8683_v53 = vmul.f32 %v8654_v13, %v4296_v0 }
 0x8d5   :  { %4754 = vmatpush1.bf16.msra.mxu1 %v5694_v1  ;;  %v4326_v1 = vld [vmem:[#allocation5 + $0x10] sm:$0x3] }
 0x8d6   :  { %4755 = vmatprep.subr.bf16.mxu1 %v5699_v29 }
 0x8d9   :  { %4756 = vmatpush1.bf16.msra.mxu1 %v5697_v39  ;;  %v8658_v39 = vrot.slane %v8585_v2, %v9500_v37  ;;  %v8741_v37 = vrot.slane %v5263_v56, %v9436_v12 }
 0x8da   :  { %4757 = vmatprep.subr.bf16.mxu1 %v5702_v52  ;;  %v4327_v52 = vld [vmem:[#allocation5 + $0x18] sm:$0x3] }
 0x8db   :  { %v8686_v11 = vmul.f32 %v8658_v39, %v4297_v51 }
 0x8dd   :  { %4758 = vmatpush1.bf16.msra.mxu1 %v5700_v26  ;;  %v8660_v26 = vrot.slane %v4170_v27, 2 }
 0x8de   :  { %4759 = vmatprep.subr.bf16.mxu1 %v5705_v15  ;;  %v8662_v15 = vrot.slane %v4171_v47, 2 }
 0x8df   :  { %v8689_v30 = vmul.f32 %v8660_v26, %v4326_v1  ;;  %v8744_v1 = vrot.slane %v5263_v56, %v9444_v23 }
 0x8e1   :  { %4760 = vmatpush1.bf16.msra.mxu1 %v5703_v20 }
 0x8e2   :  { %4761 = vmatprep.subr.bf16.mxu1 %v5708_v16 }
 0x8e5   :  { %4762 = vmatpush1.bf16.msra.mxu1 %v5706_v33  ;;  %v4473_v33 = vld [vmem:[#allocation5 + $0x30] sm:$0x1] }
 0x8e6   :  { %4763 = vmatprep.subr.bf16.mxu1 %v5711_v21  ;;  %v4474_v21 = vld [vmem:[#allocation5 + $0x38] sm:$0x1]  ;;  %v8698_v59 = vmul.f32 %v4473_v33, %v8654_v13 }
 0x8e7   :  { %v8701_v40 = vmul.f32 %v4474_v21, %v8658_v39 }
 0x8e9   :  { %4764 = vmatpush1.bf16.msra.mxu1 %v5709_v34 }
 0x999   :  { %v4062_v7 = vpop.f32.mrb[36].mxu0 }
 0x99a   :  { %v4082_v5 = vmul.f32 %v4075_v46, %v4062_v7  ;;  %v4064_v42 = vpop.f32.mrb[37].mxu0  ;;  %v8670_v46 = vrot.slane %v8585_v2, %v9444_v23  ;;  %v8678_v7 = vsel %vm7905_vm8, %v4159_v50, 0.0 }
 0x99b   :  { %v4083_v6 = vmul.f32 %v4079_v61, %v4064_v42  ;;  %v4066_v63 = vpop.f32.mrb[38].mxu0  ;;  %v4495_v61 = vld [vmem:[#allocation5 + $0x30] sm:$0x3]  ;;  %v5262_v42 = vld [vmem:[%s8907_s2 + $0x32] ss:$8 sm:$0x3] }
 0x99c   :  { %v4097_v48 = vadd.f32 %v4090_v38, %v4082_v5  ;;  %v4067_v19 = vpop.f32.mrb[39].mxu0  ;;  %v4496_v38 = vld [vmem:[#allocation5 + $0x38] sm:$0x3]  ;;  %v8692_v5 = vmul.f32 %v8662_v15, %v4327_v52  ;;  %v8735_v0 = vrot.slane %v5262_v42, %v9436_v12  ;;  %v8738_v51 = vrot.slane %v5262_v42, %v9444_v23 }
 0x99d   :  { %v4098_v14 = vadd.f32 %v4094_v54, %v4083_v6  ;;  %v9071_v54 = vrot.slane %v8622_v17, 6  ;;  %v8704_v6 = vmul.f32 %v4495_v61, %v8660_v26  ;;  %v8707_v63 = vmul.f32 %v4496_v38, %v8662_v15 }
 0x99e   :  { %v4099_v22 = vmax.f32 %v4097_v48, 0.0  ;;  %v9074_v48 = vrot.slane %v8642_v60, 4  ;;  %v9075_v19 = vrot.slane %v8646_v24, 4 }
 0x99f   :  { %v4100_v57 = vmax.f32 %v4098_v14, 0.0  ;;  %v9076_v14 = vrot.slane %v8678_v7, 4 }
 0x9a0   :  { %v4101_v35 = vmin.f32 %v4099_v22, 6.0 }
 0x9a1   :  { %v4102_v29 = vmin.f32 %v4100_v57, 6.0 }
 0x9a2   :  { %v4174_v20 = vrot.slane %v4101_v35, 5  ;;  %v4391_v16 = vrot.slane %v4101_v35, 1 }
 0x9a3   :  { %v4175_v34 = vrot.slane %v4102_v29, 5  ;;  %v4392_v43 = vrot.slane %v4102_v29, 1 }
 0x9a4   :  { %4178 = vst [vmem:[#allocation5] sm:$0x78] %v4174_v20  ;;  %4395 = vst [vmem:[#allocation5 + $0x20] sm:$0x78] %v4391_v16 }
 0x9a5   :  { %4179 = vst [vmem:[#allocation5 + $0x8] sm:$0x78] %v4175_v34  ;;  %4396 = vst [vmem:[#allocation5 + $0x28] sm:$0x78] %v4392_v43 }
 0x9ab   :  { %v4180_v9 = vld [vmem:[#allocation5] sm:$0xf] }
 0x9ac   :  { %v4186_v8 = vld [vmem:[#allocation5] sm:$0x1e]  ;;  %v4181_v29 = vld [vmem:[#allocation5 + $0x8] sm:$0xf]  ;;  %v4182_v52 = vmul.f32 %v4180_v9, %v8614_v28  ;;  %v4261_v47 = vld [vmem:[#allocation5 + $0x8] sm:$0xf0] }
 0x9ad   :  { %v4206_v50 = vld [vmem:[#allocation5] sm:$0x3c]  ;;  %v4187_v20 = vld [vmem:[#allocation5 + $0x8] sm:$0x1e]  ;;  %v4196_v16 = vmul.f32 %v8666_v62, %v4186_v8  ;;  %v4183_v43 = vmul.f32 %v4181_v29, %v8618_v49 }
 0x9ae   :  { %v4207_v33 = vld [vmem:[#allocation5 + $0x8] sm:$0x3c]  ;;  %v4214_v21 = vmul.f32 %v9071_v54, %v4206_v50  ;;  %v4230_v34 = vmul.f32 %v9070_v36, %v4206_v50  ;;  %v4197_v61 = vmul.f32 %v8670_v46, %v4187_v20  ;;  %v4240_v56 = vld [vmem:[#allocation5] sm:$0x78] }
 0x9af   :  { %v4215_v38 = vmul.f32 %v9072_v41, %v4207_v33  ;;  %v4231_v42 = vmul.f32 %v9073_v10, %v4207_v33  ;;  %v4241_v32 = vld [vmem:[#allocation5 + $0x8] sm:$0x78]  ;;  %v4260_v9 = vld [vmem:[#allocation5] sm:$0xf0]  ;;  %v4200_v8 = vrot.slane %v4196_v16, 1  ;;  %v4250_v2 = vmul.f32 %v8716_v4, %v4240_v56 }
 0x9b0   :  { %v4218_v35 = vrot.slane %v4214_v21, 2  ;;  %v4234_v57 = vrot.slane %v4230_v34, 2  ;;  %v4201_v50 = vrot.slane %v4197_v61, 1  ;;  %v4251_v20 = vmul.f32 %v8720_v18, %v4241_v32  ;;  %v4294_v54 = vld [vmem:[#allocation5] sm:$0xe0] }
 0x9b1   :  { %v4219_v36 = vrot.slane %v4215_v38, 2  ;;  %v4235_v29 = vrot.slane %v4231_v42, 2  ;;  %v4204_v3 = vadd.f32 %v4200_v8, %v4182_v52  ;;  %v4254_v41 = vrot.slane %v4250_v2, 3  ;;  %v4295_v16 = vld [vmem:[#allocation5 + $0x8] sm:$0xe0] }
 0x9b2   :  { %v4268_v33 = vmul.f32 %v9074_v48, %v4260_v9  ;;  %v4269_v10 = vmul.f32 %v9075_v19, %v4261_v47  ;;  %v4205_v21 = vadd.f32 %v4201_v50, %v4183_v43  ;;  %v4255_v34 = vrot.slane %v4251_v20, 3  ;;  %v4324_v38 = vld [vmem:[#allocation5] sm:$0xc0]  ;;  %v4325_v42 = vld [vmem:[#allocation5 + $0x8] sm:$0xc0] }
 0x9b3   :  { %v4284_v56 = vmul.f32 %v9077_v31, %v4260_v9  ;;  %v4285_v61 = vmul.f32 %v9076_v14, %v4261_v47  ;;  %v4222_v32 = vadd.f32 %v4218_v35, %v4204_v3  ;;  %v4306_v8 = vmul.f32 %v8654_v13, %v4294_v54  ;;  %v4397_v48 = vld [vmem:[#allocation5 + $0x20] sm:$0xf]  ;;  %v4398_v27 = vld [vmem:[#allocation5 + $0x28] sm:$0xf] }
 0x9b4   :  { %v4272_v52 = vrot.slane %v4268_v33, 4  ;;  %v4273_v2 = vrot.slane %v4269_v10, 4  ;;  %v4223_v22 = vadd.f32 %v4219_v36, %v4205_v21  ;;  %v4307_v43 = vmul.f32 %v8658_v39, %v4295_v16  ;;  %v4403_v14 = vld [vmem:[#allocation5 + $0x20] sm:$0x1e]  ;;  %v4404_v31 = vld [vmem:[#allocation5 + $0x28] sm:$0x1e] }
 0x9b5   :  { %v4288_v19 = vrot.slane %v4284_v56, 4  ;;  %v4289_v45 = vrot.slane %v4285_v61, 4  ;;  %v4238_v50 = vadd.f32 %v4234_v57, %v4222_v32  ;;  %v4314_v20 = vrot.slane %v4306_v8, 5  ;;  %v4415_v33 = vld [vmem:[#allocation5 + $0x20] sm:$0x3c] }
 0x9b6   :  { %v4334_v9 = vmul.f32 %v8660_v26, %v4324_v38  ;;  %v4335_v47 = vmul.f32 %v8662_v15, %v4325_v42  ;;  %v4239_v3 = vadd.f32 %v4235_v29, %v4223_v22  ;;  %v4317_v35 = vrot.slane %v4307_v43, 5  ;;  %v4416_v61 = vld [vmem:[#allocation5 + $0x28] sm:$0x3c] }
 0x9b7   :  { %v4399_v10 = vmul.f32 %v4397_v48, %v8614_v28  ;;  %v4400_v54 = vmul.f32 %v4398_v27, %v8618_v49  ;;  %v4258_v36 = vadd.f32 %v4254_v41, %v4238_v50  ;;  %v9502_v21 = vrot.slane %v8683_v53, 5 }
 0x9b8   :  { %v4342_v57 = vrot.slane %v4334_v9, 6  ;;  %v4345_v56 = vrot.slane %v4335_v47, 6  ;;  %v4259_v38 = vadd.f32 %v4255_v34, %v4239_v3  ;;  %v9503_v42 = vrot.slane %v8686_v11, 5  ;;  %v4438_v9 = vld [vmem:[#allocation5 + $0x28] sm:$0x78] }
 0x9b9   :  { %v4316_v16 = vsel %vm2901_vm10, %v4314_v20, %v9502_v21  ;;  %v4405_v22 = vmul.f32 %v4403_v14, %v8666_v62  ;;  %v4406_v28 = vmul.f32 %v4404_v31, %v8670_v46  ;;  %v4276_v48 = vadd.f32 %v4272_v52, %v4258_v36  ;;  %v4437_v14 = vld [vmem:[#allocation5 + $0x20] sm:$0x78]  ;;  %v4450_v36 = vld [vmem:[#allocation5 + $0x28] sm:$0xf0] }
 0x9ba   :  { %v4319_v32 = vsel %vm2901_vm10, %v4317_v35, %v9503_v42  ;;  %v9504_v49 = vrot.slane %v8689_v30, 6  ;;  %v9505_v53 = vrot.slane %v8692_v5, 6  ;;  %v9506_v29 = vrot.slane %v8622_v17, 6 }
 0x9bb   :  { %v4277_v8 = vadd.f32 %v4273_v2, %v4259_v38  ;;  %v4409_v11 = vrot.slane %v4405_v22, 1  ;;  %v4410_v43 = vrot.slane %v4406_v28, 1  ;;  %v9507_v50 = vrot.slane %v8626_v44, 6  ;;  %v4449_v2 = vld [vmem:[#allocation5 + $0x20] sm:$0xf0] }
 0x9bc   :  { %v4344_v41 = vsel %vm2930_vm11, %v4342_v57, %v9504_v49  ;;  %v4347_v27 = vsel %vm2930_vm11, %v4345_v56, %v9505_v53  ;;  %v4417_v34 = vmul.f32 %v4415_v33, %v9506_v29  ;;  %v4292_v46 = vadd.f32 %v4288_v19, %v4276_v48  ;;  %v4471_v49 = vld [vmem:[#allocation5 + $0x20] sm:$0xe0]  ;;  %v4472_v53 = vld [vmem:[#allocation5 + $0x28] sm:$0xe0] }
 0x9bd   :  { %v4418_v62 = vmul.f32 %v4416_v61, %v9507_v50  ;;  %v9508_v30 = vrot.slane %v8630_v25, 6  ;;  %v9509_v20 = vrot.slane %v8638_v58, 6  ;;  %v4293_v47 = vadd.f32 %v4289_v45, %v4277_v8 }
 0x9be   :  { %v4421_v31 = vrot.slane %v4417_v34, 2  ;;  %v4413_v3 = vadd.f32 %v4409_v11, %v4399_v10  ;;  %v4414_v17 = vadd.f32 %v4410_v43, %v4400_v54  ;;  %v4322_v21 = vadd.f32 %v4316_v16, %v4292_v46  ;;  %v4494_v46 = vld [vmem:[#allocation5 + $0x28] sm:$0xc0] }
 0x9bf   :  { %v4427_v52 = vmul.f32 %v4415_v33, %v9508_v30  ;;  %v4428_v5 = vmul.f32 %v4416_v61, %v9509_v20  ;;  %v4422_v35 = vrot.slane %v4418_v62, 2  ;;  %v4439_v56 = vmul.f32 %v4437_v14, %v8716_v4 }
 0x9c0   :  { %v4323_v19 = vadd.f32 %v4319_v32, %v4293_v47  ;;  %v4425_v38 = vadd.f32 %v4421_v31, %v4413_v3  ;;  %v4440_v25 = vmul.f32 %v4438_v9, %v8720_v18  ;;  %v4350_v33 = vadd.f32 %v4344_v41, %v4322_v21 }
 0x9c1   :  { %v4431_v57 = vrot.slane %v4427_v52, 2  ;;  %v4432_v44 = vrot.slane %v4428_v5, 2  ;;  %v4426_v42 = vadd.f32 %v4422_v35, %v4414_v17  ;;  %v4443_v58 = vrot.slane %v4439_v56, 3 }
 0x9c2   :  { %v9510_v61 = vrot.slane %v8642_v60, 4  ;;  %v9511_v10 = vrot.slane %v8646_v24, 4  ;;  %v4351_v22 = vadd.f32 %v4347_v27, %v4323_v19  ;;  %v4444_v48 = vrot.slane %v4440_v25, 3  ;;  %v4493_v27 = vld [vmem:[#allocation5 + $0x20] sm:$0xc0] }
 0x9c3   :  { %v4435_v28 = vadd.f32 %v4431_v57, %v4425_v38  ;;  %v4436_v16 = vadd.f32 %v4432_v44, %v4426_v42  ;;  %v4363_v4 = vmul.f32 %v8735_v0, %v4350_v33  ;;  %v9512_v18 = vrot.slane %v8674_v55, 4 }
 0x9c4   :  { %v4451_v45 = vmul.f32 %v4449_v2, %v9510_v61  ;;  %v4452_v54 = vmul.f32 %v4450_v36, %v9511_v10  ;;  %v4364_v34 = vmul.f32 %v8738_v51, %v4351_v22  ;;  %v9513_v24 = vrot.slane %v8678_v7, 4 }
 0x9c5   :  { %v4461_v41 = vmul.f32 %v4449_v2, %v9512_v18  ;;  %v4447_v60 = vadd.f32 %v4443_v58, %v4435_v28  ;;  %v4448_v8 = vadd.f32 %v4444_v48, %v4436_v16  ;;  %v4376_v43 = vadd.f32 %v8741_v37, %v4363_v4  ;;  %v5718_v4 = vld [vmem:[%s8912_s7 + $0x50] sm:$0xff]   ;;  %v5721_v18 = vld [vmem:[%s8912_s7 + $0x18] sm:$0xff]  }
 0x9c6   :  { %v4455_v32 = vrot.slane %v4451_v45, 4  ;;  %v4456_v29 = vrot.slane %v4452_v54, 4  ;;  %v4462_v11 = vmul.f32 %v4450_v36, %v9513_v24  ;;  %v4475_v62 = vmul.f32 %v4471_v49, %v8654_v13  ;;  %v5726_v24 = vld [vmem:[%s8912_s7 + $0x70] sm:$0xff]  }
 0x9c7   :  { %v4465_v50 = vrot.slane %v4461_v41, 4  ;;  %v4476_v14 = vmul.f32 %v4472_v53, %v8658_v39  ;;  %v4377_v31 = vadd.f32 %v8744_v1, %v4364_v34  ;;  %v4378_v20 = vmax.f32 %v4376_v43, 0.0  ;;  %v5722_v41 = vld [vmem:[%s8912_s7 + $0x60] sm:$0xff]   ;;  %v5729_v43 = vld [vmem:[%s8912_s7 + $0x38] sm:$0xff]  }
 0x9c8   :  { %v4459_v55 = vadd.f32 %v4455_v32, %v4447_v60  ;;  %v4460_v30 = vadd.f32 %v4456_v29, %v4448_v8  ;;  %v4466_v52 = vrot.slane %v4462_v11, 4  ;;  %v4483_v5 = vrot.slane %v4475_v62, 5  ;;  %v5719_v32 = vld [vmem:[%s8912_s7 + $0x10] sm:$0xff]   ;;  %v5720_v29 = vld [vmem:[%s8912_s7 + $0x58] sm:$0xff]   ;;  %v5723_v34 = vld [vmem:[%s8912_s7 + $0x20] sm:$0xff]  }
 0x9c9   :  { %v4486_v9 = vrot.slane %v4476_v14, 5  ;;  %v4497_v7 = vmul.f32 %v4493_v27, %v8660_v26  ;;  %v4379_v47 = vmax.f32 %v4377_v31, 0.0  ;;  %v4498_v35 = vmul.f32 %v4494_v46, %v8662_v15  ;;  %v5724_v60 = vld [vmem:[%s8912_s7 + $0x68] sm:$0xff]   ;;  %v5727_v11 = vld [vmem:[%s8912_s7 + $0x30] sm:$0xff]   ;;  %v5728_v27 = vld [vmem:[%s8912_s7 + $0x78] sm:$0xff]  }
 0x9ca   :  { %v4469_v3 = vadd.f32 %v4465_v50, %v4459_v55  ;;  %v4470_v17 = vadd.f32 %v4466_v52, %v4460_v30  ;;  %v4380_v2 = vmin.f32 %v4378_v20, 6.0  ;;  %v9514_v13 = vrot.slane %v8698_v59, 5  ;;  %v5725_v8 = vld [vmem:[%s8912_s7 + $0x28] sm:$0xff]   ;;  %v5302_v50 = vld [vmem:[%s8907_s2 + $0x34] ss:$8 sm:$0x3] }
 0x9cb   :  { %v9515_v36 = vrot.slane %v8701_v40, 5  ;;  %v4505_v57 = vrot.slane %v4497_v7, 6  ;;  %v4381_v44 = vmin.f32 %v4379_v47, 6.0  ;;  %v4508_v38 = vrot.slane %v4498_v35, 6 }
 0x9cc   :  { %v4485_v39 = vsel %vm2901_vm10, %v4483_v5, %v9514_v13  ;;  %v9516_v26 = vrot.slane %v8704_v6, 6  ;;  %v9517_v15 = vrot.slane %v8707_v63, 6  ;;  %v5303_v62 = vld [vmem:[%s8907_s2 + $0x35] ss:$8 sm:$0x3]  ;;  %v4780_v14 = vrot.slane %v5302_v50, %v9436_v12 }
 0x9cd   :  { %v4488_v21 = vsel %vm2901_vm10, %v4486_v9, %v9515_v36  ;;  %v4491_v56 = vadd.f32 %v4485_v39, %v4469_v3  ;;  %v5326_v25 = vpack.c.bf16 %v4381_v44, %v4380_v2  ;;  %v4784_v46 = vrot.slane %v5302_v50, %v9444_v23 }
 0x9ce   :  { %v4492_v19 = vadd.f32 %v4488_v21, %v4470_v17  ;;  %v4507_v42 = vsel %vm2930_vm11, %v4505_v57, %v9516_v26  ;;  %v4510_v59 = vsel %vm2930_vm11, %v4508_v38, %v9517_v15  ;;  %v4795_v31 = vrot.slane %v5303_v62, %v9436_v12 }
 0x9cf   :  { %v4513_v33 = vadd.f32 %v4507_v42, %v4491_v56  ;;  %4390 = vst [vmem:[#allocation10] sm:$0x33] %v5326_v25  ;;  %v4799_v30 = vrot.slane %v5303_v62, %v9444_v23 }
 0x9d0   :  { %v4514_v58 = vadd.f32 %v4510_v59, %v4492_v19 }
 0x9d1   :  { %v4515_v40 = vmul.f32 %v4513_v33, %v8735_v0  ;;  %v5714_v0 = vld [vmem:[%s8912_s7 + $0x40] sm:$0xff]   ;;  %v5760_v33 = vmov 1966171168  }
 0x9d2   :  { %v4516_v61 = vmul.f32 %v4514_v58, %v8738_v51  ;;  %v5715_v51 = vld [vmem:[%s8912_s7] sm:$0xff]   ;;  %5378 = vmatprep.subr.bf16.mxu0 %v5714_v0  ;;  %v4830_v58 = vunpack.c.l.s4 %v5760_v33 }
 0x9d3   :  { %v4517_v45 = vadd.f32 %v4515_v40, %v8741_v37  ;;  %5379 = vmatpush3.bf16.msra.mxu0 %v5715_v51  ;;  %v5716_v37 = vld [vmem:[%s8912_s7 + $0x48] sm:$0xff]  }
 0x9d4   :  { %v4518_v10 = vadd.f32 %v4516_v61, %v8744_v1  ;;  %v5717_v1 = vld [vmem:[%s8912_s7 + $0x8] sm:$0xff]   ;;  %5380 = vmatprep.subr.bf16.mxu0 %v5716_v37 }
 0x9d5   :  { %v4519_v54 = vmax.f32 %v4517_v45, 0.0 }
 0x9d6   :  { %v4520_v6 = vmax.f32 %v4518_v10, 0.0 }
 0x9d7   :  { %v4521_v22 = vmin.f32 %v4519_v54, 6.0  ;;  %5381 = vmatpush3.bf16.msra.mxu0 %v5717_v1 }
 0x9d8   :  { %v4522_v28 = vmin.f32 %v4520_v6, 6.0  ;;  %5382 = vmatprep.subr.bf16.mxu0 %v5718_v4  ;;  %v9518_v4 = vld [vmem:[#allocation15_spill] sm:$0xff] }
 0x9da   :  { %v5327_v16 = vpack.c.bf16 %v4522_v28, %v4521_v22 }
 0x9db   :  { %5383 = vmatpush3.bf16.msra.mxu0 %v5719_v32 }
 0x9dc   :  { %v4530_v48 = vrot.slane %v5327_v16, 6  ;;  %5384 = vmatprep.subr.bf16.mxu0 %v5720_v29  ;;  %v4831_v16 = vunpack.c.0.s8 %v4830_v58 }
 0x9de   :  { %4532 = vst [vmem:[#allocation10] sm:$0xcc] %v4530_v48  ;;  %v4834_v32 = vsub.s32 %v4831_v16, %v9518_v4 }
 0x9df   :  { %5385 = vmatpush3.bf16.msra.mxu0 %v5721_v18 }
 0x9e0   :  { %5386 = vmatprep.subr.bf16.mxu0 %v5722_v41 }
 0x9e3   :  { %5387 = vmatpush3.bf16.msra.mxu0 %v5723_v34 }
 0x9e4   :  { %5388 = vmatprep.subr.bf16.mxu0 %v5724_v60 }
 0x9e5   :  { %v4565_v63 = vld [vmem:[#allocation10] sm:$0xff] }
 0x9e6   :  { %v5268_v49 = vcombine.low %v4565_v63, %v4565_v63  ;;  %v5269_v53 = vcombine.high %v4565_v63, %v4565_v63 }
 0x9e7   :  { %5389 = vmatpush3.bf16.msra.mxu0 %v5725_v8 }
 0x9e8   :  { %4765 = vmatprep.mubr.bf16.mxu1 %v5269_v53  ;;  %5390 = vmatprep.subr.bf16.mxu0 %v5726_v24  ;;  %v9519_v24 = vlaneseq }
 0x9e9   :  { %4766 = vmatmul.mubr.bf16.vlgmr.msra.gmra.mrb[28].mxu1 %v5268_v49 }
 0x9ea   :  { %vm4846_vm15 = vcmp.lt.s32.totalorder %v9519_v24, 256 }
 0x9eb   :  { %5391 = vmatpush3.bf16.msra.mxu0 %v5727_v11 }
 0x9ec   :  { %5392 = vmatprep.subr.bf16.mxu0 %v5728_v27 }
 0x9ef   :  { %5393 = vmatpush3.bf16.msra.mxu0 %v5729_v43 }
 0xabc   :  { %v4767_v55 = vpop.f32.mrb[28].mxu1 }
 0xabd   :  { %v4787_v52 = vmul.f32 %v4780_v14, %v4767_v55  ;;  %v4769_v20 = vpop.f32.mrb[29].mxu1 }
 0xabe   :  { %v4788_v5 = vmul.f32 %v4784_v46, %v4769_v20  ;;  %v4771_v9 = vpop.f32.mrb[30].mxu1 }
 0xabf   :  { %v4802_v7 = vadd.f32 %v4795_v31, %v4787_v52  ;;  %v4772_v47 = vpop.f32.mrb[31].mxu1 }
 0xac0   :  { %v4803_v3 = vadd.f32 %v4799_v30, %v4788_v5  ;;  %v4937_v30 = vld [vmem:[%s8907_s2 + $0x36] ss:$0 sm:$0xff] }
 0xac1   :  { %v4804_v17 = vmax.f32 %v4802_v7, 0.0 }
 0xac2   :  { %v4805_v35 = vmax.f32 %v4803_v3, 0.0 }
 0xac3   :  { %v4806_v2 = vmin.f32 %v4804_v17, 6.0 }
 0xac4   :  { %v4807_v13 = vmin.f32 %v4805_v35, 6.0 }
 0xac5   :  { %v4809_v39 = vsel %vm4808_vm13, %v4806_v2, 0.0  ;;  %v4851_v36 = vrot.slane %v4806_v2, 4 }
 0xac6   :  { %v4810_v21 = vrot.slane %v4809_v39, 4  ;;  %v4816_v57 = vsel %vm4808_vm13, %v4807_v13, 0.0  ;;  %v4852_v12 = vrot.slane %v4807_v13, 4 }
 0xac7   :  { %v4855_v44 = vsel %vm4808_vm13, %v4851_v36, 0.0  ;;  %v4817_v56 = vrot.slane %v4816_v57, 4 }
 0xac8   :  { %v4811_v23 = vadd.f32 %v4810_v21, %v4809_v39  ;;  %v4856_v19 = vrot.slane %v4855_v44, 4  ;;  %v4862_v38 = vsel %vm4808_vm13, %v4852_v12, 0.0 }
 0xac9   :  { %v4818_v26 = vadd.f32 %v4817_v56, %v4816_v57  ;;  %v4863_v42 = vrot.slane %v4862_v38, 4 }
 0xaca   :  { %v4812_v25 = vrot.slane %v4811_v23, 2  ;;  %v4857_v15 = vadd.f32 %v4856_v19, %v4855_v44 }
 0xacb   :  { %v4819_v59 = vrot.slane %v4818_v26, 2  ;;  %v4864_v40 = vadd.f32 %v4863_v42, %v4862_v38 }
 0xacc   :  { %v4813_v61 = vadd.f32 %v4812_v25, %v4811_v23  ;;  %v4858_v45 = vrot.slane %v4857_v15, 2 }
 0xacd   :  { %v4820_v10 = vadd.f32 %v4819_v59, %v4818_v26  ;;  %v4865_v54 = vrot.slane %v4864_v40, 2 }
 0xace   :  { %v4814_v6 = vrot.slane %v4813_v61, 1  ;;  %v4859_v22 = vadd.f32 %v4858_v45, %v4857_v15 }
 0xacf   :  { %v4821_v28 = vrot.slane %v4820_v10, 1  ;;  %v4866_v48 = vadd.f32 %v4865_v54, %v4864_v40 }
 0xad0   :  { %v4815_v63 = vadd.f32 %v4814_v6, %v4813_v61  ;;  %v4860_v49 = vrot.slane %v4859_v22, 1 }
 0xad1   :  { %v4822_v53 = vadd.f32 %v4821_v28, %v4820_v10  ;;  %v4867_v0 = vrot.slane %v4866_v48, 1 }
 0xad2   :  { %v4824_v51 = vmul.f32 0.25, %v4815_v63  ;;  %v4861_v37 = vadd.f32 %v4860_v49, %v4859_v22 }
 0xad3   :  { %v4825_v1 = vmul.f32 0.25, %v4822_v53  ;;  %v4868_v29 = vadd.f32 %v4867_v0, %v4866_v48 }
 0xad4   :  { %v4869_v18 = vmul.f32 0.25, %v4861_v37 }
 0xad5   :  { %v4828_v41 = vcombine.low %v4824_v51, %v4825_v1  ;;  %v4870_v34 = vmul.f32 0.25, %v4868_v29 }
 0xad7   :  { %v4835_v60 = vrot.slane %v4828_v41, %v4834_v32  ;;  %v4873_v8 = vcombine.low %v4869_v18, %v4870_v34 }
 0xad9   :  { %v4842_v11 = vrot.slane %v4835_v60, %v4834_v32  ;;  %v4880_v27 = vrot.slane %v4873_v8, %v4834_v32 }
 0xadb   :  { %4848 = vst.msk [vmem:[#allocation11] ss:$2 sm:$0x3] %vm4846_vm15, %v4842_v11  ;;  %v4887_v43 = vrot.slane %v4880_v27, %v4834_v32 }
 0xadd   :  { %4890 = vst.msk [vmem:[#allocation11 + $0x1] ss:$2 sm:$0x3] %vm4846_vm15, %v4887_v43 }
 0xae4   :  { %v5304_v50 = vld.sshfl [vmem:[#allocation11] sm:$0x33 pattern:$0x76325410] }
 0xae5   :  { %v4900_v62 = vcombine.high %v5304_v50, %v5304_v50  ;;  %v4903_v46 = vpack.c.bf16 %v5304_v50, %v5304_v50 }
 0xae7   :  { %v4904_v14 = vpack.c.bf16 %v4900_v62, %v4900_v62 }
 0xae9   :  { %5066 = vmatprep.mubr.bf16.mxu0 %v4904_v14 }
 0xaea   :  { %5067 = vmatmul.mubr.bf16.vlgmr.msra.gmra.mrb[40].mxu0 %v4903_v46 }
 0xbbd   :  { %v5394_v31 = vpop.f32.mrb[40].mxu0 }
 0xbbe   :  { %v5395_v55 = vpop.f32.mrb[41].mxu0 }
 0xbbf   :  { %v5396_v52 = vadd.f32 %v5395_v55, %v5394_v31  ;;  %v5397_v20 = vpop.f32.mrb[42].mxu0 }
 0xbc0   :  { %v5398_v5 = vpop.f32.mrb[43].mxu0 }
 0xbc1   :  { %v5069_v9 = vadd.f32 %v5396_v52, %v4937_v30 }
 0xbc3   :  { %5074 = vst [vmem:[#allocation12] sm:$0x3] %v5069_v9 }
 0xbc4   :  { %5743 = shalt.err (!%p5740_p4)
}
 0xbc5   :  { %s5744_s9 = scalar_lea.hbm %s8913_s8, 32 }
 0xbc6   :  { %p5745_p5 = scmp.ne.s32.totalorder %s8913_s8, %s5744_s9  ;;  %p5748_p6 = scmp.lt.u32.totalorder %s5744_s9, %s8913_s8 }
 0xbc8   :  { %p5750_p7 = pnand %p5748_p6, %p5745_p5 }
 0xbca   :  { %5753 = shalt.err (!%p5750_p7)
}
 0xbcb   :  { %5084 = dma.vmem_to_hbm [thread:$0]  %s5082_s0, 32, %s8913_s8, [#allocation13]  }
 0xbcc   :  { %5754 = dma.done.wait [#allocation13], 32  }
 0xbcd   :  { %5755 = vsyncadd [#allocation13], 4294967264 }
 0xbce   :  { %5088 = vsyncpa [#allocation13], 1 }

</bundles_post_ra>
